<compile_context>
chip_gen: v6e
topology: v6e:2x2x1
jax: 0.10.0
libtpu: 0.0.40
codegen_flags: <defaults>
</compile_context>

<pallas_src>
import jax
import jax.numpy as jnp
import numpy as np
from jax.experimental import pallas as pl
from jax.experimental.pallas import tpu as pltpu

# ---- model dims (module defaults) -------------------------------------------
NUM_LAYERS = 4
HIDDEN = 128                      # hidden_size
HIDDEN_HALF = HIDDEN // 2         # 64
N_ENC_XYZ = 6
N_ENC_DIR = 4
D_XYZ = 3 + 2 * 3 * N_ENC_XYZ     # 39
D_DIR = 3 + 2 * 3 * N_ENC_DIR     # 27
D_IN = D_XYZ + D_DIR              # 66
N_XYZ_LAYERS = NUM_LAYERS - 1     # 3 (skip id 4 is never reached)
D_OUT = 4                         # rgb (3) + sigma (1)

F = 128                           # padded lane width inside the kernel
TILE = 2048                       # rows per grid step (sweep 1024..4096)


# ---- Pallas kernel -----------------------------------------------------------
def nerf_kernel(x_ref, wh_ref, bh_ref, wpre_ref, bpre_ref, o_ref, xpad_ref):
    tile = xpad_ref.shape[0]
    # Stage the (TILE, 66) f32 input tile as (TILE, 128) bf16 in VMEM.
    # Only the 62 pad lanes are zeroed (the 66 data lanes are overwritten).
    xpad_ref[:, D_IN:] = jnp.zeros((tile, F - D_IN), jnp.bfloat16)
    xpad_ref[:, :D_IN] = x_ref[...].astype(jnp.bfloat16)
    x = xpad_ref[...]                                          # (TILE, 128) bf16

    # layer1(xyz) + relu      (wh[0]: rows 0:39 = w1, rest zero)
    h = jnp.dot(x, wh_ref[0], preferred_element_type=jnp.float32) + bh_ref[0]
    h = jnp.maximum(h, 0.0).astype(jnp.bfloat16)

    # layers_xyz: 3x Linear(128,128) + relu (no skip concat is ever triggered)
    for i in range(1, 1 + N_XYZ_LAYERS):
        h = jnp.dot(h, wh_ref[i], preferred_element_type=jnp.float32) + bh_ref[i]
        h = jnp.maximum(h, 0.0).astype(jnp.bfloat16)

    # fc_feat + relu
    feat = jnp.dot(h, wh_ref[4], preferred_element_type=jnp.float32) + bh_ref[4]
    feat = jnp.maximum(feat, 0.0).astype(jnp.bfloat16)

    # Fused fc_alpha + layers_dir[0] as ONE K=256 pass over [feat | padded_x]:
    #   wpre rows 0:128,   col 3      = fc_alpha weight   -> pre[:, 3]  = sigma
    #   wpre rows 0:128,   cols 64:   = wdir feat-part
    #   wpre rows 128+39:128+66, 64:  = wdir view-part (consumes padded x)
    fx = jnp.concatenate([feat, x], axis=-1)                   # (TILE, 256) bf16
    pre = (jnp.dot(fx, wpre_ref[...], preferred_element_type=jnp.float32)
           + bpre_ref[...])

    # dir activation: relu(pre) needs no lane mask because fc_rgb rows 0:64
    # (including the sigma row 3) are packed as zeros.
    hdir = jnp.maximum(pre, 0.0).astype(jnp.bfloat16)

    # fc_rgb   (wh[5]: rows 64:128, cols 0:3) -> rgb lands in cols 0:3
    rgb = jnp.dot(hdir, wh_ref[5], preferred_element_type=jnp.float32) + bh_ref[5]

    # col 3 = sigma (no relu), cols 0:2 = rgb; slice to the 4 output lanes.
    lane = jax.lax.broadcasted_iota(jnp.int32, pre.shape, 1)
    out = jnp.where(lane == 3, pre, rgb)
    o_ref[...] = out[:, :D_OUT].astype(o_ref.dtype)


# ---- weight packing (done once, outside the hot path) ------------------------
def pack_params(p):
    f32, bf16 = jnp.float32, jnp.bfloat16

    # Stacked hidden-size (128,128) weights / biases:
    #   0 = layer1, 1..3 = layers_xyz, 4 = fc_feat, 5 = fc_rgb
    wh = jnp.zeros((6, F, F), f32)
    bh = jnp.zeros((6, 1, F), f32)
    wh = wh.at[0, :D_XYZ, :].set(p["w1"])                       # layer1
    bh = bh.at[0, 0, :].set(p["b1"])
    wh = wh.at[1:1 + N_XYZ_LAYERS].set(p["wxyz"])
    bh = bh.at[1:1 + N_XYZ_LAYERS, 0, :].set(p["bxyz"])
    wh = wh.at[4].set(p["wfeat"])
    bh = bh.at[4, 0, :].set(p["bfeat"])
    # fc_rgb: rows 64:128, cols 0:3.  INVARIANT: wh[5][:, 3] and bh[5,0,3]
    # must stay exactly zero (sigma column of the kernel's final combine).
    wh = wh.at[5, HIDDEN_HALF:, :3].set(p["wrgb"])
    bh = bh.at[5, 0, :3].set(p["brgb"])

    # Fused fc_alpha + layers_dir[0] weight for the K=256 pass over [feat | x].
    # INVARIANT: wpre/bpre columns 0:64 other than col 3 must stay zero.
    wpre = jnp.zeros((2 * F, F), f32)
    bpre = jnp.zeros((1, F), f32)
    wpre = wpre.at[:HIDDEN, 3].set(p["walpha"][:, 0])                       # fc_alpha
    bpre = bpre.at[0, 3].set(p["balpha"][0])
    wpre = wpre.at[:HIDDEN, HIDDEN_HALF:].set(p["wdir"][:HIDDEN, :])        # feat part
    wpre = wpre.at[F + D_XYZ:F + D_IN, HIDDEN_HALF:].set(p["wdir"][HIDDEN:, :])  # view part
    bpre = bpre.at[0, HIDDEN_HALF:].set(p["bdir"])

    return {"wh": wh.astype(bf16), "bh": bh,
            "wpre": wpre.astype(bf16), "bpre": bpre}


# ---- wrapper -----------------------------------------------------------------
def nerf_forward_pallas(x, packed, tile=TILE):
    N = x.shape[0]

    # Keep >= 4 grid steps so v7x's 2 TensorCores both get work and each core
    # still pipelines; keep the tile a multiple of 256 rows, minimum 256.
    tile = int(min(tile, max(256, N // 4)))
    tile = max(256, (tile // 256) * 256)

    n_pad = (-N) % tile
    if n_pad:
        x = jnp.pad(x, ((0, n_pad), (0, 0)))
    Np = N + n_pad
    grid = (Np // tile,)

    weight_bytes = sum(int(np.prod(v.shape)) * v.dtype.itemsize
                       for v in packed.values())
    cost = pl.CostEstimate(
        flops=int(16 * F * F) * int(Np),          # 8 x 128^2-equivalent MACs/row
        transcendentals=0,
        bytes_accessed=int(Np) * (D_IN * 4 + D_OUT * 4) + int(weight_bytes),
    )

    out = pl.pallas_call(
        nerf_kernel,
        out_shape=jax.ShapeDtypeStruct((Np, D_OUT), jnp.float32),
        grid=grid,
        in_specs=[
            pl.BlockSpec((tile, D_IN), lambda i: (i, 0)),     # x rows (f32, unpadded)
            pl.BlockSpec((6, F, F), lambda i: (0, 0, 0)),     # stacked hidden weights
            pl.BlockSpec((6, 1, F), lambda i: (0, 0, 0)),     # stacked hidden biases
            pl.BlockSpec((2 * F, F), lambda i: (0, 0)),       # fused alpha+dir weight
            pl.BlockSpec((1, F), lambda i: (0, 0)),           # fused alpha+dir bias
        ],
        out_specs=pl.BlockSpec((tile, D_OUT), lambda i: (i, 0)),
        scratch_shapes=[pltpu.VMEM((tile, F), jnp.bfloat16)],  # padded-x staging
        compiler_params=pltpu.CompilerParams(
            dimension_semantics=("parallel",),
            vmem_limit_bytes=48 * 1024 * 1024),
        cost_estimate=cost,
    )(x, packed["wh"], packed["bh"], packed["wpre"], packed["bpre"])

    return out[:N] if n_pad else out


# ---- pure-JAX reference (module semantics; optional bf16 emulation) ----------
def nerf_forward_ref(x, p, emulate_bf16=False):
    c = (lambda v: v.astype(jnp.bfloat16).astype(jnp.float32)) if emulate_bf16 \
        else (lambda v: v)
    relu = lambda v: jnp.maximum(v, 0.0)
    xyz, view = x[:, :D_XYZ], x[:, D_XYZ:]
    h = relu(c(xyz) @ c(p["w1"]) + p["b1"])
    for i in range(N_XYZ_LAYERS):
        h = relu(c(h) @ c(p["wxyz"][i]) + p["bxyz"][i])
    feat = relu(c(h) @ c(p["wfeat"]) + p["bfeat"])
    sigma = c(feat) @ c(p["walpha"]) + p["balpha"]
    o = jnp.concatenate([c(feat), c(view)], axis=-1)
    o = relu(o @ c(p["wdir"]) + p["bdir"])
    rgb = c(o) @ c(p["wrgb"]) + p["brgb"]
    return jnp.concatenate([rgb, sigma], axis=-1)


# ---- deterministic parameter init (PyTorch Linear-style uniform) -------------
def init_params(key):
    def linear(key, fan_in, fan_out):
        kw, kb = jax.random.split(key)
        bound = 1.0 / np.sqrt(fan_in)
        w = jax.random.uniform(kw, (fan_in, fan_out), jnp.float32, -bound, bound)
        b = jax.random.uniform(kb, (fan_out,), jnp.float32, -bound, bound)
        return w, b

    keys = jax.random.split(key, 8)
    p = {}
    p["w1"], p["b1"] = linear(keys[0], D_XYZ, HIDDEN)
    wx, bx = [], []
    for i in range(N_XYZ_LAYERS):
        w, b = linear(jax.random.fold_in(keys[1], i), HIDDEN, HIDDEN)
        wx.append(w); bx.append(b)
    p["wxyz"] = jnp.stack(wx)          # (3, 128, 128)
    p["bxyz"] = jnp.stack(bx)          # (3, 128)
    p["wfeat"], p["bfeat"] = linear(keys[2], HIDDEN, HIDDEN)
    p["walpha"], p["balpha"] = linear(keys[3], HIDDEN, 1)
    p["wdir"], p["bdir"] = linear(keys[4], HIDDEN + D_DIR, HIDDEN_HALF)
    p["wrgb"], p["brgb"] = linear(keys[5], HIDDEN_HALF, 3)
    return p


if __name__ == "__main__":
    key = jax.random.PRNGKey(0)
    kx, kp = jax.random.split(key)
    N = 4096
    x = jax.random.normal(kx, (N, D_IN), jnp.float32)   # [sample_size, 66]
    params = init_params(kp)
    packed = pack_params(params)

    out = nerf_forward_pallas(x, packed)
    out = jax.block_until_ready(out)
    assert out.shape == (N, D_OUT)

    # tight check against a bf16-emulating reference (same precision as kernel)
    ref_bf16 = nerf_forward_ref(x, params, emulate_bf16=True)
    np.testing.assert_allclose(np.asarray(out), np.asarray(ref_bf16),
                               rtol=1e-3, atol=1e-3)
    # loose sanity check against the full-f32 module reference
    ref_f32 = nerf_forward_ref(x, params, emulate_bf16=False)
    np.testing.assert_allclose(np.asarray(out), np.asarray(ref_f32),
                               rtol=5e-2, atol=5e-2)

    print("KERNEL_OK")
</pallas_src>

<mosaic_0001>
module attributes {stable_mosaic.version = 11 : i64} {
  func.func @nerf_kernel(%arg0: i32, %arg1: memref<1024x66xf32, #tpu.memory_space<vmem>>, %arg2: memref<6x128x128xbf16, #tpu.memory_space<vmem>>, %arg3: memref<6x1x128xf32, #tpu.memory_space<vmem>>, %arg4: memref<256x128xbf16, #tpu.memory_space<vmem>>, %arg5: memref<1x128xf32, #tpu.memory_space<vmem>>, %arg6: memref<1024x4xf32, #tpu.memory_space<vmem>>, %arg7: memref<1024x128xbf16, #tpu.memory_space<vmem>>) attributes {dimension_semantics = [#tpu.dimension_semantics<parallel>], iteration_bounds = array<i64: 4>, scalar_prefetch = 0 : i64, scratch_operands = 1 : i64, tpu.core_type = #tpu.core_type<tc>, window_params = [{transform_indices = @transform_0, window_bounds = array<i64: 1024, 66>}, {pipeline_mode = #tpu.pipeline_mode<synchronous>, transform_indices = @transform_1, window_bounds = array<i64: 6, 128, 128>}, {pipeline_mode = #tpu.pipeline_mode<synchronous>, transform_indices = @transform_2, window_bounds = array<i64: 6, 1, 128>}, {pipeline_mode = #tpu.pipeline_mode<synchronous>, transform_indices = @transform_3, window_bounds = array<i64: 256, 128>}, {pipeline_mode = #tpu.pipeline_mode<synchronous>, transform_indices = @transform_4, window_bounds = array<i64: 1, 128>}, {transform_indices = @transform_5, window_bounds = array<i64: 1024, 4>}]} {
    %cst = arith.constant 0.000000e+00 : bf16
    %0 = vector.broadcast %cst : bf16 to vector<1024x62xbf16>
    %c0 = arith.constant 0 : index
    %c66 = arith.constant 66 : index
    %1 = vector.load %arg7[%c0, %c66] : memref<1024x128xbf16, #tpu.memory_space<vmem>>, vector<1024x62xbf16>
    tpu.vector_store %arg7[%c0, %c66], %0 {strides = array<i32>} : memref<1024x128xbf16, #tpu.memory_space<vmem>>, vector<1024x62xbf16>,
    %c0_0 = arith.constant 0 : index
    %c0_1 = arith.constant 0 : index
    %2 = vector.load %arg1[%c0_0, %c0_1] : memref<1024x66xf32, #tpu.memory_space<vmem>>, vector<1024x66xf32>
    %3 = arith.truncf %2 : vector<1024x66xf32> to vector<1024x66xbf16>
    %c0_2 = arith.constant 0 : index
    %c0_3 = arith.constant 0 : index
    %4 = vector.load %arg7[%c0_2, %c0_3] : memref<1024x128xbf16, #tpu.memory_space<vmem>>, vector<1024x66xbf16>
    tpu.vector_store %arg7[%c0_2, %c0_3], %3 {strides = array<i32>} : memref<1024x128xbf16, #tpu.memory_space<vmem>>, vector<1024x66xbf16>,
    %c0_4 = arith.constant 0 : index
    %c0_5 = arith.constant 0 : index
    %5 = vector.load %arg7[%c0_4, %c0_5] : memref<1024x128xbf16, #tpu.memory_space<vmem>>, vector<1024x128xbf16>
    %c0_6 = arith.constant 0 : index
    %c0_7 = arith.constant 0 : index
    %c0_8 = arith.constant 0 : index
    %6 = vector.load %arg2[%c0_6, %c0_7, %c0_8] : memref<6x128x128xbf16, #tpu.memory_space<vmem>>, vector<1x128x128xbf16>
    %7 = vector.shape_cast %6 : vector<1x128x128xbf16> to vector<128x128xbf16>
    %cst_9 = arith.constant dense<0.000000e+00> : vector<1024x128xf32>
    %8 = tpu.matmul %5, %7, %cst_9 {dimension_numbers = #tpu.dot_dimension_numbers<[1], [0], [0], [1], [0, 0, 1, 1], [], []>} : vector<1024x128xbf16>, vector<128x128xbf16>, vector<1024x128xf32> -> vector<1024x128xf32>
    %c0_10 = arith.constant 0 : index
    %c0_11 = arith.constant 0 : index
    %c0_12 = arith.constant 0 : index
    %9 = vector.load %arg3[%c0_10, %c0_11, %c0_12] : memref<6x1x128xf32, #tpu.memory_space<vmem>>, vector<1x1x128xf32>
    %10 = vector.shape_cast %9 : vector<1x1x128xf32> to vector<1x128xf32>
    %11 = vector.broadcast %10 : vector<1x128xf32> to vector<1024x128xf32>
    %12 = arith.addf %8, %11 : vector<1024x128xf32>
    %cst_13 = arith.constant 0.000000e+00 : f32
    %13 = vector.broadcast %cst_13 : f32 to vector<1024x128xf32>
    %14 = arith.maximumf %12, %13 : vector<1024x128xf32>
    %15 = arith.truncf %14 : vector<1024x128xf32> to vector<1024x128xbf16>
    %c1 = arith.constant 1 : index
    %c0_14 = arith.constant 0 : index
    %c0_15 = arith.constant 0 : index
    %16 = vector.load %arg2[%c1, %c0_14, %c0_15] : memref<6x128x128xbf16, #tpu.memory_space<vmem>>, vector<1x128x128xbf16>
    %17 = vector.shape_cast %16 : vector<1x128x128xbf16> to vector<128x128xbf16>
    %cst_16 = arith.constant dense<0.000000e+00> : vector<1024x128xf32>
    %18 = tpu.matmul %15, %17, %cst_16 {dimension_numbers = #tpu.dot_dimension_numbers<[1], [0], [0], [1], [0, 0, 1, 1], [], []>} : vector<1024x128xbf16>, vector<128x128xbf16>, vector<1024x128xf32> -> vector<1024x128xf32>
    %c1_17 = arith.constant 1 : index
    %c0_18 = arith.constant 0 : index
    %c0_19 = arith.constant 0 : index
    %19 = vector.load %arg3[%c1_17, %c0_18, %c0_19] : memref<6x1x128xf32, #tpu.memory_space<vmem>>, vector<1x1x128xf32>
    %20 = vector.shape_cast %19 : vector<1x1x128xf32> to vector<1x128xf32>
    %21 = vector.broadcast %20 : vector<1x128xf32> to vector<1024x128xf32>
    %22 = arith.addf %18, %21 : vector<1024x128xf32>
    %cst_20 = arith.constant 0.000000e+00 : f32
    %23 = vector.broadcast %cst_20 : f32 to vector<1024x128xf32>
    %24 = arith.maximumf %22, %23 : vector<1024x128xf32>
    %25 = arith.truncf %24 : vector<1024x128xf32> to vector<1024x128xbf16>
    %c2 = arith.constant 2 : index
    %c0_21 = arith.constant 0 : index
    %c0_22 = arith.constant 0 : index
    %26 = vector.load %arg2[%c2, %c0_21, %c0_22] : memref<6x128x128xbf16, #tpu.memory_space<vmem>>, vector<1x128x128xbf16>
    %27 = vector.shape_cast %26 : vector<1x128x128xbf16> to vector<128x128xbf16>
    %cst_23 = arith.constant dense<0.000000e+00> : vector<1024x128xf32>
    %28 = tpu.matmul %25, %27, %cst_23 {dimension_numbers = #tpu.dot_dimension_numbers<[1], [0], [0], [1], [0, 0, 1, 1], [], []>} : vector<1024x128xbf16>, vector<128x128xbf16>, vector<1024x128xf32> -> vector<1024x128xf32>
    %c2_24 = arith.constant 2 : index
    %c0_25 = arith.constant 0 : index
    %c0_26 = arith.constant 0 : index
    %29 = vector.load %arg3[%c2_24, %c0_25, %c0_26] : memref<6x1x128xf32, #tpu.memory_space<vmem>>, vector<1x1x128xf32>
    %30 = vector.shape_cast %29 : vector<1x1x128xf32> to vector<1x128xf32>
    %31 = vector.broadcast %30 : vector<1x128xf32> to vector<1024x128xf32>
    %32 = arith.addf %28, %31 : vector<1024x128xf32>
    %cst_27 = arith.constant 0.000000e+00 : f32
    %33 = vector.broadcast %cst_27 : f32 to vector<1024x128xf32>
    %34 = arith.maximumf %32, %33 : vector<1024x128xf32>
    %35 = arith.truncf %34 : vector<1024x128xf32> to vector<1024x128xbf16>
    %c3 = arith.constant 3 : index
    %c0_28 = arith.constant 0 : index
    %c0_29 = arith.constant 0 : index
    %36 = vector.load %arg2[%c3, %c0_28, %c0_29] : memref<6x128x128xbf16, #tpu.memory_space<vmem>>, vector<1x128x128xbf16>
    %37 = vector.shape_cast %36 : vector<1x128x128xbf16> to vector<128x128xbf16>
    %cst_30 = arith.constant dense<0.000000e+00> : vector<1024x128xf32>
    %38 = tpu.matmul %35, %37, %cst_30 {dimension_numbers = #tpu.dot_dimension_numbers<[1], [0], [0], [1], [0, 0, 1, 1], [], []>} : vector<1024x128xbf16>, vector<128x128xbf16>, vector<1024x128xf32> -> vector<1024x128xf32>
    %c3_31 = arith.constant 3 : index
    %c0_32 = arith.constant 0 : index
    %c0_33 = arith.constant 0 : index
    %39 = vector.load %arg3[%c3_31, %c0_32, %c0_33] : memref<6x1x128xf32, #tpu.memory_space<vmem>>, vector<1x1x128xf32>
    %40 = vector.shape_cast %39 : vector<1x1x128xf32> to vector<1x128xf32>
    %41 = vector.broadcast %40 : vector<1x128xf32> to vector<1024x128xf32>
    %42 = arith.addf %38, %41 : vector<1024x128xf32>
    %cst_34 = arith.constant 0.000000e+00 : f32
    %43 = vector.broadcast %cst_34 : f32 to vector<1024x128xf32>
    %44 = arith.maximumf %42, %43 : vector<1024x128xf32>
    %45 = arith.truncf %44 : vector<1024x128xf32> to vector<1024x128xbf16>
    %c4 = arith.constant 4 : index
    %c0_35 = arith.constant 0 : index
    %c0_36 = arith.constant 0 : index
    %46 = vector.load %arg2[%c4, %c0_35, %c0_36] : memref<6x128x128xbf16, #tpu.memory_space<vmem>>, vector<1x128x128xbf16>
    %47 = vector.shape_cast %46 : vector<1x128x128xbf16> to vector<128x128xbf16>
    %cst_37 = arith.constant dense<0.000000e+00> : vector<1024x128xf32>
    %48 = tpu.matmul %45, %47, %cst_37 {dimension_numbers = #tpu.dot_dimension_numbers<[1], [0], [0], [1], [0, 0, 1, 1], [], []>} : vector<1024x128xbf16>, vector<128x128xbf16>, vector<1024x128xf32> -> vector<1024x128xf32>
    %c4_38 = arith.constant 4 : index
    %c0_39 = arith.constant 0 : index
    %c0_40 = arith.constant 0 : index
    %49 = vector.load %arg3[%c4_38, %c0_39, %c0_40] : memref<6x1x128xf32, #tpu.memory_space<vmem>>, vector<1x1x128xf32>
    %50 = vector.shape_cast %49 : vector<1x1x128xf32> to vector<1x128xf32>
    %51 = vector.broadcast %50 : vector<1x128xf32> to vector<1024x128xf32>
    %52 = arith.addf %48, %51 : vector<1024x128xf32>
    %cst_41 = arith.constant 0.000000e+00 : f32
    %53 = vector.broadcast %cst_41 : f32 to vector<1024x128xf32>
    %54 = arith.maximumf %52, %53 : vector<1024x128xf32>
    %55 = arith.truncf %54 : vector<1024x128xf32> to vector<1024x128xbf16>
    %56 = tpu.concatenate %55, %5 in 1 : vector<1024x128xbf16>, vector<1024x128xbf16> -> vector<1024x256xbf16>
    %c0_42 = arith.constant 0 : index
    %c0_43 = arith.constant 0 : index
    %57 = vector.load %arg4[%c0_42, %c0_43] : memref<256x128xbf16, #tpu.memory_space<vmem>>, vector<256x128xbf16>
    %cst_44 = arith.constant dense<0.000000e+00> : vector<1024x128xf32>
    %58 = tpu.matmul %56, %57, %cst_44 {dimension_numbers = #tpu.dot_dimension_numbers<[1], [0], [0], [1], [0, 0, 1, 1], [], []>} : vector<1024x256xbf16>, vector<256x128xbf16>, vector<1024x128xf32> -> vector<1024x128xf32>
    %c0_45 = arith.constant 0 : index
    %c0_46 = arith.constant 0 : index
    %59 = vector.load %arg5[%c0_45, %c0_46] : memref<1x128xf32, #tpu.memory_space<vmem>>, vector<1x128xf32>
    %60 = vector.broadcast %59 : vector<1x128xf32> to vector<1024x128xf32>
    %61 = arith.addf %58, %60 : vector<1024x128xf32>
    %cst_47 = arith.constant 0.000000e+00 : f32
    %62 = vector.broadcast %cst_47 : f32 to vector<1024x128xf32>
    %63 = arith.maximumf %61, %62 : vector<1024x128xf32>
    %64 = arith.truncf %63 : vector<1024x128xf32> to vector<1024x128xbf16>
    %c5 = arith.constant 5 : index
    %c0_48 = arith.constant 0 : index
    %c0_49 = arith.constant 0 : index
    %65 = vector.load %arg2[%c5, %c0_48, %c0_49] : memref<6x128x128xbf16, #tpu.memory_space<vmem>>, vector<1x128x128xbf16>
    %66 = vector.shape_cast %65 : vector<1x128x128xbf16> to vector<128x128xbf16>
    %cst_50 = arith.constant dense<0.000000e+00> : vector<1024x128xf32>
    %67 = tpu.matmul %64, %66, %cst_50 {dimension_numbers = #tpu.dot_dimension_numbers<[1], [0], [0], [1], [0, 0, 1, 1], [], []>} : vector<1024x128xbf16>, vector<128x128xbf16>, vector<1024x128xf32> -> vector<1024x128xf32>
    %c5_51 = arith.constant 5 : index
    %c0_52 = arith.constant 0 : index
    %c0_53 = arith.constant 0 : index
    %68 = vector.load %arg3[%c5_51, %c0_52, %c0_53] : memref<6x1x128xf32, #tpu.memory_space<vmem>>, vector<1x1x128xf32>
    %69 = vector.shape_cast %68 : vector<1x1x128xf32> to vector<1x128xf32>
    %70 = vector.broadcast %69 : vector<1x128xf32> to vector<1024x128xf32>
    %71 = arith.addf %67, %70 : vector<1024x128xf32>
    %72 = tpu.iota {dimensions = array<i32: 1>} : vector<1024x128xi32>
    %c3_i32 = arith.constant 3 : i32
    %73 = vector.broadcast %c3_i32 : i32 to vector<1024x128xi32>
    %74 = arith.cmpi eq, %72, %73 : vector<1024x128xi32>
    %75 = arith.select %74, %61, %71 : vector<1024x128xi1>, vector<1024x128xf32>
    %76 = vector.extract_strided_slice %75 {offsets = [0, 0], sizes = [1024, 4], strides = [1, 1]} : vector<1024x128xf32> to vector<1024x4xf32>
    %c0_54 = arith.constant 0 : index
    %c0_55 = arith.constant 0 : index
    %77 = vector.load %arg6[%c0_54, %c0_55] : memref<1024x4xf32, #tpu.memory_space<vmem>>, vector<1024x4xf32>
    tpu.vector_store %arg6[%c0_54, %c0_55], %76 {strides = array<i32>} : memref<1024x4xf32, #tpu.memory_space<vmem>>, vector<1024x4xf32>,
    return
  }
  func.func @transform_0(%arg0: i32) -> (i32, i32) {
    %c0_i32 = arith.constant 0 : i32
    %c0_i32_0 = arith.constant 0 : i32
    return %arg0, %c0_i32 : i32, i32
  }
  func.func @transform_1(%arg0: i32) -> (i32, i32, i32) {
    %c0_i32 = arith.constant 0 : i32
    %c0_i32_0 = arith.constant 0 : i32
    %c0_i32_1 = arith.constant 0 : i32
    %c0_i32_2 = arith.constant 0 : i32
    return %c0_i32, %c0_i32_0, %c0_i32_1 : i32, i32, i32
  }
  func.func @transform_2(%arg0: i32) -> (i32, i32, i32) {
    %c0_i32 = arith.constant 0 : i32
    %c0_i32_0 = arith.constant 0 : i32
    %c0_i32_1 = arith.constant 0 : i32
    %c0_i32_2 = arith.constant 0 : i32
    return %c0_i32, %c0_i32_0, %c0_i32_1 : i32, i32, i32
  }
  func.func @transform_3(%arg0: i32) -> (i32, i32) {
    %c0_i32 = arith.constant 0 : i32
    %c0_i32_0 = arith.constant 0 : i32
    %c0_i32_1 = arith.constant 0 : i32
    return %c0_i32, %c0_i32_0 : i32, i32
  }
  func.func @transform_4(%arg0: i32) -> (i32, i32) {
    %c0_i32 = arith.constant 0 : i32
    %c0_i32_0 = arith.constant 0 : i32
    %c0_i32_1 = arith.constant 0 : i32
    return %c0_i32, %c0_i32_0 : i32, i32
  }
  func.func @transform_5(%arg0: i32) -> (i32, i32) {
    %c0_i32 = arith.constant 0 : i32
    %c0_i32_0 = arith.constant 0 : i32
    return %arg0, %c0_i32 : i32, i32
  }
}

</mosaic_0001>

<bundles_post_ra>
// kernel: tpu_custom_call.1
= control target key start
LH: loop header
LB: loop body
LE: loop exit
PB: predicated region body
PF: predicated region fallthrough
CT: control target
= control target key end

     0   :  { %s9525_s18 = smov 0   ;;  %s12641_s0 = inlined_call_operand.vmem [shape: f32[4096,66], index: 0, kind: input, shape index: {}]   ;;  %s12642_s1 = inlined_call_operand.vmem [shape: bf16[6,128,128], index: 1, kind: input, shape index: {}]   ;;  %s12643_s2 = inlined_call_operand.vmem [shape: f32[6,1,128], index: 2, kind: input, shape index: {}]   ;;  %s12644_s3 = inlined_call_operand.vmem [shape: bf16[256,128], index: 3, kind: input, shape index: {}]   ;;  %s12645_s4 = inlined_call_operand.vmem [shape: f32[1,128], index: 4, kind: input, shape index: {}]   ;;  %s12646_s5 = inlined_call_operand.vmem [shape: f32[4096,4], index: 5, kind: output, shape index: {}]  }
   0x1 LB: > { %s7493_s19 = sadd.s32 4294967295, %s9492_s18   ;;  %p7497_p0 = scmp.ge.s32.totalorder %s9492_s18, 1  ;;  %s9492_s18 = sphi %s9525_s18, %s15_s18  }
   0x2   : > { %p188_p1 = scmp.lt.s32.totalorder %s9492_s18, 5 }
   0x4   : > { %p189_p2 = pnand %p7497_p0, %p188_p1 }
   0x6   : > { %192 = sbr.rel (%p189_p2) target bundleno = 2024 (0x7e8), region = 40 }
   0xb   : > { %v9285_v0 = vld [vmem:[%s12642_s1 + $0x38] sm:$0xff]   ;;  %s7498_s22 = sshll.u32 %s7493_s19, 7  ;;  %v9539_v1 = vld [vmem:[%s12642_s1 + $0x30] sm:$0xff]   ;;  %vm229_vm0 = vcmask 1043984   ;;  %v9547_v2 = vld [vmem:[%s12642_s1 + $0x28] sm:$0xff]   ;;  %v9494_v3 = vmov 0  }
   0xc   : > { %p217_p3 = scmp.lt.s32.totalorder %s7498_s22, 511  ;;  %8412 = vmatprep.subr.bf16.mxu0 %v9285_v0  ;;  %230 = vst.msk [vmem:[#allocation2] sm:$0xf] %vm229_vm0, %v9494_v3  ;;  %231 = vst.msk [vmem:[#allocation2 + $0x4] sm:$0xf] %vm229_vm0, %v9494_v3  ;;  %v9288_v4 = vld [vmem:[%s12642_s1 + $0x20] sm:$0xff]  }
   0xd   : > { %8413 = vmatpush3.bf16.msra.mxu0 %v9285_v0  ;;  %232 = vst.msk [vmem:[#allocation2 + $0x8] sm:$0xf] %vm229_vm0, %v9494_v3  ;;  %233 = vst.msk [vmem:[#allocation2 + $0xc] sm:$0xf] %vm229_vm0, %v9494_v3  ;;  %vm998_vm1 = vcmask 535552   ;;  %v9827_v14 = vld [vmem:[%s12642_s1 + $0x18] sm:$0xff]  }
   0xe   : > { %s12755_s22 = smov (!%p217_p3, %s7498_s22), 511  ;;  %8414 = vmatprep.subr.bf16.mxu0 %v9539_v1  ;;  %234 = vst.msk [vmem:[#allocation2 + $0x10] sm:$0xf] %vm229_vm0, %v9494_v3  ;;  %235 = vst.msk [vmem:[#allocation2 + $0x14] sm:$0xf] %vm229_vm0, %v9494_v3  ;;  %v9290_v39 = vld [vmem:[%s12642_s1 + $0x10] sm:$0xff]  }
   0xf   : > { %s7499_s27 = sshll.u32 %s12755_s22, 3  ;;  %236 = vst.msk [vmem:[#allocation2 + $0x18] sm:$0xf] %vm229_vm0, %v9494_v3  ;;  %237 = vst.msk [vmem:[#allocation2 + $0x1c] sm:$0xf] %vm229_vm0, %v9494_v3  ;;  %vm7308_vm3 = vcmask 31744  }
  0x10   : > { %238 = vst.msk [vmem:[#allocation2 + $0x20] sm:$0xf] %vm229_vm0, %v9494_v3  ;;  %239 = vst.msk [vmem:[#allocation2 + $0x24] sm:$0xf] %vm229_vm0, %v9494_v3  ;;  %s9811_s30 = scalar_lea.vmem %s12641_s0, %s7499_s27  ;;  %s11514_s25 = scalar_lea.vmem %s12646_s5, %s7499_s27 }
  0x11   : > { %240 = vst.msk [vmem:[#allocation2 + $0x28] sm:$0xf] %vm229_vm0, %v9494_v3  ;;  %241 = vst.msk [vmem:[#allocation2 + $0x2c] sm:$0xf] %vm229_vm0, %v9494_v3  ;;  %8415 = vmatpush3.bf16.msra.mxu0 %v9539_v1  ;;  %v358_v5 = vld [vmem:[%s9811_s30] sm:$0xff]  ;;  %v359_v6 = vld [vmem:[%s9811_s30 + $0x8] sm:$0xff] }
  0x12   : > { %242 = vst.msk [vmem:[#allocation2 + $0x30] sm:$0xf] %vm229_vm0, %v9494_v3  ;;  %243 = vst.msk [vmem:[#allocation2 + $0x34] sm:$0xf] %vm229_vm0, %v9494_v3  ;;  %8416 = vmatprep.subr.bf16.mxu0 %v9547_v2  ;;  %v360_v7 = vld [vmem:[%s9811_s30 + $0x10] sm:$0xff]  ;;  %v7852_v8 = vpack.c.bf16 %v358_v5, %v358_v5  ;;  %v7853_v9 = vpack.c.bf16 %v359_v6, %v359_v6  ;;  %v361_v10 = vld [vmem:[%s9811_s30 + $0x18] sm:$0xff] }
  0x13   : > { %244 = vst.msk [vmem:[#allocation2 + $0x38] sm:$0xf] %vm229_vm0, %v9494_v3  ;;  %245 = vst.msk [vmem:[#allocation2 + $0x3c] sm:$0xf] %vm229_vm0, %v9494_v3  ;;  %v7854_v11 = vpack.c.bf16 %v360_v7, %v360_v7  ;;  %v362_v12 = vld [vmem:[%s9811_s30 + $0x20] sm:$0xff]  ;;  %v363_v13 = vld [vmem:[%s9811_s30 + $0x28] sm:$0xff]  ;;  %v7855_v15 = vpack.c.bf16 %v361_v10, %v361_v10 }
  0x14   : > { %246 = vst.msk [vmem:[#allocation2 + $0x40] sm:$0xf] %vm229_vm0, %v9494_v3  ;;  %247 = vst.msk [vmem:[#allocation2 + $0x44] sm:$0xf] %vm229_vm0, %v9494_v3  ;;  %v7856_v16 = vpack.c.bf16 %v362_v12, %v362_v12  ;;  %v7857_v17 = vpack.c.bf16 %v363_v13, %v363_v13  ;;  %v364_v18 = vld [vmem:[%s9811_s30 + $0x30] sm:$0xff]  ;;  %v365_v19 = vld [vmem:[%s9811_s30 + $0x38] sm:$0xff] }
  0x15   : > { %248 = vst.msk [vmem:[#allocation2 + $0x48] sm:$0xf] %vm229_vm0, %v9494_v3  ;;  %249 = vst.msk [vmem:[#allocation2 + $0x4c] sm:$0xf] %vm229_vm0, %v9494_v3  ;;  %v366_v20 = vld [vmem:[%s9811_s30 + $0x40] sm:$0xff]  ;;  %8417 = vmatpush3.bf16.msra.mxu0 %v9547_v2  ;;  %v7858_v21 = vpack.c.bf16 %v364_v18, %v364_v18  ;;  %v7859_v22 = vpack.c.bf16 %v365_v19, %v365_v19  ;;  %v367_v23 = vld [vmem:[%s9811_s30 + $0x48] sm:$0xff] }
  0x16   : > { %250 = vst.msk [vmem:[#allocation2 + $0x50] sm:$0xf] %vm229_vm0, %v9494_v3  ;;  %251 = vst.msk [vmem:[#allocation2 + $0x54] sm:$0xf] %vm229_vm0, %v9494_v3  ;;  %v7860_v24 = vpack.c.bf16 %v366_v20, %v366_v20  ;;  %v368_v25 = vld [vmem:[%s9811_s30 + $0x50] sm:$0xff]  ;;  %v369_v26 = vld [vmem:[%s9811_s30 + $0x58] sm:$0xff]  ;;  %8418 = vmatprep.subr.bf16.mxu0 %v9288_v4  ;;  %v7861_v27 = vpack.c.bf16 %v367_v23, %v367_v23 }
  0x17   : > { %252 = vst.msk [vmem:[#allocation2 + $0x58] sm:$0xf] %vm229_vm0, %v9494_v3  ;;  %253 = vst.msk [vmem:[#allocation2 + $0x5c] sm:$0xf] %vm229_vm0, %v9494_v3  ;;  %v7862_v28 = vpack.c.bf16 %v368_v25, %v368_v25  ;;  %v7863_v29 = vpack.c.bf16 %v369_v26, %v369_v26  ;;  %v370_v30 = vld [vmem:[%s9811_s30 + $0x60] sm:$0xff]  ;;  %v371_v31 = vld [vmem:[%s9811_s30 + $0x68] sm:$0xff] }
  0x18   : > { %254 = vst.msk [vmem:[#allocation2 + $0x60] sm:$0xf] %vm229_vm0, %v9494_v3  ;;  %255 = vst.msk [vmem:[#allocation2 + $0x64] sm:$0xf] %vm229_vm0, %v9494_v3  ;;  %v372_v32 = vld [vmem:[%s9811_s30 + $0x70] sm:$0xff]  ;;  %v7864_v33 = vpack.c.bf16 %v370_v30, %v370_v30  ;;  %v7865_v34 = vpack.c.bf16 %v371_v31, %v371_v31  ;;  %v373_v35 = vld [vmem:[%s9811_s30 + $0x78] sm:$0xff] }
  0x19   : > { %256 = vst.msk [vmem:[#allocation2 + $0x68] sm:$0xf] %vm229_vm0, %v9494_v3  ;;  %257 = vst.msk [vmem:[#allocation2 + $0x6c] sm:$0xf] %vm229_vm0, %v9494_v3  ;;  %v7866_v36 = vpack.c.bf16 %v372_v32, %v372_v32  ;;  %v374_v37 = vld [vmem:[%s9811_s30 + $0x80] sm:$0xff]  ;;  %v375_v38 = vld [vmem:[%s9811_s30 + $0x88] sm:$0xff]  ;;  %v7867_v40 = vpack.c.bf16 %v373_v35, %v373_v35  ;;  %8419 = vmatpush3.bf16.msra.mxu0 %v9288_v4 }
  0x1a   : > { %258 = vst.msk [vmem:[#allocation2 + $0x70] sm:$0xf] %vm229_vm0, %v9494_v3  ;;  %259 = vst.msk [vmem:[#allocation2 + $0x74] sm:$0xf] %vm229_vm0, %v9494_v3  ;;  %v7868_v41 = vpack.c.bf16 %v374_v37, %v374_v37  ;;  %v7869_v42 = vpack.c.bf16 %v375_v38, %v375_v38  ;;  %v376_v43 = vld [vmem:[%s9811_s30 + $0x90] sm:$0xff]  ;;  %v377_v44 = vld [vmem:[%s9811_s30 + $0x98] sm:$0xff]  ;;  %8420 = vmatprep.subr.bf16.mxu0 %v9827_v14 }
  0x1b   : > { %260 = vst.msk [vmem:[#allocation2 + $0x78] sm:$0xf] %vm229_vm0, %v9494_v3  ;;  %261 = vst.msk [vmem:[#allocation2 + $0x7c] sm:$0xf] %vm229_vm0, %v9494_v3  ;;  %v378_v45 = vld [vmem:[%s9811_s30 + $0xa0] sm:$0xff]  ;;  %v7870_v46 = vpack.c.bf16 %v376_v43, %v376_v43  ;;  %v7871_v47 = vpack.c.bf16 %v377_v44, %v377_v44  ;;  %v379_v48 = vld [vmem:[%s9811_s30 + $0xa8] sm:$0xff] }
  0x1c   : > { %262 = vst.msk [vmem:[#allocation2 + $0x80] sm:$0xf] %vm229_vm0, %v9494_v3  ;;  %263 = vst.msk [vmem:[#allocation2 + $0x84] sm:$0xf] %vm229_vm0, %v9494_v3  ;;  %v7872_v49 = vpack.c.bf16 %v378_v45, %v378_v45  ;;  %v380_v50 = vld [vmem:[%s9811_s30 + $0xb0] sm:$0xff]  ;;  %v381_v51 = vld [vmem:[%s9811_s30 + $0xb8] sm:$0xff]  ;;  %v7873_v52 = vpack.c.bf16 %v379_v48, %v379_v48 }
  0x1d   : > { %264 = vst.msk [vmem:[#allocation2 + $0x88] sm:$0xf] %vm229_vm0, %v9494_v3  ;;  %265 = vst.msk [vmem:[#allocation2 + $0x8c] sm:$0xf] %vm229_vm0, %v9494_v3  ;;  %v7874_v53 = vpack.c.bf16 %v380_v50, %v380_v50  ;;  %v7875_v54 = vpack.c.bf16 %v381_v51, %v381_v51  ;;  %v382_v55 = vld [vmem:[%s9811_s30 + $0xc0] sm:$0xff]  ;;  %v383_v56 = vld [vmem:[%s9811_s30 + $0xc8] sm:$0xff]  ;;  %8421 = vmatpush3.bf16.msra.mxu0 %v9827_v14 }
  0x1e   : > { %266 = vst.msk [vmem:[#allocation2 + $0x90] sm:$0xf] %vm229_vm0, %v9494_v3  ;;  %267 = vst.msk [vmem:[#allocation2 + $0x94] sm:$0xf] %vm229_vm0, %v9494_v3  ;;  %v384_v57 = vld [vmem:[%s9811_s30 + $0xd0] sm:$0xff]  ;;  %v7876_v58 = vpack.c.bf16 %v382_v55, %v382_v55  ;;  %v7877_v59 = vpack.c.bf16 %v383_v56, %v383_v56  ;;  %v385_v60 = vld [vmem:[%s9811_s30 + $0xd8] sm:$0xff]  ;;  %8422 = vmatprep.subr.bf16.mxu0 %v9290_v39 }
  0x1f   : > { %268 = vst.msk [vmem:[#allocation2 + $0x98] sm:$0xf] %vm229_vm0, %v9494_v3  ;;  %269 = vst.msk [vmem:[#allocation2 + $0x9c] sm:$0xf] %vm229_vm0, %v9494_v3  ;;  %v7878_v61 = vpack.c.bf16 %v384_v57, %v384_v57  ;;  %v386_v62 = vld [vmem:[%s9811_s30 + $0xe0] sm:$0xff]  ;;  %v387_v63 = vld [vmem:[%s9811_s30 + $0xe8] sm:$0xff]  ;;  %v7879_v1 = vpack.c.bf16 %v385_v60, %v385_v60 }
  0x20   : > { %270 = vst.msk [vmem:[#allocation2 + $0xa0] sm:$0xf] %vm229_vm0, %v9494_v3  ;;  %271 = vst.msk [vmem:[#allocation2 + $0xa4] sm:$0xf] %vm229_vm0, %v9494_v3  ;;  %v7880_v2 = vpack.c.bf16 %v386_v62, %v386_v62  ;;  %v7881_v4 = vpack.c.bf16 %v387_v63, %v387_v63  ;;  %v9291_v5 = vld [vmem:[%s12642_s1 + $0x8] sm:$0xff]   ;;  %v9292_v6 = vld [vmem:[%s12642_s1] sm:$0xff]  }
  0x21   : > { %272 = vst.msk [vmem:[#allocation2 + $0xa8] sm:$0xf] %vm229_vm0, %v9494_v3  ;;  %273 = vst.msk [vmem:[#allocation2 + $0xac] sm:$0xf] %vm229_vm0, %v9494_v3  ;;  %8423 = vmatpush3.bf16.msra.mxu0 %v9290_v39  ;;  %v389_v10 = vld [vmem:[%s9811_s30 + $0xf8] sm:$0xff]  ;;  %v391_v14 = vld [vmem:[%s9811_s30 + $0x108] sm:$0xff] }
  0x22   : > { %274 = vst.msk [vmem:[#allocation2 + $0xb0] sm:$0xf] %vm229_vm0, %v9494_v3  ;;  %275 = vst.msk [vmem:[#allocation2 + $0xb4] sm:$0xf] %vm229_vm0, %v9494_v3  ;;  %8424 = vmatprep.subr.bf16.mxu0 %v9291_v5  ;;  %v7883_v13 = vpack.c.bf16 %v389_v10, %v389_v10  ;;  %v7885_v18 = vpack.c.bf16 %v391_v14, %v391_v14  ;;  %v396_v23 = vld [vmem:[%s9811_s30 + $0x130] sm:$0xff]  ;;  %v399_v30 = vld [vmem:[%s9811_s30 + $0x148] sm:$0xff] }
  0x23   : > { %276 = vst.msk [vmem:[#allocation2 + $0xb8] sm:$0xf] %vm229_vm0, %v9494_v3  ;;  %277 = vst.msk [vmem:[#allocation2 + $0xbc] sm:$0xf] %vm229_vm0, %v9494_v3  ;;  %v400_v35 = vld [vmem:[%s9811_s30 + $0x150] sm:$0xff]  ;;  %v402_v37 = vld [vmem:[%s9811_s30 + $0x160] sm:$0xff] }
  0x24   : > { %278 = vst.msk [vmem:[#allocation2 + $0xc0] sm:$0xf] %vm229_vm0, %v9494_v3  ;;  %279 = vst.msk [vmem:[#allocation2 + $0xc4] sm:$0xf] %vm229_vm0, %v9494_v3  ;;  %v7894_v38 = vpack.c.bf16 %v400_v35, %v400_v35  ;;  %v405_v43 = vld [vmem:[%s9811_s30 + $0x178] sm:$0xff]  ;;  %v406_v48 = vld [vmem:[%s9811_s30 + $0x180] sm:$0xff] }
  0x25   : > { %280 = vst.msk [vmem:[#allocation2 + $0xc8] sm:$0xf] %vm229_vm0, %v9494_v3  ;;  %281 = vst.msk [vmem:[#allocation2 + $0xcc] sm:$0xf] %vm229_vm0, %v9494_v3  ;;  %8425 = vmatpush3.bf16.msra.mxu0 %v9291_v5  ;;  %v408_v50 = vld [vmem:[%s9811_s30 + $0x190] sm:$0xff]  ;;  %v7900_v51 = vpack.c.bf16 %v406_v48, %v406_v48  ;;  %v410_v55 = vld [vmem:[%s9811_s30 + $0x1a0] sm:$0xff] }
  0x26   : > { %282 = vst.msk [vmem:[#allocation2 + $0xd0] sm:$0xf] %vm229_vm0, %v9494_v3  ;;  %283 = vst.msk [vmem:[#allocation2 + $0xd4] sm:$0xf] %vm229_vm0, %v9494_v3  ;;  %8426 = vmatprep.subr.bf16.mxu0 %v9292_v6  ;;  %v411_v56 = vld [vmem:[%s9811_s30 + $0x1a8] sm:$0xff]  ;;  %v412_v60 = vld [vmem:[%s9811_s30 + $0x1b0] sm:$0xff] }
  0x27   : > { %284 = vst.msk [vmem:[#allocation2 + $0xd8] sm:$0xf] %vm229_vm0, %v9494_v3  ;;  %285 = vst.msk [vmem:[#allocation2 + $0xdc] sm:$0xf] %vm229_vm0, %v9494_v3  ;;  %v7906_v62 = vpack.c.bf16 %v412_v60, %v412_v60  ;;  %v9322_v5 = vld [vmem:[%s12642_s1 + $0x78] sm:$0xff]   ;;  %v414_v10 = vld [vmem:[%s9811_s30 + $0x1c0] sm:$0xff] }
  0x28   : > { %286 = vst.msk [vmem:[#allocation2 + $0xe0] sm:$0xf] %vm229_vm0, %v9494_v3  ;;  %287 = vst.msk [vmem:[#allocation2 + $0xe4] sm:$0xf] %vm229_vm0, %v9494_v3  ;;  %8556 = vmatprep.subr.bf16.mxu1 %v9322_v5  ;;  %v416_v14 = vld [vmem:[%s9811_s30 + $0x1d0] sm:$0xff]  ;;  %v421_v35 = vld [vmem:[%s9811_s30 + $0x1f8] sm:$0xff] }
  0x29   : > { %288 = vst.msk [vmem:[#allocation2 + $0xe8] sm:$0xf] %vm229_vm0, %v9494_v3  ;;  %289 = vst.msk [vmem:[#allocation2 + $0xec] sm:$0xf] %vm229_vm0, %v9494_v3  ;;  %8427 = vmatpush3.bf16.msra.mxu0 %v9292_v6  ;;  %v9323_v6 = vld [vmem:[%s12642_s1 + $0x70] sm:$0xff]   ;;  %8557 = vmatpush3.bf16.msra.mxu1 %v9322_v5 }
  0x2a   : > { %290 = vst.msk [vmem:[#allocation2 + $0xf0] sm:$0xf] %vm229_vm0, %v9494_v3  ;;  %291 = vst.msk [vmem:[#allocation2 + $0xf4] sm:$0xf] %vm229_vm0, %v9494_v3  ;;  %8558 = vmatprep.subr.bf16.mxu1 %v9323_v6  ;;  %v424_v48 = vld [vmem:[%s9811_s30 + $0x210] sm:$0xff] }
  0x2b   : > { %292 = vst.msk [vmem:[#allocation2 + $0xf8] sm:$0xf] %vm229_vm0, %v9494_v3  ;;  %293 = vst.msk [vmem:[#allocation2 + $0xfc] sm:$0xf] %vm229_vm0, %v9494_v3 }
  0x2c   : > { %294 = vst.msk [vmem:[#allocation2 + $0x100] sm:$0xf] %vm229_vm0, %v9494_v3  ;;  %295 = vst.msk [vmem:[#allocation2 + $0x104] sm:$0xf] %vm229_vm0, %v9494_v3 }
  0x2d   : > { %296 = vst.msk [vmem:[#allocation2 + $0x108] sm:$0xf] %vm229_vm0, %v9494_v3  ;;  %297 = vst.msk [vmem:[#allocation2 + $0x10c] sm:$0xf] %vm229_vm0, %v9494_v3  ;;  %8559 = vmatpush3.bf16.msra.mxu1 %v9323_v6  ;;  %v430_v6 = vld [vmem:[%s9811_s30 + $0x240] sm:$0xff] }
  0x2e   : > { %298 = vst.msk [vmem:[#allocation2 + $0x110] sm:$0xf] %vm229_vm0, %v9494_v3  ;;  %299 = vst.msk [vmem:[#allocation2 + $0x114] sm:$0xf] %vm229_vm0, %v9494_v3 }
  0x2f   : > { %300 = vst.msk [vmem:[#allocation2 + $0x118] sm:$0xf] %vm229_vm0, %v9494_v3  ;;  %301 = vst.msk [vmem:[#allocation2 + $0x11c] sm:$0xf] %vm229_vm0, %v9494_v3 }
  0x30   : > { %302 = vst.msk [vmem:[#allocation2 + $0x120] sm:$0xf] %vm229_vm0, %v9494_v3  ;;  %303 = vst.msk [vmem:[#allocation2 + $0x124] sm:$0xf] %vm229_vm0, %v9494_v3 }
  0x31   : > { %304 = vst.msk [vmem:[#allocation2 + $0x128] sm:$0xf] %vm229_vm0, %v9494_v3  ;;  %305 = vst.msk [vmem:[#allocation2 + $0x12c] sm:$0xf] %vm229_vm0, %v9494_v3 }
  0x32   : > { %306 = vst.msk [vmem:[#allocation2 + $0x130] sm:$0xf] %vm229_vm0, %v9494_v3  ;;  %307 = vst.msk [vmem:[#allocation2 + $0x134] sm:$0xf] %vm229_vm0, %v9494_v3 }
  0x33   : > { %308 = vst.msk [vmem:[#allocation2 + $0x138] sm:$0xf] %vm229_vm0, %v9494_v3  ;;  %309 = vst.msk [vmem:[#allocation2 + $0x13c] sm:$0xf] %vm229_vm0, %v9494_v3 }
  0x34   : > { %310 = vst.msk [vmem:[#allocation2 + $0x140] sm:$0xf] %vm229_vm0, %v9494_v3  ;;  %311 = vst.msk [vmem:[#allocation2 + $0x144] sm:$0xf] %vm229_vm0, %v9494_v3 }
  0x35   : > { %312 = vst.msk [vmem:[#allocation2 + $0x148] sm:$0xf] %vm229_vm0, %v9494_v3  ;;  %313 = vst.msk [vmem:[#allocation2 + $0x14c] sm:$0xf] %vm229_vm0, %v9494_v3 }
  0x36   : > { %314 = vst.msk [vmem:[#allocation2 + $0x150] sm:$0xf] %vm229_vm0, %v9494_v3  ;;  %315 = vst.msk [vmem:[#allocation2 + $0x154] sm:$0xf] %vm229_vm0, %v9494_v3 }
  0x37   : > { %316 = vst.msk [vmem:[#allocation2 + $0x158] sm:$0xf] %vm229_vm0, %v9494_v3  ;;  %317 = vst.msk [vmem:[#allocation2 + $0x15c] sm:$0xf] %vm229_vm0, %v9494_v3 }
  0x38   : > { %318 = vst.msk [vmem:[#allocation2 + $0x160] sm:$0xf] %vm229_vm0, %v9494_v3  ;;  %319 = vst.msk [vmem:[#allocation2 + $0x164] sm:$0xf] %vm229_vm0, %v9494_v3 }
  0x39   : > { %320 = vst.msk [vmem:[#allocation2 + $0x168] sm:$0xf] %vm229_vm0, %v9494_v3  ;;  %321 = vst.msk [vmem:[#allocation2 + $0x16c] sm:$0xf] %vm229_vm0, %v9494_v3 }
  0x3a   : > { %322 = vst.msk [vmem:[#allocation2 + $0x170] sm:$0xf] %vm229_vm0, %v9494_v3  ;;  %323 = vst.msk [vmem:[#allocation2 + $0x174] sm:$0xf] %vm229_vm0, %v9494_v3 }
  0x3b   : > { %324 = vst.msk [vmem:[#allocation2 + $0x178] sm:$0xf] %vm229_vm0, %v9494_v3  ;;  %325 = vst.msk [vmem:[#allocation2 + $0x17c] sm:$0xf] %vm229_vm0, %v9494_v3 }
  0x3c   : > { %326 = vst.msk [vmem:[#allocation2 + $0x180] sm:$0xf] %vm229_vm0, %v9494_v3  ;;  %327 = vst.msk [vmem:[#allocation2 + $0x184] sm:$0xf] %vm229_vm0, %v9494_v3 }
  0x3d   : > { %328 = vst.msk [vmem:[#allocation2 + $0x188] sm:$0xf] %vm229_vm0, %v9494_v3  ;;  %329 = vst.msk [vmem:[#allocation2 + $0x18c] sm:$0xf] %vm229_vm0, %v9494_v3 }
  0x3e   : > { %330 = vst.msk [vmem:[#allocation2 + $0x190] sm:$0xf] %vm229_vm0, %v9494_v3  ;;  %331 = vst.msk [vmem:[#allocation2 + $0x194] sm:$0xf] %vm229_vm0, %v9494_v3 }
  0x3f   : > { %332 = vst.msk [vmem:[#allocation2 + $0x198] sm:$0xf] %vm229_vm0, %v9494_v3  ;;  %333 = vst.msk [vmem:[#allocation2 + $0x19c] sm:$0xf] %vm229_vm0, %v9494_v3 }
  0x40   : > { %334 = vst.msk [vmem:[#allocation2 + $0x1a0] sm:$0xf] %vm229_vm0, %v9494_v3  ;;  %335 = vst.msk [vmem:[#allocation2 + $0x1a4] sm:$0xf] %vm229_vm0, %v9494_v3 }
  0x41   : > { %336 = vst.msk [vmem:[#allocation2 + $0x1a8] sm:$0xf] %vm229_vm0, %v9494_v3  ;;  %337 = vst.msk [vmem:[#allocation2 + $0x1ac] sm:$0xf] %vm229_vm0, %v9494_v3 }
  0x42   : > { %338 = vst.msk [vmem:[#allocation2 + $0x1b0] sm:$0xf] %vm229_vm0, %v9494_v3  ;;  %339 = vst.msk [vmem:[#allocation2 + $0x1b4] sm:$0xf] %vm229_vm0, %v9494_v3 }
  0x43   : > { %340 = vst.msk [vmem:[#allocation2 + $0x1b8] sm:$0xf] %vm229_vm0, %v9494_v3  ;;  %341 = vst.msk [vmem:[#allocation2 + $0x1bc] sm:$0xf] %vm229_vm0, %v9494_v3 }
  0x44   : > { %342 = vst.msk [vmem:[#allocation2 + $0x1c0] sm:$0xf] %vm229_vm0, %v9494_v3  ;;  %343 = vst.msk [vmem:[#allocation2 + $0x1c4] sm:$0xf] %vm229_vm0, %v9494_v3 }
  0x45   : > { %344 = vst.msk [vmem:[#allocation2 + $0x1c8] sm:$0xf] %vm229_vm0, %v9494_v3  ;;  %345 = vst.msk [vmem:[#allocation2 + $0x1cc] sm:$0xf] %vm229_vm0, %v9494_v3 }
  0x46   : > { %346 = vst.msk [vmem:[#allocation2 + $0x1d0] sm:$0xf] %vm229_vm0, %v9494_v3  ;;  %347 = vst.msk [vmem:[#allocation2 + $0x1d4] sm:$0xf] %vm229_vm0, %v9494_v3 }
  0x47   : > { %348 = vst.msk [vmem:[#allocation2 + $0x1d8] sm:$0xf] %vm229_vm0, %v9494_v3  ;;  %349 = vst.msk [vmem:[#allocation2 + $0x1dc] sm:$0xf] %vm229_vm0, %v9494_v3 }
  0x48   : > { %350 = vst.msk [vmem:[#allocation2 + $0x1e0] sm:$0xf] %vm229_vm0, %v9494_v3  ;;  %351 = vst.msk [vmem:[#allocation2 + $0x1e4] sm:$0xf] %vm229_vm0, %v9494_v3 }
  0x49   : > { %352 = vst.msk [vmem:[#allocation2 + $0x1e8] sm:$0xf] %vm229_vm0, %v9494_v3  ;;  %353 = vst.msk [vmem:[#allocation2 + $0x1ec] sm:$0xf] %vm229_vm0, %v9494_v3 }
  0x4a   : > { %354 = vst.msk [vmem:[#allocation2 + $0x1f0] sm:$0xf] %vm229_vm0, %v9494_v3  ;;  %355 = vst.msk [vmem:[#allocation2 + $0x1f4] sm:$0xf] %vm229_vm0, %v9494_v3 }
  0x4b   : > { %356 = vst.msk [vmem:[#allocation2 + $0x1f8] sm:$0xf] %vm229_vm0, %v9494_v3  ;;  %357 = vst.msk [vmem:[#allocation2 + $0x1fc] sm:$0xf] %vm229_vm0, %v9494_v3 }
  0x4c   : > { %999 = vst.msk [vmem:[#allocation2] sm:$0xf] %vm998_vm1, %v7852_v8  ;;  %1000 = vst.msk [vmem:[#allocation2 + $0x4] sm:$0xf] %vm998_vm1, %v7853_v9  ;;  %v388_v9 = vld [vmem:[%s9811_s30 + $0xf0] sm:$0xff] }
  0x4d   : > { %1001 = vst.msk [vmem:[#allocation2 + $0x8] sm:$0xf] %vm998_vm1, %v7854_v11  ;;  %1002 = vst.msk [vmem:[#allocation2 + $0xc] sm:$0xf] %vm998_vm1, %v7855_v15  ;;  %v390_v11 = vld [vmem:[%s9811_s30 + $0x100] sm:$0xff]  ;;  %v7882_v12 = vpack.c.bf16 %v388_v9, %v388_v9  ;;  %v9326_v9 = vld [vmem:[%s12642_s1 + $0xb0] sm:$0xff]  }
  0x4e   : > { %1003 = vst.msk [vmem:[#allocation2 + $0x10] sm:$0xf] %vm998_vm1, %v7856_v16  ;;  %1004 = vst.msk [vmem:[#allocation2 + $0x14] sm:$0xf] %vm998_vm1, %v7857_v17  ;;  %v7884_v15 = vpack.c.bf16 %v390_v11, %v390_v11  ;;  %v392_v16 = vld [vmem:[%s9811_s30 + $0x110] sm:$0xff]  ;;  %v393_v17 = vld [vmem:[%s9811_s30 + $0x118] sm:$0xff] }
  0x4f   : > { %1005 = vst.msk [vmem:[#allocation2 + $0x18] sm:$0xf] %vm998_vm1, %v7858_v21  ;;  %1006 = vst.msk [vmem:[#allocation2 + $0x1c] sm:$0xf] %vm998_vm1, %v7859_v22  ;;  %v7886_v19 = vpack.c.bf16 %v392_v16, %v392_v16  ;;  %v7887_v20 = vpack.c.bf16 %v393_v17, %v393_v17  ;;  %v394_v21 = vld [vmem:[%s9811_s30 + $0x120] sm:$0xff]  ;;  %v395_v22 = vld [vmem:[%s9811_s30 + $0x128] sm:$0xff] }
  0x50   : > { %1007 = vst.msk [vmem:[#allocation2 + $0x20] sm:$0xf] %vm998_vm1, %v7860_v24  ;;  %1008 = vst.msk [vmem:[#allocation2 + $0x24] sm:$0xf] %vm998_vm1, %v7861_v27  ;;  %v7888_v25 = vpack.c.bf16 %v394_v21, %v394_v21  ;;  %v7889_v26 = vpack.c.bf16 %v395_v22, %v395_v22  ;;  %v397_v27 = vld [vmem:[%s9811_s30 + $0x138] sm:$0xff]  ;;  %v9325_v16 = vld [vmem:[%s12642_s1 + $0x60] sm:$0xff]  }
  0x51   : > { %1009 = vst.msk [vmem:[#allocation2 + $0x28] sm:$0xf] %vm998_vm1, %v7862_v28  ;;  %1010 = vst.msk [vmem:[#allocation2 + $0x2c] sm:$0xf] %vm998_vm1, %v7863_v29  ;;  %v7890_v28 = vpack.c.bf16 %v396_v23, %v396_v23  ;;  %v398_v29 = vld [vmem:[%s9811_s30 + $0x140] sm:$0xff]  ;;  %v7891_v32 = vpack.c.bf16 %v397_v27, %v397_v27 }
  0x52   : > { %1011 = vst.msk [vmem:[#allocation2 + $0x30] sm:$0xf] %vm998_vm1, %v7864_v33  ;;  %1012 = vst.msk [vmem:[#allocation2 + $0x34] sm:$0xf] %vm998_vm1, %v7865_v34  ;;  %v7892_v33 = vpack.c.bf16 %v398_v29, %v398_v29  ;;  %v7893_v34 = vpack.c.bf16 %v399_v30, %v399_v30  ;;  %v9330_v29 = vld [vmem:[%s12642_s1 + $0x50] sm:$0xff]   ;;  %v418_v30 = vld [vmem:[%s9811_s30 + $0x1e0] sm:$0xff] }
  0x53   : > { %1013 = vst.msk [vmem:[#allocation2 + $0x38] sm:$0xf] %vm998_vm1, %v7866_v36  ;;  %1014 = vst.msk [vmem:[#allocation2 + $0x3c] sm:$0xf] %vm998_vm1, %v7867_v40  ;;  %v9293_v0 = vld [vmem:[#allocation2] sm:$0xff]   ;;  %v401_v36 = vld [vmem:[%s9811_s30 + $0x158] sm:$0xff] }
  0x54   : > { %1015 = vst.msk [vmem:[#allocation2 + $0x40] sm:$0xf] %vm998_vm1, %v7868_v41  ;;  %1016 = vst.msk [vmem:[#allocation2 + $0x44] sm:$0xf] %vm998_vm1, %v7869_v42  ;;  %8428 = vmatprep.mubr.bf16.mxu0 %v9293_v0  ;;  %v9294_v7 = vld [vmem:[#allocation2 + $0x8] sm:$0xff]   ;;  %v7895_v39 = vpack.c.bf16 %v401_v36, %v401_v36  ;;  %v7896_v41 = vpack.c.bf16 %v402_v37, %v402_v37  ;;  %v404_v42 = vld [vmem:[%s9811_s30 + $0x170] sm:$0xff]  ;;  %v7915_v37 = vpack.c.bf16 %v421_v35, %v421_v35 }
  0x55   : > { %1017 = vst.msk [vmem:[#allocation2 + $0x48] sm:$0xf] %vm998_vm1, %v7870_v46  ;;  %1018 = vst.msk [vmem:[#allocation2 + $0x4c] sm:$0xf] %vm998_vm1, %v7871_v47  ;;  %v9295_v8 = vld [vmem:[#allocation2 + $0x10] sm:$0xff]   ;;  %8429 = vmatmul.mubr.bf16.vlgmr.msra.gmra.mxu0 %v9294_v7  ;;  %v403_v40 = vld [vmem:[%s9811_s30 + $0x168] sm:$0xff]  ;;  %v7898_v45 = vpack.c.bf16 %v404_v42, %v404_v42  ;;  %v7899_v46 = vpack.c.bf16 %v405_v43, %v405_v43 }
  0x56   : > { %1019 = vst.msk [vmem:[#allocation2 + $0x50] sm:$0xf] %vm998_vm1, %v7872_v49  ;;  %1020 = vst.msk [vmem:[#allocation2 + $0x54] sm:$0xf] %vm998_vm1, %v7873_v52  ;;  %8432 = vmatprep.mubr.bf16.mxu0 %v9295_v8  ;;  %v9296_v24 = vld [vmem:[#allocation2 + $0x18] sm:$0xff]   ;;  %v7897_v44 = vpack.c.bf16 %v403_v40, %v403_v40  ;;  %v407_v49 = vld [vmem:[%s9811_s30 + $0x188] sm:$0xff] }
  0x57   : > { %1021 = vst.msk [vmem:[#allocation2 + $0x58] sm:$0xf] %vm998_vm1, %v7874_v53  ;;  %1022 = vst.msk [vmem:[#allocation2 + $0x5c] sm:$0xf] %vm998_vm1, %v7875_v54  ;;  %v9297_v31 = vld [vmem:[#allocation2 + $0x20] sm:$0xff]   ;;  %v9317_v47 = vld [vmem:[%s12642_s1 + $0xb8] sm:$0xff]   ;;  %v7901_v52 = vpack.c.bf16 %v407_v49, %v407_v49  ;;  %v7902_v54 = vpack.c.bf16 %v408_v50, %v408_v50  ;;  %v7918_v50 = vpack.c.bf16 %v424_v48, %v424_v48 }
  0x58   : > { %1023 = vst.msk [vmem:[#allocation2 + $0x60] sm:$0xf] %vm998_vm1, %v7876_v58  ;;  %1024 = vst.msk [vmem:[#allocation2 + $0x64] sm:$0xf] %vm998_vm1, %v7877_v59  ;;  %8700 = vmatprep.subr.bf16.mxu0 %v9317_v47  ;;  %v409_v53 = vld [vmem:[%s9811_s30 + $0x198] sm:$0xff]  ;;  %v7904_v58 = vpack.c.bf16 %v410_v55, %v410_v55  ;;  %v7905_v59 = vpack.c.bf16 %v411_v56, %v411_v56  ;;  %v9298_v0 = vld [vmem:[#allocation2 + $0x28] sm:$0xff]  }
  0x59   : > { %1025 = vst.msk [vmem:[#allocation2 + $0x68] sm:$0xf] %vm998_vm1, %v7878_v61  ;;  %1026 = vst.msk [vmem:[#allocation2 + $0x6c] sm:$0xf] %vm998_vm1, %v7879_v1  ;;  %v7903_v57 = vpack.c.bf16 %v409_v53, %v409_v53  ;;  %v413_v61 = vld [vmem:[%s9811_s30 + $0x1b8] sm:$0xff]  ;;  %8701 = vmatpush3.bf16.msra.mxu0 %v9317_v47  ;;  %v9299_v1 = vld [vmem:[#allocation2 + $0x30] sm:$0xff]  }
  0x5a   : > { %1027 = vst.msk [vmem:[#allocation2 + $0x70] sm:$0xf] %vm998_vm1, %v7880_v2  ;;  %1028 = vst.msk [vmem:[#allocation2 + $0x74] sm:$0xf] %vm998_vm1, %v7881_v4  ;;  %v7907_v63 = vpack.c.bf16 %v413_v61, %v413_v61  ;;  %v9300_v2 = vld [vmem:[#allocation2 + $0x38] sm:$0xff]   ;;  %v9324_v7 = vld [vmem:[%s12642_s1 + $0x68] sm:$0xff]   ;;  %8702 = vmatprep.subr.bf16.mxu0 %v9326_v9 }
  0x5b   : > { %1029 = vst.msk [vmem:[#allocation2 + $0x78] sm:$0xf] %vm998_vm1, %v7882_v12  ;;  %1030 = vst.msk [vmem:[#allocation2 + $0x7c] sm:$0xf] %vm998_vm1, %v7883_v13  ;;  %v9301_v4 = vld [vmem:[#allocation2 + $0x40] sm:$0xff]   ;;  %v415_v12 = vld [vmem:[%s9811_s30 + $0x1c8] sm:$0xff]  ;;  %v7908_v13 = vpack.c.bf16 %v414_v10, %v414_v10  ;;  %8560 = vmatprep.subr.bf16.mxu1 %v9324_v7 }
  0x5c   : > { %1031 = vst.msk [vmem:[#allocation2 + $0x80] sm:$0xf] %vm998_vm1, %v7884_v15  ;;  %1032 = vst.msk [vmem:[#allocation2 + $0x84] sm:$0xf] %vm998_vm1, %v7885_v18  ;;  %v9302_v8 = vld [vmem:[#allocation2 + $0x48] sm:$0xff]   ;;  %v417_v15 = vld [vmem:[%s9811_s30 + $0x1d8] sm:$0xff]  ;;  %v7909_v17 = vpack.c.bf16 %v415_v12, %v415_v12  ;;  %v7910_v18 = vpack.c.bf16 %v416_v14, %v416_v14  ;;  %8561 = vmatpush3.bf16.msra.mxu1 %v9324_v7 }
  0x5d   : > { %1033 = vst.msk [vmem:[#allocation2 + $0x88] sm:$0xf] %vm998_vm1, %v7886_v19  ;;  %1034 = vst.msk [vmem:[#allocation2 + $0x8c] sm:$0xf] %vm998_vm1, %v7887_v20  ;;  %8433 = vmatmul.mubr.bf16.gmra.mxu0 %v9296_v24  ;;  %v9303_v11 = vld [vmem:[#allocation2 + $0x50] sm:$0xff]   ;;  %v7911_v19 = vpack.c.bf16 %v417_v15, %v417_v15  ;;  %v9329_v20 = vld [vmem:[%s12642_s1 + $0x58] sm:$0xff]   ;;  %8562 = vmatprep.subr.bf16.mxu1 %v9325_v16 }
  0x5e   : > { %1035 = vst.msk [vmem:[#allocation2 + $0x90] sm:$0xf] %vm998_vm1, %v7888_v25  ;;  %1036 = vst.msk [vmem:[#allocation2 + $0x94] sm:$0xf] %vm998_vm1, %v7889_v26  ;;  %8436 = vmatprep.mubr.bf16.mxu0 %v9297_v31  ;;  %8703 = vmatpush3.bf16.msra.mxu0 %v9326_v9  ;;  %v9304_v21 = vld [vmem:[#allocation2 + $0x58] sm:$0xff]   ;;  %v419_v31 = vld [vmem:[%s9811_s30 + $0x1e8] sm:$0xff] }
  0x5f   : > { %1037 = vst.msk [vmem:[#allocation2 + $0x98] sm:$0xf] %vm998_vm1, %v7890_v28  ;;  %1038 = vst.msk [vmem:[#allocation2 + $0x9c] sm:$0xf] %vm998_vm1, %v7891_v32  ;;  %v9305_v22 = vld [vmem:[#allocation2 + $0x60] sm:$0xff]   ;;  %v7912_v32 = vpack.c.bf16 %v418_v30, %v418_v30  ;;  %v425_v49 = vld [vmem:[%s9811_s30 + $0x218] sm:$0xff] }
  0x60   : > { %1039 = vst.msk [vmem:[#allocation2 + $0xa0] sm:$0xf] %vm998_vm1, %v7892_v33  ;;  %1040 = vst.msk [vmem:[#allocation2 + $0xa4] sm:$0xf] %vm998_vm1, %v7893_v34  ;;  %8563 = vmatpush3.bf16.msra.mxu1 %v9325_v16  ;;  %v9306_v23 = vld [vmem:[#allocation2 + $0x68] sm:$0xff]   ;;  %v7913_v33 = vpack.c.bf16 %v419_v31, %v419_v31  ;;  %v420_v34 = vld [vmem:[%s9811_s30 + $0x1f0] sm:$0xff] }
  0x61   : > { %1041 = vst.msk [vmem:[#allocation2 + $0xa8] sm:$0xf] %vm998_vm1, %v7894_v38  ;;  %1042 = vst.msk [vmem:[#allocation2 + $0xac] sm:$0xf] %vm998_vm1, %v7895_v39  ;;  %8564 = vmatprep.subr.bf16.mxu1 %v9329_v20  ;;  %v9307_v24 = vld [vmem:[#allocation2 + $0x70] sm:$0xff]   ;;  %v7914_v36 = vpack.c.bf16 %v420_v34, %v420_v34  ;;  %v9331_v39 = vld [vmem:[%s12642_s1 + $0x48] sm:$0xff]  }
  0x62   : > { %1043 = vst.msk [vmem:[#allocation2 + $0xb0] sm:$0xf] %vm998_vm1, %v7896_v41  ;;  %1044 = vst.msk [vmem:[#allocation2 + $0xb4] sm:$0xf] %vm998_vm1, %v7897_v44  ;;  %v9308_v25 = vld [vmem:[#allocation2 + $0x78] sm:$0xff]   ;;  %v9332_v41 = vld [vmem:[%s12642_s1 + $0x40] sm:$0xff]  }
  0x63   : > { %1045 = vst.msk [vmem:[#allocation2 + $0xb8] sm:$0xf] %vm998_vm1, %v7898_v45  ;;  %1046 = vst.msk [vmem:[#allocation2 + $0xbc] sm:$0xf] %vm998_vm1, %v7899_v46  ;;  %v9309_v26 = vld [vmem:[#allocation2 + $0x80] sm:$0xff]   ;;  %v423_v45 = vld [vmem:[%s9811_s30 + $0x208] sm:$0xff] }
  0x64   : > { %1047 = vst.msk [vmem:[#allocation2 + $0xc0] sm:$0xf] %vm998_vm1, %v7900_v51  ;;  %1048 = vst.msk [vmem:[#allocation2 + $0xc4] sm:$0xf] %vm998_vm1, %v7901_v52  ;;  %8565 = vmatpush3.bf16.msra.mxu1 %v9329_v20  ;;  %v9310_v27 = vld [vmem:[#allocation2 + $0x88] sm:$0xff]   ;;  %v422_v44 = vld [vmem:[%s9811_s30 + $0x200] sm:$0xff]  ;;  %v7917_v47 = vpack.c.bf16 %v423_v45, %v423_v45  ;;  %v7919_v51 = vpack.c.bf16 %v425_v49, %v425_v49 }
  0x65   : > { %1049 = vst.msk [vmem:[#allocation2 + $0xc8] sm:$0xf] %vm998_vm1, %v7902_v54  ;;  %1050 = vst.msk [vmem:[#allocation2 + $0xcc] sm:$0xf] %vm998_vm1, %v7903_v57  ;;  %8437 = vmatmul.mubr.bf16.gmra.mxu0 %v9298_v0  ;;  %v9311_v28 = vld [vmem:[#allocation2 + $0x90] sm:$0xff]   ;;  %8566 = vmatprep.subr.bf16.mxu1 %v9330_v29  ;;  %v7916_v46 = vpack.c.bf16 %v422_v44, %v422_v44  ;;  %v9335_v56 = vld [vmem:[%s12642_s1 + $0xa8] sm:$0xff]  }
  0x66   : > { %1051 = vst.msk [vmem:[#allocation2 + $0xd0] sm:$0xf] %vm998_vm1, %v7904_v58  ;;  %1052 = vst.msk [vmem:[#allocation2 + $0xd4] sm:$0xf] %vm998_vm1, %v7905_v59  ;;  %8440 = vmatprep.mubr.bf16.mxu0 %v9299_v1  ;;  %v9312_v38 = vld [vmem:[#allocation2 + $0x98] sm:$0xff]   ;;  %8704 = vmatprep.subr.bf16.mxu0 %v9335_v56  ;;  %v426_v57 = vld [vmem:[%s9811_s30 + $0x220] sm:$0xff] }
  0x67   : > { %1053 = vst.msk [vmem:[#allocation2 + $0xd8] sm:$0xf] %vm998_vm1, %v7906_v62  ;;  %1054 = vst.msk [vmem:[#allocation2 + $0xdc] sm:$0xf] %vm998_vm1, %v7907_v63  ;;  %v9313_v40 = vld [vmem:[#allocation2 + $0xa0] sm:$0xff]   ;;  %8705 = vmatpush3.bf16.msra.mxu0 %v9335_v56  ;;  %v427_v58 = vld [vmem:[%s9811_s30 + $0x228] sm:$0xff]  ;;  %v7920_v59 = vpack.c.bf16 %v426_v57, %v426_v57 }
  0x68   : > { %1055 = vst.msk [vmem:[#allocation2 + $0xe0] sm:$0xf] %vm998_vm1, %v7908_v13  ;;  %1056 = vst.msk [vmem:[#allocation2 + $0xe4] sm:$0xf] %vm998_vm1, %v7909_v17  ;;  %8567 = vmatpush3.bf16.msra.mxu1 %v9330_v29  ;;  %v9314_v42 = vld [vmem:[#allocation2 + $0xa8] sm:$0xff]   ;;  %v7921_v60 = vpack.c.bf16 %v427_v58, %v427_v58  ;;  %v428_v61 = vld [vmem:[%s9811_s30 + $0x230] sm:$0xff] }
  0x69   : > { %1057 = vst.msk [vmem:[#allocation2 + $0xe8] sm:$0xf] %vm998_vm1, %v7910_v18  ;;  %1058 = vst.msk [vmem:[#allocation2 + $0xec] sm:$0xf] %vm998_vm1, %v7911_v19  ;;  %8568 = vmatprep.subr.bf16.mxu1 %v9331_v39  ;;  %v9315_v43 = vld [vmem:[#allocation2 + $0xb0] sm:$0xff]   ;;  %v429_v62 = vld [vmem:[%s9811_s30 + $0x238] sm:$0xff]  ;;  %v7922_v63 = vpack.c.bf16 %v428_v61, %v428_v61 }
  0x6a   : > { %1059 = vst.msk [vmem:[#allocation2 + $0xf0] sm:$0xf] %vm998_vm1, %v7912_v32  ;;  %1060 = vst.msk [vmem:[#allocation2 + $0xf4] sm:$0xf] %vm998_vm1, %v7913_v33  ;;  %v9316_v52 = vld [vmem:[#allocation2 + $0xb8] sm:$0xff]   ;;  %v7923_v0 = vpack.c.bf16 %v429_v62, %v429_v62  ;;  %v431_v7 = vld [vmem:[%s9811_s30 + $0x248] sm:$0xff] }
  0x6b   : > { %1061 = vst.msk [vmem:[#allocation2 + $0xf8] sm:$0xf] %vm998_vm1, %v7914_v36  ;;  %1062 = vst.msk [vmem:[#allocation2 + $0xfc] sm:$0xf] %vm998_vm1, %v7915_v37  ;;  %v9318_v53 = vld [vmem:[#allocation2 + $0xc0] sm:$0xff]   ;;  %v7925_v9 = vpack.c.bf16 %v431_v7, %v431_v7  ;;  %v432_v10 = vld [vmem:[%s9811_s30 + $0x250] sm:$0xff] }
  0x6c   : > { %8569 = vmatpush3.bf16.msra.mxu1 %v9331_v39  ;;  %1063 = vst.msk [vmem:[#allocation2 + $0x100] sm:$0xf] %vm998_vm1, %v7916_v46  ;;  %1064 = vst.msk [vmem:[#allocation2 + $0x104] sm:$0xf] %vm998_vm1, %v7917_v47  ;;  %v9319_v54 = vld [vmem:[#allocation2 + $0xc8] sm:$0xff]   ;;  %v7926_v12 = vpack.c.bf16 %v432_v10, %v432_v10  ;;  %v9340_v16 = vld [vmem:[%s12642_s1 + $0xa0] sm:$0xff]  }
  0x6d   : > { %8441 = vmatmul.mubr.bf16.gmra.mxu0 %v9300_v2  ;;  %8570 = vmatprep.subr.bf16.mxu1 %v9332_v41  ;;  %1065 = vst.msk [vmem:[#allocation2 + $0x108] sm:$0xf] %vm998_vm1, %v7918_v50  ;;  %1066 = vst.msk [vmem:[#allocation2 + $0x10c] sm:$0xf] %vm998_vm1, %v7919_v51  ;;  %v9320_v55 = vld [vmem:[#allocation2 + $0xd0] sm:$0xff]   ;;  %v434_v19 = vld [vmem:[%s9811_s30 + $0x260] sm:$0xff] }
  0x6e   : > { %8444 = vmatprep.mubr.bf16.mxu0 %v9301_v4  ;;  %v9321_v1 = vld [vmem:[#allocation2 + $0xd8] sm:$0xff]   ;;  %1067 = vst.msk [vmem:[#allocation2 + $0x110] sm:$0xf] %vm998_vm1, %v7920_v59  ;;  %1068 = vst.msk [vmem:[#allocation2 + $0x114] sm:$0xf] %vm998_vm1, %v7921_v60  ;;  %8706 = vmatprep.subr.bf16.mxu0 %v9340_v16  ;;  %v435_v20 = vld [vmem:[%s9811_s30 + $0x268] sm:$0xff] }
  0x6f   : > { %v9327_v2 = vld [vmem:[#allocation2 + $0xe0] sm:$0xff]   ;;  %1069 = vst.msk [vmem:[#allocation2 + $0x118] sm:$0xf] %vm998_vm1, %v7922_v63  ;;  %1070 = vst.msk [vmem:[#allocation2 + $0x11c] sm:$0xf] %vm998_vm1, %v7923_v0  ;;  %8707 = vmatpush3.bf16.msra.mxu0 %v9340_v16  ;;  %v440_v29 = vld [vmem:[%s9811_s30 + $0x290] sm:$0xff] }
  0x70   : > { %8571 = vmatpush3.bf16.msra.mxu1 %v9332_v41  ;;  %v9328_v4 = vld [vmem:[#allocation2 + $0xe8] sm:$0xff]   ;;  %1072 = vst.msk [vmem:[#allocation2 + $0x124] sm:$0xf] %vm998_vm1, %v7925_v9  ;;  %1073 = vst.msk [vmem:[#allocation2 + $0x128] sm:$0xf] %vm998_vm1, %v7926_v12  ;;  %v441_v32 = vld [vmem:[%s9811_s30 + $0x298] sm:$0xff]  ;;  %v7934_v33 = vpack.c.bf16 %v440_v29, %v440_v29 }
  0x71   : > { %v9333_v5 = vld [vmem:[#allocation2 + $0xf0] sm:$0xff]   ;;  %v7935_v34 = vpack.c.bf16 %v441_v32, %v441_v32  ;;  %v9347_v37 = vld [vmem:[%s12642_s1 + $0x98] sm:$0xff]   ;;  %v443_v39 = vld [vmem:[%s9811_s30 + $0x2a8] sm:$0xff] }
  0x72   : > { %v9334_v14 = vld [vmem:[#allocation2 + $0xf8] sm:$0xff]   ;;  %1081 = vst.msk [vmem:[#allocation2 + $0x148] sm:$0xf] %vm998_vm1, %v7934_v33  ;;  %8708 = vmatprep.subr.bf16.mxu0 %v9347_v37  ;;  %v446_v46 = vld [vmem:[%s9811_s30 + $0x2c0] sm:$0xff]  ;;  %v447_v47 = vld [vmem:[%s9811_s30 + $0x2c8] sm:$0xff] }
  0x73   : > { %v9336_v15 = vld [vmem:[#allocation2 + $0x100] sm:$0xff]   ;;  %1082 = vst.msk [vmem:[#allocation2 + $0x14c] sm:$0xf] %vm998_vm1, %v7935_v34  ;;  %8709 = vmatpush3.bf16.msra.mxu0 %v9347_v37  ;;  %v448_v48 = vld [vmem:[%s9811_s30 + $0x2d0] sm:$0xff]  ;;  %v7940_v49 = vpack.c.bf16 %v446_v46, %v446_v46  ;;  %v7941_v50 = vpack.c.bf16 %v447_v47, %v447_v47  ;;  %v451_v57 = vld [vmem:[%s9811_s30 + $0x2e8] sm:$0xff] }
  0x74   : > { %v9337_v17 = vld [vmem:[#allocation2 + $0x108] sm:$0xff]   ;;  %v7942_v51 = vpack.c.bf16 %v448_v48, %v448_v48  ;;  %v450_v56 = vld [vmem:[%s9811_s30 + $0x2e0] sm:$0xff]  ;;  %v452_v58 = vld [vmem:[%s9811_s30 + $0x2f0] sm:$0xff]  ;;  %v7945_v60 = vpack.c.bf16 %v451_v57, %v451_v57 }
  0x75   : > { %8445 = vmatmul.mubr.bf16.gmra.mxu0 %v9302_v8  ;;  %v7924_v8 = vpack.c.bf16 %v430_v6, %v430_v6  ;;  %v9338_v18 = vld [vmem:[#allocation2 + $0x110] sm:$0xff]   ;;  %1087 = vst.msk [vmem:[#allocation2 + $0x160] sm:$0xf] %vm998_vm1, %v7940_v49  ;;  %1088 = vst.msk [vmem:[#allocation2 + $0x164] sm:$0xf] %vm998_vm1, %v7941_v50  ;;  %v7944_v59 = vpack.c.bf16 %v450_v56, %v450_v56  ;;  %v453_v61 = vld [vmem:[%s9811_s30 + $0x2f8] sm:$0xff]  ;;  %v7946_v62 = vpack.c.bf16 %v452_v58, %v452_v58 }
  0x76   : > { %8448 = vmatprep.mubr.bf16.mxu0 %v9303_v11  ;;  %v433_v11 = vld [vmem:[%s9811_s30 + $0x258] sm:$0xff]  ;;  %1089 = vst.msk [vmem:[#allocation2 + $0x168] sm:$0xf] %vm998_vm1, %v7942_v51  ;;  %v7947_v63 = vpack.c.bf16 %v453_v61, %v453_v61  ;;  %1092 = vst.msk [vmem:[#allocation2 + $0x174] sm:$0xf] %vm998_vm1, %v7945_v60  ;;  %v454_v0 = vld [vmem:[%s9811_s30 + $0x300] sm:$0xff] }
  0x77   : > { %v7927_v13 = vpack.c.bf16 %v433_v11, %v433_v11  ;;  %1071 = vst.msk [vmem:[#allocation2 + $0x120] sm:$0xf] %vm998_vm1, %v7924_v8  ;;  %v9339_v35 = vld [vmem:[#allocation2 + $0x118] sm:$0xff]   ;;  %1091 = vst.msk [vmem:[#allocation2 + $0x170] sm:$0xf] %vm998_vm1, %v7944_v59  ;;  %v9356_v11 = vld [vmem:[%s12642_s1 + $0x90] sm:$0xff]  }
  0x78   : > { %1093 = vst.msk [vmem:[#allocation2 + $0x178] sm:$0xf] %vm998_vm1, %v7946_v62  ;;  %1094 = vst.msk [vmem:[#allocation2 + $0x17c] sm:$0xf] %vm998_vm1, %v7947_v63  ;;  %v457_v6 = vld [vmem:[%s9811_s30 + $0x318] sm:$0xff]  ;;  %v458_v12 = vld [vmem:[%s9811_s30 + $0x320] sm:$0xff]  ;;  %8710 = vmatprep.subr.bf16.mxu0 %v9356_v11 }
  0x79   : > { %1074 = vst.msk [vmem:[#allocation2 + $0x12c] sm:$0xf] %vm998_vm1, %v7927_v13  ;;  %v7951_v9 = vpack.c.bf16 %v457_v6, %v457_v6  ;;  %v459_v13 = vld [vmem:[%s9811_s30 + $0x328] sm:$0xff]  ;;  %8711 = vmatpush3.bf16.msra.mxu0 %v9356_v11  ;;  %v468_v32 = vld [vmem:[%s9811_s30 + $0x370] sm:$0xff]  ;;  %v474_v49 = vld [vmem:[%s9811_s30 + $0x3a0] sm:$0xff] }
  0x7a   : > { %v7953_v16 = vpack.c.bf16 %v459_v13, %v459_v13  ;;  %v9365_v48 = vld [vmem:[%s12642_s1 + $0x88] sm:$0xff]   ;;  %v7968_v51 = vpack.c.bf16 %v474_v49, %v474_v49  ;;  %v478_v57 = vld [vmem:[%s9811_s30 + $0x3c0] sm:$0xff]  ;;  %v480_v59 = vld [vmem:[%s9811_s30 + $0x3d0] sm:$0xff] }
  0x7b   : > { %1098 = vst.msk [vmem:[#allocation2 + $0x18c] sm:$0xf] %vm998_vm1, %v7951_v9  ;;  %v475_v50 = vld [vmem:[%s9811_s30 + $0x3a8] sm:$0xff]  ;;  %8712 = vmatprep.subr.bf16.mxu0 %v9365_v48  ;;  %v7972_v60 = vpack.c.bf16 %v478_v57, %v478_v57  ;;  %v481_v62 = vld [vmem:[%s9811_s30 + $0x3d8] sm:$0xff]  ;;  %v7974_v63 = vpack.c.bf16 %v480_v59, %v480_v59 }
  0x7c   : > { %1100 = vst.msk [vmem:[#allocation2 + $0x194] sm:$0xf] %vm998_vm1, %v7953_v16  ;;  %v9350_v47 = vld [vmem:[#allocation2 + $0x160] sm:$0xff]   ;;  %1115 = vst.msk [vmem:[#allocation2 + $0x1d0] sm:$0xf] %vm998_vm1, %v7968_v51  ;;  %v479_v58 = vld [vmem:[%s9811_s30 + $0x3c8] sm:$0xff] }
  0x7d   : > { %8449 = vmatmul.mubr.bf16.gmra.mxu0 %v9304_v21  ;;  %v436_v21 = vld [vmem:[%s9811_s30 + $0x270] sm:$0xff]  ;;  %v7973_v61 = vpack.c.bf16 %v479_v58, %v479_v58  ;;  %1119 = vst.msk [vmem:[#allocation2 + $0x1e0] sm:$0xf] %vm998_vm1, %v7972_v60  ;;  %1121 = vst.msk [vmem:[#allocation2 + $0x1e8] sm:$0xf] %vm998_vm1, %v7974_v63  ;;  %v483_v6 = vld [vmem:[%s9811_s30 + $0x3e8] sm:$0xff] }
  0x7e   : > { %8452 = vmatprep.mubr.bf16.mxu0 %v9305_v22  ;;  %v7928_v22 = vpack.c.bf16 %v434_v19, %v434_v19  ;;  %v9341_v36 = vld [vmem:[#allocation2 + $0x120] sm:$0xff]   ;;  %8713 = vmatpush3.bf16.msra.mxu0 %v9365_v48  ;;  %v7977_v9 = vpack.c.bf16 %v483_v6, %v483_v6 }
  0x7f   : > { %1120 = vst.msk [vmem:[#allocation2 + $0x1e4] sm:$0xf] %vm998_vm1, %v7973_v61  ;;  %v9353_v13 = vld [vmem:[#allocation2 + $0x178] sm:$0xff]  }
  0x80   : > { %1075 = vst.msk [vmem:[#allocation2 + $0x130] sm:$0xf] %vm998_vm1, %v7928_v22  ;;  %v464_v22 = vld [vmem:[%s9811_s30 + $0x350] sm:$0xff]  ;;  %1124 = vst.msk [vmem:[#allocation2 + $0x1f4] sm:$0xf] %vm998_vm1, %v7977_v9 }
  0x85   : > { %8453 = vmatmul.mubr.bf16.gmra.mxu0 %v9306_v23  ;;  %v7929_v23 = vpack.c.bf16 %v435_v20, %v435_v20  ;;  %v462_v20 = vld [vmem:[%s9811_s30 + $0x340] sm:$0xff] }
  0x86   : > { %8456 = vmatprep.mubr.bf16.mxu0 %v9307_v24  ;;  %v437_v24 = vld [vmem:[%s9811_s30 + $0x278] sm:$0xff] }
  0x87   : > { %1076 = vst.msk [vmem:[#allocation2 + $0x134] sm:$0xf] %vm998_vm1, %v7929_v23  ;;  %v7956_v23 = vpack.c.bf16 %v462_v20, %v462_v20  ;;  %v10148_v20 = vld [vmem:[%s12643_s2] ss:$0 sm:$0xff] }
  0x89   : > { %1103 = vst.msk [vmem:[#allocation2 + $0x1a0] sm:$0xf] %vm998_vm1, %v7956_v23 }
  0x8d   : > { %8457 = vmatmul.mubr.bf16.gmra.mxu0 %v9308_v25  ;;  %v7930_v25 = vpack.c.bf16 %v436_v21, %v436_v21  ;;  %v463_v21 = vld [vmem:[%s9811_s30 + $0x348] sm:$0xff] }
  0x8e   : > { %8460 = vmatprep.mubr.bf16.mxu0 %v9309_v26  ;;  %v7931_v26 = vpack.c.bf16 %v437_v24, %v437_v24  ;;  %v7957_v24 = vpack.c.bf16 %v463_v21, %v463_v21 }
  0x8f   : > { %1077 = vst.msk [vmem:[#allocation2 + $0x138] sm:$0xf] %vm998_vm1, %v7930_v25  ;;  %v465_v25 = vld [vmem:[%s9811_s30 + $0x358] sm:$0xff] }
  0x90   : > { %1078 = vst.msk [vmem:[#allocation2 + $0x13c] sm:$0xf] %vm998_vm1, %v7931_v26  ;;  %v7958_v26 = vpack.c.bf16 %v464_v22, %v464_v22  ;;  %1104 = vst.msk [vmem:[#allocation2 + $0x1a4] sm:$0xf] %vm998_vm1, %v7957_v24 }
  0x92   : > { %1105 = vst.msk [vmem:[#allocation2 + $0x1a8] sm:$0xf] %vm998_vm1, %v7958_v26 }
  0x95   : > { %8461 = vmatmul.mubr.bf16.gmra.mxu0 %v9310_v27  ;;  %v438_v27 = vld [vmem:[%s9811_s30 + $0x280] sm:$0xff] }
  0x96   : > { %8464 = vmatprep.mubr.bf16.mxu0 %v9311_v28  ;;  %v439_v28 = vld [vmem:[%s9811_s30 + $0x288] sm:$0xff]  ;;  %v7932_v30 = vpack.c.bf16 %v438_v27, %v438_v27 }
  0x97   : > { %v7933_v31 = vpack.c.bf16 %v439_v28, %v439_v28  ;;  %v9344_v8 = vld [vmem:[#allocation2 + $0x138] sm:$0xff]   ;;  %v9346_v27 = vld [vmem:[#allocation2 + $0x148] sm:$0xff]   ;;  %v7959_v28 = vpack.c.bf16 %v465_v25, %v465_v25  ;;  %v9359_v25 = vld [vmem:[#allocation2 + $0x1a0] sm:$0xff]  }
  0x98   : > { %1079 = vst.msk [vmem:[#allocation2 + $0x140] sm:$0xf] %vm998_vm1, %v7932_v30  ;;  %v466_v30 = vld [vmem:[%s9811_s30 + $0x360] sm:$0xff] }
  0x99   : > { %1080 = vst.msk [vmem:[#allocation2 + $0x144] sm:$0xf] %vm998_vm1, %v7933_v31  ;;  %1106 = vst.msk [vmem:[#allocation2 + $0x1ac] sm:$0xf] %vm998_vm1, %v7959_v28  ;;  %v467_v31 = vld [vmem:[%s9811_s30 + $0x368] sm:$0xff]  ;;  %v7960_v33 = vpack.c.bf16 %v466_v30, %v466_v30 }
  0x9a   : > { %v7961_v34 = vpack.c.bf16 %v467_v31, %v467_v31 }
  0x9b   : > { %1107 = vst.msk [vmem:[#allocation2 + $0x1b0] sm:$0xf] %vm998_vm1, %v7960_v33 }
  0x9c   : > { %1108 = vst.msk [vmem:[#allocation2 + $0x1b4] sm:$0xf] %vm998_vm1, %v7961_v34 }
  0x9d   : > { %8465 = vmatmul.mubr.bf16.gmra.mxu0 %v9312_v38  ;;  %v442_v38 = vld [vmem:[%s9811_s30 + $0x2a0] sm:$0xff] }
  0x9e   : > { %8468 = vmatprep.mubr.bf16.mxu0 %v9313_v40  ;;  %v444_v40 = vld [vmem:[%s9811_s30 + $0x2b0] sm:$0xff]  ;;  %v7936_v41 = vpack.c.bf16 %v442_v38, %v442_v38  ;;  %v470_v38 = vld [vmem:[%s9811_s30 + $0x380] sm:$0xff] }
  0x9f   : > { %v7938_v44 = vpack.c.bf16 %v444_v40, %v444_v40  ;;  %v472_v40 = vld [vmem:[%s9811_s30 + $0x390] sm:$0xff] }
  0xa0   : > { %1083 = vst.msk [vmem:[#allocation2 + $0x150] sm:$0xf] %vm998_vm1, %v7936_v41  ;;  %v9345_v10 = vld [vmem:[#allocation2 + $0x140] sm:$0xff]   ;;  %v7964_v41 = vpack.c.bf16 %v470_v38, %v470_v38 }
  0xa1   : > { %1085 = vst.msk [vmem:[#allocation2 + $0x158] sm:$0xf] %vm998_vm1, %v7938_v44  ;;  %v7966_v44 = vpack.c.bf16 %v472_v40, %v472_v40  ;;  %v9360_v40 = vld [vmem:[#allocation2 + $0x1a8] sm:$0xff]  }
  0xa2   : > { %1111 = vst.msk [vmem:[#allocation2 + $0x1c0] sm:$0xf] %vm998_vm1, %v7964_v41  ;;  %v9374_v41 = vld [vmem:[%s12642_s1 + $0xf0] sm:$0xff]  }
  0xa3   : > { %1113 = vst.msk [vmem:[#allocation2 + $0x1c8] sm:$0xf] %vm998_vm1, %v7966_v44 }
  0xa5   : > { %8469 = vmatmul.mubr.bf16.gmra.mxu0 %v9314_v42  ;;  %v7937_v42 = vpack.c.bf16 %v443_v39, %v443_v39  ;;  %v471_v39 = vld [vmem:[%s9811_s30 + $0x388] sm:$0xff] }
  0xa6   : > { %8472 = vmatprep.mubr.bf16.mxu0 %v9315_v43  ;;  %v445_v43 = vld [vmem:[%s9811_s30 + $0x2b8] sm:$0xff] }
  0xa7   : > { %v7939_v45 = vpack.c.bf16 %v445_v43, %v445_v43  ;;  %1084 = vst.msk [vmem:[#allocation2 + $0x154] sm:$0xf] %vm998_vm1, %v7937_v42  ;;  %v7965_v42 = vpack.c.bf16 %v471_v39, %v471_v39  ;;  %v473_v43 = vld [vmem:[%s9811_s30 + $0x398] sm:$0xff] }
  0xa8   : > { %v7967_v46 = vpack.c.bf16 %v473_v43, %v473_v43  ;;  %v9361_v43 = vld [vmem:[#allocation2 + $0x1b0] sm:$0xff]  }
  0xa9   : > { %1086 = vst.msk [vmem:[#allocation2 + $0x15c] sm:$0xf] %vm998_vm1, %v7939_v45  ;;  %1112 = vst.msk [vmem:[#allocation2 + $0x1c4] sm:$0xf] %vm998_vm1, %v7965_v42 }
  0xaa   : > { %1114 = vst.msk [vmem:[#allocation2 + $0x1cc] sm:$0xf] %vm998_vm1, %v7967_v46 }
  0xad   : > { %8473 = vmatmul.mubr.bf16.gmra.mxu0 %v9316_v52  ;;  %v9342_v52 = vld [vmem:[#allocation2 + $0x128] sm:$0xff]  }
  0xae   : > { %8476 = vmatprep.mubr.bf16.mxu0 %v9318_v53  ;;  %v9343_v53 = vld [vmem:[#allocation2 + $0x130] sm:$0xff]  }
  0xaf   : > { %v9348_v29 = vld [vmem:[#allocation2 + $0x150] sm:$0xff]  }
  0xb0   : > { %v9349_v45 = vld [vmem:[#allocation2 + $0x158] sm:$0xff]   ;;  %v9363_v59 = vld [vmem:[#allocation2 + $0x1c0] sm:$0xff]  }
  0xb5   : > { %8477 = vmatmul.mubr.bf16.gmra.mxu0 %v9319_v54  ;;  %v449_v54 = vld [vmem:[%s9811_s30 + $0x2d8] sm:$0xff] }
  0xb6   : > { %8480 = vmatprep.mubr.bf16.mxu0 %v9320_v55  ;;  %v7943_v55 = vpack.c.bf16 %v449_v54, %v449_v54  ;;  %v477_v54 = vld [vmem:[%s9811_s30 + $0x3b8] sm:$0xff] }
  0xb7   : > { %v7971_v56 = vpack.c.bf16 %v477_v54, %v477_v54 }
  0xb8   : > { %1090 = vst.msk [vmem:[#allocation2 + $0x16c] sm:$0xf] %vm998_vm1, %v7943_v55 }
  0xb9   : > { %1118 = vst.msk [vmem:[#allocation2 + $0x1dc] sm:$0xf] %vm998_vm1, %v7971_v56 }
  0xbd   : > { %8481 = vmatmul.mubr.bf16.gmra.mxu0 %v9321_v1  ;;  %v455_v1 = vld [vmem:[%s9811_s30 + $0x308] sm:$0xff] }
  0xbe   : > { %8484 = vmatprep.mubr.bf16.mxu0 %v9327_v2  ;;  %v456_v2 = vld [vmem:[%s9811_s30 + $0x310] sm:$0xff] }
  0xbf   : > { %v7950_v7 = vpack.c.bf16 %v456_v2, %v456_v2  ;;  %v7975_v2 = vpack.c.bf16 %v481_v62, %v481_v62 }
  0xc1   : > { %1097 = vst.msk [vmem:[#allocation2 + $0x188] sm:$0xf] %vm998_vm1, %v7950_v7  ;;  %1122 = vst.msk [vmem:[#allocation2 + $0x1ec] sm:$0xf] %vm998_vm1, %v7975_v2  ;;  %v484_v7 = vld [vmem:[%s9811_s30 + $0x3f0] sm:$0xff] }
  0xc2   : > { %v7978_v11 = vpack.c.bf16 %v484_v7, %v484_v7 }
  0xc4   : > { %1125 = vst.msk [vmem:[#allocation2 + $0x1f8] sm:$0xf] %vm998_vm1, %v7978_v11 }
  0xc5   : > { %8485 = vmatmul.mubr.bf16.gmra.mxu0 %v9328_v4  ;;  %v7948_v4 = vpack.c.bf16 %v454_v0, %v454_v0  ;;  %v10127_v0 = vld [vmem:[%s12642_s1 + $0xf8] sm:$0xff]  }
  0xc6   : > { %8488 = vmatprep.mubr.bf16.mxu0 %v9333_v5  ;;  %v7949_v5 = vpack.c.bf16 %v455_v1, %v455_v1  ;;  %v9351_v1 = vld [vmem:[#allocation2 + $0x168] sm:$0xff]   ;;  %8844 = vmatprep.subr.bf16.mxu1 %v10127_v0 }
  0xc7   : > { %1095 = vst.msk [vmem:[#allocation2 + $0x180] sm:$0xf] %vm998_vm1, %v7948_v4  ;;  %v9352_v4 = vld [vmem:[#allocation2 + $0x170] sm:$0xff]  }
  0xc8   : > { %1096 = vst.msk [vmem:[#allocation2 + $0x184] sm:$0xf] %vm998_vm1, %v7949_v5  ;;  %v482_v5 = vld [vmem:[%s9811_s30 + $0x3e0] sm:$0xff]  ;;  %v9355_v16 = vld [vmem:[#allocation2 + $0x188] sm:$0xff]  }
  0xcd   : > { %8489 = vmatmul.mubr.bf16.gmra.mxu0 %v9334_v14  ;;  %v460_v14 = vld [vmem:[%s9811_s30 + $0x330] sm:$0xff] }
  0xce   : > { %8492 = vmatprep.mubr.bf16.mxu0 %v9336_v15  ;;  %v7952_v15 = vpack.c.bf16 %v458_v12, %v458_v12 }
  0xd0   : > { %1099 = vst.msk [vmem:[#allocation2 + $0x190] sm:$0xf] %vm998_vm1, %v7952_v15  ;;  %v9373_v15 = vld [vmem:[%s12642_s1 + $0x80] sm:$0xff]  }
  0xd1   : > { %8714 = vmatprep.subr.bf16.mxu0 %v9373_v15 }
  0xd2   : > { %8715 = vmatpush3.bf16.msra.mxu0 %v9373_v15 }
  0xd5   : > { %8493 = vmatmul.mubr.bf16.gmra.mxu0 %v9337_v17  ;;  %v461_v17 = vld [vmem:[%s9811_s30 + $0x338] sm:$0xff] }
  0xd6   : > { %8496 = vmatprep.mubr.bf16.mxu0 %v9338_v18  ;;  %v7954_v18 = vpack.c.bf16 %v460_v14, %v460_v14  ;;  %v7955_v19 = vpack.c.bf16 %v461_v17, %v461_v17  ;;  %v9354_v14 = vld [vmem:[#allocation2 + $0x180] sm:$0xff]  }
  0xd7   : > { %v9357_v17 = vld [vmem:[#allocation2 + $0x190] sm:$0xff]  }
  0xd8   : > { %1101 = vst.msk [vmem:[#allocation2 + $0x198] sm:$0xf] %vm998_vm1, %v7954_v18  ;;  %1102 = vst.msk [vmem:[#allocation2 + $0x19c] sm:$0xf] %vm998_vm1, %v7955_v19 }
  0xdd   : > { %8497 = vmatmul.mubr.bf16.gmra.mxu0 %v9339_v35  ;;  %v469_v35 = vld [vmem:[%s9811_s30 + $0x378] sm:$0xff] }
  0xde   : > { %8500 = vmatprep.mubr.bf16.mxu0 %v9341_v36  ;;  %v7962_v36 = vpack.c.bf16 %v468_v32, %v468_v32  ;;  %v7963_v37 = vpack.c.bf16 %v469_v35, %v469_v35 }
  0xdf   : > { %v9358_v22 = vld [vmem:[#allocation2 + $0x198] sm:$0xff]  }
  0xe0   : > { %1109 = vst.msk [vmem:[#allocation2 + $0x1b8] sm:$0xf] %vm998_vm1, %v7962_v36  ;;  %1110 = vst.msk [vmem:[#allocation2 + $0x1bc] sm:$0xf] %vm998_vm1, %v7963_v37 }
  0xe5   : > { %8501 = vmatmul.mubr.bf16.gmra.mxu0 %v9342_v52  ;;  %v7969_v52 = vpack.c.bf16 %v475_v50, %v475_v50 }
  0xe6   : > { %8504 = vmatprep.mubr.bf16.mxu0 %v9343_v53  ;;  %v476_v53 = vld [vmem:[%s9811_s30 + $0x3b0] sm:$0xff] }
  0xe7   : > { %v7970_v55 = vpack.c.bf16 %v476_v53, %v476_v53  ;;  %1116 = vst.msk [vmem:[#allocation2 + $0x1d4] sm:$0xf] %vm998_vm1, %v7969_v52  ;;  %v9362_v57 = vld [vmem:[#allocation2 + $0x1b8] sm:$0xff]  }
  0xe9   : > { %1117 = vst.msk [vmem:[#allocation2 + $0x1d8] sm:$0xf] %vm998_vm1, %v7970_v55 }
  0xed   : > { %8505 = vmatmul.mubr.bf16.gmra.mxu0 %v9344_v8  ;;  %v7976_v8 = vpack.c.bf16 %v482_v5, %v482_v5 }
  0xee   : > { %8508 = vmatprep.mubr.bf16.mxu0 %v9345_v10  ;;  %v485_v10 = vld [vmem:[%s9811_s30 + $0x3f8] sm:$0xff] }
  0xef   : > { %v7979_v12 = vpack.c.bf16 %v485_v10, %v485_v10  ;;  %1123 = vst.msk [vmem:[#allocation2 + $0x1f0] sm:$0xf] %vm998_vm1, %v7976_v8  ;;  %v9364_v10 = vld [vmem:[#allocation2 + $0x1c8] sm:$0xff]  }
  0xf1   : > { %1126 = vst.msk [vmem:[#allocation2 + $0x1fc] sm:$0xf] %vm998_vm1, %v7979_v12  ;;  %v9366_v12 = vld [vmem:[#allocation2 + $0x1d0] sm:$0xff]  }
  0xf5   : > { %8509 = vmatmul.mubr.bf16.gmra.mxu0 %v9346_v27 }
  0xf6   : > { %8512 = vmatprep.mubr.bf16.mxu0 %v9348_v29 }
  0xfd   : > { %8513 = vmatmul.mubr.bf16.gmra.mxu0 %v9349_v45 }
  0xfe   : > { %8516 = vmatprep.mubr.bf16.mxu0 %v9350_v47 }
 0x105   : > { %8517 = vmatmul.mubr.bf16.gmra.mxu0 %v9351_v1 }
 0x106   : > { %8520 = vmatprep.mubr.bf16.mxu0 %v9352_v4 }
 0x10d   : > { %8521 = vmatmul.mubr.bf16.gmra.mxu0 %v9353_v13 }
 0x10e   : > { %8524 = vmatprep.mubr.bf16.mxu0 %v9354_v14 }
 0x115   : > { %v8430_v18 = vpop.f32.mrf.mxu0  ;;  %8525 = vmatmul.mubr.bf16.gmra.mxu0 %v9355_v16 }
 0x116   : > { %8528 = vmatprep.mubr.bf16.mxu0 %v9357_v17  ;;  %v1753_v26 = vadd.f32 %v8430_v18, %v10148_v20 }
 0x117   : > { %v1744_v19 = vpop.f32.mrf.mxu0 }
 0x118   : > { %v1745_v23 = vadd.f32 %v10148_v20, %v1744_v19  ;;  %v2257_v33 = vmax.f32 %v1753_v26, 0.0 }
 0x119   : > { %v8431_v21 = vpop.f32.mrf.mxu0 }
 0x11a   : > { %v1756_v24 = vadd.f32 %v8431_v21, %v10148_v20  ;;  %v2255_v31 = vmax.f32 %v1745_v23, 0.0 }
 0x11b   : > { %v1747_v27 = vpop.f32.mrf.mxu0 }
 0x11c   : > { %v1748_v28 = vadd.f32 %v10148_v20, %v1747_v27  ;;  %v2258_v29 = vmax.f32 %v1756_v24, 0.0  ;;  %v9367_v27 = vld [vmem:[#allocation2 + $0x1d8] sm:$0xff]  }
 0x11d   : > { %v8434_v30 = vpop.f32.mrf.mxu0  ;;  %8529 = vmatmul.mubr.bf16.gmra.mxu0 %v9358_v22 }
 0x11e   : > { %v2256_v32 = vmax.f32 %v1748_v28, 0.0  ;;  %8532 = vmatprep.mubr.bf16.mxu0 %v9359_v25  ;;  %v1769_v34 = vadd.f32 %v8434_v30, %v10148_v20  ;;  %v2384_v38 = vpack.c.bf16 %v2258_v29, %v2257_v33  ;;  %v9368_v29 = vld [vmem:[#allocation2 + $0x1e0] sm:$0xff]  }
 0x11f   : > { %v1760_v35 = vpop.f32.mrf.mxu0 }
 0x120   : > { %v1761_v36 = vadd.f32 %v10148_v20, %v1760_v35  ;;  %v2383_v37 = vpack.c.bf16 %v2256_v32, %v2255_v31  ;;  %v2261_v44 = vmax.f32 %v1769_v34, 0.0 }
 0x121   : > { %v8435_v39 = vpop.f32.mrf.mxu0 }
 0x122   : > { %v1772_v42 = vadd.f32 %v8435_v39, %v10148_v20  ;;  %8572 = vmatprep.mubr.bf16.mxu1 %v2383_v37  ;;  %v2259_v46 = vmax.f32 %v1761_v36, 0.0 }
 0x123   : > { %v1763_v45 = vpop.f32.mrf.mxu0  ;;  %8573 = vmatmul.mubr.bf16.vlgmr.msra.gmra.mxu1 %v2384_v38 }
 0x124   : > { %v2262_v47 = vmax.f32 %v1772_v42, 0.0  ;;  %v1764_v48 = vadd.f32 %v10148_v20, %v1763_v45  ;;  %8845 = vmatpush3.bf16.msra.mxu1 %v10127_v0  ;;  %v9371_v45 = vld [vmem:[#allocation2 + $0x1f0] sm:$0xff]  }
 0x125   : > { %v8438_v49 = vpop.f32.mrf.mxu0  ;;  %8533 = vmatmul.mubr.bf16.gmra.mxu0 %v9360_v40  ;;  %8846 = vmatprep.subr.bf16.mxu1 %v9374_v41 }
 0x126   : > { %v2260_v50 = vmax.f32 %v1764_v48, 0.0  ;;  %8536 = vmatprep.mubr.bf16.mxu0 %v9361_v43  ;;  %v2386_v51 = vpack.c.bf16 %v2262_v47, %v2261_v44  ;;  %v1785_v52 = vadd.f32 %v8438_v49, %v10148_v20  ;;  %v9369_v43 = vld [vmem:[#allocation2 + $0x1e8] sm:$0xff]  }
 0x127   : > { %v1776_v53 = vpop.f32.mrf.mxu0 }
 0x128   : > { %v1777_v54 = vadd.f32 %v10148_v20, %v1776_v53  ;;  %v2385_v55 = vpack.c.bf16 %v2260_v50, %v2259_v46  ;;  %8847 = vmatpush3.bf16.msra.mxu1 %v9374_v41  ;;  %v2265_v60 = vmax.f32 %v1785_v52, 0.0 }
 0x129   : > { %v8439_v56 = vpop.f32.mrf.mxu0 }
 0x12a   : > { %v1788_v58 = vadd.f32 %v8439_v56, %v10148_v20  ;;  %8576 = vmatprep.mubr.bf16.mxu1 %v2385_v55  ;;  %v2263_v62 = vmax.f32 %v1777_v54, 0.0 }
 0x12b   : > { %v1779_v61 = vpop.f32.mrf.mxu0  ;;  %8577 = vmatmul.mubr.bf16.gmra.mxu1 %v2386_v51 }
 0x12c   : > { %v2266_v63 = vmax.f32 %v1788_v58, 0.0  ;;  %v1780_v0 = vadd.f32 %v10148_v20, %v1779_v61 }
 0x12d   : > { %v8442_v1 = vpop.f32.mrf.mxu0  ;;  %8537 = vmatmul.mubr.bf16.gmra.mxu0 %v9362_v57 }
 0x12e   : > { %v2264_v2 = vmax.f32 %v1780_v0, 0.0  ;;  %8540 = vmatprep.mubr.bf16.mxu0 %v9363_v59  ;;  %v2388_v4 = vpack.c.bf16 %v2266_v63, %v2265_v60  ;;  %v1801_v5 = vadd.f32 %v8442_v1, %v10148_v20  ;;  %v9372_v59 = vld [vmem:[#allocation2 + $0x1f8] sm:$0xff]  }
 0x12f   : > { %v1792_v6 = vpop.f32.mrf.mxu0 }
 0x130   : > { %v1793_v7 = vadd.f32 %v10148_v20, %v1792_v6  ;;  %v2387_v8 = vpack.c.bf16 %v2264_v2, %v2263_v62  ;;  %v2269_v13 = vmax.f32 %v1801_v5, 0.0 }
 0x131   : > { %v8443_v9 = vpop.f32.mrf.mxu0 }
 0x132   : > { %v1804_v11 = vadd.f32 %v8443_v9, %v10148_v20  ;;  %8580 = vmatprep.mubr.bf16.mxu1 %v2387_v8  ;;  %v2267_v15 = vmax.f32 %v1793_v7, 0.0 }
 0x133   : > { %v1795_v14 = vpop.f32.mrf.mxu0  ;;  %8581 = vmatmul.mubr.bf16.gmra.mxu1 %v2388_v4 }
 0x134   : > { %v2270_v16 = vmax.f32 %v1804_v11, 0.0  ;;  %v1796_v17 = vadd.f32 %v10148_v20, %v1795_v14 }
 0x135   : > { %v8446_v18 = vpop.f32.mrf.mxu0  ;;  %8541 = vmatmul.mubr.bf16.gmra.mxu0 %v9364_v10 }
 0x136   : > { %v2268_v19 = vmax.f32 %v1796_v17, 0.0  ;;  %8544 = vmatprep.mubr.bf16.mxu0 %v9366_v12  ;;  %v2390_v21 = vpack.c.bf16 %v2270_v16, %v2269_v13  ;;  %v1817_v22 = vadd.f32 %v8446_v18, %v10148_v20 }
 0x137   : > { %v1808_v23 = vpop.f32.mrf.mxu0 }
 0x138   : > { %v1809_v24 = vadd.f32 %v10148_v20, %v1808_v23  ;;  %v2389_v25 = vpack.c.bf16 %v2268_v19, %v2267_v15  ;;  %v2273_v30 = vmax.f32 %v1817_v22, 0.0 }
 0x139   : > { %v8447_v26 = vpop.f32.mrf.mxu0 }
 0x13a   : > { %v1820_v28 = vadd.f32 %v8447_v26, %v10148_v20  ;;  %8584 = vmatprep.mubr.bf16.mxu1 %v2389_v25  ;;  %v2271_v32 = vmax.f32 %v1809_v24, 0.0 }
 0x13b   : > { %v1811_v31 = vpop.f32.mrf.mxu0  ;;  %8585 = vmatmul.mubr.bf16.gmra.mxu1 %v2390_v21 }
 0x13c   : > { %v2274_v33 = vmax.f32 %v1820_v28, 0.0  ;;  %v1812_v34 = vadd.f32 %v10148_v20, %v1811_v31 }
 0x13d   : > { %v8450_v35 = vpop.f32.mrf.mxu0  ;;  %8545 = vmatmul.mubr.bf16.gmra.mxu0 %v9367_v27 }
 0x13e   : > { %v2272_v36 = vmax.f32 %v1812_v34, 0.0  ;;  %8548 = vmatprep.mubr.bf16.mxu0 %v9368_v29  ;;  %v2392_v37 = vpack.c.bf16 %v2274_v33, %v2273_v30  ;;  %v1833_v38 = vadd.f32 %v8450_v35, %v10148_v20 }
 0x13f   : > { %v1824_v39 = vpop.f32.mrf.mxu0 }
 0x140   : > { %v2391_v40 = vpack.c.bf16 %v2272_v36, %v2271_v32  ;;  %v1825_v41 = vadd.f32 %v10148_v20, %v1824_v39  ;;  %v2277_v46 = vmax.f32 %v1833_v38, 0.0 }
 0x141   : > { %v8451_v42 = vpop.f32.mrf.mxu0 }
 0x142   : > { %8588 = vmatprep.mubr.bf16.mxu1 %v2391_v40  ;;  %v1836_v44 = vadd.f32 %v8451_v42, %v10148_v20  ;;  %v2275_v48 = vmax.f32 %v1825_v41, 0.0 }
 0x143   : > { %8589 = vmatmul.mubr.bf16.gmra.mxu1 %v2392_v37  ;;  %v1827_v47 = vpop.f32.mrf.mxu0 }
 0x144   : > { %v2278_v49 = vmax.f32 %v1836_v44, 0.0  ;;  %v1828_v50 = vadd.f32 %v10148_v20, %v1827_v47 }
 0x145   : > { %v8454_v51 = vpop.f32.mrf.mxu0  ;;  %8549 = vmatmul.mubr.bf16.gmra.mxu0 %v9369_v43 }
 0x146   : > { %v2276_v52 = vmax.f32 %v1828_v50, 0.0  ;;  %8552 = vmatprep.mubr.bf16.mxu0 %v9371_v45  ;;  %v2394_v53 = vpack.c.bf16 %v2278_v49, %v2277_v46  ;;  %v1849_v54 = vadd.f32 %v8454_v51, %v10148_v20 }
 0x147   : > { %v1840_v55 = vpop.f32.mrf.mxu0 }
 0x148   : > { %v2393_v56 = vpack.c.bf16 %v2276_v52, %v2275_v48  ;;  %v1841_v57 = vadd.f32 %v10148_v20, %v1840_v55  ;;  %v2281_v61 = vmax.f32 %v1849_v54, 0.0 }
 0x149   : > { %v8455_v58 = vpop.f32.mrf.mxu0 }
 0x14a   : > { %8592 = vmatprep.mubr.bf16.mxu1 %v2393_v56  ;;  %v1852_v60 = vadd.f32 %v8455_v58, %v10148_v20  ;;  %v2279_v63 = vmax.f32 %v1841_v57, 0.0 }
 0x14b   : > { %8593 = vmatmul.mubr.bf16.gmra.mxu1 %v2394_v53  ;;  %v1843_v62 = vpop.f32.mrf.mxu0 }
 0x14c   : > { %v2282_v0 = vmax.f32 %v1852_v60, 0.0  ;;  %v1844_v1 = vadd.f32 %v10148_v20, %v1843_v62 }
 0x14d   : > { %v8458_v2 = vpop.f32.mrf.mxu0  ;;  %8553 = vmatmul.mubr.bf16.gmra.mxu0 %v9372_v59 }
 0x14e   : > { %v2280_v4 = vmax.f32 %v1844_v1, 0.0  ;;  %v2396_v5 = vpack.c.bf16 %v2282_v0, %v2281_v61  ;;  %v1865_v6 = vadd.f32 %v8458_v2, %v10148_v20 }
 0x14f   : > { %v1856_v7 = vpop.f32.mrf.mxu0 }
 0x150   : > { %v2395_v8 = vpack.c.bf16 %v2280_v4, %v2279_v63  ;;  %v1857_v9 = vadd.f32 %v10148_v20, %v1856_v7  ;;  %v2285_v12 = vmax.f32 %v1865_v6, 0.0 }
 0x151   : > { %v8459_v10 = vpop.f32.mrf.mxu0 }
 0x152   : > { %8596 = vmatprep.mubr.bf16.mxu1 %v2395_v8  ;;  %v1868_v11 = vadd.f32 %v8459_v10, %v10148_v20  ;;  %v2283_v14 = vmax.f32 %v1857_v9, 0.0 }
 0x153   : > { %8597 = vmatmul.mubr.bf16.gmra.mxu1 %v2396_v5  ;;  %v1859_v13 = vpop.f32.mrf.mxu0 }
 0x154   : > { %v2286_v15 = vmax.f32 %v1868_v11, 0.0  ;;  %v1860_v16 = vadd.f32 %v10148_v20, %v1859_v13 }
 0x155   : > { %v8462_v17 = vpop.f32.mrf.mxu0 }
 0x156   : > { %v2284_v18 = vmax.f32 %v1860_v16, 0.0  ;;  %v2398_v19 = vpack.c.bf16 %v2286_v15, %v2285_v12  ;;  %v1881_v21 = vadd.f32 %v8462_v17, %v10148_v20 }
 0x157   : > { %v1872_v22 = vpop.f32.mrf.mxu0 }
 0x158   : > { %v2397_v23 = vpack.c.bf16 %v2284_v18, %v2283_v14  ;;  %v1873_v24 = vadd.f32 %v10148_v20, %v1872_v22  ;;  %v2289_v27 = vmax.f32 %v1881_v21, 0.0 }
 0x159   : > { %v8463_v25 = vpop.f32.mrf.mxu0 }
 0x15a   : > { %8600 = vmatprep.mubr.bf16.mxu1 %v2397_v23  ;;  %v1884_v26 = vadd.f32 %v8463_v25, %v10148_v20  ;;  %v2287_v29 = vmax.f32 %v1873_v24, 0.0 }
 0x15b   : > { %8601 = vmatmul.mubr.bf16.gmra.mxu1 %v2398_v19  ;;  %v1875_v28 = vpop.f32.mrf.mxu0 }
 0x15c   : > { %v2290_v30 = vmax.f32 %v1884_v26, 0.0  ;;  %v1876_v31 = vadd.f32 %v10148_v20, %v1875_v28 }
 0x15d   : > { %v8466_v32 = vpop.f32.mrf.mxu0 }
 0x15e   : > { %v2288_v33 = vmax.f32 %v1876_v31, 0.0  ;;  %v2400_v34 = vpack.c.bf16 %v2290_v30, %v2289_v27  ;;  %v1897_v35 = vadd.f32 %v8466_v32, %v10148_v20 }
 0x15f   : > { %v1888_v36 = vpop.f32.mrf.mxu0 }
 0x160   : > { %v2399_v37 = vpack.c.bf16 %v2288_v33, %v2287_v29  ;;  %v1889_v38 = vadd.f32 %v10148_v20, %v1888_v36  ;;  %v2293_v41 = vmax.f32 %v1897_v35, 0.0  ;;  %v9375_v33 = vld [vmem:[%s12642_s1 + $0xe8] sm:$0xff]  }
 0x161   : > { %v8467_v39 = vpop.f32.mrf.mxu0  ;;  %8848 = vmatprep.subr.bf16.mxu1 %v9375_v33 }
 0x162   : > { %8604 = vmatprep.mubr.bf16.mxu1 %v2399_v37  ;;  %v1900_v40 = vadd.f32 %v8467_v39, %v10148_v20  ;;  %v2291_v43 = vmax.f32 %v1889_v38, 0.0  ;;  %8849 = vmatpush3.bf16.msra.mxu1 %v9375_v33 }
 0x163   : > { %8605 = vmatmul.mubr.bf16.gmra.mxu1 %v2400_v34  ;;  %v1891_v42 = vpop.f32.mrf.mxu0 }
 0x164   : > { %v2294_v44 = vmax.f32 %v1900_v40, 0.0  ;;  %v1892_v45 = vadd.f32 %v10148_v20, %v1891_v42 }
 0x165   : > { %v8470_v46 = vpop.f32.mrf.mxu0 }
 0x166   : > { %v2292_v47 = vmax.f32 %v1892_v45, 0.0  ;;  %v2402_v48 = vpack.c.bf16 %v2294_v44, %v2293_v41  ;;  %v1913_v49 = vadd.f32 %v8470_v46, %v10148_v20 }
 0x167   : > { %v1904_v50 = vpop.f32.mrf.mxu0 }
 0x168   : > { %v2401_v51 = vpack.c.bf16 %v2292_v47, %v2291_v43  ;;  %v1905_v52 = vadd.f32 %v10148_v20, %v1904_v50  ;;  %v2297_v55 = vmax.f32 %v1913_v49, 0.0 }
 0x169   : > { %v8471_v53 = vpop.f32.mrf.mxu0 }
 0x16a   : > { %8608 = vmatprep.mubr.bf16.mxu1 %v2401_v51  ;;  %v1916_v54 = vadd.f32 %v8471_v53, %v10148_v20  ;;  %v2295_v57 = vmax.f32 %v1905_v52, 0.0 }
 0x16b   : > { %8609 = vmatmul.mubr.bf16.gmra.mxu1 %v2402_v48  ;;  %v1907_v56 = vpop.f32.mrf.mxu0 }
 0x16c   : > { %v2298_v58 = vmax.f32 %v1916_v54, 0.0  ;;  %v1908_v59 = vadd.f32 %v10148_v20, %v1907_v56 }
 0x16d   : > { %v8474_v60 = vpop.f32.mrf.mxu0 }
 0x16e   : > { %v2296_v61 = vmax.f32 %v1908_v59, 0.0  ;;  %v2404_v62 = vpack.c.bf16 %v2298_v58, %v2297_v55  ;;  %v1929_v63 = vadd.f32 %v8474_v60, %v10148_v20 }
 0x16f   : > { %v1920_v0 = vpop.f32.mrf.mxu0 }
 0x170   : > { %v2403_v1 = vpack.c.bf16 %v2296_v61, %v2295_v57  ;;  %v1921_v2 = vadd.f32 %v10148_v20, %v1920_v0  ;;  %v2301_v6 = vmax.f32 %v1929_v63, 0.0 }
 0x171   : > { %v8475_v4 = vpop.f32.mrf.mxu0 }
 0x172   : > { %8612 = vmatprep.mubr.bf16.mxu1 %v2403_v1  ;;  %v1932_v5 = vadd.f32 %v8475_v4, %v10148_v20  ;;  %v2299_v8 = vmax.f32 %v1921_v2, 0.0 }
 0x173   : > { %8613 = vmatmul.mubr.bf16.gmra.mxu1 %v2404_v62  ;;  %v1923_v7 = vpop.f32.mrf.mxu0 }
 0x174   : > { %v2302_v9 = vmax.f32 %v1932_v5, 0.0  ;;  %v1924_v10 = vadd.f32 %v10148_v20, %v1923_v7 }
 0x175   : > { %v8478_v11 = vpop.f32.mrf.mxu0 }
 0x176   : > { %v2300_v12 = vmax.f32 %v1924_v10, 0.0  ;;  %v2406_v13 = vpack.c.bf16 %v2302_v9, %v2301_v6  ;;  %v1945_v14 = vadd.f32 %v8478_v11, %v10148_v20 }
 0x177   : > { %v1936_v15 = vpop.f32.mrf.mxu0 }
 0x178   : > { %v2405_v16 = vpack.c.bf16 %v2300_v12, %v2299_v8  ;;  %v1937_v17 = vadd.f32 %v10148_v20, %v1936_v15  ;;  %v2305_v21 = vmax.f32 %v1945_v14, 0.0 }
 0x179   : > { %v8479_v18 = vpop.f32.mrf.mxu0 }
 0x17a   : > { %8616 = vmatprep.mubr.bf16.mxu1 %v2405_v16  ;;  %v1948_v19 = vadd.f32 %v8479_v18, %v10148_v20  ;;  %v2303_v23 = vmax.f32 %v1937_v17, 0.0 }
 0x17b   : > { %8617 = vmatmul.mubr.bf16.gmra.mxu1 %v2406_v13  ;;  %v1939_v22 = vpop.f32.mrf.mxu0  ;;  %v9376_v13 = vld [vmem:[%s12642_s1 + $0xe0] sm:$0xff]  }
 0x17c   : > { %v2306_v24 = vmax.f32 %v1948_v19, 0.0  ;;  %v1940_v25 = vadd.f32 %v10148_v20, %v1939_v22  ;;  %8850 = vmatprep.subr.bf16.mxu1 %v9376_v13 }
 0x17d   : > { %v8482_v26 = vpop.f32.mrf.mxu0  ;;  %8851 = vmatpush3.bf16.msra.mxu1 %v9376_v13 }
 0x17e   : > { %v2304_v27 = vmax.f32 %v1940_v25, 0.0  ;;  %v2408_v28 = vpack.c.bf16 %v2306_v24, %v2305_v21  ;;  %v1961_v29 = vadd.f32 %v8482_v26, %v10148_v20 }
 0x17f   : > { %v1952_v30 = vpop.f32.mrf.mxu0 }
 0x180   : > { %v2407_v31 = vpack.c.bf16 %v2304_v27, %v2303_v23  ;;  %v1953_v32 = vadd.f32 %v10148_v20, %v1952_v30  ;;  %v2309_v36 = vmax.f32 %v1961_v29, 0.0 }
 0x181   : > { %v8483_v34 = vpop.f32.mrf.mxu0 }
 0x182   : > { %8620 = vmatprep.mubr.bf16.mxu1 %v2407_v31  ;;  %v1964_v35 = vadd.f32 %v8483_v34, %v10148_v20  ;;  %v2307_v38 = vmax.f32 %v1953_v32, 0.0 }
 0x183   : > { %8621 = vmatmul.mubr.bf16.gmra.mxu1 %v2408_v28  ;;  %v1955_v37 = vpop.f32.mrf.mxu0 }
 0x184   : > { %v2310_v39 = vmax.f32 %v1964_v35, 0.0  ;;  %v1956_v40 = vadd.f32 %v10148_v20, %v1955_v37 }
 0x185   : > { %v8486_v41 = vpop.f32.mrf.mxu0 }
 0x186   : > { %v2308_v42 = vmax.f32 %v1956_v40, 0.0  ;;  %v2410_v43 = vpack.c.bf16 %v2310_v39, %v2309_v36  ;;  %v1977_v44 = vadd.f32 %v8486_v41, %v10148_v20 }
 0x187   : > { %v1968_v45 = vpop.f32.mrf.mxu0 }
 0x188   : > { %v2409_v46 = vpack.c.bf16 %v2308_v42, %v2307_v38  ;;  %v1969_v47 = vadd.f32 %v10148_v20, %v1968_v45  ;;  %v2313_v50 = vmax.f32 %v1977_v44, 0.0 }
 0x189   : > { %v8487_v48 = vpop.f32.mrf.mxu0 }
 0x18a   : > { %8624 = vmatprep.mubr.bf16.mxu1 %v2409_v46  ;;  %v1980_v49 = vadd.f32 %v8487_v48, %v10148_v20  ;;  %v2311_v52 = vmax.f32 %v1969_v47, 0.0 }
 0x18b   : > { %8625 = vmatmul.mubr.bf16.gmra.mxu1 %v2410_v43  ;;  %v1971_v51 = vpop.f32.mrf.mxu0  ;;  %v9377_v43 = vld [vmem:[%s12642_s1 + $0xd8] sm:$0xff]  }
 0x18c   : > { %v2314_v53 = vmax.f32 %v1980_v49, 0.0  ;;  %v1972_v54 = vadd.f32 %v10148_v20, %v1971_v51  ;;  %8852 = vmatprep.subr.bf16.mxu1 %v9377_v43 }
 0x18d   : > { %v8490_v55 = vpop.f32.mrf.mxu0  ;;  %8853 = vmatpush3.bf16.msra.mxu1 %v9377_v43 }
 0x18e   : > { %v2312_v56 = vmax.f32 %v1972_v54, 0.0  ;;  %v2412_v57 = vpack.c.bf16 %v2314_v53, %v2313_v50  ;;  %v1993_v58 = vadd.f32 %v8490_v55, %v10148_v20 }
 0x18f   : > { %v1984_v59 = vpop.f32.mrf.mxu0 }
 0x190   : > { %v2411_v60 = vpack.c.bf16 %v2312_v56, %v2311_v52  ;;  %v1985_v61 = vadd.f32 %v10148_v20, %v1984_v59  ;;  %v2317_v0 = vmax.f32 %v1993_v58, 0.0 }
 0x191   : > { %v8491_v62 = vpop.f32.mrf.mxu0 }
 0x192   : > { %8628 = vmatprep.mubr.bf16.mxu1 %v2411_v60  ;;  %v1996_v63 = vadd.f32 %v8491_v62, %v10148_v20  ;;  %v2315_v2 = vmax.f32 %v1985_v61, 0.0 }
 0x193   : > { %8629 = vmatmul.mubr.bf16.gmra.mxu1 %v2412_v57  ;;  %v1987_v1 = vpop.f32.mrf.mxu0 }
 0x194   : > { %v2318_v4 = vmax.f32 %v1996_v63, 0.0  ;;  %v1988_v5 = vadd.f32 %v10148_v20, %v1987_v1 }
 0x195   : > { %v8494_v6 = vpop.f32.mrf.mxu0 }
 0x196   : > { %v2316_v7 = vmax.f32 %v1988_v5, 0.0  ;;  %v2414_v8 = vpack.c.bf16 %v2318_v4, %v2317_v0  ;;  %v2009_v9 = vadd.f32 %v8494_v6, %v10148_v20 }
 0x197   : > { %v2000_v10 = vpop.f32.mrf.mxu0 }
 0x198   : > { %v2413_v11 = vpack.c.bf16 %v2316_v7, %v2315_v2  ;;  %v2001_v12 = vadd.f32 %v10148_v20, %v2000_v10  ;;  %v2321_v16 = vmax.f32 %v2009_v9, 0.0  ;;  %v9378_v9 = vld [vmem:[%s12642_s1 + $0xd0] sm:$0xff]  }
 0x199   : > { %v8495_v14 = vpop.f32.mrf.mxu0  ;;  %8854 = vmatprep.subr.bf16.mxu1 %v9378_v9 }
 0x19a   : > { %8632 = vmatprep.mubr.bf16.mxu1 %v2413_v11  ;;  %v2012_v15 = vadd.f32 %v8495_v14, %v10148_v20  ;;  %v2319_v18 = vmax.f32 %v2001_v12, 0.0  ;;  %8855 = vmatpush3.bf16.msra.mxu1 %v9378_v9 }
 0x19b   : > { %8633 = vmatmul.mubr.bf16.gmra.mxu1 %v2414_v8  ;;  %v2003_v17 = vpop.f32.mrf.mxu0 }
 0x19c   : > { %v2322_v19 = vmax.f32 %v2012_v15, 0.0  ;;  %v2004_v21 = vadd.f32 %v10148_v20, %v2003_v17 }
 0x19d   : > { %v8498_v22 = vpop.f32.mrf.mxu0 }
 0x19e   : > { %v2320_v23 = vmax.f32 %v2004_v21, 0.0  ;;  %v2416_v24 = vpack.c.bf16 %v2322_v19, %v2321_v16  ;;  %v2025_v25 = vadd.f32 %v8498_v22, %v10148_v20 }
 0x19f   : > { %v2016_v26 = vpop.f32.mrf.mxu0 }
 0x1a0   : > { %v2415_v27 = vpack.c.bf16 %v2320_v23, %v2319_v18  ;;  %v2017_v28 = vadd.f32 %v10148_v20, %v2016_v26  ;;  %v2325_v31 = vmax.f32 %v2025_v25, 0.0 }
 0x1a1   : > { %v8499_v29 = vpop.f32.mrf.mxu0 }
 0x1a2   : > { %8636 = vmatprep.mubr.bf16.mxu1 %v2415_v27  ;;  %v2028_v30 = vadd.f32 %v8499_v29, %v10148_v20  ;;  %v2323_v33 = vmax.f32 %v2017_v28, 0.0 }
 0x1a3   : > { %8637 = vmatmul.mubr.bf16.gmra.mxu1 %v2416_v24  ;;  %v2019_v32 = vpop.f32.mrf.mxu0 }
 0x1a4   : > { %v2326_v34 = vmax.f32 %v2028_v30, 0.0  ;;  %v2020_v35 = vadd.f32 %v10148_v20, %v2019_v32 }
 0x1a5   : > { %v8502_v36 = vpop.f32.mrf.mxu0 }
 0x1a6   : > { %v2324_v37 = vmax.f32 %v2020_v35, 0.0  ;;  %v2418_v38 = vpack.c.bf16 %v2326_v34, %v2325_v31  ;;  %v2041_v39 = vadd.f32 %v8502_v36, %v10148_v20 }
 0x1a7   : > { %v2032_v40 = vpop.f32.mrf.mxu0 }
 0x1a8   : > { %v2417_v41 = vpack.c.bf16 %v2324_v37, %v2323_v33  ;;  %v2033_v42 = vadd.f32 %v10148_v20, %v2032_v40  ;;  %v2329_v46 = vmax.f32 %v2041_v39, 0.0  ;;  %v9379_v39 = vld [vmem:[%s12642_s1 + $0xc8] sm:$0xff]  }
 0x1a9   : > { %v8503_v44 = vpop.f32.mrf.mxu0  ;;  %8856 = vmatprep.subr.bf16.mxu1 %v9379_v39 }
 0x1aa   : > { %8640 = vmatprep.mubr.bf16.mxu1 %v2417_v41  ;;  %v2044_v45 = vadd.f32 %v8503_v44, %v10148_v20  ;;  %v2327_v48 = vmax.f32 %v2033_v42, 0.0  ;;  %8857 = vmatpush3.bf16.msra.mxu1 %v9379_v39 }
 0x1ab   : > { %8641 = vmatmul.mubr.bf16.gmra.mxu1 %v2418_v38  ;;  %v2035_v47 = vpop.f32.mrf.mxu0 }
 0x1ac   : > { %v2330_v49 = vmax.f32 %v2044_v45, 0.0  ;;  %v2036_v50 = vadd.f32 %v10148_v20, %v2035_v47  ;;  %v10264_v47 = vld [vmem:[%s12642_s1 + $0x138] sm:$0xff]  }
 0x1ad   : > { %v8506_v51 = vpop.f32.mrf.mxu0  ;;  %8988 = vmatprep.subr.bf16.mxu0 %v10264_v47 }
 0x1ae   : > { %v2328_v52 = vmax.f32 %v2036_v50, 0.0  ;;  %v2420_v53 = vpack.c.bf16 %v2330_v49, %v2329_v46  ;;  %v2057_v54 = vadd.f32 %v8506_v51, %v10148_v20 }
 0x1af   : > { %v2048_v55 = vpop.f32.mrf.mxu0 }
 0x1b0   : > { %v2419_v56 = vpack.c.bf16 %v2328_v52, %v2327_v48  ;;  %v2049_v57 = vadd.f32 %v10148_v20, %v2048_v55  ;;  %v2333_v60 = vmax.f32 %v2057_v54, 0.0 }
 0x1b1   : > { %v8507_v58 = vpop.f32.mrf.mxu0 }
 0x1b2   : > { %8644 = vmatprep.mubr.bf16.mxu1 %v2419_v56  ;;  %v2060_v59 = vadd.f32 %v8507_v58, %v10148_v20  ;;  %v2331_v62 = vmax.f32 %v2049_v57, 0.0 }
 0x1b3   : > { %8645 = vmatmul.mubr.bf16.gmra.mxu1 %v2420_v53  ;;  %v2051_v61 = vpop.f32.mrf.mxu0 }
 0x1b4   : > { %v2334_v63 = vmax.f32 %v2060_v59, 0.0  ;;  %v2052_v0 = vadd.f32 %v10148_v20, %v2051_v61 }
 0x1b5   : > { %v8510_v1 = vpop.f32.mrf.mxu0 }
 0x1b6   : > { %v2332_v2 = vmax.f32 %v2052_v0, 0.0  ;;  %v2422_v4 = vpack.c.bf16 %v2334_v63, %v2333_v60  ;;  %v2073_v5 = vadd.f32 %v8510_v1, %v10148_v20 }
 0x1b7   : > { %v2064_v6 = vpop.f32.mrf.mxu0 }
 0x1b8   : > { %v2065_v7 = vadd.f32 %v10148_v20, %v2064_v6  ;;  %v2421_v8 = vpack.c.bf16 %v2332_v2, %v2331_v62  ;;  %v2337_v12 = vmax.f32 %v2073_v5, 0.0  ;;  %v9381_v6 = vld [vmem:[%s12642_s1 + $0xc0] sm:$0xff]  }
 0x1b9   : > { %v8511_v10 = vpop.f32.mrf.mxu0  ;;  %8858 = vmatprep.subr.bf16.mxu1 %v9381_v6 }
 0x1ba   : > { %8648 = vmatprep.mubr.bf16.mxu1 %v2421_v8  ;;  %v2076_v11 = vadd.f32 %v8511_v10, %v10148_v20  ;;  %v2335_v14 = vmax.f32 %v2065_v7, 0.0  ;;  %8859 = vmatpush3.bf16.msra.mxu1 %v9381_v6 }
 0x1bb   : > { %8649 = vmatmul.mubr.bf16.gmra.mxu1 %v2422_v4  ;;  %v2067_v13 = vpop.f32.mrf.mxu0  ;;  %5822 = vmatprep.subr.bf16.mxu1 %v9494_v3 }
 0x1bc   : > { %v2338_v15 = vmax.f32 %v2076_v11, 0.0  ;;  %v2068_v16 = vadd.f32 %v10148_v20, %v2067_v13 }
 0x1bd   : > { %v8514_v17 = vpop.f32.mrf.mxu0 }
 0x1be   : > { %v2336_v18 = vmax.f32 %v2068_v16, 0.0  ;;  %v2424_v19 = vpack.c.bf16 %v2338_v15, %v2337_v12  ;;  %v2089_v21 = vadd.f32 %v8514_v17, %v10148_v20 }
 0x1bf   : > { %v2080_v22 = vpop.f32.mrf.mxu0 }
 0x1c0   : > { %v2081_v23 = vadd.f32 %v10148_v20, %v2080_v22  ;;  %v2423_v24 = vpack.c.bf16 %v2336_v18, %v2335_v14  ;;  %v2341_v27 = vmax.f32 %v2089_v21, 0.0 }
 0x1c1   : > { %v8515_v25 = vpop.f32.mrf.mxu0 }
 0x1c2   : > { %v2092_v26 = vadd.f32 %v8515_v25, %v10148_v20  ;;  %8652 = vmatprep.mubr.bf16.mxu1 %v2423_v24  ;;  %v2339_v29 = vmax.f32 %v2081_v23, 0.0 }
 0x1c3   : > { %v2083_v28 = vpop.f32.mrf.mxu0  ;;  %8653 = vmatmul.mubr.bf16.gmra.mxu1 %v2424_v19 }
 0x1c4   : > { %v2342_v30 = vmax.f32 %v2092_v26, 0.0  ;;  %v2084_v31 = vadd.f32 %v10148_v20, %v2083_v28 }
 0x1c5   : > { %v8518_v32 = vpop.f32.mrf.mxu0 }
 0x1c6   : > { %v2340_v33 = vmax.f32 %v2084_v31, 0.0  ;;  %v2426_v34 = vpack.c.bf16 %v2342_v30, %v2341_v27  ;;  %v2105_v35 = vadd.f32 %v8518_v32, %v10148_v20  ;;  %v10286_v32 = vld [vmem:[%s12643_s2 + $0x1] ss:$0 sm:$0xff] }
 0x1c7   : > { %v2096_v36 = vpop.f32.mrf.mxu0 }
 0x1c8   : > { %v2097_v37 = vadd.f32 %v10148_v20, %v2096_v36  ;;  %v2425_v38 = vpack.c.bf16 %v2340_v33, %v2339_v29  ;;  %v2345_v42 = vmax.f32 %v2105_v35, 0.0 }
 0x1c9   : > { %v8519_v40 = vpop.f32.mrf.mxu0 }
 0x1ca   : > { %v2108_v41 = vadd.f32 %v8519_v40, %v10148_v20  ;;  %8656 = vmatprep.mubr.bf16.mxu1 %v2425_v38  ;;  %v2343_v44 = vmax.f32 %v2097_v37, 0.0 }
 0x1cb   : > { %v2099_v43 = vpop.f32.mrf.mxu0  ;;  %8657 = vmatmul.mubr.bf16.gmra.mxu1 %v2426_v34 }
 0x1cc   : > { %v2346_v45 = vmax.f32 %v2108_v41, 0.0  ;;  %v2100_v46 = vadd.f32 %v10148_v20, %v2099_v43 }
 0x1cd   : > { %v8522_v48 = vpop.f32.mrf.mxu0 }
 0x1ce   : > { %v2344_v49 = vmax.f32 %v2100_v46, 0.0  ;;  %v2428_v50 = vpack.c.bf16 %v2346_v45, %v2345_v42  ;;  %v2121_v51 = vadd.f32 %v8522_v48, %v10148_v20 }
 0x1cf   : > { %v2112_v52 = vpop.f32.mrf.mxu0 }
 0x1d0   : > { %v2113_v53 = vadd.f32 %v10148_v20, %v2112_v52  ;;  %v2427_v54 = vpack.c.bf16 %v2344_v49, %v2343_v44  ;;  %v2349_v57 = vmax.f32 %v2121_v51, 0.0 }
 0x1d1   : > { %v8523_v55 = vpop.f32.mrf.mxu0 }
 0x1d2   : > { %v2124_v56 = vadd.f32 %v8523_v55, %v10148_v20  ;;  %8660 = vmatprep.mubr.bf16.mxu1 %v2427_v54  ;;  %v2347_v59 = vmax.f32 %v2113_v53, 0.0 }
 0x1d3   : > { %v2115_v58 = vpop.f32.mrf.mxu0  ;;  %8661 = vmatmul.mubr.bf16.gmra.mxu1 %v2428_v50 }
 0x1d4   : > { %v2350_v60 = vmax.f32 %v2124_v56, 0.0  ;;  %v2116_v61 = vadd.f32 %v10148_v20, %v2115_v58 }
 0x1d5   : > { %v8526_v62 = vpop.f32.mrf.mxu0 }
 0x1d6   : > { %v2348_v63 = vmax.f32 %v2116_v61, 0.0  ;;  %v2430_v0 = vpack.c.bf16 %v2350_v60, %v2349_v57  ;;  %v2137_v1 = vadd.f32 %v8526_v62, %v10148_v20 }
 0x1d7   : > { %v2128_v2 = vpop.f32.mrf.mxu0 }
 0x1d8   : > { %v2129_v4 = vadd.f32 %v10148_v20, %v2128_v2  ;;  %v2429_v5 = vpack.c.bf16 %v2348_v63, %v2347_v59  ;;  %v2353_v9 = vmax.f32 %v2137_v1, 0.0  ;;  %v9382_v1 = vld [vmem:[%s12642_s1 + $0x130] sm:$0xff]  }
 0x1d9   : > { %v8527_v7 = vpop.f32.mrf.mxu0 }
 0x1da   : > { %v2140_v8 = vadd.f32 %v8527_v7, %v10148_v20  ;;  %8664 = vmatprep.mubr.bf16.mxu1 %v2429_v5  ;;  %v2351_v11 = vmax.f32 %v2129_v4, 0.0 }
 0x1db   : > { %v2131_v10 = vpop.f32.mrf.mxu0  ;;  %8665 = vmatmul.mubr.bf16.gmra.mxu1 %v2430_v0 }
 0x1dc   : > { %v2354_v12 = vmax.f32 %v2140_v8, 0.0  ;;  %v2132_v13 = vadd.f32 %v10148_v20, %v2131_v10 }
 0x1dd   : > { %v8530_v14 = vpop.f32.mrf.mxu0 }
 0x1de   : > { %v2352_v15 = vmax.f32 %v2132_v13, 0.0  ;;  %v2432_v16 = vpack.c.bf16 %v2354_v12, %v2353_v9  ;;  %v2153_v17 = vadd.f32 %v8530_v14, %v10148_v20 }
 0x1df   : > { %v2144_v18 = vpop.f32.mrf.mxu0 }
 0x1e0   : > { %v2145_v19 = vadd.f32 %v10148_v20, %v2144_v18  ;;  %v2431_v21 = vpack.c.bf16 %v2352_v15, %v2351_v11  ;;  %v2357_v25 = vmax.f32 %v2153_v17, 0.0 }
 0x1e1   : > { %v8531_v22 = vpop.f32.mrf.mxu0 }
 0x1e2   : > { %v2156_v23 = vadd.f32 %v8531_v22, %v10148_v20  ;;  %8668 = vmatprep.mubr.bf16.mxu1 %v2431_v21  ;;  %v2355_v27 = vmax.f32 %v2145_v19, 0.0 }
 0x1e3   : > { %v8574_v24 = vpop.f32.mrf.mxu1  ;;  %v2147_v26 = vpop.f32.mrf.mxu0  ;;  %8669 = vmatmul.mubr.bf16.gmra.mxu1 %v2432_v16 }
 0x1e4   : > { %v2358_v28 = vmax.f32 %v2156_v23, 0.0  ;;  %v2148_v29 = vadd.f32 %v10148_v20, %v2147_v26  ;;  %v2563_v41 = vadd.f32 %v8574_v24, %v10286_v32 }
 0x1e5   : > { %v2554_v30 = vpop.f32.mrf.mxu1  ;;  %v8534_v31 = vpop.f32.mrf.mxu0 }
 0x1e6   : > { %v2356_v33 = vmax.f32 %v2148_v29, 0.0  ;;  %v2434_v35 = vpack.c.bf16 %v2358_v28, %v2357_v25  ;;  %v2555_v37 = vadd.f32 %v10286_v32, %v2554_v30  ;;  %v2169_v39 = vadd.f32 %v8534_v31, %v10148_v20 }
 0x1e7   : > { %v8575_v34 = vpop.f32.mrf.mxu1  ;;  %v2160_v36 = vpop.f32.mrf.mxu0  ;;  %v3067_v55 = vmax.f32 %v2563_v41, 0.0 }
 0x1e8   : > { %v2566_v38 = vadd.f32 %v8575_v34, %v10286_v32  ;;  %v2433_v40 = vpack.c.bf16 %v2356_v33, %v2355_v27  ;;  %v2161_v43 = vadd.f32 %v10148_v20, %v2160_v36  ;;  %v3065_v51 = vmax.f32 %v2555_v37, 0.0 }
 0x1e9   : > { %v2557_v42 = vpop.f32.mrf.mxu1  ;;  %v8535_v44 = vpop.f32.mrf.mxu0  ;;  %v2361_v53 = vmax.f32 %v2169_v39, 0.0 }
 0x1ea   : > { %v2558_v45 = vadd.f32 %v10286_v32, %v2557_v42  ;;  %v2172_v46 = vadd.f32 %v8535_v44, %v10148_v20  ;;  %8672 = vmatprep.mubr.bf16.mxu1 %v2433_v40  ;;  %v3068_v48 = vmax.f32 %v2566_v38, 0.0  ;;  %v2359_v57 = vmax.f32 %v2161_v43, 0.0 }
 0x1eb   : > { %v8578_v49 = vpop.f32.mrf.mxu1  ;;  %v2163_v50 = vpop.f32.mrf.mxu0  ;;  %8673 = vmatmul.mubr.bf16.gmra.mxu1 %v2434_v35 }
 0x1ec   : > { %v3066_v52 = vmax.f32 %v2558_v45, 0.0  ;;  %v2362_v54 = vmax.f32 %v2172_v46, 0.0  ;;  %v2164_v58 = vadd.f32 %v10148_v20, %v2163_v50  ;;  %v3194_v61 = vpack.c.bf16 %v3068_v48, %v3067_v55 }
 0x1ed   : > { %v2570_v56 = vpop.f32.mrf.mxu1  ;;  %v8538_v59 = vpop.f32.mrf.mxu0  ;;  %v2579_v7 = vadd.f32 %v8578_v49, %v10286_v32 }
 0x1ee   : > { %v3193_v60 = vpack.c.bf16 %v3066_v52, %v3065_v51  ;;  %v2360_v63 = vmax.f32 %v2164_v58, 0.0  ;;  %v2571_v2 = vadd.f32 %v10286_v32, %v2570_v56  ;;  %v2436_v5 = vpack.c.bf16 %v2362_v54, %v2361_v53 }
 0x1ef   : > { %v8579_v62 = vpop.f32.mrf.mxu1  ;;  %v2176_v0 = vpop.f32.mrf.mxu0  ;;  %v2185_v6 = vadd.f32 %v8538_v59, %v10148_v20  ;;  %v3071_v22 = vmax.f32 %v2579_v7, 0.0 }
 0x1f0   : > { %v2582_v4 = vadd.f32 %v8579_v62, %v10286_v32  ;;  %8716 = vmatprep.mubr.bf16.mxu0 %v3193_v60  ;;  %v2177_v9 = vadd.f32 %v10148_v20, %v2176_v0  ;;  %v2435_v11 = vpack.c.bf16 %v2360_v63, %v2359_v57  ;;  %v3069_v17 = vmax.f32 %v2571_v2, 0.0 }
 0x1f1   : > { %v2573_v8 = vpop.f32.mrf.mxu1  ;;  %8717 = vmatmul.mubr.bf16.vlgmr.msra.gmra.mxu0 %v3194_v61  ;;  %v8539_v10 = vpop.f32.mrf.mxu0  ;;  %v2365_v19 = vmax.f32 %v2185_v6, 0.0 }
 0x1f2   : > { %v2574_v12 = vadd.f32 %v10286_v32, %v2573_v8  ;;  %v2188_v13 = vadd.f32 %v8539_v10, %v10148_v20  ;;  %8989 = vmatpush3.bf16.msra.mxu0 %v10264_v47  ;;  %v3072_v14 = vmax.f32 %v2582_v4, 0.0  ;;  %8676 = vmatprep.mubr.bf16.mxu1 %v2435_v11  ;;  %v2363_v25 = vmax.f32 %v2177_v9, 0.0  ;;  %v10311_v20 = vld [vmem:[%s12643_s2] ss:$0 sm:$0xff] }
 0x1f3   : > { %v8582_v15 = vpop.f32.mrf.mxu1  ;;  %v2179_v16 = vpop.f32.mrf.mxu0  ;;  %8990 = vmatprep.subr.bf16.mxu0 %v9382_v1  ;;  %8677 = vmatmul.mubr.bf16.gmra.mxu1 %v2436_v5 }
 0x1f4   : > { %v3070_v18 = vmax.f32 %v2574_v12, 0.0  ;;  %v2366_v21 = vmax.f32 %v2188_v13, 0.0  ;;  %v2595_v23 = vadd.f32 %v8582_v15, %v10286_v32  ;;  %v2180_v47 = vadd.f32 %v10311_v20, %v2179_v16 }
 0x1f5   : > { %v2586_v24 = vpop.f32.mrf.mxu1  ;;  %v8542_v26 = vpop.f32.mrf.mxu0  ;;  %v3196_v29 = vpack.c.bf16 %v3072_v14, %v3071_v22 }
 0x1f6   : > { %v2587_v27 = vadd.f32 %v10286_v32, %v2586_v24  ;;  %v3195_v28 = vpack.c.bf16 %v3070_v18, %v3069_v17  ;;  %8991 = vmatpush3.bf16.msra.mxu0 %v9382_v1  ;;  %v2364_v31 = vmax.f32 %v2180_v47, 0.0  ;;  %v2438_v35 = vpack.c.bf16 %v2366_v21, %v2365_v19 }
 0x1f7   : > { %v8583_v30 = vpop.f32.mrf.mxu1  ;;  %v2192_v33 = vpop.f32.mrf.mxu0  ;;  %v2201_v36 = vadd.f32 %v10311_v20, %v8542_v26  ;;  %v3075_v37 = vmax.f32 %v2595_v23, 0.0 }
 0x1f8   : > { %v2598_v34 = vadd.f32 %v8583_v30, %v10286_v32  ;;  %8720 = vmatprep.mubr.bf16.mxu0 %v3195_v28  ;;  %v2193_v39 = vadd.f32 %v10311_v20, %v2192_v33  ;;  %v2437_v41 = vpack.c.bf16 %v2364_v31, %v2363_v25  ;;  %v3073_v42 = vmax.f32 %v2587_v27, 0.0 }
 0x1f9   : > { %v2589_v38 = vpop.f32.mrf.mxu1  ;;  %8721 = vmatmul.mubr.bf16.gmra.mxu0 %v3196_v29  ;;  %v8543_v40 = vpop.f32.mrf.mxu0  ;;  %v2369_v50 = vmax.f32 %v2201_v36, 0.0 }
 0x1fa   : > { %v3076_v43 = vmax.f32 %v2598_v34, 0.0  ;;  %v2590_v44 = vadd.f32 %v10286_v32, %v2589_v38  ;;  %v2204_v45 = vadd.f32 %v10311_v20, %v8543_v40  ;;  %8680 = vmatprep.mubr.bf16.mxu1 %v2437_v41  ;;  %v2367_v55 = vmax.f32 %v2193_v39, 0.0 }
 0x1fb   : > { %v8586_v46 = vpop.f32.mrf.mxu1  ;;  %v2195_v48 = vpop.f32.mrf.mxu0  ;;  %8681 = vmatmul.mubr.bf16.gmra.mxu1 %v2438_v35 }
 0x1fc   : > { %v3074_v49 = vmax.f32 %v2590_v44, 0.0  ;;  %v2370_v51 = vmax.f32 %v2204_v45, 0.0  ;;  %v3198_v52 = vpack.c.bf16 %v3076_v43, %v3075_v37  ;;  %v2611_v53 = vadd.f32 %v8586_v46, %v10286_v32 }
 0x1fd   : > { %v2602_v54 = vpop.f32.mrf.mxu1  ;;  %v2196_v56 = vadd.f32 %v10311_v20, %v2195_v48  ;;  %v8546_v57 = vpop.f32.mrf.mxu0 }
 0x1fe   : > { %v2603_v58 = vadd.f32 %v10286_v32, %v2602_v54  ;;  %v3197_v59 = vpack.c.bf16 %v3074_v49, %v3073_v42  ;;  %v2440_v0 = vpack.c.bf16 %v2370_v51, %v2369_v50  ;;  %v2217_v1 = vadd.f32 %v10311_v20, %v8546_v57 }
 0x1ff   : > { %v8587_v60 = vpop.f32.mrf.mxu1  ;;  %v2368_v61 = vmax.f32 %v2196_v56, 0.0  ;;  %v2208_v62 = vpop.f32.mrf.mxu0  ;;  %v3079_v2 = vmax.f32 %v2611_v53, 0.0 }
 0x200   : > { %v2614_v63 = vadd.f32 %v8587_v60, %v10286_v32  ;;  %8724 = vmatprep.mubr.bf16.mxu0 %v3197_v59  ;;  %v2209_v5 = vadd.f32 %v10311_v20, %v2208_v62  ;;  %v3077_v8 = vmax.f32 %v2603_v58, 0.0  ;;  %v2373_v15 = vmax.f32 %v2217_v1, 0.0 }
 0x201   : > { %v2605_v4 = vpop.f32.mrf.mxu1  ;;  %8725 = vmatmul.mubr.bf16.gmra.mxu0 %v3198_v52  ;;  %v8547_v6 = vpop.f32.mrf.mxu0  ;;  %v2439_v7 = vpack.c.bf16 %v2368_v61, %v2367_v55 }
 0x202   : > { %v3080_v9 = vmax.f32 %v2614_v63, 0.0  ;;  %v2606_v10 = vadd.f32 %v10286_v32, %v2605_v4  ;;  %v2220_v11 = vadd.f32 %v10311_v20, %v8547_v6  ;;  %v2371_v21 = vmax.f32 %v2209_v5, 0.0 }
 0x203   : > { %v8590_v12 = vpop.f32.mrf.mxu1  ;;  %8684 = vmatprep.mubr.bf16.mxu1 %v2439_v7  ;;  %v2211_v13 = vpop.f32.mrf.mxu0 }
 0x204   : > { %v3078_v14 = vmax.f32 %v2606_v10, 0.0  ;;  %v2374_v16 = vmax.f32 %v2220_v11, 0.0  ;;  %8685 = vmatmul.mubr.bf16.gmra.mxu1 %v2440_v0  ;;  %v3200_v17 = vpack.c.bf16 %v3080_v9, %v3079_v2  ;;  %v2627_v18 = vadd.f32 %v8590_v12, %v10286_v32 }
 0x205   : > { %v2618_v19 = vpop.f32.mrf.mxu1  ;;  %v2212_v22 = vadd.f32 %v10311_v20, %v2211_v13  ;;  %v8550_v23 = vpop.f32.mrf.mxu0 }
 0x206   : > { %v2619_v24 = vadd.f32 %v10286_v32, %v2618_v19  ;;  %v3199_v25 = vpack.c.bf16 %v3078_v14, %v3077_v8  ;;  %v2442_v29 = vpack.c.bf16 %v2374_v16, %v2373_v15  ;;  %v2233_v30 = vadd.f32 %v10311_v20, %v8550_v23 }
 0x207   : > { %v8591_v47 = vpop.f32.mrf.mxu1  ;;  %v2372_v26 = vmax.f32 %v2212_v22, 0.0  ;;  %v2224_v27 = vpop.f32.mrf.mxu0  ;;  %v3083_v31 = vmax.f32 %v2627_v18, 0.0 }
 0x208   : > { %v2630_v28 = vadd.f32 %v8591_v47, %v10286_v32  ;;  %8728 = vmatprep.mubr.bf16.mxu0 %v3199_v25  ;;  %v2225_v34 = vadd.f32 %v10311_v20, %v2224_v27  ;;  %v3081_v37 = vmax.f32 %v2619_v24, 0.0  ;;  %v2377_v44 = vmax.f32 %v2233_v30, 0.0 }
 0x209   : > { %v2621_v33 = vpop.f32.mrf.mxu1  ;;  %8729 = vmatmul.mubr.bf16.gmra.mxu0 %v3200_v17  ;;  %v8551_v35 = vpop.f32.mrf.mxu0  ;;  %v2441_v36 = vpack.c.bf16 %v2372_v26, %v2371_v21 }
 0x20a   : > { %v3084_v38 = vmax.f32 %v2630_v28, 0.0  ;;  %v2622_v39 = vadd.f32 %v10286_v32, %v2621_v33  ;;  %v2236_v40 = vadd.f32 %v10311_v20, %v8551_v35  ;;  %v2375_v50 = vmax.f32 %v2225_v34, 0.0 }
 0x20b   : > { %v8594_v41 = vpop.f32.mrf.mxu1  ;;  %8688 = vmatprep.mubr.bf16.mxu1 %v2441_v36  ;;  %v2227_v42 = vpop.f32.mrf.mxu0 }
 0x20c   : > { %v3082_v43 = vmax.f32 %v2622_v39, 0.0  ;;  %v2378_v45 = vmax.f32 %v2236_v40, 0.0  ;;  %8689 = vmatmul.mubr.bf16.gmra.mxu1 %v2442_v29  ;;  %v3202_v46 = vpack.c.bf16 %v3084_v38, %v3083_v31  ;;  %v2643_v48 = vadd.f32 %v8594_v41, %v10286_v32 }
 0x20d   : > { %v2634_v49 = vpop.f32.mrf.mxu1  ;;  %v2228_v51 = vadd.f32 %v10311_v20, %v2227_v42  ;;  %v8554_v52 = vpop.f32.mrf.mxu0 }
 0x20e   : > { %v3201_v53 = vpack.c.bf16 %v3082_v43, %v3081_v37  ;;  %v2635_v54 = vadd.f32 %v10286_v32, %v2634_v49  ;;  %v2444_v59 = vpack.c.bf16 %v2378_v45, %v2377_v44  ;;  %v2249_v60 = vadd.f32 %v10311_v20, %v8554_v52 }
 0x20f   : > { %v8595_v55 = vpop.f32.mrf.mxu1  ;;  %v2376_v56 = vmax.f32 %v2228_v51, 0.0  ;;  %v2240_v57 = vpop.f32.mrf.mxu0  ;;  %v3087_v61 = vmax.f32 %v2643_v48, 0.0 }
 0x210   : > { %8732 = vmatprep.mubr.bf16.mxu0 %v3201_v53  ;;  %v2646_v58 = vadd.f32 %v8595_v55, %v10286_v32  ;;  %v2241_v63 = vadd.f32 %v10311_v20, %v2240_v57  ;;  %v3085_v2 = vmax.f32 %v2635_v54, 0.0  ;;  %v2381_v10 = vmax.f32 %v2249_v60, 0.0 }
 0x211   : > { %8733 = vmatmul.mubr.bf16.gmra.mxu0 %v3202_v46  ;;  %v2637_v62 = vpop.f32.mrf.mxu1  ;;  %v8555_v0 = vpop.f32.mrf.mxu0  ;;  %v2443_v1 = vpack.c.bf16 %v2376_v56, %v2375_v50 }
 0x212   : > { %v3088_v4 = vmax.f32 %v2646_v58, 0.0  ;;  %v2638_v5 = vadd.f32 %v10286_v32, %v2637_v62  ;;  %v2252_v6 = vadd.f32 %v10311_v20, %v8555_v0  ;;  %v2379_v15 = vmax.f32 %v2241_v63, 0.0 }
 0x213   : > { %v8598_v7 = vpop.f32.mrf.mxu1  ;;  %8692 = vmatprep.mubr.bf16.mxu1 %v2443_v1  ;;  %v2243_v8 = vpop.f32.mrf.mxu0 }
 0x214   : > { %v3086_v9 = vmax.f32 %v2638_v5, 0.0  ;;  %v2382_v11 = vmax.f32 %v2252_v6, 0.0  ;;  %8693 = vmatmul.mubr.bf16.gmra.mxu1 %v2444_v59  ;;  %v3204_v12 = vpack.c.bf16 %v3088_v4, %v3087_v61  ;;  %v2659_v13 = vadd.f32 %v8598_v7, %v10286_v32 }
 0x215   : > { %v2650_v14 = vpop.f32.mrf.mxu1  ;;  %v2244_v16 = vadd.f32 %v10311_v20, %v2243_v8 }
 0x216   : > { %v3203_v17 = vpack.c.bf16 %v3086_v9, %v3085_v2  ;;  %v2651_v18 = vadd.f32 %v10286_v32, %v2650_v14  ;;  %v2446_v23 = vpack.c.bf16 %v2382_v11, %v2381_v10  ;;  %v3091_v24 = vmax.f32 %v2659_v13, 0.0 }
 0x217   : > { %v8599_v19 = vpop.f32.mrf.mxu1  ;;  %v2380_v21 = vmax.f32 %v2244_v16, 0.0 }
 0x218   : > { %8736 = vmatprep.mubr.bf16.mxu0 %v3203_v17  ;;  %v2662_v22 = vadd.f32 %v8599_v19, %v10286_v32  ;;  %v3089_v26 = vmax.f32 %v2651_v18, 0.0 }
 0x219   : > { %8737 = vmatmul.mubr.bf16.gmra.mxu0 %v3204_v12  ;;  %v2653_v25 = vpop.f32.mrf.mxu1  ;;  %v2445_v47 = vpack.c.bf16 %v2380_v21, %v2379_v15 }
 0x21a   : > { %v3092_v27 = vmax.f32 %v2662_v22, 0.0  ;;  %v2654_v28 = vadd.f32 %v10286_v32, %v2653_v25 }
 0x21b   : > { %v8602_v29 = vpop.f32.mrf.mxu1  ;;  %8696 = vmatprep.mubr.bf16.mxu1 %v2445_v47 }
 0x21c   : > { %v3090_v20 = vmax.f32 %v2654_v28, 0.0  ;;  %8697 = vmatmul.mubr.bf16.gmra.mxu1 %v2446_v23  ;;  %v3206_v30 = vpack.c.bf16 %v3092_v27, %v3091_v24  ;;  %v2675_v31 = vadd.f32 %v8602_v29, %v10286_v32 }
 0x21d   : > { %v2666_v33 = vpop.f32.mrf.mxu1 }
 0x21e   : > { %v3205_v34 = vpack.c.bf16 %v3090_v20, %v3089_v26  ;;  %v2667_v35 = vadd.f32 %v10286_v32, %v2666_v33  ;;  %v3095_v38 = vmax.f32 %v2675_v31, 0.0 }
 0x21f   : > { %v8603_v36 = vpop.f32.mrf.mxu1 }
 0x220   : > { %8740 = vmatprep.mubr.bf16.mxu0 %v3205_v34  ;;  %v2678_v37 = vadd.f32 %v8603_v36, %v10286_v32  ;;  %v3093_v40 = vmax.f32 %v2667_v35, 0.0 }
 0x221   : > { %8741 = vmatmul.mubr.bf16.gmra.mxu0 %v3206_v30  ;;  %v2669_v39 = vpop.f32.mrf.mxu1 }
 0x222   : > { %v3096_v41 = vmax.f32 %v2678_v37, 0.0  ;;  %v2670_v42 = vadd.f32 %v10286_v32, %v2669_v39 }
 0x223   : > { %v8606_v43 = vpop.f32.mrf.mxu1 }
 0x224   : > { %v3094_v44 = vmax.f32 %v2670_v42, 0.0  ;;  %v3208_v45 = vpack.c.bf16 %v3096_v41, %v3095_v38  ;;  %v2691_v46 = vadd.f32 %v8606_v43, %v10286_v32 }
 0x225   : > { %v2682_v48 = vpop.f32.mrf.mxu1 }
 0x226   : > { %v3207_v49 = vpack.c.bf16 %v3094_v44, %v3093_v40  ;;  %v2683_v50 = vadd.f32 %v10286_v32, %v2682_v48  ;;  %v3099_v53 = vmax.f32 %v2691_v46, 0.0 }
 0x227   : > { %v8607_v51 = vpop.f32.mrf.mxu1 }
 0x228   : > { %8744 = vmatprep.mubr.bf16.mxu0 %v3207_v49  ;;  %v2694_v52 = vadd.f32 %v8607_v51, %v10286_v32  ;;  %v3097_v55 = vmax.f32 %v2683_v50, 0.0 }
 0x229   : > { %8745 = vmatmul.mubr.bf16.gmra.mxu0 %v3208_v45  ;;  %v2685_v54 = vpop.f32.mrf.mxu1 }
 0x22a   : > { %v3100_v56 = vmax.f32 %v2694_v52, 0.0  ;;  %v2686_v57 = vadd.f32 %v10286_v32, %v2685_v54 }
 0x22b   : > { %v8610_v58 = vpop.f32.mrf.mxu1 }
 0x22c   : > { %v3098_v59 = vmax.f32 %v2686_v57, 0.0  ;;  %v3210_v60 = vpack.c.bf16 %v3100_v56, %v3099_v53  ;;  %v2707_v61 = vadd.f32 %v8610_v58, %v10286_v32 }
 0x22d   : > { %v2698_v62 = vpop.f32.mrf.mxu1 }
 0x22e   : > { %v3209_v63 = vpack.c.bf16 %v3098_v59, %v3097_v55  ;;  %v2699_v0 = vadd.f32 %v10286_v32, %v2698_v62  ;;  %v3103_v4 = vmax.f32 %v2707_v61, 0.0  ;;  %v9383_v59 = vld [vmem:[%s12642_s1 + $0x128] sm:$0xff]  }
 0x22f   : > { %v8611_v1 = vpop.f32.mrf.mxu1  ;;  %8992 = vmatprep.subr.bf16.mxu0 %v9383_v59 }
 0x230   : > { %8748 = vmatprep.mubr.bf16.mxu0 %v3209_v63  ;;  %v2710_v2 = vadd.f32 %v8611_v1, %v10286_v32  ;;  %v3101_v6 = vmax.f32 %v2699_v0, 0.0  ;;  %8993 = vmatpush3.bf16.msra.mxu0 %v9383_v59 }
 0x231   : > { %8749 = vmatmul.mubr.bf16.gmra.mxu0 %v3210_v60  ;;  %v2701_v5 = vpop.f32.mrf.mxu1 }
 0x232   : > { %v3104_v7 = vmax.f32 %v2710_v2, 0.0  ;;  %v2702_v8 = vadd.f32 %v10286_v32, %v2701_v5 }
 0x233   : > { %v8614_v9 = vpop.f32.mrf.mxu1 }
 0x234   : > { %v3102_v10 = vmax.f32 %v2702_v8, 0.0  ;;  %v3212_v11 = vpack.c.bf16 %v3104_v7, %v3103_v4  ;;  %v2723_v12 = vadd.f32 %v8614_v9, %v10286_v32 }
 0x235   : > { %v2714_v13 = vpop.f32.mrf.mxu1 }
 0x236   : > { %v3211_v14 = vpack.c.bf16 %v3102_v10, %v3101_v6  ;;  %v2715_v15 = vadd.f32 %v10286_v32, %v2714_v13  ;;  %v3107_v18 = vmax.f32 %v2723_v12, 0.0 }
 0x237   : > { %v8615_v16 = vpop.f32.mrf.mxu1 }
 0x238   : > { %8752 = vmatprep.mubr.bf16.mxu0 %v3211_v14  ;;  %v2726_v17 = vadd.f32 %v8615_v16, %v10286_v32  ;;  %v3105_v21 = vmax.f32 %v2715_v15, 0.0 }
 0x239   : > { %8753 = vmatmul.mubr.bf16.gmra.mxu0 %v3212_v11  ;;  %v2717_v19 = vpop.f32.mrf.mxu1 }
 0x23a   : > { %v3108_v22 = vmax.f32 %v2726_v17, 0.0  ;;  %v2718_v23 = vadd.f32 %v10286_v32, %v2717_v19 }
 0x23b   : > { %v8618_v24 = vpop.f32.mrf.mxu1 }
 0x23c   : > { %v3106_v25 = vmax.f32 %v2718_v23, 0.0  ;;  %v3214_v47 = vpack.c.bf16 %v3108_v22, %v3107_v18  ;;  %v2739_v26 = vadd.f32 %v8618_v24, %v10286_v32 }
 0x23d   : > { %v2730_v27 = vpop.f32.mrf.mxu1 }
 0x23e   : > { %v3213_v28 = vpack.c.bf16 %v3106_v25, %v3105_v21  ;;  %v2731_v29 = vadd.f32 %v10286_v32, %v2730_v27  ;;  %v3111_v31 = vmax.f32 %v2739_v26, 0.0 }
 0x23f   : > { %v8619_v20 = vpop.f32.mrf.mxu1 }
 0x240   : > { %8756 = vmatprep.mubr.bf16.mxu0 %v3213_v28  ;;  %v2742_v30 = vadd.f32 %v8619_v20, %v10286_v32  ;;  %v3109_v34 = vmax.f32 %v2731_v29, 0.0 }
 0x241   : > { %8757 = vmatmul.mubr.bf16.gmra.mxu0 %v3214_v47  ;;  %v2733_v33 = vpop.f32.mrf.mxu1 }
 0x242   : > { %v3112_v35 = vmax.f32 %v2742_v30, 0.0  ;;  %v2734_v36 = vadd.f32 %v10286_v32, %v2733_v33 }
 0x243   : > { %v8622_v37 = vpop.f32.mrf.mxu1 }
 0x244   : > { %v3110_v38 = vmax.f32 %v2734_v36, 0.0  ;;  %v3216_v39 = vpack.c.bf16 %v3112_v35, %v3111_v31  ;;  %v2755_v40 = vadd.f32 %v8622_v37, %v10286_v32 }
 0x245   : > { %v2746_v41 = vpop.f32.mrf.mxu1 }
 0x246   : > { %v3215_v42 = vpack.c.bf16 %v3110_v38, %v3109_v34  ;;  %v2747_v43 = vadd.f32 %v10286_v32, %v2746_v41  ;;  %v3115_v46 = vmax.f32 %v2755_v40, 0.0 }
 0x247   : > { %v8623_v44 = vpop.f32.mrf.mxu1 }
 0x248   : > { %8760 = vmatprep.mubr.bf16.mxu0 %v3215_v42  ;;  %v2758_v45 = vadd.f32 %v8623_v44, %v10286_v32  ;;  %v3113_v49 = vmax.f32 %v2747_v43, 0.0 }
 0x249   : > { %8761 = vmatmul.mubr.bf16.gmra.mxu0 %v3216_v39  ;;  %v2749_v48 = vpop.f32.mrf.mxu1  ;;  %v9384_v39 = vld [vmem:[%s12642_s1 + $0x120] sm:$0xff]  }
 0x24a   : > { %v3116_v50 = vmax.f32 %v2758_v45, 0.0  ;;  %v2750_v51 = vadd.f32 %v10286_v32, %v2749_v48  ;;  %8994 = vmatprep.subr.bf16.mxu0 %v9384_v39 }
 0x24b   : > { %v8626_v52 = vpop.f32.mrf.mxu1  ;;  %8995 = vmatpush3.bf16.msra.mxu0 %v9384_v39 }
 0x24c   : > { %v3114_v53 = vmax.f32 %v2750_v51, 0.0  ;;  %v3218_v54 = vpack.c.bf16 %v3116_v50, %v3115_v46  ;;  %v2771_v55 = vadd.f32 %v8626_v52, %v10286_v32 }
 0x24d   : > { %v2762_v56 = vpop.f32.mrf.mxu1 }
 0x24e   : > { %v3217_v57 = vpack.c.bf16 %v3114_v53, %v3113_v49  ;;  %v2763_v58 = vadd.f32 %v10286_v32, %v2762_v56  ;;  %v3119_v62 = vmax.f32 %v2771_v55, 0.0 }
 0x24f   : > { %v8627_v60 = vpop.f32.mrf.mxu1 }
 0x250   : > { %8764 = vmatprep.mubr.bf16.mxu0 %v3217_v57  ;;  %v2774_v61 = vadd.f32 %v8627_v60, %v10286_v32  ;;  %v3117_v0 = vmax.f32 %v2763_v58, 0.0 }
 0x251   : > { %8765 = vmatmul.mubr.bf16.gmra.mxu0 %v3218_v54  ;;  %v2765_v63 = vpop.f32.mrf.mxu1 }
 0x252   : > { %v3120_v1 = vmax.f32 %v2774_v61, 0.0  ;;  %v2766_v2 = vadd.f32 %v10286_v32, %v2765_v63 }
 0x253   : > { %v8630_v4 = vpop.f32.mrf.mxu1 }
 0x254   : > { %v3118_v5 = vmax.f32 %v2766_v2, 0.0  ;;  %v3220_v6 = vpack.c.bf16 %v3120_v1, %v3119_v62  ;;  %v2787_v7 = vadd.f32 %v8630_v4, %v10286_v32 }
 0x255   : > { %v2778_v8 = vpop.f32.mrf.mxu1 }
 0x256   : > { %v3219_v9 = vpack.c.bf16 %v3118_v5, %v3117_v0  ;;  %v2779_v10 = vadd.f32 %v10286_v32, %v2778_v8  ;;  %v3123_v13 = vmax.f32 %v2787_v7, 0.0 }
 0x257   : > { %v8631_v11 = vpop.f32.mrf.mxu1 }
 0x258   : > { %8768 = vmatprep.mubr.bf16.mxu0 %v3219_v9  ;;  %v2790_v12 = vadd.f32 %v8631_v11, %v10286_v32  ;;  %v3121_v15 = vmax.f32 %v2779_v10, 0.0 }
 0x259   : > { %8769 = vmatmul.mubr.bf16.gmra.mxu0 %v3220_v6  ;;  %v2781_v14 = vpop.f32.mrf.mxu1  ;;  %v9385_v6 = vld [vmem:[%s12642_s1 + $0x118] sm:$0xff]  }
 0x25a   : > { %v3124_v16 = vmax.f32 %v2790_v12, 0.0  ;;  %v2782_v17 = vadd.f32 %v10286_v32, %v2781_v14  ;;  %8996 = vmatprep.subr.bf16.mxu0 %v9385_v6 }
 0x25b   : > { %v8634_v18 = vpop.f32.mrf.mxu1  ;;  %8997 = vmatpush3.bf16.msra.mxu0 %v9385_v6 }
 0x25c   : > { %v3122_v19 = vmax.f32 %v2782_v17, 0.0  ;;  %v3222_v21 = vpack.c.bf16 %v3124_v16, %v3123_v13  ;;  %v2803_v22 = vadd.f32 %v8634_v18, %v10286_v32 }
 0x25d   : > { %v2794_v23 = vpop.f32.mrf.mxu1 }
 0x25e   : > { %v3221_v24 = vpack.c.bf16 %v3122_v19, %v3121_v15  ;;  %v2795_v25 = vadd.f32 %v10286_v32, %v2794_v23  ;;  %v3127_v27 = vmax.f32 %v2803_v22, 0.0 }
 0x25f   : > { %v8635_v47 = vpop.f32.mrf.mxu1 }
 0x260   : > { %8772 = vmatprep.mubr.bf16.mxu0 %v3221_v24  ;;  %v2806_v26 = vadd.f32 %v8635_v47, %v10286_v32  ;;  %v3125_v29 = vmax.f32 %v2795_v25, 0.0 }
 0x261   : > { %8773 = vmatmul.mubr.bf16.gmra.mxu0 %v3222_v21  ;;  %v2797_v28 = vpop.f32.mrf.mxu1 }
 0x262   : > { %v3128_v20 = vmax.f32 %v2806_v26, 0.0  ;;  %v2798_v30 = vadd.f32 %v10286_v32, %v2797_v28 }
 0x263   : > { %v8638_v31 = vpop.f32.mrf.mxu1 }
 0x264   : > { %v3126_v33 = vmax.f32 %v2798_v30, 0.0  ;;  %v3224_v34 = vpack.c.bf16 %v3128_v20, %v3127_v27  ;;  %v2819_v35 = vadd.f32 %v8638_v31, %v10286_v32 }
 0x265   : > { %v2810_v36 = vpop.f32.mrf.mxu1 }
 0x266   : > { %v3223_v37 = vpack.c.bf16 %v3126_v33, %v3125_v29  ;;  %v2811_v38 = vadd.f32 %v10286_v32, %v2810_v36  ;;  %v3131_v42 = vmax.f32 %v2819_v35, 0.0  ;;  %v9386_v35 = vld [vmem:[%s12642_s1 + $0x110] sm:$0xff]  }
 0x267   : > { %v8639_v40 = vpop.f32.mrf.mxu1  ;;  %8998 = vmatprep.subr.bf16.mxu0 %v9386_v35 }
 0x268   : > { %8776 = vmatprep.mubr.bf16.mxu0 %v3223_v37  ;;  %v2822_v41 = vadd.f32 %v8639_v40, %v10286_v32  ;;  %v3129_v44 = vmax.f32 %v2811_v38, 0.0  ;;  %8999 = vmatpush3.bf16.msra.mxu0 %v9386_v35 }
 0x269   : > { %8777 = vmatmul.mubr.bf16.gmra.mxu0 %v3224_v34  ;;  %v2813_v43 = vpop.f32.mrf.mxu1 }
 0x26a   : > { %v3132_v45 = vmax.f32 %v2822_v41, 0.0  ;;  %v2814_v46 = vadd.f32 %v10286_v32, %v2813_v43 }
 0x26b   : > { %v8642_v48 = vpop.f32.mrf.mxu1 }
 0x26c   : > { %v3130_v49 = vmax.f32 %v2814_v46, 0.0  ;;  %v3226_v50 = vpack.c.bf16 %v3132_v45, %v3131_v42  ;;  %v2835_v51 = vadd.f32 %v8642_v48, %v10286_v32 }
 0x26d   : > { %v2826_v52 = vpop.f32.mrf.mxu1 }
 0x26e   : > { %v3225_v53 = vpack.c.bf16 %v3130_v49, %v3129_v44  ;;  %v2827_v54 = vadd.f32 %v10286_v32, %v2826_v52  ;;  %v3135_v57 = vmax.f32 %v2835_v51, 0.0 }
 0x26f   : > { %v8643_v55 = vpop.f32.mrf.mxu1 }
 0x270   : > { %8780 = vmatprep.mubr.bf16.mxu0 %v3225_v53  ;;  %v2838_v56 = vadd.f32 %v8643_v55, %v10286_v32  ;;  %v3133_v59 = vmax.f32 %v2827_v54, 0.0 }
 0x271   : > { %8781 = vmatmul.mubr.bf16.gmra.mxu0 %v3226_v50  ;;  %v2829_v58 = vpop.f32.mrf.mxu1 }
 0x272   : > { %v3136_v60 = vmax.f32 %v2838_v56, 0.0  ;;  %v2830_v61 = vadd.f32 %v10286_v32, %v2829_v58 }
 0x273   : > { %v8646_v62 = vpop.f32.mrf.mxu1 }
 0x274   : > { %v3134_v63 = vmax.f32 %v2830_v61, 0.0  ;;  %v3228_v0 = vpack.c.bf16 %v3136_v60, %v3135_v57  ;;  %v2851_v1 = vadd.f32 %v8646_v62, %v10286_v32 }
 0x275   : > { %v2842_v2 = vpop.f32.mrf.mxu1 }
 0x276   : > { %v3227_v4 = vpack.c.bf16 %v3134_v63, %v3133_v59  ;;  %v2843_v5 = vadd.f32 %v10286_v32, %v2842_v2  ;;  %v3139_v9 = vmax.f32 %v2851_v1, 0.0  ;;  %v9387_v1 = vld [vmem:[%s12642_s1 + $0x108] sm:$0xff]  }
 0x277   : > { %v8647_v7 = vpop.f32.mrf.mxu1  ;;  %9000 = vmatprep.subr.bf16.mxu0 %v9387_v1 }
 0x278   : > { %8784 = vmatprep.mubr.bf16.mxu0 %v3227_v4  ;;  %v2854_v8 = vadd.f32 %v8647_v7, %v10286_v32  ;;  %v3137_v11 = vmax.f32 %v2843_v5, 0.0  ;;  %9001 = vmatpush3.bf16.msra.mxu0 %v9387_v1 }
 0x279   : > { %8785 = vmatmul.mubr.bf16.gmra.mxu0 %v3228_v0  ;;  %v2845_v10 = vpop.f32.mrf.mxu1 }
 0x27a   : > { %v3140_v12 = vmax.f32 %v2854_v8, 0.0  ;;  %v2846_v13 = vadd.f32 %v10286_v32, %v2845_v10 }
 0x27b   : > { %v8650_v14 = vpop.f32.mrf.mxu1 }
 0x27c   : > { %v3138_v15 = vmax.f32 %v2846_v13, 0.0  ;;  %v3230_v16 = vpack.c.bf16 %v3140_v12, %v3139_v9  ;;  %v2867_v17 = vadd.f32 %v8650_v14, %v10286_v32 }
 0x27d   : > { %v2858_v18 = vpop.f32.mrf.mxu1 }
 0x27e   : > { %v3229_v19 = vpack.c.bf16 %v3138_v15, %v3137_v11  ;;  %v2859_v21 = vadd.f32 %v10286_v32, %v2858_v18  ;;  %v3143_v24 = vmax.f32 %v2867_v17, 0.0 }
 0x27f   : > { %v8651_v22 = vpop.f32.mrf.mxu1 }
 0x280   : > { %8788 = vmatprep.mubr.bf16.mxu0 %v3229_v19  ;;  %v2870_v23 = vadd.f32 %v8651_v22, %v10286_v32  ;;  %v3141_v47 = vmax.f32 %v2859_v21, 0.0 }
 0x281   : > { %8789 = vmatmul.mubr.bf16.gmra.mxu0 %v3230_v16  ;;  %v2861_v25 = vpop.f32.mrf.mxu1 }
 0x282   : > { %v3144_v26 = vmax.f32 %v2870_v23, 0.0  ;;  %v2862_v27 = vadd.f32 %v10286_v32, %v2861_v25 }
 0x283   : > { %v8654_v28 = vpop.f32.mrf.mxu1 }
 0x284   : > { %v3142_v29 = vmax.f32 %v2862_v27, 0.0  ;;  %v3232_v20 = vpack.c.bf16 %v3144_v26, %v3143_v24  ;;  %v2883_v30 = vadd.f32 %v8654_v28, %v10286_v32 }
 0x285   : > { %v2874_v31 = vpop.f32.mrf.mxu1 }
 0x286   : > { %v2875_v33 = vadd.f32 %v10286_v32, %v2874_v31  ;;  %v3231_v34 = vpack.c.bf16 %v3142_v29, %v3141_v47  ;;  %v3147_v38 = vmax.f32 %v2883_v30, 0.0  ;;  %v9390_v30 = vld [vmem:[%s12642_s1 + $0x100] sm:$0xff]  }
 0x287   : > { %v8655_v36 = vpop.f32.mrf.mxu1  ;;  %9002 = vmatprep.subr.bf16.mxu0 %v9390_v30 }
 0x288   : > { %8792 = vmatprep.mubr.bf16.mxu0 %v3231_v34  ;;  %v2886_v37 = vadd.f32 %v8655_v36, %v10286_v32  ;;  %v3145_v40 = vmax.f32 %v2875_v33, 0.0  ;;  %9003 = vmatpush3.bf16.msra.mxu0 %v9390_v30 }
 0x289   : > { %8793 = vmatmul.mubr.bf16.gmra.mxu0 %v3232_v20  ;;  %v2877_v39 = vpop.f32.mrf.mxu1 }
 0x28a   : > { %v3148_v41 = vmax.f32 %v2886_v37, 0.0  ;;  %v2878_v42 = vadd.f32 %v10286_v32, %v2877_v39 }
 0x28b   : > { %v8658_v43 = vpop.f32.mrf.mxu1 }
 0x28c   : > { %v3146_v44 = vmax.f32 %v2878_v42, 0.0  ;;  %v3234_v45 = vpack.c.bf16 %v3148_v41, %v3147_v38  ;;  %v2899_v46 = vadd.f32 %v8658_v43, %v10286_v32  ;;  %v10441_v38 = vld [vmem:[%s12643_s2 + $0x1] ss:$0 sm:$0xff] }
 0x28d   : > { %v2890_v48 = vpop.f32.mrf.mxu1 }
 0x28e   : > { %v2891_v49 = vadd.f32 %v10286_v32, %v2890_v48  ;;  %v3233_v50 = vpack.c.bf16 %v3146_v44, %v3145_v40  ;;  %v3151_v53 = vmax.f32 %v2899_v46, 0.0 }
 0x28f   : > { %v8659_v51 = vpop.f32.mrf.mxu1 }
 0x290   : > { %v2902_v52 = vadd.f32 %v8659_v51, %v10286_v32  ;;  %8796 = vmatprep.mubr.bf16.mxu0 %v3233_v50  ;;  %v3149_v55 = vmax.f32 %v2891_v49, 0.0 }
 0x291   : > { %v2893_v54 = vpop.f32.mrf.mxu1  ;;  %8797 = vmatmul.mubr.bf16.gmra.mxu0 %v3234_v45 }
 0x292   : > { %v3152_v56 = vmax.f32 %v2902_v52, 0.0  ;;  %v2894_v57 = vadd.f32 %v10286_v32, %v2893_v54 }
 0x293   : > { %v8662_v58 = vpop.f32.mrf.mxu1 }
 0x294   : > { %v3150_v59 = vmax.f32 %v2894_v57, 0.0  ;;  %v3236_v60 = vpack.c.bf16 %v3152_v56, %v3151_v53  ;;  %v2915_v61 = vadd.f32 %v8662_v58, %v10286_v32  ;;  %v10451_v56 = vld [vmem:[%s12643_s2 + $0x2] ss:$0 sm:$0xff] }
 0x295   : > { %v2906_v62 = vpop.f32.mrf.mxu1 }
 0x296   : > { %v2907_v63 = vadd.f32 %v10286_v32, %v2906_v62  ;;  %v3235_v0 = vpack.c.bf16 %v3150_v59, %v3149_v55  ;;  %v3155_v5 = vmax.f32 %v2915_v61, 0.0 }
 0x297   : > { %v8663_v2 = vpop.f32.mrf.mxu1 }
 0x298   : > { %v2918_v4 = vadd.f32 %v8663_v2, %v10286_v32  ;;  %8800 = vmatprep.mubr.bf16.mxu0 %v3235_v0  ;;  %v3153_v7 = vmax.f32 %v2907_v63, 0.0 }
 0x299   : > { %v2909_v6 = vpop.f32.mrf.mxu1  ;;  %8801 = vmatmul.mubr.bf16.gmra.mxu0 %v3236_v60 }
 0x29a   : > { %v3156_v8 = vmax.f32 %v2918_v4, 0.0  ;;  %v2910_v9 = vadd.f32 %v10286_v32, %v2909_v6 }
 0x29b   : > { %v8666_v10 = vpop.f32.mrf.mxu1 }
 0x29c   : > { %v3154_v11 = vmax.f32 %v2910_v9, 0.0  ;;  %v3238_v12 = vpack.c.bf16 %v3156_v8, %v3155_v5  ;;  %v2931_v13 = vadd.f32 %v8666_v10, %v10286_v32 }
 0x29d   : > { %v2922_v14 = vpop.f32.mrf.mxu1 }
 0x29e   : > { %v2923_v15 = vadd.f32 %v10286_v32, %v2922_v14  ;;  %v3237_v16 = vpack.c.bf16 %v3154_v11, %v3153_v7  ;;  %v3159_v19 = vmax.f32 %v2931_v13, 0.0 }
 0x29f   : > { %v8667_v17 = vpop.f32.mrf.mxu1 }
 0x2a0   : > { %v2934_v18 = vadd.f32 %v8667_v17, %v10286_v32  ;;  %8804 = vmatprep.mubr.bf16.mxu0 %v3237_v16  ;;  %v3157_v22 = vmax.f32 %v2923_v15, 0.0 }
 0x2a1   : > { %v2925_v21 = vpop.f32.mrf.mxu1  ;;  %8805 = vmatmul.mubr.bf16.gmra.mxu0 %v3238_v12 }
 0x2a2   : > { %v3160_v23 = vmax.f32 %v2934_v18, 0.0  ;;  %v2926_v24 = vadd.f32 %v10286_v32, %v2925_v21 }
 0x2a3   : > { %v8670_v25 = vpop.f32.mrf.mxu1 }
 0x2a4   : > { %v3158_v47 = vmax.f32 %v2926_v24, 0.0  ;;  %v3240_v26 = vpack.c.bf16 %v3160_v23, %v3159_v19  ;;  %v2947_v27 = vadd.f32 %v8670_v25, %v10286_v32  ;;  %v9388_v23 = vld [vmem:[%s12644_s3 + $0x38] sm:$0xff]  }
 0x2a5   : > { %v2938_v28 = vpop.f32.mrf.mxu1 }
 0x2a6   : > { %v2939_v29 = vadd.f32 %v10286_v32, %v2938_v28  ;;  %v3239_v20 = vpack.c.bf16 %v3158_v47, %v3157_v22  ;;  %v3163_v34 = vmax.f32 %v2947_v27, 0.0 }
 0x2a7   : > { %v8671_v31 = vpop.f32.mrf.mxu1 }
 0x2a8   : > { %v2950_v33 = vadd.f32 %v8671_v31, %v10286_v32  ;;  %8808 = vmatprep.mubr.bf16.mxu0 %v3239_v20  ;;  %v3161_v36 = vmax.f32 %v2939_v29, 0.0 }
 0x2a9   : > { %v2941_v35 = vpop.f32.mrf.mxu1  ;;  %8809 = vmatmul.mubr.bf16.gmra.mxu0 %v3240_v26 }
 0x2aa   : > { %v3164_v37 = vmax.f32 %v2950_v33, 0.0  ;;  %v2942_v39 = vadd.f32 %v10441_v38, %v2941_v35 }
 0x2ab   : > { %v8674_v40 = vpop.f32.mrf.mxu1 }
 0x2ac   : > { %v3162_v41 = vmax.f32 %v2942_v39, 0.0  ;;  %v3242_v42 = vpack.c.bf16 %v3164_v37, %v3163_v34  ;;  %v2963_v32 = vadd.f32 %v10441_v38, %v8674_v40  ;;  %v9389_v37 = vld [vmem:[%s12644_s3 + $0x30] sm:$0xff]  }
 0x2ad   : > { %v2954_v43 = vpop.f32.mrf.mxu1 }
 0x2ae   : > { %v2955_v44 = vadd.f32 %v10441_v38, %v2954_v43  ;;  %v3241_v45 = vpack.c.bf16 %v3162_v41, %v3161_v36  ;;  %v3167_v50 = vmax.f32 %v2963_v32, 0.0 }
 0x2af   : > { %v8675_v46 = vpop.f32.mrf.mxu1 }
 0x2b0   : > { %v2966_v48 = vadd.f32 %v10441_v38, %v8675_v46  ;;  %8812 = vmatprep.mubr.bf16.mxu0 %v3241_v45  ;;  %v3165_v52 = vmax.f32 %v2955_v44, 0.0 }
 0x2b1   : > { %v8718_v49 = vpop.f32.mrf.mxu0  ;;  %v2957_v51 = vpop.f32.mrf.mxu1  ;;  %8813 = vmatmul.mubr.bf16.gmra.mxu0 %v3242_v42 }
 0x2b2   : > { %v3168_v53 = vmax.f32 %v2966_v48, 0.0  ;;  %v2958_v54 = vadd.f32 %v10441_v38, %v2957_v51  ;;  %v3373_v2 = vadd.f32 %v8718_v49, %v10451_v56 }
 0x2b3   : > { %v3364_v55 = vpop.f32.mrf.mxu0  ;;  %v8678_v58 = vpop.f32.mrf.mxu1 }
 0x2b4   : > { %v3166_v57 = vmax.f32 %v2958_v54, 0.0  ;;  %v3244_v60 = vpack.c.bf16 %v3168_v53, %v3167_v50  ;;  %v3365_v61 = vadd.f32 %v10451_v56, %v3364_v55  ;;  %v2979_v63 = vadd.f32 %v10441_v38, %v8678_v58  ;;  %v9391_v53 = vld [vmem:[%s12644_s3 + $0x28] sm:$0xff]  }
 0x2b5   : > { %v8719_v59 = vpop.f32.mrf.mxu0  ;;  %v2970_v0 = vpop.f32.mrf.mxu1  ;;  %v3877_v15 = vmax.f32 %v3373_v2, 0.0 }
 0x2b6   : > { %v3376_v62 = vadd.f32 %v8719_v59, %v10451_v56  ;;  %v3243_v1 = vpack.c.bf16 %v3166_v57, %v3165_v52  ;;  %v2971_v5 = vadd.f32 %v10441_v38, %v2970_v0  ;;  %v3875_v11 = vmax.f32 %v3365_v61, 0.0 }
 0x2b7   : > { %v3367_v4 = vpop.f32.mrf.mxu0  ;;  %v8679_v7 = vpop.f32.mrf.mxu1  ;;  %v3171_v13 = vmax.f32 %v2979_v63, 0.0 }
 0x2b8   : > { %v3368_v6 = vadd.f32 %v10451_v56, %v3367_v4  ;;  %8816 = vmatprep.mubr.bf16.mxu0 %v3243_v1  ;;  %v3878_v8 = vmax.f32 %v3376_v62, 0.0  ;;  %v2982_v10 = vadd.f32 %v10441_v38, %v8679_v7  ;;  %v3169_v17 = vmax.f32 %v2971_v5, 0.0 }
 0x2b9   : > { %v8722_v9 = vpop.f32.mrf.mxu0  ;;  %8817 = vmatmul.mubr.bf16.gmra.mxu0 %v3244_v60  ;;  %v2973_v14 = vpop.f32.mrf.mxu1 }
 0x2ba   : > { %v3876_v12 = vmax.f32 %v3368_v6, 0.0  ;;  %v3172_v18 = vmax.f32 %v2982_v10, 0.0  ;;  %v2974_v19 = vadd.f32 %v10441_v38, %v2973_v14  ;;  %v4004_v24 = vpack.c.bf16 %v3878_v8, %v3877_v15 }
 0x2bb   : > { %v3380_v16 = vpop.f32.mrf.mxu0  ;;  %v8682_v22 = vpop.f32.mrf.mxu1  ;;  %v3389_v30 = vadd.f32 %v8722_v9, %v10451_v56 }
 0x2bc   : > { %v4003_v21 = vpack.c.bf16 %v3876_v12, %v3875_v11  ;;  %v3170_v47 = vmax.f32 %v2974_v19, 0.0  ;;  %v3381_v26 = vadd.f32 %v10451_v56, %v3380_v16  ;;  %v3246_v28 = vpack.c.bf16 %v3172_v18, %v3171_v13 }
 0x2bd   : > { %v8723_v25 = vpop.f32.mrf.mxu0  ;;  %v2995_v29 = vadd.f32 %v10441_v38, %v8682_v22  ;;  %v2986_v20 = vpop.f32.mrf.mxu1  ;;  %v3881_v45 = vmax.f32 %v3389_v30, 0.0 }
 0x2be   : > { %v3392_v27 = vadd.f32 %v8723_v25, %v10451_v56  ;;  %8860 = vmatprep.mubr.bf16.mxu1 %v4003_v21  ;;  %v2987_v33 = vadd.f32 %v10441_v38, %v2986_v20  ;;  %v3245_v34 = vpack.c.bf16 %v3170_v47, %v3169_v17  ;;  %v3879_v42 = vmax.f32 %v3381_v26, 0.0 }
 0x2bf   : > { %v3383_v31 = vpop.f32.mrf.mxu0  ;;  %8861 = vmatmul.mubr.bf16.vlgmr.msra.gmra.mxu1 %v4004_v24  ;;  %v8683_v36 = vpop.f32.mrf.mxu1  ;;  %v3175_v43 = vmax.f32 %v2995_v29, 0.0 }
 0x2c0   : > { %v3384_v35 = vadd.f32 %v10451_v56, %v3383_v31  ;;  %5823 = vmatpush1.bf16.msra.mxu1 %v9388_v23  ;;  %v3882_v39 = vmax.f32 %v3392_v27, 0.0  ;;  %v2998_v41 = vadd.f32 %v10441_v38, %v8683_v36  ;;  %8820 = vmatprep.mubr.bf16.mxu0 %v3245_v34  ;;  %v3173_v48 = vmax.f32 %v2987_v33, 0.0 }
 0x2c1   : > { %v8726_v40 = vpop.f32.mrf.mxu0  ;;  %5824 = vmatprep.subr.bf16.mxu1 %v9494_v3  ;;  %v2989_v44 = vpop.f32.mrf.mxu1  ;;  %8821 = vmatmul.mubr.bf16.gmra.mxu0 %v3246_v28 }
 0x2c2   : > { %v3880_v32 = vmax.f32 %v3384_v35, 0.0  ;;  %v3176_v49 = vmax.f32 %v2998_v41, 0.0  ;;  %v2990_v50 = vadd.f32 %v10441_v38, %v2989_v44  ;;  %v4006_v54 = vpack.c.bf16 %v3882_v39, %v3881_v45 }
 0x2c3   : > { %v3396_v46 = vpop.f32.mrf.mxu0  ;;  %v3405_v55 = vadd.f32 %v8726_v40, %v10451_v56 }
 0x2c4   : > { %v4005_v51 = vpack.c.bf16 %v3880_v32, %v3879_v42  ;;  %v8686_v52 = vpop.f32.mrf.mxu1  ;;  %5825 = vmatpush1.bf16.msra.mxu1 %v9389_v37  ;;  %v3174_v58 = vmax.f32 %v2990_v50, 0.0  ;;  %v3397_v59 = vadd.f32 %v10451_v56, %v3396_v46  ;;  %v3248_v61 = vpack.c.bf16 %v3176_v49, %v3175_v43 }
 0x2c5   : > { %v8727_v57 = vpop.f32.mrf.mxu0  ;;  %5826 = vmatprep.subr.bf16.mxu1 %v9494_v3  ;;  %v3011_v62 = vadd.f32 %v10441_v38, %v8686_v52  ;;  %v3885_v9 = vmax.f32 %v3405_v55, 0.0 }
 0x2c6   : > { %v3408_v60 = vadd.f32 %v8727_v57, %v10451_v56  ;;  %8864 = vmatprep.mubr.bf16.mxu1 %v4005_v51  ;;  %v3002_v63 = vpop.f32.mrf.mxu1  ;;  %v3247_v2 = vpack.c.bf16 %v3174_v58, %v3173_v48  ;;  %v3883_v10 = vmax.f32 %v3397_v59, 0.0 }
 0x2c7   : > { %v3399_v0 = vpop.f32.mrf.mxu0  ;;  %8865 = vmatmul.mubr.bf16.gmra.mxu1 %v4006_v54  ;;  %v3003_v1 = vadd.f32 %v10441_v38, %v3002_v63  ;;  %v3179_v12 = vmax.f32 %v3011_v62, 0.0 }
 0x2c8   : > { %v3400_v4 = vadd.f32 %v10451_v56, %v3399_v0  ;;  %v8687_v5 = vpop.f32.mrf.mxu1  ;;  %5827 = vmatpush1.bf16.msra.mxu1 %v9391_v53  ;;  %v3886_v6 = vmax.f32 %v3408_v60, 0.0  ;;  %8824 = vmatprep.mubr.bf16.mxu0 %v3247_v2 }
 0x2c9   : > { %v8730_v7 = vpop.f32.mrf.mxu0  ;;  %v3014_v8 = vadd.f32 %v10441_v38, %v8687_v5  ;;  %5828 = vmatprep.subr.bf16.mxu1 %v9494_v3  ;;  %8825 = vmatmul.mubr.bf16.gmra.mxu0 %v3248_v61  ;;  %v3177_v16 = vmax.f32 %v3003_v1, 0.0 }
 0x2ca   : > { %v3884_v11 = vmax.f32 %v3400_v4, 0.0  ;;  %v3005_v13 = vpop.f32.mrf.mxu1  ;;  %v3421_v14 = vadd.f32 %v8730_v7, %v10451_v56  ;;  %v4008_v23 = vpack.c.bf16 %v3886_v6, %v3885_v9 }
 0x2cb   : > { %v3412_v15 = vpop.f32.mrf.mxu0  ;;  %v3180_v17 = vmax.f32 %v3014_v8, 0.0  ;;  %v3006_v18 = vadd.f32 %v10441_v38, %v3005_v13 }
 0x2cc   : > { %v3413_v19 = vadd.f32 %v10451_v56, %v3412_v15  ;;  %v4007_v21 = vpack.c.bf16 %v3884_v11, %v3883_v10  ;;  %v8690_v22 = vpop.f32.mrf.mxu1  ;;  %v3889_v29 = vmax.f32 %v3421_v14, 0.0 }
 0x2cd   : > { %v8731_v24 = vpop.f32.mrf.mxu0  ;;  %v3178_v25 = vmax.f32 %v3006_v18, 0.0  ;;  %v3250_v26 = vpack.c.bf16 %v3180_v17, %v3179_v12  ;;  %v3027_v27 = vadd.f32 %v10441_v38, %v8690_v22 }
 0x2ce   : > { %v3424_v47 = vadd.f32 %v8731_v24, %v10451_v56  ;;  %8868 = vmatprep.mubr.bf16.mxu1 %v4007_v21  ;;  %v3018_v28 = vpop.f32.mrf.mxu1  ;;  %v3887_v33 = vmax.f32 %v3413_v19, 0.0 }
 0x2cf   : > { %v3415_v20 = vpop.f32.mrf.mxu0  ;;  %8869 = vmatmul.mubr.bf16.gmra.mxu1 %v4008_v23  ;;  %v3019_v30 = vadd.f32 %v10441_v38, %v3018_v28  ;;  %v3249_v31 = vpack.c.bf16 %v3178_v25, %v3177_v16  ;;  %v3183_v41 = vmax.f32 %v3027_v27, 0.0 }
 0x2d0   : > { %v3890_v34 = vmax.f32 %v3424_v47, 0.0  ;;  %v3416_v35 = vadd.f32 %v10451_v56, %v3415_v20  ;;  %v8691_v36 = vpop.f32.mrf.mxu1 }
 0x2d1   : > { %v8734_v37 = vpop.f32.mrf.mxu0  ;;  %v3030_v39 = vadd.f32 %v10441_v38, %v8691_v36  ;;  %8828 = vmatprep.mubr.bf16.mxu0 %v3249_v31  ;;  %v3181_v42 = vmax.f32 %v3019_v30, 0.0 }
 0x2d2   : > { %v3888_v40 = vmax.f32 %v3416_v35, 0.0  ;;  %v3021_v32 = vpop.f32.mrf.mxu1  ;;  %8829 = vmatmul.mubr.bf16.gmra.mxu0 %v3250_v26  ;;  %v4010_v43 = vpack.c.bf16 %v3890_v34, %v3889_v29  ;;  %v3437_v44 = vadd.f32 %v8734_v37, %v10451_v56 }
 0x2d3   : > { %v3428_v45 = vpop.f32.mrf.mxu0  ;;  %v3184_v46 = vmax.f32 %v3030_v39, 0.0  ;;  %v3022_v48 = vadd.f32 %v10441_v38, %v3021_v32 }
 0x2d4   : > { %v3429_v49 = vadd.f32 %v10451_v56, %v3428_v45  ;;  %v4009_v50 = vpack.c.bf16 %v3888_v40, %v3887_v33  ;;  %v8694_v51 = vpop.f32.mrf.mxu1  ;;  %v3893_v59 = vmax.f32 %v3437_v44, 0.0 }
 0x2d5   : > { %v8735_v52 = vpop.f32.mrf.mxu0  ;;  %v3182_v53 = vmax.f32 %v3022_v48, 0.0  ;;  %v3252_v55 = vpack.c.bf16 %v3184_v46, %v3183_v41  ;;  %v3043_v57 = vadd.f32 %v10441_v38, %v8694_v51 }
 0x2d6   : > { %v3440_v54 = vadd.f32 %v8735_v52, %v10451_v56  ;;  %8872 = vmatprep.mubr.bf16.mxu1 %v4009_v50  ;;  %v3034_v58 = vpop.f32.mrf.mxu1  ;;  %v3891_v63 = vmax.f32 %v3429_v49, 0.0 }
 0x2d7   : > { %v3431_v60 = vpop.f32.mrf.mxu0  ;;  %8873 = vmatmul.mubr.bf16.gmra.mxu1 %v4010_v43  ;;  %v3035_v61 = vadd.f32 %v10441_v38, %v3034_v58  ;;  %v3251_v62 = vpack.c.bf16 %v3182_v53, %v3181_v42  ;;  %v3187_v7 = vmax.f32 %v3043_v57, 0.0 }
 0x2d8   : > { %v3894_v0 = vmax.f32 %v3440_v54, 0.0  ;;  %v3432_v1 = vadd.f32 %v10451_v56, %v3431_v60  ;;  %v8695_v2 = vpop.f32.mrf.mxu1 }
 0x2d9   : > { %v8738_v4 = vpop.f32.mrf.mxu0  ;;  %v3046_v5 = vadd.f32 %v10441_v38, %v8695_v2  ;;  %8832 = vmatprep.mubr.bf16.mxu0 %v3251_v62  ;;  %v3185_v8 = vmax.f32 %v3035_v61, 0.0 }
 0x2da   : > { %v3892_v6 = vmax.f32 %v3432_v1, 0.0  ;;  %v3037_v9 = vpop.f32.mrf.mxu1  ;;  %8833 = vmatmul.mubr.bf16.gmra.mxu0 %v3252_v55  ;;  %v4012_v10 = vpack.c.bf16 %v3894_v0, %v3893_v59  ;;  %v3453_v11 = vadd.f32 %v8738_v4, %v10451_v56 }
 0x2db   : > { %v3444_v12 = vpop.f32.mrf.mxu0  ;;  %v3188_v13 = vmax.f32 %v3046_v5, 0.0  ;;  %v3038_v14 = vadd.f32 %v10441_v38, %v3037_v9 }
 0x2dc   : > { %v4011_v15 = vpack.c.bf16 %v3892_v6, %v3891_v63  ;;  %v3445_v16 = vadd.f32 %v10451_v56, %v3444_v12  ;;  %v8698_v17 = vpop.f32.mrf.mxu1  ;;  %v3897_v25 = vmax.f32 %v3453_v11, 0.0 }
 0x2dd   : > { %v8739_v18 = vpop.f32.mrf.mxu0  ;;  %v3186_v19 = vmax.f32 %v3038_v14, 0.0  ;;  %v3254_v22 = vpack.c.bf16 %v3188_v13, %v3187_v7  ;;  %v3059_v23 = vadd.f32 %v10441_v38, %v8698_v17 }
 0x2de   : > { %8876 = vmatprep.mubr.bf16.mxu1 %v4011_v15  ;;  %v3456_v21 = vadd.f32 %v8739_v18, %v10451_v56  ;;  %v3050_v24 = vpop.f32.mrf.mxu1  ;;  %v3895_v28 = vmax.f32 %v3445_v16, 0.0 }
 0x2df   : > { %8877 = vmatmul.mubr.bf16.gmra.mxu1 %v4012_v10  ;;  %v3447_v47 = vpop.f32.mrf.mxu0  ;;  %v3051_v26 = vadd.f32 %v10441_v38, %v3050_v24  ;;  %v3253_v27 = vpack.c.bf16 %v3186_v19, %v3185_v8  ;;  %v3191_v35 = vmax.f32 %v3059_v23, 0.0 }
 0x2e0   : > { %v3898_v29 = vmax.f32 %v3456_v21, 0.0  ;;  %v3448_v20 = vadd.f32 %v10451_v56, %v3447_v47  ;;  %v8699_v30 = vpop.f32.mrf.mxu1 }
 0x2e1   : > { %v8742_v31 = vpop.f32.mrf.mxu0  ;;  %v3062_v33 = vadd.f32 %v10441_v38, %v8699_v30  ;;  %8836 = vmatprep.mubr.bf16.mxu0 %v3253_v27  ;;  %v3189_v36 = vmax.f32 %v3051_v26, 0.0 }
 0x2e2   : > { %v3896_v34 = vmax.f32 %v3448_v20, 0.0  ;;  %v3053_v37 = vpop.f32.mrf.mxu1  ;;  %8837 = vmatmul.mubr.bf16.gmra.mxu0 %v3254_v22  ;;  %v4014_v39 = vpack.c.bf16 %v3898_v29, %v3897_v25  ;;  %v3469_v40 = vadd.f32 %v8742_v31, %v10451_v56 }
 0x2e3   : > { %v3460_v41 = vpop.f32.mrf.mxu0  ;;  %v3192_v42 = vmax.f32 %v3062_v33, 0.0  ;;  %v3054_v32 = vadd.f32 %v10441_v38, %v3053_v37 }
 0x2e4   : > { %v4013_v43 = vpack.c.bf16 %v3896_v34, %v3895_v28  ;;  %v3461_v44 = vadd.f32 %v10451_v56, %v3460_v41  ;;  %v3901_v50 = vmax.f32 %v3469_v40, 0.0 }
 0x2e5   : > { %v8743_v45 = vpop.f32.mrf.mxu0  ;;  %v3190_v46 = vmax.f32 %v3054_v32, 0.0  ;;  %v3256_v49 = vpack.c.bf16 %v3192_v42, %v3191_v35 }
 0x2e6   : > { %8880 = vmatprep.mubr.bf16.mxu1 %v4013_v43  ;;  %v3472_v48 = vadd.f32 %v8743_v45, %v10451_v56  ;;  %v3899_v53 = vmax.f32 %v3461_v44, 0.0 }
 0x2e7   : > { %8881 = vmatmul.mubr.bf16.gmra.mxu1 %v4014_v39  ;;  %v3463_v51 = vpop.f32.mrf.mxu0  ;;  %v3255_v52 = vpack.c.bf16 %v3190_v46, %v3189_v36 }
 0x2e8   : > { %v3902_v54 = vmax.f32 %v3472_v48, 0.0  ;;  %v3464_v55 = vadd.f32 %v10451_v56, %v3463_v51 }
 0x2e9   : > { %v8746_v57 = vpop.f32.mrf.mxu0  ;;  %8840 = vmatprep.mubr.bf16.mxu0 %v3255_v52 }
 0x2ea   : > { %v3900_v38 = vmax.f32 %v3464_v55, 0.0  ;;  %8841 = vmatmul.mubr.bf16.gmra.mxu0 %v3256_v49  ;;  %v4016_v58 = vpack.c.bf16 %v3902_v54, %v3901_v50  ;;  %v3485_v59 = vadd.f32 %v8746_v57, %v10451_v56 }
 0x2eb   : > { %v3476_v60 = vpop.f32.mrf.mxu0 }
 0x2ec   : > { %v4015_v61 = vpack.c.bf16 %v3900_v38, %v3899_v53  ;;  %v3477_v62 = vadd.f32 %v10451_v56, %v3476_v60  ;;  %v3905_v1 = vmax.f32 %v3485_v59, 0.0  ;;  %v9392_v38 = vld [vmem:[%s12644_s3 + $0x20] sm:$0xff]  }
 0x2ed   : > { %v8747_v63 = vpop.f32.mrf.mxu0  ;;  %5829 = vmatpush1.bf16.msra.mxu1 %v9392_v38 }
 0x2ee   : > { %8884 = vmatprep.mubr.bf16.mxu1 %v4015_v61  ;;  %v3488_v0 = vadd.f32 %v8747_v63, %v10451_v56  ;;  %v3903_v4 = vmax.f32 %v3477_v62, 0.0  ;;  %5830 = vmatprep.subr.bf16.mxu1 %v9494_v3 }
 0x2ef   : > { %8885 = vmatmul.mubr.bf16.gmra.mxu1 %v4016_v58  ;;  %v3479_v2 = vpop.f32.mrf.mxu0 }
 0x2f0   : > { %v3906_v5 = vmax.f32 %v3488_v0, 0.0  ;;  %v3480_v6 = vadd.f32 %v10451_v56, %v3479_v2 }
 0x2f1   : > { %v8750_v7 = vpop.f32.mrf.mxu0 }
 0x2f2   : > { %v3904_v8 = vmax.f32 %v3480_v6, 0.0  ;;  %v4018_v9 = vpack.c.bf16 %v3906_v5, %v3905_v1  ;;  %v3501_v10 = vadd.f32 %v8750_v7, %v10451_v56 }
 0x2f3   : > { %v3492_v11 = vpop.f32.mrf.mxu0 }
 0x2f4   : > { %v4017_v12 = vpack.c.bf16 %v3904_v8, %v3903_v4  ;;  %v3493_v13 = vadd.f32 %v10451_v56, %v3492_v11  ;;  %v3909_v16 = vmax.f32 %v3501_v10, 0.0 }
 0x2f5   : > { %v8751_v14 = vpop.f32.mrf.mxu0 }
 0x2f6   : > { %8888 = vmatprep.mubr.bf16.mxu1 %v4017_v12  ;;  %v3504_v15 = vadd.f32 %v8751_v14, %v10451_v56  ;;  %v3907_v18 = vmax.f32 %v3493_v13, 0.0 }
 0x2f7   : > { %8889 = vmatmul.mubr.bf16.gmra.mxu1 %v4018_v9  ;;  %v3495_v17 = vpop.f32.mrf.mxu0 }
 0x2f8   : > { %v3910_v19 = vmax.f32 %v3504_v15, 0.0  ;;  %v3496_v21 = vadd.f32 %v10451_v56, %v3495_v17 }
 0x2f9   : > { %v8754_v22 = vpop.f32.mrf.mxu0 }
 0x2fa   : > { %v3908_v23 = vmax.f32 %v3496_v21, 0.0  ;;  %v4020_v24 = vpack.c.bf16 %v3910_v19, %v3909_v16  ;;  %v3517_v25 = vadd.f32 %v8754_v22, %v10451_v56 }
 0x2fb   : > { %v3508_v47 = vpop.f32.mrf.mxu0 }
 0x2fc   : > { %v4019_v26 = vpack.c.bf16 %v3908_v23, %v3907_v18  ;;  %v3509_v27 = vadd.f32 %v10451_v56, %v3508_v47  ;;  %v3913_v20 = vmax.f32 %v3517_v25, 0.0 }
 0x2fd   : > { %v8755_v28 = vpop.f32.mrf.mxu0 }
 0x2fe   : > { %8892 = vmatprep.mubr.bf16.mxu1 %v4019_v26  ;;  %v3520_v29 = vadd.f32 %v8755_v28, %v10451_v56  ;;  %v3911_v31 = vmax.f32 %v3509_v27, 0.0 }
 0x2ff   : > { %8893 = vmatmul.mubr.bf16.gmra.mxu1 %v4020_v24  ;;  %v3511_v30 = vpop.f32.mrf.mxu0  ;;  %v9393_v24 = vld [vmem:[%s12644_s3 + $0x18] sm:$0xff]  }
 0x300   : > { %v3914_v33 = vmax.f32 %v3520_v29, 0.0  ;;  %v3512_v34 = vadd.f32 %v10451_v56, %v3511_v30  ;;  %5831 = vmatpush1.bf16.msra.mxu1 %v9393_v24 }
 0x301   : > { %v8758_v35 = vpop.f32.mrf.mxu0  ;;  %5832 = vmatprep.subr.bf16.mxu1 %v9494_v3 }
 0x302   : > { %v3912_v36 = vmax.f32 %v3512_v34, 0.0  ;;  %v4022_v37 = vpack.c.bf16 %v3914_v33, %v3913_v20  ;;  %v3533_v39 = vadd.f32 %v8758_v35, %v10451_v56 }
 0x303   : > { %v3524_v40 = vpop.f32.mrf.mxu0 }
 0x304   : > { %v4021_v41 = vpack.c.bf16 %v3912_v36, %v3911_v31  ;;  %v3525_v42 = vadd.f32 %v10451_v56, %v3524_v40  ;;  %v3917_v44 = vmax.f32 %v3533_v39, 0.0 }
 0x305   : > { %v8759_v32 = vpop.f32.mrf.mxu0 }
 0x306   : > { %8896 = vmatprep.mubr.bf16.mxu1 %v4021_v41  ;;  %v3536_v43 = vadd.f32 %v8759_v32, %v10451_v56  ;;  %v3915_v46 = vmax.f32 %v3525_v42, 0.0 }
 0x307   : > { %8897 = vmatmul.mubr.bf16.gmra.mxu1 %v4022_v37  ;;  %v3527_v45 = vpop.f32.mrf.mxu0 }
 0x308   : > { %v3918_v48 = vmax.f32 %v3536_v43, 0.0  ;;  %v3528_v49 = vadd.f32 %v10451_v56, %v3527_v45  ;;  %v9394_v45 = vld [vmem:[%s12644_s3 + $0x10] sm:$0xff]  }
 0x309   : > { %v8762_v50 = vpop.f32.mrf.mxu0  ;;  %5833 = vmatpush1.bf16.msra.mxu1 %v9394_v45 }
 0x30a   : > { %v3916_v51 = vmax.f32 %v3528_v49, 0.0  ;;  %v4024_v52 = vpack.c.bf16 %v3918_v48, %v3917_v44  ;;  %v3549_v53 = vadd.f32 %v8762_v50, %v10451_v56  ;;  %5834 = vmatprep.subr.bf16.mxu1 %v9494_v3 }
 0x30b   : > { %v3540_v54 = vpop.f32.mrf.mxu0 }
 0x30c   : > { %v4023_v55 = vpack.c.bf16 %v3916_v51, %v3915_v46  ;;  %v3541_v57 = vadd.f32 %v10451_v56, %v3540_v54  ;;  %v3921_v60 = vmax.f32 %v3549_v53, 0.0 }
 0x30d   : > { %v8763_v58 = vpop.f32.mrf.mxu0 }
 0x30e   : > { %8900 = vmatprep.mubr.bf16.mxu1 %v4023_v55  ;;  %v3552_v59 = vadd.f32 %v8763_v58, %v10451_v56  ;;  %v3919_v62 = vmax.f32 %v3541_v57, 0.0 }
 0x30f   : > { %8901 = vmatmul.mubr.bf16.gmra.mxu1 %v4024_v52  ;;  %v3543_v61 = vpop.f32.mrf.mxu0 }
 0x310   : > { %v3922_v63 = vmax.f32 %v3552_v59, 0.0  ;;  %v3544_v0 = vadd.f32 %v10451_v56, %v3543_v61 }
 0x311   : > { %v8766_v1 = vpop.f32.mrf.mxu0 }
 0x312   : > { %v3920_v2 = vmax.f32 %v3544_v0, 0.0  ;;  %v4026_v4 = vpack.c.bf16 %v3922_v63, %v3921_v60  ;;  %v3565_v5 = vadd.f32 %v8766_v1, %v10451_v56 }
 0x313   : > { %v3556_v6 = vpop.f32.mrf.mxu0 }
 0x314   : > { %v4025_v7 = vpack.c.bf16 %v3920_v2, %v3919_v62  ;;  %v3557_v8 = vadd.f32 %v10451_v56, %v3556_v6  ;;  %v3925_v11 = vmax.f32 %v3565_v5, 0.0  ;;  %v9395_v5 = vld [vmem:[%s12644_s3 + $0x8] sm:$0xff]  }
 0x315   : > { %v8767_v9 = vpop.f32.mrf.mxu0  ;;  %5835 = vmatpush1.bf16.msra.mxu1 %v9395_v5 }
 0x316   : > { %8904 = vmatprep.mubr.bf16.mxu1 %v4025_v7  ;;  %v3568_v10 = vadd.f32 %v8767_v9, %v10451_v56  ;;  %v3923_v13 = vmax.f32 %v3557_v8, 0.0  ;;  %5836 = vmatprep.subr.bf16.mxu1 %v9494_v3 }
 0x317   : > { %8905 = vmatmul.mubr.bf16.gmra.mxu1 %v4026_v4  ;;  %v3559_v12 = vpop.f32.mrf.mxu0 }
 0x318   : > { %v3926_v14 = vmax.f32 %v3568_v10, 0.0  ;;  %v3560_v15 = vadd.f32 %v10451_v56, %v3559_v12 }
 0x319   : > { %v8770_v16 = vpop.f32.mrf.mxu0 }
 0x31a   : > { %v3924_v17 = vmax.f32 %v3560_v15, 0.0  ;;  %v4028_v18 = vpack.c.bf16 %v3926_v14, %v3925_v11  ;;  %v3581_v19 = vadd.f32 %v8770_v16, %v10451_v56 }
 0x31b   : > { %v3572_v21 = vpop.f32.mrf.mxu0 }
 0x31c   : > { %v4027_v22 = vpack.c.bf16 %v3924_v17, %v3923_v13  ;;  %v3573_v23 = vadd.f32 %v10451_v56, %v3572_v21  ;;  %v3929_v26 = vmax.f32 %v3581_v19, 0.0  ;;  %v9396_v21 = vld [vmem:[%s12644_s3] sm:$0xff]  }
 0x31d   : > { %v8771_v25 = vpop.f32.mrf.mxu0  ;;  %5837 = vmatpush1.bf16.msra.mxu1 %v9396_v21 }
 0x31e   : > { %8908 = vmatprep.mubr.bf16.mxu1 %v4027_v22  ;;  %v3584_v47 = vadd.f32 %v8771_v25, %v10451_v56  ;;  %v3927_v28 = vmax.f32 %v3573_v23, 0.0  ;;  %5838 = vmatprep.subr.bf16.mxu1 %v9494_v3 }
 0x31f   : > { %8909 = vmatmul.mubr.bf16.gmra.mxu1 %v4028_v18  ;;  %v3575_v27 = vpop.f32.mrf.mxu0 }
 0x320   : > { %v3930_v29 = vmax.f32 %v3584_v47, 0.0  ;;  %v3576_v20 = vadd.f32 %v10451_v56, %v3575_v27 }
 0x321   : > { %v8774_v30 = vpop.f32.mrf.mxu0 }
 0x322   : > { %v3928_v31 = vmax.f32 %v3576_v20, 0.0  ;;  %v4030_v33 = vpack.c.bf16 %v3930_v29, %v3929_v26  ;;  %v3597_v34 = vadd.f32 %v8774_v30, %v10451_v56 }
 0x323   : > { %v3588_v35 = vpop.f32.mrf.mxu0 }
 0x324   : > { %v4029_v36 = vpack.c.bf16 %v3928_v31, %v3927_v28  ;;  %v3589_v37 = vadd.f32 %v10451_v56, %v3588_v35  ;;  %v3933_v41 = vmax.f32 %v3597_v34, 0.0  ;;  %v9397_v35 = vld [vmem:[%s12644_s3 + $0x78] sm:$0xff]  }
 0x325   : > { %v8775_v39 = vpop.f32.mrf.mxu0  ;;  %5839 = vmatpush2.bf16.msra.mxu1 %v9397_v35 }
 0x326   : > { %8912 = vmatprep.mubr.bf16.mxu1 %v4029_v36  ;;  %v3600_v40 = vadd.f32 %v8775_v39, %v10451_v56  ;;  %v3931_v32 = vmax.f32 %v3589_v37, 0.0  ;;  %5840 = vmatprep.subr.bf16.mxu1 %v9494_v3 }
 0x327   : > { %8913 = vmatmul.mubr.bf16.gmra.mxu1 %v4030_v33  ;;  %v3591_v42 = vpop.f32.mrf.mxu0 }
 0x328   : > { %v3934_v43 = vmax.f32 %v3600_v40, 0.0  ;;  %v3592_v44 = vadd.f32 %v10451_v56, %v3591_v42 }
 0x329   : > { %v8778_v46 = vpop.f32.mrf.mxu0 }
 0x32a   : > { %v3932_v48 = vmax.f32 %v3592_v44, 0.0  ;;  %v4032_v49 = vpack.c.bf16 %v3934_v43, %v3933_v41  ;;  %v3613_v50 = vadd.f32 %v8778_v46, %v10451_v56 }
 0x32b   : > { %v3604_v51 = vpop.f32.mrf.mxu0 }
 0x32c   : > { %v4031_v52 = vpack.c.bf16 %v3932_v48, %v3931_v32  ;;  %v3605_v53 = vadd.f32 %v10451_v56, %v3604_v51  ;;  %v3937_v57 = vmax.f32 %v3613_v50, 0.0  ;;  %v9398_v51 = vld [vmem:[%s12644_s3 + $0x70] sm:$0xff]  }
 0x32d   : > { %v8779_v54 = vpop.f32.mrf.mxu0  ;;  %5841 = vmatpush2.bf16.msra.mxu1 %v9398_v51 }
 0x32e   : > { %8916 = vmatprep.mubr.bf16.mxu1 %v4031_v52  ;;  %v3616_v55 = vadd.f32 %v8779_v54, %v10451_v56  ;;  %v3935_v58 = vmax.f32 %v3605_v53, 0.0  ;;  %5842 = vmatprep.subr.bf16.mxu1 %v9494_v3 }
 0x32f   : > { %8917 = vmatmul.mubr.bf16.gmra.mxu1 %v4032_v49  ;;  %v3607_v38 = vpop.f32.mrf.mxu0 }
 0x330   : > { %v3938_v59 = vmax.f32 %v3616_v55, 0.0  ;;  %v3608_v60 = vadd.f32 %v10451_v56, %v3607_v38 }
 0x331   : > { %v8782_v61 = vpop.f32.mrf.mxu0 }
 0x332   : > { %v3936_v62 = vmax.f32 %v3608_v60, 0.0  ;;  %v4034_v63 = vpack.c.bf16 %v3938_v59, %v3937_v57  ;;  %v3629_v0 = vadd.f32 %v8782_v61, %v10451_v56 }
 0x333   : > { %v3620_v1 = vpop.f32.mrf.mxu0 }
 0x334   : > { %v4033_v2 = vpack.c.bf16 %v3936_v62, %v3935_v58  ;;  %v3621_v4 = vadd.f32 %v10451_v56, %v3620_v1  ;;  %v3941_v8 = vmax.f32 %v3629_v0, 0.0 }
 0x335   : > { %v8783_v6 = vpop.f32.mrf.mxu0 }
 0x336   : > { %8920 = vmatprep.mubr.bf16.mxu1 %v4033_v2  ;;  %v3632_v7 = vadd.f32 %v8783_v6, %v10451_v56  ;;  %v3939_v10 = vmax.f32 %v3621_v4, 0.0  ;;  %v9399_v2 = vld [vmem:[%s12644_s3 + $0x68] sm:$0xff]  }
 0x337   : > { %8921 = vmatmul.mubr.bf16.gmra.mxu1 %v4034_v63  ;;  %v3623_v9 = vpop.f32.mrf.mxu0 }
 0x338   : > { %v3942_v11 = vmax.f32 %v3632_v7, 0.0  ;;  %v3624_v12 = vadd.f32 %v10451_v56, %v3623_v9  ;;  %5843 = vmatpush2.bf16.msra.mxu1 %v9399_v2 }
 0x339   : > { %v8786_v13 = vpop.f32.mrf.mxu0  ;;  %5844 = vmatprep.subr.bf16.mxu1 %v9494_v3 }
 0x33a   : > { %v3940_v14 = vmax.f32 %v3624_v12, 0.0  ;;  %v4036_v15 = vpack.c.bf16 %v3942_v11, %v3941_v8  ;;  %v3645_v16 = vadd.f32 %v8786_v13, %v10451_v56 }
 0x33b   : > { %v3636_v17 = vpop.f32.mrf.mxu0 }
 0x33c   : > { %v4035_v18 = vpack.c.bf16 %v3940_v14, %v3939_v10  ;;  %v3637_v19 = vadd.f32 %v10451_v56, %v3636_v17  ;;  %v3945_v24 = vmax.f32 %v3645_v16, 0.0 }
 0x33d   : > { %v8787_v22 = vpop.f32.mrf.mxu0 }
 0x33e   : > { %8924 = vmatprep.mubr.bf16.mxu1 %v4035_v18  ;;  %v3648_v23 = vadd.f32 %v8787_v22, %v10451_v56  ;;  %v3943_v47 = vmax.f32 %v3637_v19, 0.0  ;;  %v9400_v18 = vld [vmem:[%s12644_s3 + $0x60] sm:$0xff]  }
 0x33f   : > { %8925 = vmatmul.mubr.bf16.gmra.mxu1 %v4036_v15  ;;  %v3639_v25 = vpop.f32.mrf.mxu0 }
 0x340   : > { %v3946_v26 = vmax.f32 %v3648_v23, 0.0  ;;  %v3640_v27 = vadd.f32 %v10451_v56, %v3639_v25  ;;  %5845 = vmatpush2.bf16.msra.mxu1 %v9400_v18 }
 0x341   : > { %v8790_v28 = vpop.f32.mrf.mxu0  ;;  %5846 = vmatprep.subr.bf16.mxu1 %v9494_v3 }
 0x342   : > { %v3944_v29 = vmax.f32 %v3640_v27, 0.0  ;;  %v4038_v20 = vpack.c.bf16 %v3946_v26, %v3945_v24  ;;  %v3661_v30 = vadd.f32 %v8790_v28, %v10451_v56 }
 0x343   : > { %v3652_v31 = vpop.f32.mrf.mxu0 }
 0x344   : > { %v4037_v33 = vpack.c.bf16 %v3944_v29, %v3943_v47  ;;  %v3653_v34 = vadd.f32 %v10451_v56, %v3652_v31  ;;  %v3949_v39 = vmax.f32 %v3661_v30, 0.0 }
 0x345   : > { %v8791_v36 = vpop.f32.mrf.mxu0 }
 0x346   : > { %8928 = vmatprep.mubr.bf16.mxu1 %v4037_v33  ;;  %v3664_v37 = vadd.f32 %v8791_v36, %v10451_v56  ;;  %v3947_v41 = vmax.f32 %v3653_v34, 0.0  ;;  %v9401_v33 = vld [vmem:[%s12644_s3 + $0x58] sm:$0xff]  }
 0x347   : > { %8929 = vmatmul.mubr.bf16.gmra.mxu1 %v4038_v20  ;;  %v3655_v40 = vpop.f32.mrf.mxu0 }
 0x348   : > { %v3950_v42 = vmax.f32 %v3664_v37, 0.0  ;;  %v3656_v32 = vadd.f32 %v10451_v56, %v3655_v40  ;;  %5847 = vmatpush2.bf16.msra.mxu1 %v9401_v33 }
 0x349   : > { %v8794_v43 = vpop.f32.mrf.mxu0  ;;  %5848 = vmatprep.subr.bf16.mxu1 %v9494_v3 }
 0x34a   : > { %v3948_v44 = vmax.f32 %v3656_v32, 0.0  ;;  %v4040_v45 = vpack.c.bf16 %v3950_v42, %v3949_v39  ;;  %v3677_v46 = vadd.f32 %v8794_v43, %v10451_v56 }
 0x34b   : > { %v3668_v48 = vpop.f32.mrf.mxu0 }
 0x34c   : > { %v4039_v49 = vpack.c.bf16 %v3948_v44, %v3947_v41  ;;  %v3669_v50 = vadd.f32 %v10451_v56, %v3668_v48  ;;  %v3953_v54 = vmax.f32 %v3677_v46, 0.0 }
 0x34d   : > { %v8795_v52 = vpop.f32.mrf.mxu0 }
 0x34e   : > { %8932 = vmatprep.mubr.bf16.mxu1 %v4039_v49  ;;  %v3680_v53 = vadd.f32 %v8795_v52, %v10451_v56  ;;  %v3951_v57 = vmax.f32 %v3669_v50, 0.0  ;;  %v9402_v49 = vld [vmem:[%s12644_s3 + $0x50] sm:$0xff]  }
 0x34f   : > { %8933 = vmatmul.mubr.bf16.gmra.mxu1 %v4040_v45  ;;  %v3671_v55 = vpop.f32.mrf.mxu0 }
 0x350   : > { %v3954_v38 = vmax.f32 %v3680_v53, 0.0  ;;  %v3672_v58 = vadd.f32 %v10451_v56, %v3671_v55  ;;  %5849 = vmatpush2.bf16.msra.mxu1 %v9402_v49 }
 0x351   : > { %v8798_v59 = vpop.f32.mrf.mxu0  ;;  %5850 = vmatprep.subr.bf16.mxu1 %v9494_v3 }
 0x352   : > { %v3952_v60 = vmax.f32 %v3672_v58, 0.0  ;;  %v4042_v61 = vpack.c.bf16 %v3954_v38, %v3953_v54  ;;  %v3693_v62 = vadd.f32 %v8798_v59, %v10451_v56 }
 0x353   : > { %v3684_v63 = vpop.f32.mrf.mxu0 }
 0x354   : > { %v3685_v0 = vadd.f32 %v10451_v56, %v3684_v63  ;;  %v4041_v1 = vpack.c.bf16 %v3952_v60, %v3951_v57  ;;  %v3957_v6 = vmax.f32 %v3693_v62, 0.0  ;;  %v10631_v57 = vld [vmem:[%s12643_s2 + $0x2] ss:$0 sm:$0xff] }
 0x355   : > { %v8799_v4 = vpop.f32.mrf.mxu0 }
 0x356   : > { %8936 = vmatprep.mubr.bf16.mxu1 %v4041_v1  ;;  %v3696_v5 = vadd.f32 %v8799_v4, %v10451_v56  ;;  %v3955_v8 = vmax.f32 %v3685_v0, 0.0  ;;  %v9403_v0 = vld [vmem:[%s12644_s3 + $0x48] sm:$0xff]  }
 0x357   : > { %8937 = vmatmul.mubr.bf16.gmra.mxu1 %v4042_v61  ;;  %v3687_v7 = vpop.f32.mrf.mxu0 }
 0x358   : > { %v3958_v9 = vmax.f32 %v3696_v5, 0.0  ;;  %v3688_v10 = vadd.f32 %v10451_v56, %v3687_v7  ;;  %5851 = vmatpush2.bf16.msra.mxu1 %v9403_v0 }
 0x359   : > { %v8802_v11 = vpop.f32.mrf.mxu0  ;;  %5852 = vmatprep.subr.bf16.mxu1 %v9494_v3 }
 0x35a   : > { %v3956_v12 = vmax.f32 %v3688_v10, 0.0  ;;  %v4044_v13 = vpack.c.bf16 %v3958_v9, %v3957_v6  ;;  %v3709_v14 = vadd.f32 %v8802_v11, %v10451_v56 }
 0x35b   : > { %v3700_v15 = vpop.f32.mrf.mxu0 }
 0x35c   : > { %v3701_v16 = vadd.f32 %v10451_v56, %v3700_v15  ;;  %v4043_v17 = vpack.c.bf16 %v3956_v12, %v3955_v8  ;;  %v3961_v22 = vmax.f32 %v3709_v14, 0.0 }
 0x35d   : > { %v8803_v19 = vpop.f32.mrf.mxu0 }
 0x35e   : > { %v3712_v21 = vadd.f32 %v8803_v19, %v10451_v56  ;;  %8940 = vmatprep.mubr.bf16.mxu1 %v4043_v17  ;;  %v3959_v24 = vmax.f32 %v3701_v16, 0.0  ;;  %v9404_v16 = vld [vmem:[%s12644_s3 + $0x40] sm:$0xff]  }
 0x35f   : > { %v3703_v23 = vpop.f32.mrf.mxu0  ;;  %8941 = vmatmul.mubr.bf16.gmra.mxu1 %v4044_v13 }
 0x360   : > { %v3962_v25 = vmax.f32 %v3712_v21, 0.0  ;;  %v3704_v47 = vadd.f32 %v10451_v56, %v3703_v23  ;;  %5853 = vmatpush2.bf16.msra.mxu1 %v9404_v16 }
 0x361   : > { %v8806_v26 = vpop.f32.mrf.mxu0 }
 0x362   : > { %v3960_v27 = vmax.f32 %v3704_v47, 0.0  ;;  %v4046_v28 = vpack.c.bf16 %v3962_v25, %v3961_v22  ;;  %v3725_v29 = vadd.f32 %v8806_v26, %v10451_v56  ;;  %v10652_v47 = vld [vmem:[%s12643_s2 + $0x3] ss:$0 sm:$0xff] }
 0x363   : > { %v3716_v20 = vpop.f32.mrf.mxu0 }
 0x364   : > { %v3717_v30 = vadd.f32 %v10451_v56, %v3716_v20  ;;  %v4045_v31 = vpack.c.bf16 %v3960_v27, %v3959_v24  ;;  %v3965_v36 = vmax.f32 %v3725_v29, 0.0 }
 0x365   : > { %v8807_v34 = vpop.f32.mrf.mxu0 }
 0x366   : > { %v3728_v35 = vadd.f32 %v8807_v34, %v10451_v56  ;;  %8944 = vmatprep.mubr.bf16.mxu1 %v4045_v31  ;;  %v3963_v39 = vmax.f32 %v3717_v30, 0.0 }
 0x367   : > { %v3719_v37 = vpop.f32.mrf.mxu0  ;;  %8945 = vmatmul.mubr.bf16.gmra.mxu1 %v4046_v28 }
 0x368   : > { %v3966_v40 = vmax.f32 %v3728_v35, 0.0  ;;  %v3720_v41 = vadd.f32 %v10451_v56, %v3719_v37 }
 0x369   : > { %v8810_v42 = vpop.f32.mrf.mxu0 }
 0x36a   : > { %v3964_v32 = vmax.f32 %v3720_v41, 0.0  ;;  %v4048_v43 = vpack.c.bf16 %v3966_v40, %v3965_v36  ;;  %v3741_v44 = vadd.f32 %v8810_v42, %v10451_v56 }
 0x36b   : > { %v3732_v45 = vpop.f32.mrf.mxu0 }
 0x36c   : > { %v3733_v46 = vadd.f32 %v10451_v56, %v3732_v45  ;;  %v4047_v48 = vpack.c.bf16 %v3964_v32, %v3963_v39  ;;  %v3969_v52 = vmax.f32 %v3741_v44, 0.0 }
 0x36d   : > { %v8811_v50 = vpop.f32.mrf.mxu0 }
 0x36e   : > { %v3744_v51 = vadd.f32 %v8811_v50, %v10451_v56  ;;  %8948 = vmatprep.mubr.bf16.mxu1 %v4047_v48  ;;  %v3967_v54 = vmax.f32 %v3733_v46, 0.0 }
 0x36f   : > { %v3735_v53 = vpop.f32.mrf.mxu0  ;;  %8949 = vmatmul.mubr.bf16.gmra.mxu1 %v4048_v43 }
 0x370   : > { %v3970_v55 = vmax.f32 %v3744_v51, 0.0  ;;  %v3736_v38 = vadd.f32 %v10631_v57, %v3735_v53 }
 0x371   : > { %v8814_v58 = vpop.f32.mrf.mxu0 }
 0x372   : > { %v3968_v59 = vmax.f32 %v3736_v38, 0.0  ;;  %v4050_v60 = vpack.c.bf16 %v3970_v55, %v3969_v52  ;;  %v3757_v56 = vadd.f32 %v10631_v57, %v8814_v58 }
 0x373   : > { %v3748_v61 = vpop.f32.mrf.mxu0 }
 0x374   : > { %v3749_v62 = vadd.f32 %v10631_v57, %v3748_v61  ;;  %v4049_v63 = vpack.c.bf16 %v3968_v59, %v3967_v54  ;;  %v3973_v4 = vmax.f32 %v3757_v56, 0.0 }
 0x375   : > { %v8815_v1 = vpop.f32.mrf.mxu0 }
 0x376   : > { %v3760_v2 = vadd.f32 %v10631_v57, %v8815_v1  ;;  %8952 = vmatprep.mubr.bf16.mxu1 %v4049_v63  ;;  %v3971_v6 = vmax.f32 %v3749_v62, 0.0 }
 0x377   : > { %v3751_v5 = vpop.f32.mrf.mxu0  ;;  %8953 = vmatmul.mubr.bf16.gmra.mxu1 %v4050_v60 }
 0x378   : > { %v3974_v7 = vmax.f32 %v3760_v2, 0.0  ;;  %v3752_v8 = vadd.f32 %v10631_v57, %v3751_v5 }
 0x379   : > { %v8818_v9 = vpop.f32.mrf.mxu0 }
 0x37a   : > { %v3972_v10 = vmax.f32 %v3752_v8, 0.0  ;;  %v4052_v11 = vpack.c.bf16 %v3974_v7, %v3973_v4  ;;  %v3773_v12 = vadd.f32 %v10631_v57, %v8818_v9 }
 0x37b   : > { %v3764_v13 = vpop.f32.mrf.mxu0 }
 0x37c   : > { %v3765_v14 = vadd.f32 %v10631_v57, %v3764_v13  ;;  %v4051_v15 = vpack.c.bf16 %v3972_v10, %v3971_v6  ;;  %v3977_v19 = vmax.f32 %v3773_v12, 0.0 }
 0x37d   : > { %v8819_v17 = vpop.f32.mrf.mxu0 }
 0x37e   : > { %v3776_v3 = vadd.f32 %v10631_v57, %v8819_v17  ;;  %8956 = vmatprep.mubr.bf16.mxu1 %v4051_v15  ;;  %v3975_v22 = vmax.f32 %v3765_v14, 0.0 }
 0x37f   : > { %v8862_v18 = vpop.f32.mrf.mxu1  ;;  %v3767_v21 = vpop.f32.mrf.mxu0  ;;  %8957 = vmatmul.mubr.bf16.gmra.mxu1 %v4052_v11 }
 0x380   : > { %v3978_v23 = vmax.f32 %v3776_v3, 0.0  ;;  %v3768_v24 = vadd.f32 %v10631_v57, %v3767_v21  ;;  %v4183_v35 = vadd.f32 %v8862_v18, %v10652_v47 }
 0x381   : > { %v4174_v25 = vpop.f32.mrf.mxu1  ;;  %v8822_v27 = vpop.f32.mrf.mxu0 }
 0x382   : > { %v3976_v26 = vmax.f32 %v3768_v24, 0.0  ;;  %v4054_v29 = vpack.c.bf16 %v3978_v23, %v3977_v19  ;;  %v4175_v20 = vadd.f32 %v10652_v47, %v4174_v25  ;;  %v3789_v31 = vadd.f32 %v10631_v57, %v8822_v27 }
 0x383   : > { %v8863_v28 = vpop.f32.mrf.mxu1  ;;  %v3780_v33 = vpop.f32.mrf.mxu0  ;;  %v4687_v48 = vmax.f32 %v4183_v35, 0.0 }
 0x384   : > { %v4186_v30 = vadd.f32 %v8863_v28, %v10652_v47  ;;  %v4053_v34 = vpack.c.bf16 %v3976_v26, %v3975_v22  ;;  %v3781_v37 = vadd.f32 %v10631_v57, %v3780_v33  ;;  %v4685_v43 = vmax.f32 %v4175_v20, 0.0 }
 0x385   : > { %v4177_v36 = vpop.f32.mrf.mxu1  ;;  %v8823_v40 = vpop.f32.mrf.mxu0  ;;  %v3981_v45 = vmax.f32 %v3789_v31, 0.0 }
 0x386   : > { %v4178_v39 = vadd.f32 %v10652_v47, %v4177_v36  ;;  %8960 = vmatprep.mubr.bf16.mxu1 %v4053_v34  ;;  %v4688_v41 = vmax.f32 %v4186_v30, 0.0  ;;  %v3792_v32 = vadd.f32 %v10631_v57, %v8823_v40  ;;  %v3979_v50 = vmax.f32 %v3781_v37, 0.0 }
 0x387   : > { %v8866_v42 = vpop.f32.mrf.mxu1  ;;  %8961 = vmatmul.mubr.bf16.gmra.mxu1 %v4054_v29  ;;  %v3783_v46 = vpop.f32.mrf.mxu0 }
 0x388   : > { %v4686_v44 = vmax.f32 %v4178_v39, 0.0  ;;  %v3982_v51 = vmax.f32 %v3792_v32, 0.0  ;;  %v3784_v52 = vadd.f32 %v10631_v57, %v3783_v46  ;;  %v4814_v55 = vpack.c.bf16 %v4688_v41, %v4687_v48 }
 0x389   : > { %v4190_v49 = vpop.f32.mrf.mxu1  ;;  %v8826_v54 = vpop.f32.mrf.mxu0  ;;  %v4199_v63 = vadd.f32 %v8866_v42, %v10652_v47 }
 0x38a   : > { %v4813_v53 = vpack.c.bf16 %v4686_v44, %v4685_v43  ;;  %v3980_v58 = vmax.f32 %v3784_v52, 0.0  ;;  %v4191_v59 = vadd.f32 %v10652_v47, %v4190_v49  ;;  %v4056_v56 = vpack.c.bf16 %v3982_v51, %v3981_v45 }
 0x38b   : > { %v8867_v38 = vpop.f32.mrf.mxu1  ;;  %v3805_v61 = vadd.f32 %v10631_v57, %v8826_v54  ;;  %v3796_v62 = vpop.f32.mrf.mxu0  ;;  %v4691_v13 = vmax.f32 %v4199_v63, 0.0 }
 0x38c   : > { %v4202_v60 = vadd.f32 %v8867_v38, %v10652_v47  ;;  %9004 = vmatprep.mubr.bf16.mxu0 %v4813_v53  ;;  %v3797_v1 = vadd.f32 %v10631_v57, %v3796_v62  ;;  %v4055_v2 = vpack.c.bf16 %v3980_v58, %v3979_v50  ;;  %v4689_v9 = vmax.f32 %v4191_v59, 0.0 }
 0x38d   : > { %v4193_v0 = vpop.f32.mrf.mxu1  ;;  %9005 = vmatmul.mubr.bf16.vlgmr.msra.gmra.mxu0 %v4814_v55  ;;  %v8827_v5 = vpop.f32.mrf.mxu0  ;;  %v3985_v11 = vmax.f32 %v3805_v61, 0.0 }
 0x38e   : > { %v4194_v4 = vadd.f32 %v10652_v47, %v4193_v0  ;;  %v4692_v6 = vmax.f32 %v4202_v60, 0.0  ;;  %v3808_v8 = vadd.f32 %v10631_v57, %v8827_v5  ;;  %8964 = vmatprep.mubr.bf16.mxu1 %v4055_v2  ;;  %v3983_v15 = vmax.f32 %v3797_v1, 0.0 }
 0x38f   : > { %v8870_v7 = vpop.f32.mrf.mxu1  ;;  %v3799_v12 = vpop.f32.mrf.mxu0  ;;  %8965 = vmatmul.mubr.bf16.gmra.mxu1 %v4056_v56 }
 0x390   : > { %v4690_v10 = vmax.f32 %v4194_v4, 0.0  ;;  %v3986_v16 = vmax.f32 %v3808_v8, 0.0  ;;  %v3800_v17 = vadd.f32 %v10631_v57, %v3799_v12  ;;  %v4816_v19 = vpack.c.bf16 %v4692_v6, %v4691_v13 }
 0x391   : > { %v4206_v14 = vpop.f32.mrf.mxu1  ;;  %v4215_v28 = vadd.f32 %v8870_v7, %v10652_v47 }
 0x392   : > { %v4815_v3 = vpack.c.bf16 %v4690_v10, %v4689_v9  ;;  %v8830_v18 = vpop.f32.mrf.mxu0  ;;  %v3984_v22 = vmax.f32 %v3800_v17, 0.0  ;;  %v4207_v23 = vadd.f32 %v10652_v47, %v4206_v14  ;;  %v4058_v25 = vpack.c.bf16 %v3986_v16, %v3985_v11 }
 0x393   : > { %v8871_v21 = vpop.f32.mrf.mxu1  ;;  %v3821_v26 = vadd.f32 %v10631_v57, %v8830_v18  ;;  %v4695_v42 = vmax.f32 %v4215_v28, 0.0 }
 0x394   : > { %v4218_v24 = vadd.f32 %v8871_v21, %v10652_v47  ;;  %9008 = vmatprep.mubr.bf16.mxu0 %v4815_v3  ;;  %v3812_v27 = vpop.f32.mrf.mxu0  ;;  %v4057_v30 = vpack.c.bf16 %v3984_v22, %v3983_v15  ;;  %v4693_v37 = vmax.f32 %v4207_v23, 0.0 }
 0x395   : > { %v4209_v29 = vpop.f32.mrf.mxu1  ;;  %9009 = vmatmul.mubr.bf16.gmra.mxu0 %v4816_v19  ;;  %v3813_v20 = vadd.f32 %v10631_v57, %v3812_v27  ;;  %v3989_v40 = vmax.f32 %v3821_v26, 0.0 }
 0x396   : > { %v4210_v31 = vadd.f32 %v10652_v47, %v4209_v29  ;;  %v8831_v33 = vpop.f32.mrf.mxu0  ;;  %v4696_v34 = vmax.f32 %v4218_v24, 0.0  ;;  %8968 = vmatprep.mubr.bf16.mxu1 %v4057_v30 }
 0x397   : > { %v8874_v35 = vpop.f32.mrf.mxu1  ;;  %v3824_v36 = vadd.f32 %v10631_v57, %v8831_v33  ;;  %8969 = vmatmul.mubr.bf16.gmra.mxu1 %v4058_v25  ;;  %v3987_v43 = vmax.f32 %v3813_v20, 0.0 }
 0x398   : > { %v4694_v39 = vmax.f32 %v4210_v31, 0.0  ;;  %v3815_v41 = vpop.f32.mrf.mxu0  ;;  %v4818_v49 = vpack.c.bf16 %v4696_v34, %v4695_v42  ;;  %v4231_v50 = vadd.f32 %v8874_v35, %v10652_v47 }
 0x399   : > { %v4222_v32 = vpop.f32.mrf.mxu1  ;;  %v3990_v44 = vmax.f32 %v3824_v36, 0.0  ;;  %v3816_v45 = vadd.f32 %v10631_v57, %v3815_v41 }
 0x39a   : > { %v4817_v46 = vpack.c.bf16 %v4694_v39, %v4693_v37  ;;  %v8834_v48 = vpop.f32.mrf.mxu0  ;;  %v4223_v53 = vadd.f32 %v10652_v47, %v4222_v32  ;;  %v4699_v63 = vmax.f32 %v4231_v50, 0.0 }
 0x39b   : > { %v8875_v51 = vpop.f32.mrf.mxu1  ;;  %v3988_v52 = vmax.f32 %v3816_v45, 0.0  ;;  %v4060_v55 = vpack.c.bf16 %v3990_v44, %v3989_v40  ;;  %v3837_v38 = vadd.f32 %v10631_v57, %v8834_v48 }
 0x39c   : > { %v4234_v54 = vadd.f32 %v8875_v51, %v10652_v47  ;;  %9012 = vmatprep.mubr.bf16.mxu0 %v4817_v46  ;;  %v3828_v58 = vpop.f32.mrf.mxu0  ;;  %v4697_v4 = vmax.f32 %v4223_v53, 0.0 }
 0x39d   : > { %v4225_v59 = vpop.f32.mrf.mxu1  ;;  %9013 = vmatmul.mubr.bf16.gmra.mxu0 %v4818_v49  ;;  %v3829_v60 = vadd.f32 %v10631_v57, %v3828_v58  ;;  %v4059_v56 = vpack.c.bf16 %v3988_v52, %v3987_v43  ;;  %v3993_v6 = vmax.f32 %v3837_v38, 0.0 }
 0x39e   : > { %v4226_v61 = vadd.f32 %v10652_v47, %v4225_v59  ;;  %v8835_v62 = vpop.f32.mrf.mxu0  ;;  %v4700_v0 = vmax.f32 %v4234_v54, 0.0 }
 0x39f   : > { %v8878_v1 = vpop.f32.mrf.mxu1  ;;  %v3840_v2 = vadd.f32 %v10631_v57, %v8835_v62  ;;  %8972 = vmatprep.mubr.bf16.mxu1 %v4059_v56  ;;  %v3991_v10 = vmax.f32 %v3829_v60, 0.0 }
 0x3a0   : > { %v4698_v5 = vmax.f32 %v4226_v61, 0.0  ;;  %v3831_v7 = vpop.f32.mrf.mxu0  ;;  %8973 = vmatmul.mubr.bf16.gmra.mxu1 %v4060_v55  ;;  %v4247_v8 = vadd.f32 %v8878_v1, %v10652_v47  ;;  %v4820_v16 = vpack.c.bf16 %v4700_v0, %v4699_v63 }
 0x3a1   : > { %v4238_v9 = vpop.f32.mrf.mxu1  ;;  %v3994_v11 = vmax.f32 %v3840_v2, 0.0  ;;  %v3832_v12 = vadd.f32 %v10631_v57, %v3831_v7 }
 0x3a2   : > { %v4239_v13 = vadd.f32 %v10652_v47, %v4238_v9  ;;  %v4819_v14 = vpack.c.bf16 %v4698_v5, %v4697_v4  ;;  %v8838_v15 = vpop.f32.mrf.mxu0  ;;  %v4703_v23 = vmax.f32 %v4247_v8, 0.0 }
 0x3a3   : > { %v8879_v17 = vpop.f32.mrf.mxu1  ;;  %v3992_v3 = vmax.f32 %v3832_v12, 0.0  ;;  %v4062_v19 = vpack.c.bf16 %v3994_v11, %v3993_v6  ;;  %v3853_v21 = vadd.f32 %v10631_v57, %v8838_v15 }
 0x3a4   : > { %v4250_v18 = vadd.f32 %v8879_v17, %v10652_v47  ;;  %9016 = vmatprep.mubr.bf16.mxu0 %v4819_v14  ;;  %v3844_v22 = vpop.f32.mrf.mxu0  ;;  %v4701_v27 = vmax.f32 %v4239_v13, 0.0 }
 0x3a5   : > { %v4241_v24 = vpop.f32.mrf.mxu1  ;;  %9017 = vmatmul.mubr.bf16.gmra.mxu0 %v4820_v16  ;;  %v3845_v25 = vadd.f32 %v10631_v57, %v3844_v22  ;;  %v4061_v26 = vpack.c.bf16 %v3992_v3, %v3991_v10  ;;  %v3997_v34 = vmax.f32 %v3853_v21, 0.0 }
 0x3a6   : > { %v4704_v28 = vmax.f32 %v4250_v18, 0.0  ;;  %v4242_v29 = vadd.f32 %v10652_v47, %v4241_v24  ;;  %v8839_v20 = vpop.f32.mrf.mxu0  ;;  %v9416_v24 = vld [vmem:[#allocation2] sm:$0xff]  }
 0x3a7   : > { %v8882_v30 = vpop.f32.mrf.mxu1  ;;  %v3856_v31 = vadd.f32 %v10631_v57, %v8839_v20  ;;  %8976 = vmatprep.mubr.bf16.mxu1 %v4061_v26  ;;  %v3995_v35 = vmax.f32 %v3845_v25, 0.0 }
 0x3a8   : > { %v4702_v33 = vmax.f32 %v4242_v29, 0.0  ;;  %v3847_v36 = vpop.f32.mrf.mxu0  ;;  %8977 = vmatmul.mubr.bf16.gmra.mxu1 %v4062_v19  ;;  %v4822_v37 = vpack.c.bf16 %v4704_v28, %v4703_v23  ;;  %v4263_v39 = vadd.f32 %v8882_v30, %v10652_v47 }
 0x3a9   : > { %v4254_v40 = vpop.f32.mrf.mxu1  ;;  %v3998_v41 = vmax.f32 %v3856_v31, 0.0  ;;  %v3848_v42 = vadd.f32 %v10631_v57, %v3847_v36 }
 0x3aa   : > { %v4821_v32 = vpack.c.bf16 %v4702_v33, %v4701_v27  ;;  %v4255_v43 = vadd.f32 %v10652_v47, %v4254_v40  ;;  %v8842_v44 = vpop.f32.mrf.mxu0  ;;  %v4707_v52 = vmax.f32 %v4263_v39, 0.0 }
 0x3ab   : > { %v8883_v45 = vpop.f32.mrf.mxu1  ;;  %v3996_v46 = vmax.f32 %v3848_v42, 0.0  ;;  %v4064_v49 = vpack.c.bf16 %v3998_v41, %v3997_v34  ;;  %v3869_v50 = vadd.f32 %v10631_v57, %v8842_v44 }
 0x3ac   : > { %9020 = vmatprep.mubr.bf16.mxu0 %v4821_v32  ;;  %v4266_v48 = vadd.f32 %v8883_v45, %v10652_v47  ;;  %v3860_v51 = vpop.f32.mrf.mxu0  ;;  %v4705_v38 = vmax.f32 %v4255_v43, 0.0 }
 0x3ad   : > { %9021 = vmatmul.mubr.bf16.gmra.mxu0 %v4822_v37  ;;  %v4257_v53 = vpop.f32.mrf.mxu1  ;;  %v3861_v54 = vadd.f32 %v10631_v57, %v3860_v51  ;;  %v4063_v55 = vpack.c.bf16 %v3996_v46, %v3995_v35  ;;  %v4001_v63 = vmax.f32 %v3869_v50, 0.0 }
 0x3ae   : > { %v4708_v58 = vmax.f32 %v4266_v48, 0.0  ;;  %v4258_v59 = vadd.f32 %v10652_v47, %v4257_v53  ;;  %v8843_v60 = vpop.f32.mrf.mxu0 }
 0x3af   : > { %v8886_v56 = vpop.f32.mrf.mxu1  ;;  %v3872_v61 = vadd.f32 %v10631_v57, %v8843_v60  ;;  %8980 = vmatprep.mubr.bf16.mxu1 %v4063_v55  ;;  %v3999_v0 = vmax.f32 %v3861_v54, 0.0 }
 0x3b0   : > { %v4706_v62 = vmax.f32 %v4258_v59, 0.0  ;;  %v3863_v1 = vpop.f32.mrf.mxu0  ;;  %8981 = vmatmul.mubr.bf16.gmra.mxu1 %v4064_v49  ;;  %v4824_v2 = vpack.c.bf16 %v4708_v58, %v4707_v52  ;;  %v4279_v4 = vadd.f32 %v8886_v56, %v10652_v47 }
 0x3b1   : > { %v4270_v5 = vpop.f32.mrf.mxu1  ;;  %v4002_v6 = vmax.f32 %v3872_v61, 0.0  ;;  %v3864_v7 = vadd.f32 %v10631_v57, %v3863_v1 }
 0x3b2   : > { %v4823_v8 = vpack.c.bf16 %v4706_v62, %v4705_v38  ;;  %v4271_v9 = vadd.f32 %v10652_v47, %v4270_v5  ;;  %v4711_v14 = vmax.f32 %v4279_v4, 0.0 }
 0x3b3   : > { %v8887_v10 = vpop.f32.mrf.mxu1  ;;  %v4000_v11 = vmax.f32 %v3864_v7, 0.0  ;;  %v4066_v13 = vpack.c.bf16 %v4002_v6, %v4001_v63 }
 0x3b4   : > { %9024 = vmatprep.mubr.bf16.mxu0 %v4823_v8  ;;  %v4282_v12 = vadd.f32 %v8887_v10, %v10652_v47  ;;  %v4709_v17 = vmax.f32 %v4271_v9, 0.0 }
 0x3b5   : > { %9025 = vmatmul.mubr.bf16.gmra.mxu0 %v4824_v2  ;;  %v4273_v15 = vpop.f32.mrf.mxu1  ;;  %v4065_v16 = vpack.c.bf16 %v4000_v11, %v3999_v0 }
 0x3b6   : > { %v4712_v3 = vmax.f32 %v4282_v12, 0.0  ;;  %v4274_v18 = vadd.f32 %v10652_v47, %v4273_v15 }
 0x3b7   : > { %v8890_v19 = vpop.f32.mrf.mxu1  ;;  %8984 = vmatprep.mubr.bf16.mxu1 %v4065_v16 }
 0x3b8   : > { %v4710_v57 = vmax.f32 %v4274_v18, 0.0  ;;  %8985 = vmatmul.mubr.bf16.gmra.mxu1 %v4066_v13  ;;  %v4826_v21 = vpack.c.bf16 %v4712_v3, %v4711_v14  ;;  %v4295_v22 = vadd.f32 %v8890_v19, %v10652_v47 }
 0x3b9   : > { %v4286_v23 = vpop.f32.mrf.mxu1  ;;  %5854 = vmatprep.mubr.bf16.mxu1 %v9416_v24 }
 0x3ba   : > { %v4825_v25 = vpack.c.bf16 %v4710_v57, %v4709_v17  ;;  %v4287_v26 = vadd.f32 %v10652_v47, %v4286_v23  ;;  %v4715_v29 = vmax.f32 %v4295_v22, 0.0 }
 0x3bb   : > { %v8891_v27 = vpop.f32.mrf.mxu1 }
 0x3bc   : > { %9028 = vmatprep.mubr.bf16.mxu0 %v4825_v25  ;;  %v4298_v28 = vadd.f32 %v8891_v27, %v10652_v47  ;;  %v4713_v30 = vmax.f32 %v4287_v26, 0.0 }
 0x3bd   : > { %9029 = vmatmul.mubr.bf16.gmra.mxu0 %v4826_v21  ;;  %v4289_v20 = vpop.f32.mrf.mxu1 }
 0x3be   : > { %v4716_v31 = vmax.f32 %v4298_v28, 0.0  ;;  %v4290_v33 = vadd.f32 %v10652_v47, %v4289_v20 }
 0x3bf   : > { %v8894_v34 = vpop.f32.mrf.mxu1 }
 0x3c0   : > { %v4714_v35 = vmax.f32 %v4290_v33, 0.0  ;;  %v4828_v36 = vpack.c.bf16 %v4716_v31, %v4715_v29  ;;  %v4311_v37 = vadd.f32 %v8894_v34, %v10652_v47 }
 0x3c1   : > { %v4302_v39 = vpop.f32.mrf.mxu1 }
 0x3c2   : > { %v4827_v40 = vpack.c.bf16 %v4714_v35, %v4713_v30  ;;  %v4303_v41 = vadd.f32 %v10652_v47, %v4302_v39  ;;  %v4719_v43 = vmax.f32 %v4311_v37, 0.0 }
 0x3c3   : > { %v8895_v42 = vpop.f32.mrf.mxu1 }
 0x3c4   : > { %9032 = vmatprep.mubr.bf16.mxu0 %v4827_v40  ;;  %v4314_v32 = vadd.f32 %v8895_v42, %v10652_v47  ;;  %v4717_v45 = vmax.f32 %v4303_v41, 0.0 }
 0x3c5   : > { %9033 = vmatmul.mubr.bf16.gmra.mxu0 %v4828_v36  ;;  %v4305_v44 = vpop.f32.mrf.mxu1 }
 0x3c6   : > { %v4720_v46 = vmax.f32 %v4314_v32, 0.0  ;;  %v4306_v48 = vadd.f32 %v10652_v47, %v4305_v44 }
 0x3c7   : > { %v8898_v49 = vpop.f32.mrf.mxu1 }
 0x3c8   : > { %v4718_v50 = vmax.f32 %v4306_v48, 0.0  ;;  %v4830_v51 = vpack.c.bf16 %v4720_v46, %v4719_v43  ;;  %v4327_v52 = vadd.f32 %v8898_v49, %v10652_v47 }
 0x3c9   : > { %v4318_v53 = vpop.f32.mrf.mxu1 }
 0x3ca   : > { %v4829_v54 = vpack.c.bf16 %v4718_v50, %v4717_v45  ;;  %v4319_v55 = vadd.f32 %v10652_v47, %v4318_v53  ;;  %v4723_v59 = vmax.f32 %v4327_v52, 0.0 }
 0x3cb   : > { %v8899_v38 = vpop.f32.mrf.mxu1 }
 0x3cc   : > { %9036 = vmatprep.mubr.bf16.mxu0 %v4829_v54  ;;  %v4330_v58 = vadd.f32 %v8899_v38, %v10652_v47  ;;  %v4721_v56 = vmax.f32 %v4319_v55, 0.0 }
 0x3cd   : > { %9037 = vmatmul.mubr.bf16.gmra.mxu0 %v4830_v51  ;;  %v4321_v60 = vpop.f32.mrf.mxu1 }
 0x3ce   : > { %v4724_v61 = vmax.f32 %v4330_v58, 0.0  ;;  %v4322_v62 = vadd.f32 %v10652_v47, %v4321_v60 }
 0x3cf   : > { %v8902_v63 = vpop.f32.mrf.mxu1 }
 0x3d0   : > { %v4722_v0 = vmax.f32 %v4322_v62, 0.0  ;;  %v4832_v1 = vpack.c.bf16 %v4724_v61, %v4723_v59  ;;  %v4343_v2 = vadd.f32 %v8902_v63, %v10652_v47 }
 0x3d1   : > { %v4334_v4 = vpop.f32.mrf.mxu1 }
 0x3d2   : > { %v4831_v5 = vpack.c.bf16 %v4722_v0, %v4721_v56  ;;  %v4335_v6 = vadd.f32 %v10652_v47, %v4334_v4  ;;  %v4727_v9 = vmax.f32 %v4343_v2, 0.0 }
 0x3d3   : > { %v8903_v7 = vpop.f32.mrf.mxu1 }
 0x3d4   : > { %9040 = vmatprep.mubr.bf16.mxu0 %v4831_v5  ;;  %v4346_v8 = vadd.f32 %v8903_v7, %v10652_v47  ;;  %v4725_v11 = vmax.f32 %v4335_v6, 0.0 }
 0x3d5   : > { %9041 = vmatmul.mubr.bf16.gmra.mxu0 %v4832_v1  ;;  %v4337_v10 = vpop.f32.mrf.mxu1 }
 0x3d6   : > { %v4728_v12 = vmax.f32 %v4346_v8, 0.0  ;;  %v4338_v13 = vadd.f32 %v10652_v47, %v4337_v10 }
 0x3d7   : > { %v8906_v14 = vpop.f32.mrf.mxu1 }
 0x3d8   : > { %v4726_v15 = vmax.f32 %v4338_v13, 0.0  ;;  %v4834_v16 = vpack.c.bf16 %v4728_v12, %v4727_v9  ;;  %v4359_v17 = vadd.f32 %v8906_v14, %v10652_v47 }
 0x3d9   : > { %v4350_v3 = vpop.f32.mrf.mxu1 }
 0x3da   : > { %v4833_v18 = vpack.c.bf16 %v4726_v15, %v4725_v11  ;;  %v4351_v19 = vadd.f32 %v10652_v47, %v4350_v3  ;;  %v4731_v22 = vmax.f32 %v4359_v17, 0.0 }
 0x3db   : > { %v8907_v57 = vpop.f32.mrf.mxu1 }
 0x3dc   : > { %9044 = vmatprep.mubr.bf16.mxu0 %v4833_v18  ;;  %v4362_v21 = vadd.f32 %v8907_v57, %v10652_v47  ;;  %v4729_v24 = vmax.f32 %v4351_v19, 0.0 }
 0x3dd   : > { %9045 = vmatmul.mubr.bf16.gmra.mxu0 %v4834_v16  ;;  %v4353_v23 = vpop.f32.mrf.mxu1 }
 0x3de   : > { %v4732_v25 = vmax.f32 %v4362_v21, 0.0  ;;  %v4354_v26 = vadd.f32 %v10652_v47, %v4353_v23 }
 0x3df   : > { %v8910_v27 = vpop.f32.mrf.mxu1 }
 0x3e0   : > { %v4730_v28 = vmax.f32 %v4354_v26, 0.0  ;;  %v4836_v29 = vpack.c.bf16 %v4732_v25, %v4731_v22  ;;  %v4375_v20 = vadd.f32 %v8910_v27, %v10652_v47 }
 0x3e1   : > { %v4366_v30 = vpop.f32.mrf.mxu1 }
 0x3e2   : > { %v4835_v31 = vpack.c.bf16 %v4730_v28, %v4729_v24  ;;  %v4367_v33 = vadd.f32 %v10652_v47, %v4366_v30  ;;  %v4735_v36 = vmax.f32 %v4375_v20, 0.0 }
 0x3e3   : > { %v8911_v34 = vpop.f32.mrf.mxu1 }
 0x3e4   : > { %9048 = vmatprep.mubr.bf16.mxu0 %v4835_v31  ;;  %v4378_v35 = vadd.f32 %v8911_v34, %v10652_v47  ;;  %v4733_v39 = vmax.f32 %v4367_v33, 0.0 }
 0x3e5   : > { %9049 = vmatmul.mubr.bf16.gmra.mxu0 %v4836_v29  ;;  %v4369_v37 = vpop.f32.mrf.mxu1 }
 0x3e6   : > { %v4736_v40 = vmax.f32 %v4378_v35, 0.0  ;;  %v4370_v41 = vadd.f32 %v10652_v47, %v4369_v37 }
 0x3e7   : > { %v8914_v42 = vpop.f32.mrf.mxu1 }
 0x3e8   : > { %v4734_v32 = vmax.f32 %v4370_v41, 0.0  ;;  %v4838_v43 = vpack.c.bf16 %v4736_v40, %v4735_v36  ;;  %v4391_v44 = vadd.f32 %v8914_v42, %v10652_v47 }
 0x3e9   : > { %v4382_v45 = vpop.f32.mrf.mxu1 }
 0x3ea   : > { %v4837_v46 = vpack.c.bf16 %v4734_v32, %v4733_v39  ;;  %v4383_v48 = vadd.f32 %v10652_v47, %v4382_v45  ;;  %v4739_v51 = vmax.f32 %v4391_v44, 0.0 }
 0x3eb   : > { %v8915_v49 = vpop.f32.mrf.mxu1 }
 0x3ec   : > { %9052 = vmatprep.mubr.bf16.mxu0 %v4837_v46  ;;  %v4394_v50 = vadd.f32 %v8915_v49, %v10652_v47  ;;  %v4737_v53 = vmax.f32 %v4383_v48, 0.0 }
 0x3ed   : > { %9053 = vmatmul.mubr.bf16.gmra.mxu0 %v4838_v43  ;;  %v4385_v52 = vpop.f32.mrf.mxu1 }
 0x3ee   : > { %v4740_v54 = vmax.f32 %v4394_v50, 0.0  ;;  %v4386_v55 = vadd.f32 %v10652_v47, %v4385_v52 }
 0x3ef   : > { %v8918_v38 = vpop.f32.mrf.mxu1 }
 0x3f0   : > { %v4738_v58 = vmax.f32 %v4386_v55, 0.0  ;;  %v4840_v59 = vpack.c.bf16 %v4740_v54, %v4739_v51  ;;  %v4407_v60 = vadd.f32 %v8918_v38, %v10652_v47 }
 0x3f1   : > { %v4398_v56 = vpop.f32.mrf.mxu1 }
 0x3f2   : > { %v4839_v61 = vpack.c.bf16 %v4738_v58, %v4737_v53  ;;  %v4399_v62 = vadd.f32 %v10652_v47, %v4398_v56  ;;  %v4743_v1 = vmax.f32 %v4407_v60, 0.0 }
 0x3f3   : > { %v8919_v63 = vpop.f32.mrf.mxu1 }
 0x3f4   : > { %9056 = vmatprep.mubr.bf16.mxu0 %v4839_v61  ;;  %v4410_v0 = vadd.f32 %v8919_v63, %v10652_v47  ;;  %v4741_v4 = vmax.f32 %v4399_v62, 0.0 }
 0x3f5   : > { %9057 = vmatmul.mubr.bf16.gmra.mxu0 %v4840_v59  ;;  %v4401_v2 = vpop.f32.mrf.mxu1 }
 0x3f6   : > { %v4744_v5 = vmax.f32 %v4410_v0, 0.0  ;;  %v4402_v6 = vadd.f32 %v10652_v47, %v4401_v2 }
 0x3f7   : > { %v8922_v7 = vpop.f32.mrf.mxu1 }
 0x3f8   : > { %v4742_v8 = vmax.f32 %v4402_v6, 0.0  ;;  %v4842_v9 = vpack.c.bf16 %v4744_v5, %v4743_v1  ;;  %v4423_v10 = vadd.f32 %v8922_v7, %v10652_v47 }
 0x3f9   : > { %v4414_v11 = vpop.f32.mrf.mxu1 }
 0x3fa   : > { %v4841_v12 = vpack.c.bf16 %v4742_v8, %v4741_v4  ;;  %v4415_v13 = vadd.f32 %v10652_v47, %v4414_v11  ;;  %v4747_v16 = vmax.f32 %v4423_v10, 0.0 }
 0x3fb   : > { %v8923_v14 = vpop.f32.mrf.mxu1 }
 0x3fc   : > { %9060 = vmatprep.mubr.bf16.mxu0 %v4841_v12  ;;  %v4426_v15 = vadd.f32 %v8923_v14, %v10652_v47  ;;  %v4745_v3 = vmax.f32 %v4415_v13, 0.0 }
 0x3fd   : > { %9061 = vmatmul.mubr.bf16.gmra.mxu0 %v4842_v9  ;;  %v4417_v17 = vpop.f32.mrf.mxu1 }
 0x3fe   : > { %v4748_v18 = vmax.f32 %v4426_v15, 0.0  ;;  %v4418_v19 = vadd.f32 %v10652_v47, %v4417_v17 }
 0x3ff   : > { %v8926_v57 = vpop.f32.mrf.mxu1 }
 0x400   : > { %v4746_v21 = vmax.f32 %v4418_v19, 0.0  ;;  %v4844_v22 = vpack.c.bf16 %v4748_v18, %v4747_v16  ;;  %v4439_v23 = vadd.f32 %v8926_v57, %v10652_v47 }
 0x401   : > { %v4430_v24 = vpop.f32.mrf.mxu1 }
 0x402   : > { %v4843_v25 = vpack.c.bf16 %v4746_v21, %v4745_v3  ;;  %v4431_v26 = vadd.f32 %v10652_v47, %v4430_v24  ;;  %v4751_v29 = vmax.f32 %v4439_v23, 0.0 }
 0x403   : > { %v8927_v27 = vpop.f32.mrf.mxu1 }
 0x404   : > { %9064 = vmatprep.mubr.bf16.mxu0 %v4843_v25  ;;  %v4442_v28 = vadd.f32 %v8927_v27, %v10652_v47  ;;  %v4749_v30 = vmax.f32 %v4431_v26, 0.0 }
 0x405   : > { %9065 = vmatmul.mubr.bf16.gmra.mxu0 %v4844_v22  ;;  %v4433_v20 = vpop.f32.mrf.mxu1 }
 0x406   : > { %v4752_v31 = vmax.f32 %v4442_v28, 0.0  ;;  %v4434_v33 = vadd.f32 %v10652_v47, %v4433_v20 }
 0x407   : > { %v8930_v34 = vpop.f32.mrf.mxu1 }
 0x408   : > { %v4750_v35 = vmax.f32 %v4434_v33, 0.0  ;;  %v4846_v36 = vpack.c.bf16 %v4752_v31, %v4751_v29  ;;  %v4455_v37 = vadd.f32 %v8930_v34, %v10652_v47 }
 0x409   : > { %v4446_v39 = vpop.f32.mrf.mxu1 }
 0x40a   : > { %v4845_v40 = vpack.c.bf16 %v4750_v35, %v4749_v30  ;;  %v4447_v41 = vadd.f32 %v10652_v47, %v4446_v39  ;;  %v4755_v43 = vmax.f32 %v4455_v37, 0.0 }
 0x40b   : > { %v8931_v42 = vpop.f32.mrf.mxu1 }
 0x40c   : > { %9068 = vmatprep.mubr.bf16.mxu0 %v4845_v40  ;;  %v4458_v32 = vadd.f32 %v8931_v42, %v10652_v47  ;;  %v4753_v45 = vmax.f32 %v4447_v41, 0.0 }
 0x40d   : > { %9069 = vmatmul.mubr.bf16.gmra.mxu0 %v4846_v36  ;;  %v4449_v44 = vpop.f32.mrf.mxu1 }
 0x40e   : > { %v4756_v46 = vmax.f32 %v4458_v32, 0.0  ;;  %v4450_v48 = vadd.f32 %v10652_v47, %v4449_v44 }
 0x40f   : > { %v8934_v49 = vpop.f32.mrf.mxu1 }
 0x410   : > { %v4754_v50 = vmax.f32 %v4450_v48, 0.0  ;;  %v4848_v51 = vpack.c.bf16 %v4756_v46, %v4755_v43  ;;  %v4471_v52 = vadd.f32 %v8934_v49, %v10652_v47 }
 0x411   : > { %v4462_v53 = vpop.f32.mrf.mxu1 }
 0x412   : > { %v4847_v54 = vpack.c.bf16 %v4754_v50, %v4753_v45  ;;  %v4463_v55 = vadd.f32 %v10652_v47, %v4462_v53  ;;  %v4759_v59 = vmax.f32 %v4471_v52, 0.0 }
 0x413   : > { %v8935_v38 = vpop.f32.mrf.mxu1 }
 0x414   : > { %9072 = vmatprep.mubr.bf16.mxu0 %v4847_v54  ;;  %v4474_v58 = vadd.f32 %v8935_v38, %v10652_v47  ;;  %v4757_v56 = vmax.f32 %v4463_v55, 0.0 }
 0x415   : > { %9073 = vmatmul.mubr.bf16.gmra.mxu0 %v4848_v51  ;;  %v4465_v60 = vpop.f32.mrf.mxu1 }
 0x416   : > { %v4760_v61 = vmax.f32 %v4474_v58, 0.0  ;;  %v4466_v62 = vadd.f32 %v10652_v47, %v4465_v60 }
 0x417   : > { %v8938_v63 = vpop.f32.mrf.mxu1 }
 0x418   : > { %v4758_v0 = vmax.f32 %v4466_v62, 0.0  ;;  %v4850_v1 = vpack.c.bf16 %v4760_v61, %v4759_v59  ;;  %v4487_v2 = vadd.f32 %v8938_v63, %v10652_v47 }
 0x419   : > { %v4478_v4 = vpop.f32.mrf.mxu1 }
 0x41a   : > { %v4849_v5 = vpack.c.bf16 %v4758_v0, %v4757_v56  ;;  %v4479_v6 = vadd.f32 %v10652_v47, %v4478_v4  ;;  %v4763_v9 = vmax.f32 %v4487_v2, 0.0 }
 0x41b   : > { %v8939_v7 = vpop.f32.mrf.mxu1 }
 0x41c   : > { %9076 = vmatprep.mubr.bf16.mxu0 %v4849_v5  ;;  %v4490_v8 = vadd.f32 %v8939_v7, %v10652_v47  ;;  %v4761_v11 = vmax.f32 %v4479_v6, 0.0 }
 0x41d   : > { %9077 = vmatmul.mubr.bf16.gmra.mxu0 %v4850_v1  ;;  %v4481_v10 = vpop.f32.mrf.mxu1 }
 0x41e   : > { %v4764_v12 = vmax.f32 %v4490_v8, 0.0  ;;  %v4482_v13 = vadd.f32 %v10652_v47, %v4481_v10 }
 0x41f   : > { %v8942_v14 = vpop.f32.mrf.mxu1 }
 0x420   : > { %v4762_v15 = vmax.f32 %v4482_v13, 0.0  ;;  %v4852_v16 = vpack.c.bf16 %v4764_v12, %v4763_v9  ;;  %v4503_v17 = vadd.f32 %v8942_v14, %v10652_v47 }
 0x421   : > { %v4494_v3 = vpop.f32.mrf.mxu1 }
 0x422   : > { %v4495_v18 = vadd.f32 %v10652_v47, %v4494_v3  ;;  %v4851_v19 = vpack.c.bf16 %v4762_v15, %v4761_v11  ;;  %v4767_v22 = vmax.f32 %v4503_v17, 0.0 }
 0x423   : > { %v8943_v57 = vpop.f32.mrf.mxu1 }
 0x424   : > { %9080 = vmatprep.mubr.bf16.mxu0 %v4851_v19  ;;  %v4506_v21 = vadd.f32 %v8943_v57, %v10652_v47  ;;  %v4765_v24 = vmax.f32 %v4495_v18, 0.0 }
 0x425   : > { %9081 = vmatmul.mubr.bf16.gmra.mxu0 %v4852_v16  ;;  %v4497_v23 = vpop.f32.mrf.mxu1 }
 0x426   : > { %v4768_v25 = vmax.f32 %v4506_v21, 0.0  ;;  %v4498_v26 = vadd.f32 %v10652_v47, %v4497_v23 }
 0x427   : > { %v8946_v27 = vpop.f32.mrf.mxu1 }
 0x428   : > { %v4766_v28 = vmax.f32 %v4498_v26, 0.0  ;;  %v4854_v29 = vpack.c.bf16 %v4768_v25, %v4767_v22  ;;  %v4519_v20 = vadd.f32 %v8946_v27, %v10652_v47 }
 0x429   : > { %v4510_v30 = vpop.f32.mrf.mxu1 }
 0x42a   : > { %v4511_v31 = vadd.f32 %v10652_v47, %v4510_v30  ;;  %v4853_v33 = vpack.c.bf16 %v4766_v28, %v4765_v24  ;;  %v4771_v36 = vmax.f32 %v4519_v20, 0.0 }
 0x42b   : > { %v8947_v34 = vpop.f32.mrf.mxu1 }
 0x42c   : > { %v4522_v35 = vadd.f32 %v8947_v34, %v10652_v47  ;;  %9084 = vmatprep.mubr.bf16.mxu0 %v4853_v33  ;;  %v4769_v39 = vmax.f32 %v4511_v31, 0.0  ;;  %v10784_v34 = vld [vmem:[%s12643_s2 + $0x3] ss:$0 sm:$0xff] }
 0x42d   : > { %v4513_v37 = vpop.f32.mrf.mxu1  ;;  %9085 = vmatmul.mubr.bf16.gmra.mxu0 %v4854_v29 }
 0x42e   : > { %v4772_v40 = vmax.f32 %v4522_v35, 0.0  ;;  %v4514_v41 = vadd.f32 %v10652_v47, %v4513_v37 }
 0x42f   : > { %v8950_v42 = vpop.f32.mrf.mxu1 }
 0x430   : > { %v4770_v32 = vmax.f32 %v4514_v41, 0.0  ;;  %v4856_v43 = vpack.c.bf16 %v4772_v40, %v4771_v36  ;;  %v4535_v44 = vadd.f32 %v8950_v42, %v10652_v47 }
 0x431   : > { %v4526_v45 = vpop.f32.mrf.mxu1 }
 0x432   : > { %v4527_v46 = vadd.f32 %v10652_v47, %v4526_v45  ;;  %v4855_v48 = vpack.c.bf16 %v4770_v32, %v4769_v39  ;;  %v4775_v51 = vmax.f32 %v4535_v44, 0.0 }
 0x433   : > { %v8951_v49 = vpop.f32.mrf.mxu1 }
 0x434   : > { %v4538_v50 = vadd.f32 %v8951_v49, %v10652_v47  ;;  %9088 = vmatprep.mubr.bf16.mxu0 %v4855_v48  ;;  %v4773_v53 = vmax.f32 %v4527_v46, 0.0 }
 0x435   : > { %v4529_v52 = vpop.f32.mrf.mxu1  ;;  %9089 = vmatmul.mubr.bf16.gmra.mxu0 %v4856_v43 }
 0x436   : > { %v4776_v54 = vmax.f32 %v4538_v50, 0.0  ;;  %v4530_v55 = vadd.f32 %v10652_v47, %v4529_v52 }
 0x437   : > { %v8954_v38 = vpop.f32.mrf.mxu1 }
 0x438   : > { %v4774_v58 = vmax.f32 %v4530_v55, 0.0  ;;  %v4858_v59 = vpack.c.bf16 %v4776_v54, %v4775_v51  ;;  %v4551_v60 = vadd.f32 %v8954_v38, %v10652_v47 }
 0x439   : > { %v4542_v56 = vpop.f32.mrf.mxu1 }
 0x43a   : > { %v4543_v61 = vadd.f32 %v10652_v47, %v4542_v56  ;;  %v4857_v62 = vpack.c.bf16 %v4774_v58, %v4773_v53  ;;  %v4779_v1 = vmax.f32 %v4551_v60, 0.0 }
 0x43b   : > { %v8955_v63 = vpop.f32.mrf.mxu1 }
 0x43c   : > { %v4554_v0 = vadd.f32 %v8955_v63, %v10652_v47  ;;  %9092 = vmatprep.mubr.bf16.mxu0 %v4857_v62  ;;  %v4777_v4 = vmax.f32 %v4543_v61, 0.0 }
 0x43d   : > { %v4545_v2 = vpop.f32.mrf.mxu1  ;;  %9093 = vmatmul.mubr.bf16.gmra.mxu0 %v4858_v59 }
 0x43e   : > { %v4780_v5 = vmax.f32 %v4554_v0, 0.0  ;;  %v4546_v6 = vadd.f32 %v10652_v47, %v4545_v2 }
 0x43f   : > { %v8958_v7 = vpop.f32.mrf.mxu1 }
 0x440   : > { %v4778_v8 = vmax.f32 %v4546_v6, 0.0  ;;  %v4860_v9 = vpack.c.bf16 %v4780_v5, %v4779_v1  ;;  %v4567_v10 = vadd.f32 %v8958_v7, %v10652_v47  ;;  %v9418_v7 = vld [vmem:[#allocation2 + $0x8] sm:$0xff]  }
 0x441   : > { %v4558_v11 = vpop.f32.mrf.mxu1 }
 0x442   : > { %v4559_v12 = vadd.f32 %v10652_v47, %v4558_v11  ;;  %v4859_v13 = vpack.c.bf16 %v4778_v8, %v4777_v4  ;;  %v4783_v16 = vmax.f32 %v4567_v10, 0.0 }
 0x443   : > { %v8959_v14 = vpop.f32.mrf.mxu1 }
 0x444   : > { %v4570_v15 = vadd.f32 %v8959_v14, %v10652_v47  ;;  %9096 = vmatprep.mubr.bf16.mxu0 %v4859_v13  ;;  %v4781_v3 = vmax.f32 %v4559_v12, 0.0 }
 0x445   : > { %v4561_v17 = vpop.f32.mrf.mxu1  ;;  %9097 = vmatmul.mubr.bf16.gmra.mxu0 %v4860_v9 }
 0x446   : > { %v4784_v18 = vmax.f32 %v4570_v15, 0.0  ;;  %v4562_v19 = vadd.f32 %v10652_v47, %v4561_v17 }
 0x447   : > { %v8962_v57 = vpop.f32.mrf.mxu1 }
 0x448   : > { %v4782_v21 = vmax.f32 %v4562_v19, 0.0  ;;  %v4862_v22 = vpack.c.bf16 %v4784_v18, %v4783_v16  ;;  %v4583_v23 = vadd.f32 %v8962_v57, %v10652_v47 }
 0x449   : > { %v4574_v24 = vpop.f32.mrf.mxu1 }
 0x44a   : > { %v4575_v25 = vadd.f32 %v10652_v47, %v4574_v24  ;;  %v4861_v26 = vpack.c.bf16 %v4782_v21, %v4781_v3  ;;  %v4787_v20 = vmax.f32 %v4583_v23, 0.0 }
 0x44b   : > { %v8963_v27 = vpop.f32.mrf.mxu1 }
 0x44c   : > { %v4586_v28 = vadd.f32 %v8963_v27, %v10652_v47  ;;  %9100 = vmatprep.mubr.bf16.mxu0 %v4861_v26  ;;  %v4785_v31 = vmax.f32 %v4575_v25, 0.0  ;;  %v10790_v47 = vld [vmem:[%s12643_s2 + $0x4] ss:$0 sm:$0xff] }
 0x44d   : > { %v9006_v29 = vpop.f32.mrf.mxu0  ;;  %v4577_v30 = vpop.f32.mrf.mxu1  ;;  %9101 = vmatmul.mubr.bf16.gmra.mxu0 %v4862_v22 }
 0x44e   : > { %v4788_v33 = vmax.f32 %v4586_v28, 0.0  ;;  %v4578_v35 = vadd.f32 %v10784_v34, %v4577_v30  ;;  %v4993_v1 = vadd.f32 %v9006_v29, %v10790_v47 }
 0x44f   : > { %v4984_v36 = vpop.f32.mrf.mxu0  ;;  %v8966_v39 = vpop.f32.mrf.mxu1 }
 0x450   : > { %v4786_v37 = vmax.f32 %v4578_v35, 0.0  ;;  %v4864_v41 = vpack.c.bf16 %v4788_v33, %v4787_v20  ;;  %v4985_v42 = vadd.f32 %v10790_v47, %v4984_v36  ;;  %v4599_v32 = vadd.f32 %v10784_v34, %v8966_v39  ;;  %v9419_v20 = vld [vmem:[#allocation2 + $0x10] sm:$0xff]  }
 0x451   : > { %v9007_v40 = vpop.f32.mrf.mxu0  ;;  %v4590_v43 = vpop.f32.mrf.mxu1  ;;  %v5497_v14 = vmax.f32 %v4993_v1, 0.0 }
 0x452   : > { %v4863_v44 = vpack.c.bf16 %v4786_v37, %v4785_v31  ;;  %v4591_v46 = vadd.f32 %v10784_v34, %v4590_v43  ;;  %v5495_v52 = vmax.f32 %v4985_v42, 0.0  ;;  %v4791_v54 = vmax.f32 %v4599_v32, 0.0 }
 0x453   : > { %v4987_v45 = vpop.f32.mrf.mxu0  ;;  %v8967_v49 = vpop.f32.mrf.mxu1  ;;  %v4996_v56 = vadd.f32 %v9007_v40, %v10790_v47 }
 0x454   : > { %v4988_v48 = vadd.f32 %v10790_v47, %v4987_v45  ;;  %9104 = vmatprep.mubr.bf16.mxu0 %v4863_v44  ;;  %v4602_v51 = vadd.f32 %v10784_v34, %v8967_v49  ;;  %v4789_v58 = vmax.f32 %v4591_v46, 0.0 }
 0x455   : > { %v10796_v50 = vpop.f32.mrf.mxu0  ;;  %9105 = vmatmul.mubr.bf16.gmra.mxu0 %v4864_v41  ;;  %v4593_v55 = vpop.f32.mrf.mxu1  ;;  %v5498_v10 = vmax.f32 %v4996_v56, 0.0 }
 0x456   : > { %v5496_v53 = vmax.f32 %v4988_v48, 0.0  ;;  %v4792_v59 = vmax.f32 %v4602_v51, 0.0  ;;  %v4594_v60 = vadd.f32 %v10784_v34, %v4593_v55 }
 0x457   : > { %v5000_v38 = vpop.f32.mrf.mxu0  ;;  %v8970_v62 = vpop.f32.mrf.mxu1  ;;  %v5624_v57 = vpack.c.bf16 %v5498_v10, %v5497_v14 }
 0x458   : > { %v5623_v61 = vpack.c.bf16 %v5496_v53, %v5495_v52  ;;  %v4790_v0 = vmax.f32 %v4594_v60, 0.0  ;;  %v4866_v2 = vpack.c.bf16 %v4792_v59, %v4791_v54  ;;  %v4615_v4 = vadd.f32 %v10784_v34, %v8970_v62 }
 0x459   : > { %v9011_v63 = vpop.f32.mrf.mxu0  ;;  %v4606_v5 = vpop.f32.mrf.mxu1  ;;  %v5001_v25 = vadd.f32 %v10790_v47, %v5000_v38  ;;  %v5009_v52 = vadd.f32 %v10796_v50, %v10790_v47 }
 0x45a   : > { %5855 = vmatmul.mubr.bf16.vlgmr.msra.gmra.mxu1 %v5623_v61  ;;  %v4607_v8 = vadd.f32 %v10784_v34, %v4606_v5  ;;  %v4865_v9 = vpack.c.bf16 %v4790_v0, %v4789_v58  ;;  %v4795_v15 = vmax.f32 %v4615_v4, 0.0  ;;  %v5012_v45 = vadd.f32 %v9011_v63, %v10790_v47  ;;  %v9420_v58 = vld [vmem:[#allocation2 + $0x18] sm:$0xff]  }
 0x45b   : > { %v5003_v6 = vpop.f32.mrf.mxu0  ;;  %5862 = vmatprep.mubr.bf16.mxu1 %v9418_v7  ;;  %v8971_v11 = vpop.f32.mrf.mxu1  ;;  %v5499_v39 = vmax.f32 %v5001_v25, 0.0  ;;  %v5501_v50 = vmax.f32 %v5009_v52, 0.0 }
 0x45c   : > { %v4618_v13 = vadd.f32 %v10784_v34, %v8971_v11  ;;  %9108 = vmatprep.mubr.bf16.mxu0 %v4865_v9  ;;  %v4793_v3 = vmax.f32 %v4607_v8, 0.0  ;;  %v5004_v21 = vadd.f32 %v10790_v47, %v5003_v6  ;;  %v5502_v56 = vmax.f32 %v5012_v45, 0.0  ;;  %v9422_v45 = vld [vmem:[#allocation2 + $0x28] sm:$0xff]  }
 0x45d   : > { %v10804_v12 = vpop.f32.mrf.mxu0  ;;  %v4609_v16 = vpop.f32.mrf.mxu1  ;;  %9109 = vmatmul.mubr.bf16.gmra.mxu0 %v4866_v2 }
 0x45e   : > { %v4796_v18 = vmax.f32 %v4618_v13, 0.0  ;;  %v4610_v19 = vadd.f32 %v10784_v34, %v4609_v16  ;;  %v5500_v33 = vmax.f32 %v5004_v21, 0.0  ;;  %v5626_v7 = vpack.c.bf16 %v5502_v56, %v5501_v50 }
 0x45f   : > { %v10807_v17 = vpop.f32.mrf.mxu0 }
 0x460   : > { %v8974_v22 = vpop.f32.mrf.mxu1  ;;  %v4794_v24 = vmax.f32 %v4610_v19, 0.0  ;;  %v4868_v26 = vpack.c.bf16 %v4796_v18, %v4795_v15  ;;  %v5625_v46 = vpack.c.bf16 %v5500_v33, %v5499_v39  ;;  %v5017_v13 = vadd.f32 %v10790_v47, %v10807_v17  ;;  %v9421_v18 = vld [vmem:[#allocation2 + $0x20] sm:$0xff]  }
 0x461   : > { %v10811_v23 = vpop.f32.mrf.mxu0  ;;  %v4631_v27 = vadd.f32 %v10784_v34, %v8974_v22 }
 0x462   : > { %5863 = vmatmul.mubr.bf16.gmra.mxu1 %v5624_v57  ;;  %v4622_v28 = vpop.f32.mrf.mxu1  ;;  %v4867_v31 = vpack.c.bf16 %v4794_v24, %v4793_v3  ;;  %v5503_v17 = vmax.f32 %v5017_v13, 0.0 }
 0x463   : > { %v5019_v29 = vpop.f32.mrf.mxu0  ;;  %5870 = vmatprep.mubr.bf16.mxu1 %v9419_v20  ;;  %v4623_v30 = vadd.f32 %v10784_v34, %v4622_v28  ;;  %v4799_v40 = vmax.f32 %v4631_v27, 0.0 }
 0x464   : > { %v8975_v35 = vpop.f32.mrf.mxu1  ;;  %9112 = vmatprep.mubr.bf16.mxu0 %v4867_v31  ;;  %v5020_v8 = vadd.f32 %v10790_v47, %v5019_v29  ;;  %v5028_v31 = vadd.f32 %v10811_v23, %v10790_v47 }
 0x465   : > { %v10816_v36 = vpop.f32.mrf.mxu0  ;;  %v4634_v37 = vadd.f32 %v10784_v34, %v8975_v35  ;;  %9113 = vmatmul.mubr.bf16.gmra.mxu0 %v4868_v26  ;;  %v4797_v32 = vmax.f32 %v4623_v30, 0.0 }
 0x466   : > { %v4625_v41 = vpop.f32.mrf.mxu1  ;;  %v5504_v21 = vmax.f32 %v5020_v8, 0.0 }
 0x467   : > { %v10819_v42 = vpop.f32.mrf.mxu0  ;;  %v4800_v43 = vmax.f32 %v4634_v37, 0.0  ;;  %v4626_v44 = vadd.f32 %v10784_v34, %v4625_v41 }
 0x468   : > { %v8978_v48 = vpop.f32.mrf.mxu1  ;;  %v5627_v33 = vpack.c.bf16 %v5504_v21, %v5503_v17 }
 0x469   : > { %v10823_v49 = vpop.f32.mrf.mxu0  ;;  %v4798_v51 = vmax.f32 %v4626_v44, 0.0  ;;  %v4870_v53 = vpack.c.bf16 %v4800_v43, %v4799_v40  ;;  %v4647_v54 = vadd.f32 %v10784_v34, %v8978_v48  ;;  %v5025_v40 = vadd.f32 %v10804_v12, %v10790_v47 }
 0x46a   : > { %5871 = vmatmul.mubr.bf16.gmra.mxu1 %v5625_v46  ;;  %v4638_v55 = vpop.f32.mrf.mxu1  ;;  %v5506_v48 = vmax.f32 %v5028_v31, 0.0 }
 0x46b   : > { %v10828_v38 = vpop.f32.mrf.mxu0  ;;  %5878 = vmatprep.mubr.bf16.mxu1 %v9420_v58  ;;  %v4639_v59 = vadd.f32 %v10784_v34, %v4638_v55  ;;  %v4869_v60 = vpack.c.bf16 %v4798_v51, %v4797_v32  ;;  %v4803_v0 = vmax.f32 %v4647_v54, 0.0  ;;  %v5505_v12 = vmax.f32 %v5025_v40, 0.0 }
 0x46c   : > { %v8979_v61 = vpop.f32.mrf.mxu1 }
 0x46d   : > { %v10831_v62 = vpop.f32.mrf.mxu0  ;;  %v4650_v63 = vadd.f32 %v10784_v34, %v8979_v61  ;;  %9116 = vmatprep.mubr.bf16.mxu0 %v4869_v60  ;;  %v4801_v4 = vmax.f32 %v4639_v59, 0.0  ;;  %v5628_v61 = vpack.c.bf16 %v5506_v48, %v5505_v12 }
 0x46e   : > { %v4641_v1 = vpop.f32.mrf.mxu1  ;;  %9117 = vmatmul.mubr.bf16.gmra.mxu0 %v4870_v53 }
 0x46f   : > { %v10834_v2 = vpop.f32.mrf.mxu0  ;;  %v4804_v5 = vmax.f32 %v4650_v63, 0.0  ;;  %v4642_v6 = vadd.f32 %v10784_v34, %v4641_v1  ;;  %v5036_v63 = vadd.f32 %v10790_v47, %v10828_v38  ;;  %v5033_v1 = vadd.f32 %v10790_v47, %v10819_v42 }
 0x470   : > { %v8982_v9 = vpop.f32.mrf.mxu1 }
 0x471   : > { %v10838_v10 = vpop.f32.mrf.mxu0  ;;  %v4802_v11 = vmax.f32 %v4642_v6, 0.0  ;;  %v4872_v14 = vpack.c.bf16 %v4804_v5, %v4803_v0  ;;  %v4663_v15 = vadd.f32 %v10784_v34, %v8982_v9  ;;  %v9423_v5 = vld [vmem:[#allocation2 + $0x30] sm:$0xff]   ;;  %v5508_v8 = vmax.f32 %v5036_v63, 0.0 }
 0x472   : > { %5879 = vmatmul.mubr.bf16.gmra.mxu1 %v5626_v7  ;;  %v4654_v16 = vpop.f32.mrf.mxu1 }
 0x473   : > { %v10843_v3 = vpop.f32.mrf.mxu0  ;;  %5886 = vmatprep.mubr.bf16.mxu1 %v9421_v18  ;;  %v4655_v19 = vadd.f32 %v10784_v34, %v4654_v16  ;;  %v4871_v57 = vpack.c.bf16 %v4802_v11, %v4801_v4  ;;  %v4807_v26 = vmax.f32 %v4663_v15, 0.0  ;;  %v5044_v11 = vadd.f32 %v10823_v49, %v10790_v47  ;;  %v9405_v15 = vld [vmem:[%s12642_s1 + $0x178] sm:$0xff]  }
 0x474   : > { %v8983_v22 = vpop.f32.mrf.mxu1  ;;  %v9424_v16 = vld [vmem:[#allocation2 + $0x38] sm:$0xff]   ;;  %9132 = vmatprep.subr.bf16.mxu0 %v9405_v15 }
 0x475   : > { %v10846_v24 = vpop.f32.mrf.mxu0  ;;  %v4666_v25 = vadd.f32 %v10784_v34, %v8983_v22  ;;  %9120 = vmatprep.mubr.bf16.mxu0 %v4871_v57  ;;  %v4805_v29 = vmax.f32 %v4655_v19, 0.0  ;;  %v9406_v19 = vld [vmem:[%s12642_s1 + $0x170] sm:$0xff]   ;;  %v5510_v49 = vmax.f32 %v5044_v11, 0.0  ;;  %9133 = vmatpush3.bf16.msra.mxu0 %v9405_v15 }
 0x476   : > { %v4657_v27 = vpop.f32.mrf.mxu1  ;;  %9121 = vmatmul.mubr.bf16.gmra.mxu0 %v4872_v14  ;;  %v5041_v14 = vadd.f32 %v10816_v36, %v10790_v47  ;;  %9134 = vmatprep.subr.bf16.mxu0 %v9406_v19 }
 0x477   : > { %v10849_v28 = vpop.f32.mrf.mxu0  ;;  %v4808_v20 = vmax.f32 %v4666_v25, 0.0  ;;  %v4658_v30 = vadd.f32 %v10784_v34, %v4657_v27  ;;  %v5052_v25 = vadd.f32 %v10790_v47, %v10843_v3  ;;  %v9407_v27 = vld [vmem:[%s12642_s1 + $0x168] sm:$0xff]  }
 0x478   : > { %v8986_v35 = vpop.f32.mrf.mxu1  ;;  %v5509_v21 = vmax.f32 %v5041_v14, 0.0 }
 0x479   : > { %v10854_v37 = vpop.f32.mrf.mxu0  ;;  %v4806_v39 = vmax.f32 %v4658_v30, 0.0  ;;  %v4874_v41 = vpack.c.bf16 %v4808_v20, %v4807_v26  ;;  %v4679_v32 = vadd.f32 %v10784_v34, %v8986_v35  ;;  %9135 = vmatpush3.bf16.msra.mxu0 %v9406_v19  ;;  %v5049_v26 = vadd.f32 %v10790_v47, %v10834_v2  ;;  %v9408_v30 = vld [vmem:[%s12642_s1 + $0x160] sm:$0xff]  }
 0x47a   : > { %5887 = vmatmul.mubr.bf16.gmra.mxu1 %v5627_v33  ;;  %v4670_v43 = vpop.f32.mrf.mxu1  ;;  %v5630_v22 = vpack.c.bf16 %v5510_v49, %v5509_v21  ;;  %v5512_v3 = vmax.f32 %v5052_v25, 0.0  ;;  %9136 = vmatprep.subr.bf16.mxu0 %v9407_v27  ;;  %v5057_v35 = vadd.f32 %v10831_v62, %v10790_v47  ;;  %v9429_v19 = vld [vmem:[#allocation2 + $0x60] sm:$0xff]  }
 0x47b   : > { %v10859_v44 = vpop.f32.mrf.mxu0  ;;  %5894 = vmatprep.mubr.bf16.mxu1 %v9422_v45  ;;  %v4671_v46 = vadd.f32 %v10784_v34, %v4670_v43  ;;  %v4873_v23 = vpack.c.bf16 %v4806_v39, %v4805_v29  ;;  %v4811_v54 = vmax.f32 %v4679_v32, 0.0  ;;  %v9425_v29 = vld [vmem:[#allocation2 + $0x40] sm:$0xff]   ;;  %v5511_v33 = vmax.f32 %v5049_v26, 0.0  ;;  %v9426_v32 = vld [vmem:[#allocation2 + $0x48] sm:$0xff]   ;;  %v9409_v45 = vld [vmem:[%s12642_s1 + $0x158] sm:$0xff]  }
 0x47c   : > { %v8987_v51 = vpop.f32.mrf.mxu1  ;;  %v5060_v39 = vadd.f32 %v10838_v10, %v10790_v47  ;;  %v9410_v10 = vld [vmem:[%s12642_s1 + $0x150] sm:$0xff]   ;;  %v5068_v12 = vadd.f32 %v10790_v47, %v10859_v44  ;;  %v9412_v44 = vld [vmem:[%s12642_s1 + $0x140] sm:$0xff]  }
 0x47d   : > { %v10862_v52 = vpop.f32.mrf.mxu0  ;;  %v4682_v53 = vadd.f32 %v10784_v34, %v8987_v51  ;;  %9124 = vmatprep.mubr.bf16.mxu0 %v4873_v23  ;;  %v4809_v59 = vmax.f32 %v4671_v46, 0.0  ;;  %9137 = vmatpush3.bf16.msra.mxu0 %v9407_v27  ;;  %v5631_v40 = vpack.c.bf16 %v5512_v3, %v5511_v33  ;;  %v5513_v46 = vmax.f32 %v5057_v35, 0.0 }
 0x47e   : > { %v4673_v55 = vpop.f32.mrf.mxu1  ;;  %9125 = vmatmul.mubr.bf16.gmra.mxu0 %v4874_v41  ;;  %9138 = vmatprep.subr.bf16.mxu0 %v9408_v30  ;;  %v5514_v23 = vmax.f32 %v5060_v39, 0.0  ;;  %v5089_v27 = vadd.f32 %v10862_v52, %v10790_v47 }
 0x47f   : > { %v10865_v58 = vpop.f32.mrf.mxu0  ;;  %v4812_v60 = vmax.f32 %v4682_v53, 0.0  ;;  %v4674_v56 = vadd.f32 %v10784_v34, %v4673_v55  ;;  %v5507_v34 = vmax.f32 %v5033_v1, 0.0  ;;  %v5065_v53 = vadd.f32 %v10790_v47, %v10849_v28  ;;  %v9427_v55 = vld [vmem:[#allocation2 + $0x50] sm:$0xff]  }
 0x480   : > { %v5632_v51 = vpack.c.bf16 %v5514_v23, %v5513_v46  ;;  %v5076_v1 = vadd.f32 %v10854_v37, %v10790_v47  ;;  %v5081_v37 = vadd.f32 %v10790_v47, %v10865_v58  ;;  %v5521_v33 = vmax.f32 %v5089_v27, 0.0  ;;  %v9431_v46 = vld [vmem:[#allocation2 + $0x70] sm:$0xff]  }
 0x481   : > { %v10870_v50 = vpop.f32.mrf.mxu0  ;;  %v4810_v0 = vmax.f32 %v4674_v56, 0.0  ;;  %v4876_v4 = vpack.c.bf16 %v4812_v60, %v4811_v54  ;;  %v5629_v13 = vpack.c.bf16 %v5508_v8, %v5507_v34  ;;  %9139 = vmatpush3.bf16.msra.mxu0 %v9408_v30  ;;  %v9411_v60 = vld [vmem:[%s12642_s1 + $0x148] sm:$0xff]   ;;  %v5515_v56 = vmax.f32 %v5065_v53, 0.0 }
 0x482   : > { %5895 = vmatmul.mubr.bf16.gmra.mxu1 %v5628_v61  ;;  %9140 = vmatprep.subr.bf16.mxu0 %v9409_v45  ;;  %v5516_v61 = vmax.f32 %v5068_v12, 0.0  ;;  %v5518_v11 = vmax.f32 %v5076_v1, 0.0  ;;  %v5519_v21 = vmax.f32 %v5081_v37, 0.0  ;;  %v5092_v58 = vadd.f32 %v10870_v50, %v10790_v47  ;;  %v9430_v30 = vld [vmem:[#allocation2 + $0x68] sm:$0xff]  }
 0x483   : > { %5902 = vmatprep.mubr.bf16.mxu1 %v9423_v5  ;;  %v10874_v6 = vpop.f32.mrf.mxu0  ;;  %v4875_v7 = vpack.c.bf16 %v4810_v0, %v4809_v59  ;;  %v5073_v0 = vadd.f32 %v10846_v24, %v10790_v47 }
 0x484   : > { %v5084_v15 = vadd.f32 %v10790_v47, %v10874_v6  ;;  %v5522_v35 = vmax.f32 %v5092_v58, 0.0  ;;  %v9434_v58 = vld [vmem:[#allocation2 + $0x88] sm:$0xff]  }
 0x485   : > { %v10876_v9 = vpop.f32.mrf.mxu0  ;;  %9128 = vmatprep.mubr.bf16.mxu0 %v4875_v7  ;;  %9141 = vmatpush3.bf16.msra.mxu0 %v9409_v45  ;;  %v9428_v7 = vld [vmem:[#allocation2 + $0x58] sm:$0xff]   ;;  %v5517_v34 = vmax.f32 %v5073_v0, 0.0 }
 0x486   : > { %9129 = vmatmul.mubr.bf16.gmra.mxu0 %v4876_v4  ;;  %9142 = vmatprep.subr.bf16.mxu0 %v9410_v10  ;;  %v5633_v4 = vpack.c.bf16 %v5516_v61, %v5515_v56  ;;  %v9432_v56 = vld [vmem:[#allocation2 + $0x78] sm:$0xff]  }
 0x487   : > { %v10878_v38 = vpop.f32.mrf.mxu0  ;;  %v5634_v24 = vpack.c.bf16 %v5518_v11, %v5517_v34  ;;  %v9433_v11 = vld [vmem:[#allocation2 + $0x80] sm:$0xff]  }
 0x488   : > { %v5097_v52 = vadd.f32 %v10790_v47, %v10878_v38 }
 0x489   : > { %v10882_v42 = vpop.f32.mrf.mxu0  ;;  %9143 = vmatpush3.bf16.msra.mxu0 %v9410_v10 }
 0x48a   : > { %5903 = vmatmul.mubr.bf16.gmra.mxu1 %v5629_v13  ;;  %9144 = vmatprep.subr.bf16.mxu0 %v9411_v60  ;;  %v5523_v10 = vmax.f32 %v5097_v52, 0.0  ;;  %v5108_v38 = vadd.f32 %v10882_v42, %v10790_v47 }
 0x48b   : > { %5910 = vmatprep.mubr.bf16.mxu1 %v9424_v16  ;;  %v10889_v18 = vpop.f32.mrf.mxu0 }
 0x48c   : > { %v5100_v50 = vadd.f32 %v10790_v47, %v10889_v18  ;;  %v5526_v0 = vmax.f32 %v5108_v38, 0.0 }
 0x48d   : > { %v10894_v57 = vpop.f32.mrf.mxu0  ;;  %9145 = vmatpush3.bf16.msra.mxu0 %v9411_v60 }
 0x48e   : > { %9146 = vmatprep.subr.bf16.mxu0 %v9412_v44 }
 0x48f   : > { %v10896_v36 = vpop.f32.mrf.mxu0 }
 0x491   : > { %v10900_v17 = vpop.f32.mrf.mxu0  ;;  %9147 = vmatpush3.bf16.msra.mxu0 %v9412_v44 }
 0x492   : > { %5911 = vmatmul.mubr.bf16.gmra.mxu1 %v5630_v22  ;;  %v5520_v22 = vmax.f32 %v5084_v15, 0.0 }
 0x493   : > { %5918 = vmatprep.mubr.bf16.mxu1 %v9425_v29  ;;  %v10907_v20 = vpop.f32.mrf.mxu0 }
 0x494   : > { %v5635_v6 = vpack.c.bf16 %v5520_v22, %v5519_v21  ;;  %v5116_v42 = vadd.f32 %v10790_v47, %v10907_v20  ;;  %v5121_v22 = vadd.f32 %v10894_v57, %v10790_v47 }
 0x495   : > { %v10912_v31 = vpop.f32.mrf.mxu0 }
 0x496   : > { %v5528_v15 = vmax.f32 %v5116_v42, 0.0 }
 0x497   : > { %v10914_v2 = vpop.f32.mrf.mxu0 }
 0x498   : > { %v5129_v57 = vadd.f32 %v10790_v47, %v10914_v2 }
 0x499   : > { %v10920_v41 = vpop.f32.mrf.mxu0 }
 0x49a   : > { %5919 = vmatmul.mubr.bf16.gmra.mxu1 %v5631_v40  ;;  %v5140_v2 = vadd.f32 %v10920_v41, %v10790_v47 }
 0x49b   : > { %5926 = vmatprep.mubr.bf16.mxu1 %v9426_v32  ;;  %v10922_v43 = vpop.f32.mrf.mxu0  ;;  %v5636_v32 = vpack.c.bf16 %v5522_v35, %v5521_v33 }
 0x49c   : > { %v5534_v42 = vmax.f32 %v5140_v2, 0.0 }
 0x49d   : > { %v10927_v48 = vpop.f32.mrf.mxu0 }
 0x49f   : > { %v10929_v62 = vpop.f32.mrf.mxu0 }
 0x4a1   : > { %v10938_v54 = vpop.f32.mrf.mxu0 }
 0x4a2   : > { %5927 = vmatmul.mubr.bf16.gmra.mxu1 %v5632_v51  ;;  %v5524_v51 = vmax.f32 %v5100_v50, 0.0 }
 0x4a3   : > { %5934 = vmatprep.mubr.bf16.mxu1 %v9427_v55  ;;  %v10940_v59 = vpop.f32.mrf.mxu0  ;;  %v5105_v55 = vadd.f32 %v10876_v9, %v10790_v47  ;;  %v5113_v9 = vadd.f32 %v10790_v47, %v10896_v36  ;;  %v5124_v36 = vadd.f32 %v10900_v17, %v10790_v47  ;;  %v5132_v17 = vadd.f32 %v10790_v47, %v10922_v43 }
 0x4a4   : > { %v5637_v18 = vpack.c.bf16 %v5524_v51, %v5523_v10  ;;  %v5531_v51 = vmax.f32 %v5129_v57, 0.0  ;;  %v5148_v41 = vadd.f32 %v10790_v47, %v10940_v59  ;;  %v5153_v57 = vadd.f32 %v10927_v48, %v10790_v47 }
 0x4a5   : > { %v10945_v63 = vpop.f32.mrf.mxu0  ;;  %v5525_v44 = vmax.f32 %v5105_v55, 0.0  ;;  %v5527_v37 = vmax.f32 %v5113_v9, 0.0  ;;  %v5530_v33 = vmax.f32 %v5124_v36, 0.0  ;;  %v5532_v55 = vmax.f32 %v5132_v17, 0.0  ;;  %v9437_v36 = vld [vmem:[#allocation2 + $0xa0] sm:$0xff]  }
 0x4a7   : > { %v10947_v28 = vpop.f32.mrf.mxu0  ;;  %v5639_v20 = vpack.c.bf16 %v5528_v15, %v5527_v37  ;;  %v5641_v43 = vpack.c.bf16 %v5532_v55, %v5531_v51  ;;  %v5537_v55 = vmax.f32 %v5153_v57, 0.0 }
 0x4a8   : > { %v5161_v48 = vadd.f32 %v10790_v47, %v10947_v28 }
 0x4a9   : > { %v10956_v5 = vpop.f32.mrf.mxu0 }
 0x4aa   : > { %5935 = vmatmul.mubr.bf16.gmra.mxu1 %v5633_v4  ;;  %v5172_v28 = vadd.f32 %v10956_v5, %v10790_v47 }
 0x4ab   : > { %5942 = vmatprep.mubr.bf16.mxu1 %v9428_v7  ;;  %v10958_v8 = vpop.f32.mrf.mxu0  ;;  %v5638_v7 = vpack.c.bf16 %v5526_v0, %v5525_v44  ;;  %v9436_v0 = vld [vmem:[#allocation2 + $0x98] sm:$0xff]  }
 0x4ad   : > { %v10960_v13 = vpop.f32.mrf.mxu0 }
 0x4af   : > { %v10962_v14 = vpop.f32.mrf.mxu0 }
 0x4b1   : > { %v10968_v16 = vpop.f32.mrf.mxu0 }
 0x4b2   : > { %5943 = vmatmul.mubr.bf16.gmra.mxu1 %v5634_v24 }
 0x4b3   : > { %5950 = vmatprep.mubr.bf16.mxu1 %v9429_v19  ;;  %v10970_v49 = vpop.f32.mrf.mxu0 }
 0x4b4   : > { %v5180_v5 = vadd.f32 %v10790_v47, %v10970_v49 }
 0x4b5   : > { %v10972_v25 = vpop.f32.mrf.mxu0 }
 0x4b7   : > { %v10974_v26 = vpop.f32.mrf.mxu0 }
 0x4b9   : > { %v10980_v29 = vpop.f32.mrf.mxu0 }
 0x4ba   : > { %5951 = vmatmul.mubr.bf16.gmra.mxu1 %v5635_v6 }
 0x4bb   : > { %5958 = vmatprep.mubr.bf16.mxu1 %v9430_v30  ;;  %v10982_v3 = vpop.f32.mrf.mxu0  ;;  %v5529_v30 = vmax.f32 %v5121_v22, 0.0 }
 0x4bd   : > { %v10984_v39 = vpop.f32.mrf.mxu0  ;;  %v5640_v52 = vpack.c.bf16 %v5530_v33, %v5529_v30  ;;  %v5536_v30 = vmax.f32 %v5148_v41, 0.0 }
 0x4bf   : > { %v10986_v40 = vpop.f32.mrf.mxu0 }
 0x4c1   : > { %v10992_v45 = vpop.f32.mrf.mxu0 }
 0x4c2   : > { %5959 = vmatmul.mubr.bf16.gmra.mxu1 %v5636_v32 }
 0x4c3   : > { %5966 = vmatprep.mubr.bf16.mxu1 %v9431_v46  ;;  %v10994_v23 = vpop.f32.mrf.mxu0  ;;  %v9435_v46 = vld [vmem:[#allocation2 + $0x90] sm:$0xff]  }
 0x4c5   : > { %v10996_v53 = vpop.f32.mrf.mxu0 }
 0x4c7   : > { %v10998_v12 = vpop.f32.mrf.mxu0 }
 0x4c9   : > { %v11004_v60 = vpop.f32.mrf.mxu0 }
 0x4ca   : > { %5967 = vmatmul.mubr.bf16.gmra.mxu1 %v5637_v18 }
 0x4cb   : > { %5974 = vmatprep.mubr.bf16.mxu1 %v9432_v56  ;;  %v11006_v61 = vpop.f32.mrf.mxu0  ;;  %v5137_v56 = vadd.f32 %v10912_v31, %v10790_v47  ;;  %v5145_v31 = vadd.f32 %v10790_v47, %v10929_v62  ;;  %v5156_v62 = vadd.f32 %v10938_v54, %v10790_v47  ;;  %v5164_v54 = vadd.f32 %v10790_v47, %v10958_v8 }
 0x4cd   : > { %v11008_v1 = vpop.f32.mrf.mxu0  ;;  %v5533_v9 = vmax.f32 %v5137_v56, 0.0  ;;  %v5538_v56 = vmax.f32 %v5156_v62, 0.0  ;;  %v5540_v41 = vmax.f32 %v5164_v54, 0.0  ;;  %v9440_v62 = vld [vmem:[#allocation2 + $0xb8] sm:$0xff]  }
 0x4cf   : > { %v11010_v4 = vpop.f32.mrf.mxu0  ;;  %v5642_v15 = vpack.c.bf16 %v5534_v42, %v5533_v9  ;;  %v9439_v42 = vld [vmem:[#allocation2 + $0xb0] sm:$0xff]  }
 0x4d1   : > { %v11016_v34 = vpop.f32.mrf.mxu0 }
 0x4d2   : > { %5975 = vmatmul.mubr.bf16.gmra.mxu1 %v5638_v7 }
 0x4d3   : > { %5982 = vmatprep.mubr.bf16.mxu1 %v9433_v11  ;;  %v11018_v24 = vpop.f32.mrf.mxu0 }
 0x4d5   : > { %v11020_v19 = vpop.f32.mrf.mxu0 }
 0x4d7   : > { %v11022_v21 = vpop.f32.mrf.mxu0 }
 0x4d9   : > { %v11028_v27 = vpop.f32.mrf.mxu0 }
 0x4da   : > { %5983 = vmatmul.mubr.bf16.gmra.mxu1 %v5639_v20 }
 0x4db   : > { %5990 = vmatprep.mubr.bf16.mxu1 %v9434_v58  ;;  %v11030_v6 = vpop.f32.mrf.mxu0  ;;  %v5535_v58 = vmax.f32 %v5145_v31, 0.0  ;;  %v5539_v31 = vmax.f32 %v5161_v48, 0.0 }
 0x4dd   : > { %v11032_v35 = vpop.f32.mrf.mxu0  ;;  %v5643_v59 = vpack.c.bf16 %v5536_v30, %v5535_v58  ;;  %v5169_v30 = vadd.f32 %v10945_v63, %v10790_v47  ;;  %v5645_v8 = vpack.c.bf16 %v5540_v41, %v5539_v31  ;;  %v5177_v63 = vadd.f32 %v10790_v47, %v10962_v14 }
 0x4de   : > { %v5188_v14 = vadd.f32 %v10968_v16, %v10790_v47 }
 0x4df   : > { %v11034_v32 = vpop.f32.mrf.mxu0  ;;  %v5543_v41 = vmax.f32 %v5177_v63, 0.0  ;;  %v9442_v63 = vld [vmem:[#allocation2 + $0xc8] sm:$0xff]  }
 0x4e1   : > { %v11040_v50 = vpop.f32.mrf.mxu0 }
 0x4e2   : > { %5991 = vmatmul.mubr.bf16.gmra.mxu1 %v5640_v52 }
 0x4e3   : > { %5998 = vmatprep.mubr.bf16.mxu1 %v9435_v46  ;;  %v11042_v10 = vpop.f32.mrf.mxu0  ;;  %v9438_v46 = vld [vmem:[#allocation2 + $0xa8] sm:$0xff]  }
 0x4e5   : > { %v11044_v38 = vpop.f32.mrf.mxu0 }
 0x4e7   : > { %v11046_v18 = vpop.f32.mrf.mxu0 }
 0x4e9   : > { %v11052_v44 = vpop.f32.mrf.mxu0 }
 0x4ea   : > { %5999 = vmatmul.mubr.bf16.gmra.mxu1 %v5641_v43 }
 0x4eb   : > { %6006 = vmatprep.mubr.bf16.mxu1 %v9436_v0  ;;  %v11054_v7 = vpop.f32.mrf.mxu0  ;;  %v5644_v0 = vpack.c.bf16 %v5538_v56, %v5537_v55  ;;  %v5542_v55 = vmax.f32 %v5172_v28, 0.0 }
 0x4ed   : > { %v11056_v11 = vpop.f32.mrf.mxu0 }
 0x4ef   : > { %v11058_v37 = vpop.f32.mrf.mxu0 }
 0x4f1   : > { %v11064_v22 = vpop.f32.mrf.mxu0 }
 0x4f2   : > { %6007 = vmatmul.mubr.bf16.gmra.mxu1 %v5642_v15 }
 0x4f3   : > { %6014 = vmatprep.mubr.bf16.mxu1 %v9437_v36  ;;  %v11066_v20 = vpop.f32.mrf.mxu0 }
 0x4f5   : > { %v11068_v33 = vpop.f32.mrf.mxu0 }
 0x4f7   : > { %v11070_v52 = vpop.f32.mrf.mxu0 }
 0x4f9   : > { %v11076_v17 = vpop.f32.mrf.mxu0 }
 0x4fa   : > { %6015 = vmatmul.mubr.bf16.gmra.mxu1 %v5643_v59 }
 0x4fb   : > { %6022 = vmatprep.mubr.bf16.mxu1 %v9438_v46  ;;  %v11078_v51 = vpop.f32.mrf.mxu0  ;;  %v5541_v46 = vmax.f32 %v5169_v30, 0.0  ;;  %v5544_v30 = vmax.f32 %v5180_v5, 0.0 }
 0x4fd   : > { %v11080_v2 = vpop.f32.mrf.mxu0  ;;  %v5646_v48 = vpack.c.bf16 %v5542_v55, %v5541_v46  ;;  %v5647_v49 = vpack.c.bf16 %v5544_v30, %v5543_v41  ;;  %v11129_v55 = vld [vmem:[%s12645_s4] ss:$0 sm:$0xff] }
 0x4ff   : > { %v11082_v43 = vpop.f32.mrf.mxu0 }
 0x501   : > { %v11088_v9 = vpop.f32.mrf.mxu0 }
 0x502   : > { %6023 = vmatmul.mubr.bf16.gmra.mxu1 %v5644_v0 }
 0x503   : > { %6030 = vmatprep.mubr.bf16.mxu1 %v9439_v42  ;;  %v11090_v15 = vpop.f32.mrf.mxu0  ;;  %v9441_v42 = vld [vmem:[#allocation2 + $0xc0] sm:$0xff]  }
 0x505   : > { %v11092_v36 = vpop.f32.mrf.mxu0 }
 0x507   : > { %v11094_v58 = vpop.f32.mrf.mxu0 }
 0x509   : > { %v11100_v57 = vpop.f32.mrf.mxu0 }
 0x50a   : > { %6031 = vmatmul.mubr.bf16.gmra.mxu1 %v5645_v8 }
 0x50b   : > { %6038 = vmatprep.mubr.bf16.mxu1 %v9440_v62  ;;  %v11102_v59 = vpop.f32.mrf.mxu0  ;;  %v5185_v62 = vadd.f32 %v10960_v13, %v10790_v47 }
 0x50d   : > { %v11104_v56 = vpop.f32.mrf.mxu0 }
 0x50e   : > { %12668 = vst [vmem:[#allocation3_spill] sm:$0xff] %v11104_v56 }
 0x50f   : > { %v11106_v0 = vpop.f32.mrf.mxu0 }
 0x511   : > { %v11112_v54 = vpop.f32.mrf.mxu0 }
 0x512   : > { %12669 = vst [vmem:[#allocation4_spill] sm:$0xff] %v11112_v54  ;;  %6039 = vmatmul.mubr.bf16.gmra.mxu1 %v5646_v48  ;;  %v9443_v54 = vld [vmem:[#allocation2 + $0xd0] sm:$0xff]  }
 0x513   : > { %6046 = vmatprep.mubr.bf16.mxu1 %v9441_v42  ;;  %v11114_v31 = vpop.f32.mrf.mxu0  ;;  %v5545_v42 = vmax.f32 %v5185_v62, 0.0 }
 0x514   : > { %12670 = vst [vmem:[#allocation5_spill] sm:$0xff] %v11114_v31 }
 0x515   : > { %v11116_v28 = vpop.f32.mrf.mxu0 }
 0x516   : > { %12671 = vst [vmem:[#allocation6_spill] sm:$0xff] %v11116_v28  ;;  %v5546_v28 = vmax.f32 %v5188_v14, 0.0 }
 0x517   : > { %v11118_v8 = vpop.f32.mrf.mxu0 }
 0x518   : > { %12672 = vst [vmem:[#allocation7_spill] sm:$0xff] %v11118_v8 }
 0x519   : > { %v11124_v46 = vpop.f32.mrf.mxu0 }
 0x51a   : > { %12673 = vst [vmem:[#allocation8_spill] sm:$0xff] %v11124_v46  ;;  %v5856_v48 = vpop.f32.mrf.mxu1  ;;  %6047 = vmatmul.mubr.bf16.gmra.mxu1 %v5647_v49  ;;  %v5648_v46 = vpack.c.bf16 %v5546_v28, %v5545_v42  ;;  %v5193_v49 = vadd.f32 %v10790_v47, %v10974_v26 }
 0x51b   : > { %6054 = vmatprep.mubr.bf16.mxu1 %v9442_v63  ;;  %v11131_v5 = vpop.f32.mrf.mxu0  ;;  %v11134_v8 = vadd.f32 %v11129_v55, %v5856_v48  ;;  %v5196_v63 = vadd.f32 %v10790_v47, %v10982_v3 }
 0x51c   : > { %12674 = vst [vmem:[#allocation9_spill] sm:$0xff] %v11131_v5  ;;  %v5858_v13 = vpop.f32.mrf.mxu1  ;;  %v5547_v28 = vmax.f32 %v5193_v49, 0.0 }
 0x51d   : > { %12675 = vst [vmem:[#allocation10_spill] sm:$0xff] %v11134_v8  ;;  %v11136_v41 = vpop.f32.mrf.mxu0  ;;  %v6367_v14 = vmax.f32 %v11134_v8, 0.0  ;;  %v5548_v42 = vmax.f32 %v5196_v63, 0.0 }
 0x51e   : > { %v5859_v16 = vpop.f32.mrf.mxu1  ;;  %12676 = vst [vmem:[#allocation11_spill] sm:$0xff] %v11136_v41 }
 0x51f   : > { %v11139_v30 = vadd.f32 %v11129_v55, %v5859_v16  ;;  %v11145_v62 = vpop.f32.mrf.mxu0  ;;  %v5649_v49 = vpack.c.bf16 %v5548_v42, %v5547_v28 }
 0x520   : > { %v5861_v5 = vpop.f32.mrf.mxu1  ;;  %12678 = vst [vmem:[#allocation13_spill] sm:$0xff] %v11145_v62 }
 0x521   : > { %12677 = vst [vmem:[#allocation12_spill] sm:$0xff] %v11139_v30  ;;  %v6368_v48 = vmax.f32 %v11139_v30, 0.0  ;;  %v11149_v41 = vpop.f32.mrf.mxu0 }
 0x522   : > { %v5864_v13 = vpop.f32.mrf.mxu1  ;;  %6055 = vmatmul.mubr.bf16.gmra.mxu1 %v5648_v46  ;;  %12679 = vst [vmem:[#allocation14_spill] sm:$0xff] %v11149_v41 }
 0x523   : > { %v6495_v16 = vpack.c.bf16 %v6368_v48, %v6367_v14  ;;  %6062 = vmatprep.mubr.bf16.mxu1 %v9443_v54  ;;  %v11151_v56 = vpop.f32.mrf.mxu0  ;;  %v11154_v3 = vadd.f32 %v11129_v55, %v5864_v13  ;;  %v5201_v14 = vadd.f32 %v10972_v25, %v10790_v47  ;;  %v5204_v54 = vadd.f32 %v10980_v29, %v10790_v47 }
 0x524   : > { %v5866_v26 = vpop.f32.mrf.mxu1  ;;  %12680 = vst [vmem:[#allocation15_spill] sm:$0xff] %v11151_v56  ;;  %v9444_v56 = vld [vmem:[#allocation2 + $0xd8] sm:$0xff]  }
 0x525   : > { %9148 = vmatprep.mubr.bf16.mxu0 %v6495_v16  ;;  %v9114_v8 = vpop.f32.mrf.mxu0  ;;  %v6369_v13 = vmax.f32 %v11154_v3, 0.0  ;;  %v5549_v62 = vmax.f32 %v5201_v14, 0.0  ;;  %v5550_v31 = vmax.f32 %v5204_v54, 0.0  ;;  %v5209_v14 = vadd.f32 %v10790_v47, %v10986_v40 }
 0x526   : > { %v5867_v5 = vpop.f32.mrf.mxu1  ;;  %v5425_v46 = vadd.f32 %v9114_v8, %v10790_v47  ;;  %v5212_v54 = vadd.f32 %v10790_v47, %v10994_v23 }
 0x527   : > { %v11157_v30 = vadd.f32 %v11129_v55, %v5867_v5  ;;  %v11164_v48 = vpop.f32.mrf.mxu0  ;;  %v5551_v40 = vmax.f32 %v5209_v14, 0.0  ;;  %v5217_v14 = vadd.f32 %v10984_v39, %v10790_v47 }
 0x528   : > { %v5869_v63 = vpop.f32.mrf.mxu1  ;;  %12682 = vst [vmem:[#allocation17_spill] sm:$0xff] %v11164_v48  ;;  %v5605_v8 = vmax.f32 %v5425_v46, 0.0  ;;  %v5650_v46 = vpack.c.bf16 %v5550_v31, %v5549_v62  ;;  %v5552_v62 = vmax.f32 %v5212_v54, 0.0  ;;  %v5220_v54 = vadd.f32 %v10992_v45, %v10790_v47 }
 0x529   : > { %12681 = vst [vmem:[#allocation16_spill] sm:$0xff] %v11157_v30  ;;  %v6370_v16 = vmax.f32 %v11157_v30, 0.0  ;;  %v9115_v5 = vpop.f32.mrf.mxu0 }
 0x52a   : > { %v5872_v26 = vpop.f32.mrf.mxu1  ;;  %6063 = vmatmul.mubr.bf16.gmra.mxu1 %v5649_v49  ;;  %v5428_v25 = vadd.f32 %v9115_v5, %v10790_v47 }
 0x52b   : > { %v6496_v41 = vpack.c.bf16 %v6370_v16, %v6369_v13  ;;  %6070 = vmatprep.mubr.bf16.mxu1 %v9444_v56  ;;  %v11169_v28 = vpop.f32.mrf.mxu0  ;;  %v11172_v42 = vadd.f32 %v11129_v55, %v5872_v26 }
 0x52c   : > { %v5874_v29 = vpop.f32.mrf.mxu1  ;;  %v5606_v63 = vmax.f32 %v5428_v25, 0.0 }
 0x52d   : > { %9149 = vmatmul.mubr.bf16.vlgmr.msra.gmra.mxu0 %v6496_v41  ;;  %v6371_v41 = vmax.f32 %v11172_v42, 0.0  ;;  %v9445_v29 = vld [vmem:[#allocation2 + $0xe0] sm:$0xff]  }
 0x52e   : > { %v5875_v48 = vpop.f32.mrf.mxu1  ;;  %v9118_v30 = vpop.f32.mrf.mxu0  ;;  %v11177_v13 = vpack.c.bf16 %v5606_v63, %v5605_v8 }
 0x52f   : > { %v11175_v49 = vadd.f32 %v11129_v55, %v5875_v48  ;;  %v5441_v56 = vadd.f32 %v9118_v30, %v10790_v47 }
 0x530   : > { %12684 = vst [vmem:[#allocation19_spill] sm:$0xff] %v11177_v13  ;;  %v5877_v16 = vpop.f32.mrf.mxu1  ;;  %v11184_v26 = vpop.f32.mrf.mxu0 }
 0x531   : > { %12683 = vst [vmem:[#allocation18_spill] sm:$0xff] %v11175_v49  ;;  %12685 = vst [vmem:[#allocation20_spill] sm:$0xff] %v11184_v26  ;;  %v6372_v5 = vmax.f32 %v11175_v49, 0.0  ;;  %v5609_v31 = vmax.f32 %v5441_v56, 0.0 }
 0x532   : > { %v5880_v48 = vpop.f32.mrf.mxu1  ;;  %6071 = vmatmul.mubr.bf16.gmra.mxu1 %v5650_v46  ;;  %v9119_v8 = vpop.f32.mrf.mxu0 }
 0x533   : > { %v6497_v25 = vpack.c.bf16 %v6372_v5, %v6371_v41  ;;  %6078 = vmatprep.mubr.bf16.mxu1 %v9445_v29  ;;  %v5444_v30 = vadd.f32 %v9119_v8, %v10790_v47  ;;  %v11192_v16 = vadd.f32 %v11129_v55, %v5880_v48  ;;  %v5651_v5 = vpack.c.bf16 %v5552_v62, %v5551_v40 }
 0x534   : > { %v5882_v63 = vpop.f32.mrf.mxu1  ;;  %v11189_v23 = vpop.f32.mrf.mxu0 }
 0x535   : > { %12686 = vst [vmem:[#allocation21_spill] sm:$0xff] %v11189_v23  ;;  %9152 = vmatprep.mubr.bf16.mxu0 %v6497_v25  ;;  %v5610_v13 = vmax.f32 %v5444_v30, 0.0  ;;  %v6373_v25 = vmax.f32 %v11192_v16, 0.0  ;;  %v9446_v30 = vld [vmem:[#allocation2 + $0xe8] sm:$0xff]   ;;  %v5553_v63 = vmax.f32 %v5217_v14, 0.0 }
 0x536   : > { %v5883_v26 = vpop.f32.mrf.mxu1  ;;  %v9122_v49 = vpop.f32.mrf.mxu0  ;;  %v11223_v14 = vld [vmem:[%s12643_s2 + $0x4] ss:$0 sm:$0xff] }
 0x537   : > { %v11195_v46 = vadd.f32 %v11129_v55, %v5883_v26  ;;  %v11197_v41 = vpack.c.bf16 %v5610_v13, %v5609_v31  ;;  %v5457_v56 = vadd.f32 %v9122_v49, %v10790_v47 }
 0x538   : > { %v5885_v48 = vpop.f32.mrf.mxu1  ;;  %v11204_v8 = vpop.f32.mrf.mxu0 }
 0x539   : > { %12687 = vst [vmem:[#allocation22_spill] sm:$0xff] %v11197_v41  ;;  %12688 = vst [vmem:[#allocation23_spill] sm:$0xff] %v11204_v8  ;;  %v6374_v29 = vmax.f32 %v11195_v46, 0.0  ;;  %v5613_v49 = vmax.f32 %v5457_v56, 0.0  ;;  %v5554_v41 = vmax.f32 %v5220_v54, 0.0  ;;  %v5225_v54 = vadd.f32 %v11223_v14, %v10998_v12 }
 0x53a   : > { %v5888_v26 = vpop.f32.mrf.mxu1  ;;  %6079 = vmatmul.mubr.bf16.gmra.mxu1 %v5651_v5  ;;  %v9123_v13 = vpop.f32.mrf.mxu0 }
 0x53b   : > { %v6498_v31 = vpack.c.bf16 %v6374_v29, %v6373_v25  ;;  %6086 = vmatprep.mubr.bf16.mxu1 %v9446_v30  ;;  %v5460_v39 = vadd.f32 %v9123_v13, %v10790_v47  ;;  %v11212_v62 = vadd.f32 %v11129_v55, %v5888_v26  ;;  %v5652_v29 = vpack.c.bf16 %v5554_v41, %v5553_v63 }
 0x53c   : > { %v5890_v45 = vpop.f32.mrf.mxu1  ;;  %v11209_v40 = vpop.f32.mrf.mxu0  ;;  %v5228_v26 = vadd.f32 %v11223_v14, %v11006_v61  ;;  %v5555_v12 = vmax.f32 %v5225_v54, 0.0  ;;  %v5233_v54 = vadd.f32 %v11223_v14, %v10996_v53 }
 0x53d   : > { %12689 = vst [vmem:[#allocation24_spill] sm:$0xff] %v11209_v40  ;;  %9153 = vmatmul.mubr.bf16.gmra.mxu0 %v6498_v31  ;;  %v5614_v48 = vmax.f32 %v5460_v39, 0.0 }
 0x53e   : > { %v5891_v8 = vpop.f32.mrf.mxu1  ;;  %v9126_v23 = vpop.f32.mrf.mxu0  ;;  %v5556_v45 = vmax.f32 %v5228_v26, 0.0  ;;  %v5236_v26 = vadd.f32 %v11223_v14, %v11004_v60 }
 0x53f   : > { %v11215_v5 = vadd.f32 %v11129_v55, %v5891_v8  ;;  %v11217_v25 = vpack.c.bf16 %v5614_v48, %v5613_v49  ;;  %v5473_v56 = vadd.f32 %v9126_v23, %v10790_v47  ;;  %v6375_v8 = vmax.f32 %v11212_v62, 0.0  ;;  %v9448_v49 = vld [vmem:[#allocation2 + $0xf0] sm:$0xff]  }
 0x540   : > { %v5893_v13 = vpop.f32.mrf.mxu1  ;;  %v11229_v31 = vpop.f32.mrf.mxu0 }
 0x541   : > { %12690 = vst [vmem:[#allocation25_spill] sm:$0xff] %v11217_v25  ;;  %12691 = vst [vmem:[#allocation26_spill] sm:$0xff] %v11229_v31  ;;  %v6376_v30 = vmax.f32 %v11215_v5, 0.0  ;;  %v5617_v39 = vmax.f32 %v5473_v56, 0.0 }
 0x542   : > { %v5896_v47 = vpop.f32.mrf.mxu1  ;;  %6087 = vmatmul.mubr.bf16.gmra.mxu1 %v5652_v29  ;;  %v9127_v23 = vpop.f32.mrf.mxu0 }
 0x543   : > { %v6499_v41 = vpack.c.bf16 %v6376_v30, %v6375_v8  ;;  %6094 = vmatprep.mubr.bf16.mxu1 %v9448_v49  ;;  %v5476_v63 = vadd.f32 %v11223_v14, %v9127_v23  ;;  %v11237_v13 = vadd.f32 %v11129_v55, %v5896_v47  ;;  %v5653_v30 = vpack.c.bf16 %v5556_v45, %v5555_v12 }
 0x544   : > { %v5898_v48 = vpop.f32.mrf.mxu1  ;;  %v11234_v61 = vpop.f32.mrf.mxu0 }
 0x545   : > { %9156 = vmatprep.mubr.bf16.mxu0 %v6499_v41  ;;  %v5618_v25 = vmax.f32 %v5476_v63, 0.0  ;;  %v6377_v41 = vmax.f32 %v11237_v13, 0.0  ;;  %v9449_v63 = vld [vmem:[#allocation2 + $0xf8] sm:$0xff]   ;;  %v5557_v48 = vmax.f32 %v5233_v54, 0.0  ;;  %v5244_v54 = vadd.f32 %v11223_v14, %v11018_v24 }
 0x546   : > { %v5899_v31 = vpop.f32.mrf.mxu1  ;;  %v9130_v40 = vpop.f32.mrf.mxu0 }
 0x547   : > { %v11240_v29 = vadd.f32 %v11129_v55, %v5899_v31  ;;  %v11242_v8 = vpack.c.bf16 %v5618_v25, %v5617_v39  ;;  %v5489_v56 = vadd.f32 %v11223_v14, %v9130_v40 }
 0x548   : > { %v5901_v47 = vpop.f32.mrf.mxu1  ;;  %v11249_v23 = vpop.f32.mrf.mxu0 }
 0x549   : > { %12692 = vst [vmem:[#allocation27_spill] sm:$0xff] %v11242_v8  ;;  %12693 = vst [vmem:[#allocation28_spill] sm:$0xff] %v11249_v23  ;;  %v6378_v49 = vmax.f32 %v11240_v29, 0.0  ;;  %v5621_v40 = vmax.f32 %v5489_v56, 0.0  ;;  %v5558_v8 = vmax.f32 %v5236_v26, 0.0  ;;  %v5241_v56 = vadd.f32 %v11223_v14, %v11010_v4 }
 0x54a   : > { %v5904_v31 = vpop.f32.mrf.mxu1  ;;  %6095 = vmatmul.mubr.bf16.gmra.mxu1 %v5653_v30  ;;  %v9131_v25 = vpop.f32.mrf.mxu0 }
 0x54b   : > { %v6500_v39 = vpack.c.bf16 %v6378_v49, %v6377_v41  ;;  %6102 = vmatprep.mubr.bf16.mxu1 %v9449_v63  ;;  %v5492_v53 = vadd.f32 %v11223_v14, %v9131_v25  ;;  %v11255_v12 = vadd.f32 %v11129_v55, %v5904_v31  ;;  %v5654_v41 = vpack.c.bf16 %v5558_v8, %v5557_v48  ;;  %v9450_v63 = vld [vmem:[#allocation2 + $0x100] sm:$0xff]  }
 0x54c   : > { %v5906_v60 = vpop.f32.mrf.mxu1  ;;  %v5249_v48 = vadd.f32 %v11223_v14, %v11008_v1 }
 0x54d   : > { %9157 = vmatmul.mubr.bf16.gmra.mxu0 %v6500_v39  ;;  %v5622_v45 = vmax.f32 %v5492_v53, 0.0  ;;  %v6379_v49 = vmax.f32 %v11255_v12, 0.0  ;;  %v5559_v53 = vmax.f32 %v5241_v56, 0.0 }
 0x54e   : > { %v5907_v47 = vpop.f32.mrf.mxu1 }
 0x54f   : > { %v11258_v23 = vadd.f32 %v11129_v55, %v5907_v47  ;;  %v11260_v30 = vpack.c.bf16 %v5622_v45, %v5621_v40  ;;  %v5560_v40 = vmax.f32 %v5244_v54, 0.0  ;;  %v5252_v45 = vadd.f32 %v11223_v14, %v11016_v34 }
 0x550   : > { %v5909_v26 = vpop.f32.mrf.mxu1 }
 0x551   : > { %v6380_v31 = vmax.f32 %v11258_v23, 0.0  ;;  %v5655_v47 = vpack.c.bf16 %v5560_v40, %v5559_v53  ;;  %v5257_v40 = vadd.f32 %v11223_v14, %v11022_v21 }
 0x552   : > { %v5912_v25 = vpop.f32.mrf.mxu1  ;;  %6103 = vmatmul.mubr.bf16.gmra.mxu1 %v5654_v41 }
 0x553   : > { %v6501_v39 = vpack.c.bf16 %v6380_v31, %v6379_v49  ;;  %6110 = vmatprep.mubr.bf16.mxu1 %v9450_v63  ;;  %v11269_v8 = vadd.f32 %v11129_v55, %v5912_v25  ;;  %v9451_v31 = vld [vmem:[#allocation2 + $0x108] sm:$0xff]   ;;  %v5561_v25 = vmax.f32 %v5249_v48, 0.0 }
 0x554   : > { %v5914_v60 = vpop.f32.mrf.mxu1 }
 0x555   : > { %9160 = vmatprep.mubr.bf16.mxu0 %v6501_v39  ;;  %v6381_v56 = vmax.f32 %v11269_v8, 0.0  ;;  %v5562_v39 = vmax.f32 %v5252_v45, 0.0 }
 0x556   : > { %v5915_v4 = vpop.f32.mrf.mxu1 }
 0x557   : > { %v11272_v24 = vadd.f32 %v11129_v55, %v5915_v4  ;;  %v5656_v53 = vpack.c.bf16 %v5562_v39, %v5561_v25  ;;  %v5260_v4 = vadd.f32 %v11223_v14, %v11030_v6  ;;  %v5265_v39 = vadd.f32 %v11223_v14, %v11020_v19 }
 0x558   : > { %v5917_v41 = vpop.f32.mrf.mxu1 }
 0x559   : > { %v6382_v54 = vmax.f32 %v11272_v24, 0.0 }
 0x55a   : > { %v5920_v26 = vpop.f32.mrf.mxu1  ;;  %6111 = vmatmul.mubr.bf16.gmra.mxu1 %v5655_v47 }
 0x55b   : > { %v6502_v49 = vpack.c.bf16 %v6382_v54, %v6381_v56  ;;  %6118 = vmatprep.mubr.bf16.mxu1 %v9451_v31  ;;  %v11281_v60 = vadd.f32 %v11129_v55, %v5920_v26  ;;  %v9452_v54 = vld [vmem:[#allocation2 + $0x110] sm:$0xff]   ;;  %v5563_v26 = vmax.f32 %v5257_v40, 0.0 }
 0x55c   : > { %v5922_v63 = vpop.f32.mrf.mxu1 }
 0x55d   : > { %9161 = vmatmul.mubr.bf16.gmra.mxu0 %v6502_v49  ;;  %v6383_v48 = vmax.f32 %v11281_v60, 0.0  ;;  %v5564_v49 = vmax.f32 %v5260_v4, 0.0  ;;  %v5268_v63 = vadd.f32 %v11223_v14, %v11028_v27 }
 0x55e   : > { %v5923_v1 = vpop.f32.mrf.mxu1 }
 0x55f   : > { %v11284_v34 = vadd.f32 %v11129_v55, %v5923_v1  ;;  %v5657_v1 = vpack.c.bf16 %v5564_v49, %v5563_v26  ;;  %v5273_v49 = vadd.f32 %v11223_v14, %v11034_v32 }
 0x560   : > { %v5925_v47 = vpop.f32.mrf.mxu1 }
 0x561   : > { %v6384_v45 = vmax.f32 %v11284_v34, 0.0 }
 0x562   : > { %v5928_v41 = vpop.f32.mrf.mxu1  ;;  %6119 = vmatmul.mubr.bf16.gmra.mxu1 %v5656_v53 }
 0x563   : > { %v6503_v56 = vpack.c.bf16 %v6384_v45, %v6383_v48  ;;  %6126 = vmatprep.mubr.bf16.mxu1 %v9452_v54  ;;  %v11293_v25 = vadd.f32 %v11129_v55, %v5928_v41  ;;  %v9453_v45 = vld [vmem:[#allocation2 + $0x118] sm:$0xff]   ;;  %v5565_v41 = vmax.f32 %v5265_v39, 0.0 }
 0x564   : > { %v5930_v31 = vpop.f32.mrf.mxu1 }
 0x565   : > { %9164 = vmatprep.mubr.bf16.mxu0 %v6503_v56  ;;  %v6385_v40 = vmax.f32 %v11293_v25, 0.0  ;;  %v5566_v56 = vmax.f32 %v5268_v63, 0.0 }
 0x566   : > { %v5931_v21 = vpop.f32.mrf.mxu1 }
 0x567   : > { %v11296_v6 = vadd.f32 %v11129_v55, %v5931_v21  ;;  %v5658_v26 = vpack.c.bf16 %v5566_v56, %v5565_v41  ;;  %v5276_v21 = vadd.f32 %v11223_v14, %v11042_v10  ;;  %v5281_v56 = vadd.f32 %v11223_v14, %v11032_v35 }
 0x568   : > { %v5933_v53 = vpop.f32.mrf.mxu1 }
 0x569   : > { %v6386_v4 = vmax.f32 %v11296_v6, 0.0 }
 0x56a   : > { %v5936_v47 = vpop.f32.mrf.mxu1  ;;  %6127 = vmatmul.mubr.bf16.gmra.mxu1 %v5657_v1 }
 0x56b   : > { %v6504_v48 = vpack.c.bf16 %v6386_v4, %v6385_v40  ;;  %6134 = vmatprep.mubr.bf16.mxu1 %v9453_v45  ;;  %v11305_v31 = vadd.f32 %v11129_v55, %v5936_v47  ;;  %v9454_v4 = vld [vmem:[#allocation2 + $0x120] sm:$0xff]   ;;  %v5567_v47 = vmax.f32 %v5273_v49, 0.0 }
 0x56c   : > { %v5938_v54 = vpop.f32.mrf.mxu1 }
 0x56d   : > { %9165 = vmatmul.mubr.bf16.gmra.mxu0 %v6504_v48  ;;  %v6387_v39 = vmax.f32 %v11305_v31, 0.0  ;;  %v5568_v48 = vmax.f32 %v5276_v21, 0.0  ;;  %v5284_v54 = vadd.f32 %v11223_v14, %v11040_v50 }
 0x56e   : > { %v5939_v19 = vpop.f32.mrf.mxu1 }
 0x56f   : > { %v11308_v27 = vadd.f32 %v11129_v55, %v5939_v19  ;;  %v5659_v19 = vpack.c.bf16 %v5568_v48, %v5567_v47  ;;  %v5289_v48 = vadd.f32 %v11223_v14, %v11046_v18 }
 0x570   : > { %v5941_v1 = vpop.f32.mrf.mxu1 }
 0x571   : > { %v6388_v63 = vmax.f32 %v11308_v27, 0.0 }
 0x572   : > { %v5944_v53 = vpop.f32.mrf.mxu1  ;;  %6135 = vmatmul.mubr.bf16.gmra.mxu1 %v5658_v26 }
 0x573   : > { %v6505_v40 = vpack.c.bf16 %v6388_v63, %v6387_v39  ;;  %6142 = vmatprep.mubr.bf16.mxu1 %v9454_v4  ;;  %v11317_v41 = vadd.f32 %v11129_v55, %v5944_v53  ;;  %v9455_v63 = vld [vmem:[#allocation2 + $0x128] sm:$0xff]   ;;  %v5569_v53 = vmax.f32 %v5281_v56, 0.0 }
 0x574   : > { %v5946_v45 = vpop.f32.mrf.mxu1 }
 0x575   : > { %9168 = vmatprep.mubr.bf16.mxu0 %v6505_v40  ;;  %v6389_v49 = vmax.f32 %v11317_v41, 0.0  ;;  %v5570_v40 = vmax.f32 %v5284_v54, 0.0 }
 0x576   : > { %v5947_v32 = vpop.f32.mrf.mxu1 }
 0x577   : > { %v11320_v10 = vadd.f32 %v11129_v55, %v5947_v32  ;;  %v5660_v47 = vpack.c.bf16 %v5570_v40, %v5569_v53  ;;  %v5292_v32 = vadd.f32 %v11223_v14, %v11054_v7  ;;  %v5297_v40 = vadd.f32 %v11223_v14, %v11044_v38 }
 0x578   : > { %v5949_v26 = vpop.f32.mrf.mxu1 }
 0x579   : > { %v6390_v21 = vmax.f32 %v11320_v10, 0.0 }
 0x57a   : > { %v5952_v1 = vpop.f32.mrf.mxu1  ;;  %6143 = vmatmul.mubr.bf16.gmra.mxu1 %v5659_v19 }
 0x57b   : > { %v6506_v39 = vpack.c.bf16 %v6390_v21, %v6389_v49  ;;  %6150 = vmatprep.mubr.bf16.mxu1 %v9455_v63  ;;  %v11329_v45 = vadd.f32 %v11129_v55, %v5952_v1  ;;  %v9456_v21 = vld [vmem:[#allocation2 + $0x130] sm:$0xff]   ;;  %v5571_v1 = vmax.f32 %v5289_v48, 0.0 }
 0x57c   : > { %v5954_v4 = vpop.f32.mrf.mxu1 }
 0x57d   : > { %9169 = vmatmul.mubr.bf16.gmra.mxu0 %v6506_v39  ;;  %v6391_v56 = vmax.f32 %v11329_v45, 0.0  ;;  %v5572_v39 = vmax.f32 %v5292_v32, 0.0  ;;  %v5300_v4 = vadd.f32 %v11223_v14, %v11052_v44 }
 0x57e   : > { %v5955_v35 = vpop.f32.mrf.mxu1 }
 0x57f   : > { %v11332_v50 = vadd.f32 %v11129_v55, %v5955_v35  ;;  %v5661_v35 = vpack.c.bf16 %v5572_v39, %v5571_v1  ;;  %v5305_v39 = vadd.f32 %v11223_v14, %v11058_v37 }
 0x580   : > { %v5957_v19 = vpop.f32.mrf.mxu1 }
 0x581   : > { %v6392_v54 = vmax.f32 %v11332_v50, 0.0 }
 0x582   : > { %v5960_v26 = vpop.f32.mrf.mxu1  ;;  %6151 = vmatmul.mubr.bf16.gmra.mxu1 %v5660_v47 }
 0x583   : > { %v6507_v49 = vpack.c.bf16 %v6392_v54, %v6391_v56  ;;  %6158 = vmatprep.mubr.bf16.mxu1 %v9456_v21  ;;  %v11341_v53 = vadd.f32 %v11129_v55, %v5960_v26  ;;  %v9457_v54 = vld [vmem:[#allocation2 + $0x138] sm:$0xff]   ;;  %v5573_v26 = vmax.f32 %v5297_v40, 0.0 }
 0x584   : > { %v5962_v63 = vpop.f32.mrf.mxu1 }
 0x585   : > { %9172 = vmatprep.mubr.bf16.mxu0 %v6507_v49  ;;  %v6393_v48 = vmax.f32 %v11341_v53, 0.0  ;;  %v5574_v49 = vmax.f32 %v5300_v4, 0.0 }
 0x586   : > { %v5963_v18 = vpop.f32.mrf.mxu1 }
 0x587   : > { %v11344_v7 = vadd.f32 %v11129_v55, %v5963_v18  ;;  %v5662_v1 = vpack.c.bf16 %v5574_v49, %v5573_v26  ;;  %v5308_v18 = vadd.f32 %v11223_v14, %v11066_v20  ;;  %v5313_v49 = vadd.f32 %v11223_v14, %v11056_v11 }
 0x588   : > { %v5965_v47 = vpop.f32.mrf.mxu1 }
 0x589   : > { %v6394_v32 = vmax.f32 %v11344_v7, 0.0 }
 0x58a   : > { %v5968_v19 = vpop.f32.mrf.mxu1  ;;  %6159 = vmatmul.mubr.bf16.gmra.mxu1 %v5661_v35 }
 0x58b   : > { %v6508_v56 = vpack.c.bf16 %v6394_v32, %v6393_v48  ;;  %6166 = vmatprep.mubr.bf16.mxu1 %v9457_v54  ;;  %v11353_v63 = vadd.f32 %v11129_v55, %v5968_v19  ;;  %v9458_v32 = vld [vmem:[#allocation2 + $0x140] sm:$0xff]   ;;  %v5575_v19 = vmax.f32 %v5305_v39, 0.0 }
 0x58c   : > { %v5970_v21 = vpop.f32.mrf.mxu1 }
 0x58d   : > { %9173 = vmatmul.mubr.bf16.gmra.mxu0 %v6508_v56  ;;  %v6395_v40 = vmax.f32 %v11353_v63, 0.0  ;;  %v5576_v56 = vmax.f32 %v5308_v18, 0.0  ;;  %v5316_v21 = vadd.f32 %v11223_v14, %v11064_v22 }
 0x58e   : > { %v5971_v38 = vpop.f32.mrf.mxu1 }
 0x58f   : > { %v11356_v44 = vadd.f32 %v11129_v55, %v5971_v38  ;;  %v5663_v38 = vpack.c.bf16 %v5576_v56, %v5575_v19  ;;  %v5321_v56 = vadd.f32 %v11223_v14, %v11070_v52 }
 0x590   : > { %v5973_v35 = vpop.f32.mrf.mxu1 }
 0x591   : > { %v6396_v4 = vmax.f32 %v11356_v44, 0.0 }
 0x592   : > { %v5976_v47 = vpop.f32.mrf.mxu1  ;;  %6167 = vmatmul.mubr.bf16.gmra.mxu1 %v5662_v1 }
 0x593   : > { %v6509_v48 = vpack.c.bf16 %v6396_v4, %v6395_v40  ;;  %6174 = vmatprep.mubr.bf16.mxu1 %v9458_v32  ;;  %v11365_v26 = vadd.f32 %v11129_v55, %v5976_v47  ;;  %v9459_v4 = vld [vmem:[#allocation2 + $0x148] sm:$0xff]   ;;  %v5577_v47 = vmax.f32 %v5313_v49, 0.0 }
 0x594   : > { %v5978_v54 = vpop.f32.mrf.mxu1 }
 0x595   : > { %9176 = vmatprep.mubr.bf16.mxu0 %v6509_v48  ;;  %v6397_v39 = vmax.f32 %v11365_v26, 0.0  ;;  %v5578_v48 = vmax.f32 %v5316_v21, 0.0 }
 0x596   : > { %v5979_v37 = vpop.f32.mrf.mxu1 }
 0x597   : > { %v11368_v20 = vadd.f32 %v11129_v55, %v5979_v37  ;;  %v5664_v19 = vpack.c.bf16 %v5578_v48, %v5577_v47  ;;  %v5324_v37 = vadd.f32 %v11223_v14, %v11078_v51  ;;  %v5329_v48 = vadd.f32 %v11223_v14, %v11068_v33 }
 0x598   : > { %v5981_v1 = vpop.f32.mrf.mxu1 }
 0x599   : > { %v6398_v18 = vmax.f32 %v11368_v20, 0.0 }
 0x59a   : > { %v5984_v35 = vpop.f32.mrf.mxu1  ;;  %6175 = vmatmul.mubr.bf16.gmra.mxu1 %v5663_v38 }
 0x59b   : > { %v6510_v40 = vpack.c.bf16 %v6398_v18, %v6397_v39  ;;  %6182 = vmatprep.mubr.bf16.mxu1 %v9459_v4  ;;  %v11377_v54 = vadd.f32 %v11129_v55, %v5984_v35  ;;  %v9460_v18 = vld [vmem:[#allocation2 + $0x150] sm:$0xff]   ;;  %v5579_v35 = vmax.f32 %v5321_v56, 0.0 }
 0x59c   : > { %v5986_v32 = vpop.f32.mrf.mxu1 }
 0x59d   : > { %9177 = vmatmul.mubr.bf16.gmra.mxu0 %v6510_v40  ;;  %v6399_v49 = vmax.f32 %v11377_v54, 0.0  ;;  %v5580_v40 = vmax.f32 %v5324_v37, 0.0  ;;  %v5332_v32 = vadd.f32 %v11223_v14, %v11076_v17 }
 0x59e   : > { %v5987_v11 = vpop.f32.mrf.mxu1 }
 0x59f   : > { %v11380_v22 = vadd.f32 %v11129_v55, %v5987_v11  ;;  %v5665_v11 = vpack.c.bf16 %v5580_v40, %v5579_v35  ;;  %v5337_v40 = vadd.f32 %v11223_v14, %v11082_v43 }
 0x5a0   : > { %v5989_v38 = vpop.f32.mrf.mxu1 }
 0x5a1   : > { %v6400_v21 = vmax.f32 %v11380_v22, 0.0 }
 0x5a2   : > { %v5992_v1 = vpop.f32.mrf.mxu1  ;;  %6183 = vmatmul.mubr.bf16.gmra.mxu1 %v5664_v19 }
 0x5a3   : > { %v6511_v39 = vpack.c.bf16 %v6400_v21, %v6399_v49  ;;  %6190 = vmatprep.mubr.bf16.mxu1 %v9460_v18  ;;  %v11389_v47 = vadd.f32 %v11129_v55, %v5992_v1  ;;  %v9461_v21 = vld [vmem:[#allocation2 + $0x158] sm:$0xff]   ;;  %v5581_v1 = vmax.f32 %v5329_v48, 0.0 }
 0x5a4   : > { %v5994_v4 = vpop.f32.mrf.mxu1 }
 0x5a5   : > { %9180 = vmatprep.mubr.bf16.mxu0 %v6511_v39  ;;  %v6401_v56 = vmax.f32 %v11389_v47, 0.0  ;;  %v5582_v39 = vmax.f32 %v5332_v32, 0.0 }
 0x5a6   : > { %v5995_v52 = vpop.f32.mrf.mxu1 }
 0x5a7   : > { %v11392_v51 = vadd.f32 %v11129_v55, %v5995_v52  ;;  %v5666_v35 = vpack.c.bf16 %v5582_v39, %v5581_v1  ;;  %v5340_v52 = vadd.f32 %v11223_v14, %v11090_v15  ;;  %v5345_v39 = vadd.f32 %v11223_v14, %v11080_v2 }
 0x5a8   : > { %v5997_v19 = vpop.f32.mrf.mxu1 }
 0x5a9   : > { %v6402_v37 = vmax.f32 %v11392_v51, 0.0 }
 0x5aa   : > { %v6000_v38 = vpop.f32.mrf.mxu1  ;;  %6191 = vmatmul.mubr.bf16.gmra.mxu1 %v5665_v11 }
 0x5ab   : > { %v6512_v49 = vpack.c.bf16 %v6402_v37, %v6401_v56  ;;  %6198 = vmatprep.mubr.bf16.mxu1 %v9461_v21  ;;  %v11401_v4 = vadd.f32 %v11129_v55, %v6000_v38  ;;  %v9462_v37 = vld [vmem:[#allocation2 + $0x160] sm:$0xff]   ;;  %v5583_v38 = vmax.f32 %v5337_v40, 0.0 }
 0x5ac   : > { %v6002_v18 = vpop.f32.mrf.mxu1 }
 0x5ad   : > { %9181 = vmatmul.mubr.bf16.gmra.mxu0 %v6512_v49  ;;  %v6403_v48 = vmax.f32 %v11401_v4, 0.0  ;;  %v5584_v49 = vmax.f32 %v5340_v52, 0.0  ;;  %v5348_v18 = vadd.f32 %v11223_v14, %v11088_v9 }
 0x5ae   : > { %v6003_v33 = vpop.f32.mrf.mxu1 }
 0x5af   : > { %v11404_v17 = vadd.f32 %v11129_v55, %v6003_v33  ;;  %v5667_v33 = vpack.c.bf16 %v5584_v49, %v5583_v38  ;;  %v5353_v49 = vadd.f32 %v11223_v14, %v11094_v58 }
 0x5b0   : > { %v6005_v11 = vpop.f32.mrf.mxu1 }
 0x5b1   : > { %v6404_v32 = vmax.f32 %v11404_v17, 0.0 }
 0x5b2   : > { %v6008_v19 = vpop.f32.mrf.mxu1  ;;  %6199 = vmatmul.mubr.bf16.gmra.mxu1 %v5666_v35 }
 0x5b3   : > { %v6513_v56 = vpack.c.bf16 %v6404_v32, %v6403_v48  ;;  %6206 = vmatprep.mubr.bf16.mxu1 %v9462_v37  ;;  %v11413_v1 = vadd.f32 %v11129_v55, %v6008_v19  ;;  %v9463_v32 = vld [vmem:[#allocation2 + $0x168] sm:$0xff]   ;;  %v5585_v19 = vmax.f32 %v5345_v39, 0.0 }
 0x5b4   : > { %v6010_v21 = vpop.f32.mrf.mxu1 }
 0x5b5   : > { %9184 = vmatprep.mubr.bf16.mxu0 %v6513_v56  ;;  %v6405_v40 = vmax.f32 %v11413_v1, 0.0  ;;  %v5586_v56 = vmax.f32 %v5348_v18, 0.0 }
 0x5b6   : > { %v6011_v43 = vpop.f32.mrf.mxu1 }
 0x5b7   : > { %v11416_v15 = vadd.f32 %v11129_v55, %v6011_v43  ;;  %v5668_v38 = vpack.c.bf16 %v5586_v56, %v5585_v19  ;;  %v5356_v43 = vadd.f32 %v11223_v14, %v11102_v59  ;;  %v5361_v56 = vadd.f32 %v11223_v14, %v11092_v36 }
 0x5b8   : > { %v6013_v35 = vpop.f32.mrf.mxu1 }
 0x5b9   : > { %v6406_v52 = vmax.f32 %v11416_v15, 0.0 }
 0x5ba   : > { %v6016_v11 = vpop.f32.mrf.mxu1  ;;  %6207 = vmatmul.mubr.bf16.gmra.mxu1 %v5667_v33 }
 0x5bb   : > { %v6514_v48 = vpack.c.bf16 %v6406_v52, %v6405_v40  ;;  %6214 = vmatprep.mubr.bf16.mxu1 %v9463_v32  ;;  %v11425_v21 = vadd.f32 %v11129_v55, %v6016_v11  ;;  %v9464_v52 = vld [vmem:[#allocation2 + $0x170] sm:$0xff]   ;;  %v5587_v11 = vmax.f32 %v5353_v49, 0.0 }
 0x5bc   : > { %v6018_v37 = vpop.f32.mrf.mxu1 }
 0x5bd   : > { %9185 = vmatmul.mubr.bf16.gmra.mxu0 %v6514_v48  ;;  %v6407_v39 = vmax.f32 %v11425_v21, 0.0  ;;  %v5588_v48 = vmax.f32 %v5356_v43, 0.0  ;;  %v5364_v37 = vadd.f32 %v11223_v14, %v11100_v57 }
 0x5be   : > { %v6019_v2 = vpop.f32.mrf.mxu1 }
 0x5bf   : > { %v11428_v9 = vadd.f32 %v11129_v55, %v6019_v2  ;;  %v5669_v2 = vpack.c.bf16 %v5588_v48, %v5587_v11  ;;  %v5369_v48 = vadd.f32 %v11223_v14, %v11106_v0 }
 0x5c0   : > { %v6021_v33 = vpop.f32.mrf.mxu1 }
 0x5c1   : > { %12694 = vst [vmem:[#allocation29_spill] sm:$0xff] %v11428_v9  ;;  %v6408_v18 = vmax.f32 %v11428_v9, 0.0 }
 0x5c2   : > { %v6024_v35 = vpop.f32.mrf.mxu1  ;;  %6215 = vmatmul.mubr.bf16.gmra.mxu1 %v5668_v38 }
 0x5c3   : > { %v6515_v40 = vpack.c.bf16 %v6408_v18, %v6407_v39  ;;  %6222 = vmatprep.mubr.bf16.mxu1 %v9464_v52  ;;  %v11437_v19 = vadd.f32 %v11129_v55, %v6024_v35  ;;  %v9465_v18 = vld [vmem:[#allocation2 + $0x178] sm:$0xff]   ;;  %v5589_v35 = vmax.f32 %v5361_v56, 0.0 }
 0x5c4   : > { %v6026_v32 = vpop.f32.mrf.mxu1 }
 0x5c5   : > { %9188 = vmatprep.mubr.bf16.mxu0 %v6515_v40  ;;  %v6409_v49 = vmax.f32 %v11437_v19, 0.0  ;;  %v5590_v40 = vmax.f32 %v5364_v37, 0.0 }
 0x5c6   : > { %v6027_v58 = vpop.f32.mrf.mxu1 }
 0x5c7   : > { %v11440_v59 = vadd.f32 %v11129_v55, %v6027_v58  ;;  %v5670_v11 = vpack.c.bf16 %v5590_v40, %v5589_v35  ;;  %v12697_v58 = vld [vmem:[#allocation5_spill] sm:$0xff] }
 0x5c8   : > { %v6029_v38 = vpop.f32.mrf.mxu1 }
 0x5c9   : > { %v6410_v43 = vmax.f32 %v11440_v59, 0.0 }
 0x5ca   : > { %v6032_v33 = vpop.f32.mrf.mxu1  ;;  %6223 = vmatmul.mubr.bf16.gmra.mxu1 %v5669_v2  ;;  %v5372_v2 = vadd.f32 %v11223_v14, %v12697_v58 }
 0x5cb   : > { %v6516_v39 = vpack.c.bf16 %v6410_v43, %v6409_v49  ;;  %6230 = vmatprep.mubr.bf16.mxu1 %v9465_v18  ;;  %v11449_v32 = vadd.f32 %v11129_v55, %v6032_v33  ;;  %v9466_v33 = vld [vmem:[#allocation2 + $0x180] sm:$0xff]  }
 0x5cc   : > { %v6034_v52 = vpop.f32.mrf.mxu1  ;;  %v5592_v18 = vmax.f32 %v5372_v2, 0.0 }
 0x5cd   : > { %12695 = vst [vmem:[#allocation30_spill] sm:$0xff] %v11449_v32  ;;  %9189 = vmatmul.mubr.bf16.gmra.mxu0 %v6516_v39  ;;  %v6411_v56 = vmax.f32 %v11449_v32, 0.0  ;;  %v5591_v39 = vmax.f32 %v5369_v48, 0.0 }
 0x5ce   : > { %v6035_v36 = vpop.f32.mrf.mxu1 }
 0x5cf   : > { %v11452_v57 = vadd.f32 %v11129_v55, %v6035_v36  ;;  %v12700_v36 = vld [vmem:[#allocation3_spill] sm:$0xff] }
 0x5d0   : > { %v6037_v38 = vpop.f32.mrf.mxu1  ;;  %v5377_v58 = vadd.f32 %v11223_v14, %v12700_v36 }
 0x5d1   : > { %12696 = vst [vmem:[#allocation31_spill] sm:$0xff] %v11452_v57  ;;  %v6412_v37 = vmax.f32 %v11452_v57, 0.0  ;;  %v12701_v38 = vld [vmem:[#allocation4_spill] sm:$0xff] }
 0x5d2   : > { %v6040_v49 = vpop.f32.mrf.mxu1  ;;  %6231 = vmatmul.mubr.bf16.gmra.mxu1 %v5670_v11  ;;  %v5380_v11 = vadd.f32 %v11223_v14, %v12701_v38  ;;  %v12704_v38 = vld [vmem:[#allocation7_spill] sm:$0xff] }
 0x5d3   : > { %v6517_v43 = vpack.c.bf16 %v6412_v37, %v6411_v56  ;;  %6238 = vmatprep.mubr.bf16.mxu1 %v9466_v33  ;;  %v11461_v35 = vadd.f32 %v11129_v55, %v6040_v49  ;;  %v5671_v56 = vpack.c.bf16 %v5592_v18, %v5591_v39 }
 0x5d4   : > { %v6042_v52 = vpop.f32.mrf.mxu1 }
 0x5d5   : > { %12698 = vst [vmem:[#allocation5_spill] sm:$0xff] %v11461_v35  ;;  %9192 = vmatprep.mubr.bf16.mxu0 %v6517_v43  ;;  %v6413_v48 = vmax.f32 %v11461_v35, 0.0  ;;  %v9467_v43 = vld [vmem:[#allocation2 + $0x188] sm:$0xff]   ;;  %v5593_v52 = vmax.f32 %v5377_v58, 0.0 }
 0x5d6   : > { %v6043_v0 = vpop.f32.mrf.mxu1 }
 0x5d7   : > { %v11464_v40 = vadd.f32 %v11129_v55, %v6043_v0  ;;  %v5594_v0 = vmax.f32 %v5380_v11, 0.0 }
 0x5d8   : > { %v6045_v37 = vpop.f32.mrf.mxu1 }
 0x5d9   : > { %12699 = vst [vmem:[#allocation32_spill] sm:$0xff] %v11464_v40  ;;  %v6414_v2 = vmax.f32 %v11464_v40, 0.0  ;;  %v5672_v18 = vpack.c.bf16 %v5594_v0, %v5593_v52  ;;  %v5385_v37 = vadd.f32 %v11223_v14, %v12704_v38  ;;  %v12705_v40 = vld [vmem:[#allocation9_spill] sm:$0xff]  ;;  %v7177_v0 = vlaneseq }
 0x5da   : > { %v6048_v33 = vpop.f32.mrf.mxu1  ;;  %6239 = vmatmul.mubr.bf16.gmra.mxu1 %v5671_v56  ;;  %v5388_v56 = vadd.f32 %v11223_v14, %v12705_v40  ;;  %v12707_v40 = vld [vmem:[#allocation6_spill] sm:$0xff] }
 0x5db   : > { %v6518_v49 = vpack.c.bf16 %v6414_v2, %v6413_v48  ;;  %6246 = vmatprep.mubr.bf16.mxu1 %v9467_v43  ;;  %v11473_v32 = vadd.f32 %v11129_v55, %v6048_v33  ;;  %v9468_v33 = vld [vmem:[#allocation2 + $0x190] sm:$0xff]  }
 0x5dc   : > { %v6050_v57 = vpop.f32.mrf.mxu1  ;;  %v5596_v43 = vmax.f32 %v5388_v56, 0.0 }
 0x5dd   : > { %12702 = vst [vmem:[#allocation3_spill] sm:$0xff] %v11473_v32  ;;  %9193 = vmatmul.mubr.bf16.gmra.mxu0 %v6518_v49  ;;  %v6415_v58 = vmax.f32 %v11473_v32, 0.0  ;;  %v5595_v49 = vmax.f32 %v5385_v37, 0.0  ;;  %v12708_v32 = vld [vmem:[#allocation8_spill] sm:$0xff] }
 0x5de   : > { %v6051_v36 = vpop.f32.mrf.mxu1 }
 0x5df   : > { %v11476_v39 = vadd.f32 %v11129_v55, %v6051_v36 }
 0x5e0   : > { %v6053_v48 = vpop.f32.mrf.mxu1 }
 0x5e1   : > { %12703 = vst [vmem:[#allocation4_spill] sm:$0xff] %v11476_v39  ;;  %v6416_v57 = vmax.f32 %v11476_v39, 0.0  ;;  %v5393_v48 = vadd.f32 %v11223_v14, %v12707_v40  ;;  %v5396_v39 = vadd.f32 %v11223_v14, %v12708_v32  ;;  %v11498_v40 = vpop.f32.mrf.mxu0  ;;  %v11503_v32 = vld [vmem:[%s12643_s2 + $0x5] ss:$0 sm:$0xff] }
 0x5e2   : > { %v6056_v11 = vpop.f32.mrf.mxu1  ;;  %6247 = vmatmul.mubr.bf16.gmra.mxu1 %v5672_v18 }
 0x5e3   : > { %v6519_v2 = vpack.c.bf16 %v6416_v57, %v6415_v58  ;;  %6254 = vmatprep.mubr.bf16.mxu1 %v9468_v33  ;;  %v11485_v52 = vadd.f32 %v11129_v55, %v6056_v11  ;;  %v5673_v58 = vpack.c.bf16 %v5596_v43, %v5595_v49  ;;  %v11496_v11 = vand.u32 127, %v7177_v0  ;;  %v9469_v49 = vld [vmem:[#allocation2 + $0x198] sm:$0xff]  }
 0x5e4   : > { %v6058_v36 = vpop.f32.mrf.mxu1  ;;  %v5597_v33 = vmax.f32 %v5393_v48, 0.0 }
 0x5e5   : > { %12706 = vst [vmem:[#allocation7_spill] sm:$0xff] %v11485_v52  ;;  %9196 = vmatprep.mubr.bf16.mxu0 %v6519_v2  ;;  %v6417_v37 = vmax.f32 %v11485_v52, 0.0  ;;  %v5598_v36 = vmax.f32 %v5396_v39, 0.0  ;;  %vm7179_vm2 = vcmp.eq.s32.totalorder %v11496_v11, 3 }
 0x5e6   : > { %v6059_v38 = vpop.f32.mrf.mxu1 }
 0x5e7   : > { %v11492_v18 = vadd.f32 %v11129_v55, %v6059_v38 }
 0x5e8   : > { %v6061_v57 = vpop.f32.mrf.mxu1 }
 0x5e9   : > { %12709 = vst [vmem:[#allocation9_spill] sm:$0xff] %v11492_v18  ;;  %v6418_v56 = vmax.f32 %v11492_v18, 0.0 }
 0x5ea   : > { %v6064_v2 = vpop.f32.mrf.mxu1  ;;  %6255 = vmatmul.mubr.bf16.gmra.mxu1 %v5673_v58  ;;  %v5674_v58 = vpack.c.bf16 %v5598_v36, %v5597_v33 }
 0x5eb   : > { %v6520_v35 = vpack.c.bf16 %v6418_v56, %v6417_v37  ;;  %6262 = vmatprep.mubr.bf16.mxu1 %v9469_v49  ;;  %v11506_v38 = vadd.f32 %v11129_v55, %v6064_v2  ;;  %v12712_v56 = vld [vmem:[#allocation13_spill] sm:$0xff]  ;;  %v12713_v2 = vld [vmem:[#allocation15_spill] sm:$0xff] }
 0x5ec   : > { %v6066_v43 = vpop.f32.mrf.mxu1  ;;  %v5404_v49 = vadd.f32 %v11223_v14, %v12713_v2 }
 0x5ed   : > { %12710 = vst [vmem:[#allocation6_spill] sm:$0xff] %v11506_v38  ;;  %v9150_v0 = vpop.f32.mrf.mxu0  ;;  %9197 = vmatmul.mubr.bf16.gmra.mxu0 %v6520_v35  ;;  %v5401_v35 = vadd.f32 %v11223_v14, %v12712_v56  ;;  %v6419_v33 = vmax.f32 %v11506_v38, 0.0 }
 0x5ee   : > { %v6675_v39 = vadd.f32 %v9150_v0, %v11503_v32  ;;  %v6067_v48 = vpop.f32.mrf.mxu1 }
 0x5ef   : > { %v11518_v57 = vadd.f32 %v11129_v55, %v6067_v48  ;;  %v6666_v37 = vpop.f32.mrf.mxu0  ;;  %v12714_v48 = vld [vmem:[#allocation10_spill] sm:$0xff] }
 0x5f0   : > { %v7182_v43 = vsel %vm7179_vm2, %v11154_v3, %v6675_v39  ;;  %v6667_v0 = vadd.f32 %v11503_v32, %v6666_v37  ;;  %v6069_v18 = vpop.f32.mrf.mxu1  ;;  %v9470_v39 = vld [vmem:[#allocation2 + $0x1a0] sm:$0xff]   ;;  %v5599_v37 = vmax.f32 %v5401_v35, 0.0  ;;  %v12716_v35 = vld [vmem:[#allocation12_spill] sm:$0xff] }
 0x5f1   : > { %12711 = vst [vmem:[#allocation8_spill] sm:$0xff] %v11518_v57  ;;  %7311 = vst.msk [vmem:[%s11514_s25 + $0x10] sm:$0xff] %vm7308_vm3, %v7182_v43  ;;  %v6420_v55 = vmax.f32 %v11518_v57, 0.0  ;;  %v9151_v36 = vpop.f32.mrf.mxu0  ;;  %v5600_v43 = vmax.f32 %v5404_v49, 0.0  ;;  %v12715_v57 = vld [vmem:[#allocation16_spill] sm:$0xff] }
 0x5f2   : > { %v7180_v56 = vsel %vm7179_vm2, %v12714_v48, %v6667_v0  ;;  %v6678_v2 = vadd.f32 %v9151_v36, %v11503_v32  ;;  %v6072_v52 = vpop.f32.mrf.mxu1  ;;  %6263 = vmatmul.mubr.bf16.gmra.mxu1 %v5674_v58  ;;  %v11547_v58 = vld [vmem:[%s12645_s4] ss:$0 sm:$0xff]  ;;  %v12718_v48 = vld [vmem:[#allocation14_spill] sm:$0xff] }
 0x5f3   : > { %7309 = vst.msk [vmem:[%s11514_s25] sm:$0xff] %vm7308_vm3, %v7180_v56  ;;  %v6669_v3 = vpop.f32.mrf.mxu0  ;;  %v6521_v18 = vpack.c.bf16 %v6420_v55, %v6419_v33  ;;  %6270 = vmatprep.mubr.bf16.mxu1 %v9470_v39  ;;  %v11550_v33 = vadd.f32 %v11547_v58, %v6072_v52 }
 0x5f4   : > { %v7183_v38 = vsel %vm7179_vm2, %v12715_v57, %v6678_v2  ;;  %v6670_v9 = vadd.f32 %v11503_v32, %v6669_v3  ;;  %v6074_v0 = vpop.f32.mrf.mxu1  ;;  %v12717_v57 = vld [vmem:[#allocation11_spill] sm:$0xff]  ;;  %v5675_v2 = vpack.c.bf16 %v5600_v43, %v5599_v37 }
 0x5f5   : > { %7312 = vst.msk [vmem:[%s11514_s25 + $0x18] sm:$0xff] %vm7308_vm3, %v7183_v38  ;;  %9200 = vmatprep.mubr.bf16.mxu0 %v6521_v18  ;;  %v5409_v36 = vadd.f32 %v11223_v14, %v12717_v57  ;;  %v5412_v38 = vadd.f32 %v11223_v14, %v12718_v48  ;;  %v6421_v3 = vmax.f32 %v11550_v33, 0.0  ;;  %v9472_v57 = vld [vmem:[#allocation2 + $0x1a8] sm:$0xff]  }
 0x5f6   : > { %v7181_v49 = vsel %vm7179_vm2, %v12716_v35, %v6670_v9  ;;  %v6075_v55 = vpop.f32.mrf.mxu1 }
 0x5f7   : > { %7310 = vst.msk [vmem:[%s11514_s25 + $0x8] sm:$0xff] %vm7308_vm3, %v7181_v49  ;;  %v11562_v56 = vadd.f32 %v11547_v58, %v6075_v55  ;;  %v5601_v9 = vmax.f32 %v5409_v36, 0.0  ;;  %v5602_v0 = vmax.f32 %v5412_v38, 0.0  ;;  %v12720_v38 = vld [vmem:[#allocation17_spill] sm:$0xff] }
 0x5f8   : > { %v6077_v52 = vpop.f32.mrf.mxu1 }
 0x5f9   : > { %12719 = vst [vmem:[#allocation13_spill] sm:$0xff] %v11562_v56  ;;  %v6422_v18 = vmax.f32 %v11562_v56, 0.0  ;;  %v5676_v52 = vpack.c.bf16 %v5602_v0, %v5601_v9 }
 0x5fa   : > { %v6080_v39 = vpop.f32.mrf.mxu1  ;;  %6271 = vmatmul.mubr.bf16.gmra.mxu1 %v5675_v2  ;;  %v5417_v2 = vadd.f32 %v11223_v14, %v12720_v38 }
 0x5fb   : > { %v6522_v35 = vpack.c.bf16 %v6422_v18, %v6421_v3  ;;  %6278 = vmatprep.mubr.bf16.mxu1 %v9472_v57  ;;  %v11567_v49 = vadd.f32 %v11547_v58, %v6080_v39  ;;  %v5420_v3 = vadd.f32 %v11223_v14, %v11169_v28 }
 0x5fc   : > { %v6082_v48 = vpop.f32.mrf.mxu1 }
 0x5fd   : > { %v9154_v55 = vpop.f32.mrf.mxu0  ;;  %9201 = vmatmul.mubr.bf16.gmra.mxu0 %v6522_v35  ;;  %v6423_v9 = vmax.f32 %v11567_v49, 0.0  ;;  %v5604_v38 = vmax.f32 %v5420_v3, 0.0 }
 0x5fe   : > { %v6691_v37 = vadd.f32 %v9154_v55, %v11503_v32  ;;  %v6083_v43 = vpop.f32.mrf.mxu1 }
 0x5ff   : > { %v11571_v56 = vadd.f32 %v11547_v58, %v6083_v43  ;;  %v6682_v36 = vpop.f32.mrf.mxu0  ;;  %v9473_v43 = vld [vmem:[#allocation2 + $0x1b0] sm:$0xff]  }
 0x600   : > { %v7186_v18 = vsel %vm7179_vm2, %v11192_v16, %v6691_v37  ;;  %v6683_v39 = vadd.f32 %v11503_v32, %v6682_v36  ;;  %v6085_v35 = vpop.f32.mrf.mxu1  ;;  %v5603_v36 = vmax.f32 %v5417_v2, 0.0 }
 0x601   : > { %7315 = vst.msk [vmem:[%s11514_s25 + $0x30] sm:$0xff] %vm7308_vm3, %v7186_v18  ;;  %v6424_v0 = vmax.f32 %v11571_v56, 0.0  ;;  %v9155_v57 = vpop.f32.mrf.mxu0 }
 0x602   : > { %v7184_v48 = vsel %vm7179_vm2, %v11172_v42, %v6683_v39  ;;  %v6694_v28 = vadd.f32 %v9155_v57, %v11503_v32  ;;  %v6088_v55 = vpop.f32.mrf.mxu1  ;;  %6279 = vmatmul.mubr.bf16.gmra.mxu1 %v5676_v52  ;;  %v12721_v39 = vld [vmem:[#allocation18_spill] sm:$0xff] }
 0x603   : > { %7313 = vst.msk [vmem:[%s11514_s25 + $0x20] sm:$0xff] %vm7308_vm3, %v7184_v48  ;;  %v6685_v16 = vpop.f32.mrf.mxu0  ;;  %v6523_v37 = vpack.c.bf16 %v6424_v0, %v6423_v9  ;;  %6286 = vmatprep.mubr.bf16.mxu1 %v9473_v43  ;;  %v11598_v52 = vadd.f32 %v11547_v58, %v6088_v55 }
 0x604   : > { %v7187_v18 = vsel %vm7179_vm2, %v11195_v46, %v6694_v28  ;;  %v6686_v35 = vadd.f32 %v11503_v32, %v6685_v16  ;;  %v6090_v42 = vpop.f32.mrf.mxu1  ;;  %v5677_v46 = vpack.c.bf16 %v5604_v38, %v5603_v36  ;;  %v9474_v16 = vld [vmem:[#allocation2 + $0x1b8] sm:$0xff]  }
 0x605   : > { %7316 = vst.msk [vmem:[%s11514_s25 + $0x38] sm:$0xff] %vm7308_vm3, %v7187_v18  ;;  %9204 = vmatprep.mubr.bf16.mxu0 %v6523_v37  ;;  %v6425_v57 = vmax.f32 %v11598_v52, 0.0 }
 0x606   : > { %v7185_v9 = vsel %vm7179_vm2, %v12721_v39, %v6686_v35  ;;  %v6091_v0 = vpop.f32.mrf.mxu1  ;;  %v12722_v39 = vld [vmem:[#allocation20_spill] sm:$0xff] }
 0x607   : > { %7314 = vst.msk [vmem:[%s11514_s25 + $0x28] sm:$0xff] %vm7308_vm3, %v7185_v9  ;;  %v11606_v2 = vadd.f32 %v11547_v58, %v6091_v0  ;;  %v5433_v9 = vadd.f32 %v11223_v14, %v12722_v39  ;;  %v12723_v0 = vld [vmem:[#allocation21_spill] sm:$0xff] }
 0x608   : > { %v6093_v3 = vpop.f32.mrf.mxu1 }
 0x609   : > { %v6426_v48 = vmax.f32 %v11606_v2, 0.0  ;;  %v5607_v39 = vmax.f32 %v5433_v9, 0.0 }
 0x60a   : > { %v6096_v28 = vpop.f32.mrf.mxu1  ;;  %6287 = vmatmul.mubr.bf16.gmra.mxu1 %v5677_v46  ;;  %v5436_v46 = vadd.f32 %v11223_v14, %v12723_v0 }
 0x60b   : > { %v6524_v55 = vpack.c.bf16 %v6426_v48, %v6425_v57  ;;  %6294 = vmatprep.mubr.bf16.mxu1 %v9474_v16  ;;  %v11611_v43 = vadd.f32 %v11547_v58, %v6096_v28 }
 0x60c   : > { %v6098_v37 = vpop.f32.mrf.mxu1  ;;  %v5608_v0 = vmax.f32 %v5436_v46, 0.0 }
 0x60d   : > { %v9158_v18 = vpop.f32.mrf.mxu0  ;;  %9205 = vmatmul.mubr.bf16.gmra.mxu0 %v6524_v55  ;;  %v6427_v28 = vmax.f32 %v11611_v43, 0.0 }
 0x60e   : > { %v6707_v35 = vadd.f32 %v9158_v18, %v11503_v32  ;;  %v6099_v36 = vpop.f32.mrf.mxu1 }
 0x60f   : > { %v11615_v38 = vadd.f32 %v11547_v58, %v6099_v36  ;;  %v6698_v42 = vpop.f32.mrf.mxu0  ;;  %v12724_v36 = vld [vmem:[#allocation19_spill] sm:$0xff] }
 0x610   : > { %v7190_v3 = vsel %vm7179_vm2, %v11237_v13, %v6707_v35  ;;  %v6699_v57 = vadd.f32 %v11503_v32, %v6698_v42  ;;  %v6101_v48 = vpop.f32.mrf.mxu1  ;;  %v9475_v42 = vld [vmem:[#allocation2 + $0x1c0] sm:$0xff]  }
 0x611   : > { %7319 = vst.msk [vmem:[%s11514_s25 + $0x50] sm:$0xff] %vm7308_vm3, %v7190_v3  ;;  %v6428_v55 = vmax.f32 %v11615_v38, 0.0  ;;  %v9159_v16 = vpop.f32.mrf.mxu0 }
 0x612   : > { %v7188_v37 = vsel %vm7179_vm2, %v11212_v62, %v6699_v57  ;;  %v6710_v14 = vadd.f32 %v9159_v16, %v11503_v32  ;;  %v6104_v18 = vpop.f32.mrf.mxu1  ;;  %6295 = vmatmul.mubr.bf16.gmra.mxu1 %v12724_v36  ;;  %v9476_v36 = vld [vmem:[#allocation2 + $0x1c8] sm:$0xff]  }
 0x613   : > { %7317 = vst.msk [vmem:[%s11514_s25 + $0x40] sm:$0xff] %vm7308_vm3, %v7188_v37  ;;  %v6701_v13 = vpop.f32.mrf.mxu0  ;;  %v6525_v35 = vpack.c.bf16 %v6428_v55, %v6427_v28  ;;  %6302 = vmatprep.mubr.bf16.mxu1 %v9475_v42  ;;  %v11643_v48 = vadd.f32 %v11547_v58, %v6104_v18 }
 0x614   : > { %v7191_v3 = vsel %vm7179_vm2, %v11240_v29, %v6710_v14  ;;  %v6702_v62 = vadd.f32 %v11503_v32, %v6701_v13  ;;  %v6106_v57 = vpop.f32.mrf.mxu1  ;;  %v5679_v29 = vpack.c.bf16 %v5608_v0, %v5607_v39 }
 0x615   : > { %7320 = vst.msk [vmem:[%s11514_s25 + $0x58] sm:$0xff] %vm7308_vm3, %v7191_v3  ;;  %9208 = vmatprep.mubr.bf16.mxu0 %v6525_v35  ;;  %v6429_v16 = vmax.f32 %v11643_v48, 0.0  ;;  %v12725_v57 = vld [vmem:[#allocation23_spill] sm:$0xff] }
 0x616   : > { %v7189_v28 = vsel %vm7179_vm2, %v11215_v5, %v6702_v62  ;;  %v6107_v55 = vpop.f32.mrf.mxu1  ;;  %v11665_v62 = vld [vmem:[%s12643_s2 + $0x4] ss:$0 sm:$0xff] }
 0x617   : > { %7318 = vst.msk [vmem:[%s11514_s25 + $0x48] sm:$0xff] %vm7308_vm3, %v7189_v28  ;;  %v11651_v9 = vadd.f32 %v11547_v58, %v6107_v55  ;;  %v5449_v28 = vadd.f32 %v11665_v62, %v12725_v57  ;;  %v12726_v55 = vld [vmem:[#allocation24_spill] sm:$0xff]  ;;  %v12727_v57 = vld [vmem:[#allocation22_spill] sm:$0xff] }
 0x618   : > { %v6109_v46 = vpop.f32.mrf.mxu1 }
 0x619   : > { %v6430_v37 = vmax.f32 %v11651_v9, 0.0 }
 0x61a   : > { %v6112_v14 = vpop.f32.mrf.mxu1  ;;  %6303 = vmatmul.mubr.bf16.gmra.mxu1 %v5679_v29  ;;  %v5452_v29 = vadd.f32 %v11665_v62, %v12726_v55  ;;  %v5611_v55 = vmax.f32 %v5449_v28, 0.0 }
 0x61b   : > { %v6526_v18 = vpack.c.bf16 %v6430_v37, %v6429_v16  ;;  %6310 = vmatprep.mubr.bf16.mxu1 %v9476_v36  ;;  %v11656_v5 = vadd.f32 %v11547_v58, %v6112_v14 }
 0x61c   : > { %v6114_v13 = vpop.f32.mrf.mxu1 }
 0x61d   : > { %v9162_v35 = vpop.f32.mrf.mxu0  ;;  %9209 = vmatmul.mubr.bf16.gmra.mxu0 %v6526_v18  ;;  %v6431_v14 = vmax.f32 %v11656_v5, 0.0 }
 0x61e   : > { %v6723_v42 = vadd.f32 %v9162_v35, %v11503_v32  ;;  %v6115_v39 = vpop.f32.mrf.mxu1 }
 0x61f   : > { %v11660_v0 = vadd.f32 %v11547_v58, %v6115_v39  ;;  %v6714_v3 = vpop.f32.mrf.mxu0 }
 0x620   : > { %v7194_v46 = vsel %vm7179_vm2, %v11269_v8, %v6723_v42  ;;  %v6715_v16 = vadd.f32 %v11503_v32, %v6714_v3  ;;  %v6117_v37 = vpop.f32.mrf.mxu1  ;;  %v9478_v3 = vld [vmem:[#allocation2 + $0x1d0] sm:$0xff]  }
 0x621   : > { %7323 = vst.msk [vmem:[%s11514_s25 + $0x70] sm:$0xff] %vm7308_vm3, %v7194_v46  ;;  %v6432_v18 = vmax.f32 %v11660_v0, 0.0  ;;  %v9163_v36 = vpop.f32.mrf.mxu0  ;;  %v5612_v46 = vmax.f32 %v5452_v29, 0.0 }
 0x622   : > { %v7192_v13 = vsel %vm7179_vm2, %v11255_v12, %v6715_v16  ;;  %v6726_v35 = vadd.f32 %v9163_v36, %v11503_v32  ;;  %v6120_v39 = vpop.f32.mrf.mxu1  ;;  %6311 = vmatmul.mubr.bf16.gmra.mxu1 %v12727_v57 }
 0x623   : > { %7321 = vst.msk [vmem:[%s11514_s25 + $0x60] sm:$0xff] %vm7308_vm3, %v7192_v13  ;;  %v6717_v8 = vpop.f32.mrf.mxu0  ;;  %v6527_v42 = vpack.c.bf16 %v6432_v18, %v6431_v14  ;;  %6318 = vmatprep.mubr.bf16.mxu1 %v9478_v3  ;;  %v11693_v36 = vadd.f32 %v11547_v58, %v6120_v39 }
 0x624   : > { %v7195_v37 = vsel %vm7179_vm2, %v11272_v24, %v6726_v35  ;;  %v6718_v12 = vadd.f32 %v11503_v32, %v6717_v8  ;;  %v6122_v16 = vpop.f32.mrf.mxu1  ;;  %v5681_v24 = vpack.c.bf16 %v5612_v46, %v5611_v55  ;;  %v9479_v8 = vld [vmem:[#allocation2 + $0x1d8] sm:$0xff]  }
 0x625   : > { %7324 = vst.msk [vmem:[%s11514_s25 + $0x78] sm:$0xff] %vm7308_vm3, %v7195_v37  ;;  %9212 = vmatprep.mubr.bf16.mxu0 %v6527_v42  ;;  %v6433_v13 = vmax.f32 %v11693_v36, 0.0  ;;  %v12728_v16 = vld [vmem:[#allocation26_spill] sm:$0xff] }
 0x626   : > { %v7193_v14 = vsel %vm7179_vm2, %v11258_v23, %v6718_v12  ;;  %v6123_v18 = vpop.f32.mrf.mxu1 }
 0x627   : > { %7322 = vst.msk [vmem:[%s11514_s25 + $0x68] sm:$0xff] %vm7308_vm3, %v7193_v14  ;;  %v11701_v28 = vadd.f32 %v11547_v58, %v6123_v18  ;;  %v5465_v14 = vadd.f32 %v11665_v62, %v12728_v16  ;;  %v5468_v18 = vadd.f32 %v11665_v62, %v11234_v61 }
 0x628   : > { %v6125_v29 = vpop.f32.mrf.mxu1 }
 0x629   : > { %v6434_v35 = vmax.f32 %v11701_v28, 0.0  ;;  %v5616_v16 = vmax.f32 %v5468_v18, 0.0 }
 0x62a   : > { %v6128_v57 = vpop.f32.mrf.mxu1  ;;  %6319 = vmatmul.mubr.bf16.gmra.mxu1 %v5681_v24 }
 0x62b   : > { %v6528_v39 = vpack.c.bf16 %v6434_v35, %v6433_v13  ;;  %6326 = vmatprep.mubr.bf16.mxu1 %v9479_v8  ;;  %v11706_v23 = vadd.f32 %v11547_v58, %v6128_v57 }
 0x62c   : > { %v6130_v42 = vpop.f32.mrf.mxu1 }
 0x62d   : > { %v9166_v3 = vpop.f32.mrf.mxu0  ;;  %9213 = vmatmul.mubr.bf16.gmra.mxu0 %v6528_v39  ;;  %v6435_v35 = vmax.f32 %v11706_v23, 0.0 }
 0x62e   : > { %v6739_v37 = vadd.f32 %v9166_v3, %v11503_v32  ;;  %v6131_v55 = vpop.f32.mrf.mxu1  ;;  %v12729_v3 = vld [vmem:[#allocation25_spill] sm:$0xff] }
 0x62f   : > { %v11710_v46 = vadd.f32 %v11547_v58, %v6131_v55  ;;  %v6730_v12 = vpop.f32.mrf.mxu0  ;;  %v9480_v55 = vld [vmem:[#allocation2 + $0x1e0] sm:$0xff]  }
 0x630   : > { %v7198_v24 = vsel %vm7179_vm2, %v11293_v25, %v6739_v37  ;;  %v6731_v29 = vadd.f32 %v11503_v32, %v6730_v12  ;;  %v6133_v13 = vpop.f32.mrf.mxu1  ;;  %v5615_v12 = vmax.f32 %v5465_v14, 0.0 }
 0x631   : > { %7327 = vst.msk [vmem:[%s11514_s25 + $0x90] sm:$0xff] %vm7308_vm3, %v7198_v24  ;;  %v6436_v57 = vmax.f32 %v11710_v46, 0.0  ;;  %v9167_v39 = vpop.f32.mrf.mxu0 }
 0x632   : > { %v7196_v8 = vsel %vm7179_vm2, %v11281_v60, %v6731_v29  ;;  %v6742_v61 = vadd.f32 %v9167_v39, %v11503_v32  ;;  %v6136_v42 = vpop.f32.mrf.mxu1  ;;  %6327 = vmatmul.mubr.bf16.gmra.mxu1 %v12729_v3  ;;  %v9481_v3 = vld [vmem:[#allocation2 + $0x1e8] sm:$0xff]  }
 0x633   : > { %7325 = vst.msk [vmem:[%s11514_s25 + $0x80] sm:$0xff] %vm7308_vm3, %v7196_v8  ;;  %v6733_v25 = vpop.f32.mrf.mxu0  ;;  %v6529_v37 = vpack.c.bf16 %v6436_v57, %v6435_v35  ;;  %6334 = vmatprep.mubr.bf16.mxu1 %v9480_v55  ;;  %v11738_v13 = vadd.f32 %v11547_v58, %v6136_v42 }
 0x634   : > { %v7199_v24 = vsel %vm7179_vm2, %v11296_v6, %v6742_v61  ;;  %v6734_v60 = vadd.f32 %v11503_v32, %v6733_v25  ;;  %v6138_v29 = vpop.f32.mrf.mxu1  ;;  %v5683_v6 = vpack.c.bf16 %v5616_v16, %v5615_v12 }
 0x635   : > { %7328 = vst.msk [vmem:[%s11514_s25 + $0x98] sm:$0xff] %vm7308_vm3, %v7199_v24  ;;  %9216 = vmatprep.mubr.bf16.mxu0 %v6529_v37  ;;  %v6437_v39 = vmax.f32 %v11738_v13, 0.0 }
 0x636   : > { %v7197_v35 = vsel %vm7179_vm2, %v11284_v34, %v6734_v60  ;;  %v6139_v57 = vpop.f32.mrf.mxu1  ;;  %v12730_v60 = vld [vmem:[#allocation28_spill] sm:$0xff] }
 0x637   : > { %7326 = vst.msk [vmem:[%s11514_s25 + $0x88] sm:$0xff] %vm7308_vm3, %v7197_v35  ;;  %v11746_v14 = vadd.f32 %v11547_v58, %v6139_v57  ;;  %v5481_v29 = vadd.f32 %v11665_v62, %v12730_v60  ;;  %v5484_v35 = vadd.f32 %v11665_v62, %v11498_v40 }
 0x638   : > { %v6141_v18 = vpop.f32.mrf.mxu1 }
 0x639   : > { %v6438_v8 = vmax.f32 %v11746_v14, 0.0 }
 0x63a   : > { %v6144_v61 = vpop.f32.mrf.mxu1  ;;  %6335 = vmatmul.mubr.bf16.gmra.mxu1 %v5683_v6 }
 0x63b   : > { %v6530_v42 = vpack.c.bf16 %v6438_v8, %v6437_v39  ;;  %6342 = vmatprep.mubr.bf16.mxu1 %v9481_v3  ;;  %v11751_v34 = vadd.f32 %v11547_v58, %v6144_v61  ;;  %v12731_v3 = vld [vmem:[#allocation27_spill] sm:$0xff] }
 0x63c   : > { %v6146_v25 = vpop.f32.mrf.mxu1 }
 0x63d   : > { %v9170_v37 = vpop.f32.mrf.mxu0  ;;  %9217 = vmatmul.mubr.bf16.gmra.mxu0 %v6530_v42  ;;  %v6439_v39 = vmax.f32 %v11751_v34, 0.0 }
 0x63e   : > { %v6755_v55 = vadd.f32 %v9170_v37, %v11503_v32  ;;  %v6147_v12 = vpop.f32.mrf.mxu1  ;;  %v9482_v37 = vld [vmem:[#allocation2 + $0x1f0] sm:$0xff]  }
 0x63f   : > { %v11755_v16 = vadd.f32 %v11547_v58, %v6147_v12  ;;  %v6746_v24 = vpop.f32.mrf.mxu0  ;;  %v5620_v12 = vmax.f32 %v5484_v35, 0.0 }
 0x640   : > { %v7202_v57 = vsel %vm7179_vm2, %v11317_v41, %v6755_v55  ;;  %v6747_v6 = vadd.f32 %v11503_v32, %v6746_v24  ;;  %v6149_v18 = vpop.f32.mrf.mxu1  ;;  %v5619_v55 = vmax.f32 %v5481_v29, 0.0 }
 0x641   : > { %7331 = vst.msk [vmem:[%s11514_s25 + $0xb0] sm:$0xff] %vm7308_vm3, %v7202_v57  ;;  %v6440_v8 = vmax.f32 %v11755_v16, 0.0  ;;  %v9171_v61 = vpop.f32.mrf.mxu0 }
 0x642   : > { %v7200_v42 = vsel %vm7179_vm2, %v11305_v31, %v6747_v6  ;;  %v6758_v40 = vadd.f32 %v9171_v61, %v11503_v32  ;;  %v6152_v62 = vpop.f32.mrf.mxu1  ;;  %6343 = vmatmul.mubr.bf16.gmra.mxu1 %v12731_v3 }
 0x643   : > { %7329 = vst.msk [vmem:[%s11514_s25 + $0xa0] sm:$0xff] %vm7308_vm3, %v7200_v42  ;;  %v6749_v41 = vpop.f32.mrf.mxu0  ;;  %v6531_v25 = vpack.c.bf16 %v6440_v8, %v6439_v39  ;;  %6350 = vmatprep.mubr.bf16.mxu1 %v9482_v37  ;;  %v11783_v57 = vadd.f32 %v11547_v58, %v6152_v62 }
 0x644   : > { %v7203_v24 = vsel %vm7179_vm2, %v11320_v10, %v6758_v40  ;;  %v6750_v31 = vadd.f32 %v11503_v32, %v6749_v41  ;;  %v6154_v60 = vpop.f32.mrf.mxu1  ;;  %v5685_v10 = vpack.c.bf16 %v5620_v12, %v5619_v55  ;;  %v9483_v40 = vld [vmem:[#allocation2 + $0x1f8] sm:$0xff]  }
 0x645   : > { %7332 = vst.msk [vmem:[%s11514_s25 + $0xb8] sm:$0xff] %vm7308_vm3, %v7203_v24  ;;  %9220 = vmatprep.mubr.bf16.mxu0 %v6531_v25  ;;  %v6441_v39 = vmax.f32 %v11783_v57, 0.0 }
 0x646   : > { %v7201_v6 = vsel %vm7179_vm2, %v11308_v27, %v6750_v31  ;;  %v6155_v18 = vpop.f32.mrf.mxu1 }
 0x647   : > { %7330 = vst.msk [vmem:[%s11514_s25 + $0xa8] sm:$0xff] %vm7308_vm3, %v7201_v6  ;;  %v11791_v29 = vadd.f32 %v11547_v58, %v6155_v18 }
 0x648   : > { %v6157_v35 = vpop.f32.mrf.mxu1 }
 0x649   : > { %v6442_v8 = vmax.f32 %v11791_v29, 0.0 }
 0x64a   : > { %v6160_v61 = vpop.f32.mrf.mxu1  ;;  %6351 = vmatmul.mubr.bf16.gmra.mxu1 %v5685_v10 }
 0x64b   : > { %v6532_v42 = vpack.c.bf16 %v6442_v8, %v6441_v39  ;;  %6358 = vmatprep.mubr.bf16.mxu1 %v9483_v40  ;;  %v11796_v27 = vadd.f32 %v11547_v58, %v6160_v61 }
 0x64c   : > { %v6162_v62 = vpop.f32.mrf.mxu1 }
 0x64d   : > { %v9174_v3 = vpop.f32.mrf.mxu0  ;;  %9221 = vmatmul.mubr.bf16.gmra.mxu0 %v6532_v42  ;;  %v6443_v60 = vmax.f32 %v11796_v27, 0.0 }
 0x64e   : > { %v6771_v41 = vadd.f32 %v9174_v3, %v11503_v32  ;;  %v6163_v25 = vpop.f32.mrf.mxu1 }
 0x64f   : > { %v11800_v37 = vadd.f32 %v11547_v58, %v6163_v25  ;;  %v6762_v55 = vpop.f32.mrf.mxu0 }
 0x650   : > { %v7206_v12 = vsel %vm7179_vm2, %v11341_v53, %v6771_v41  ;;  %v6763_v24 = vadd.f32 %v11503_v32, %v6762_v55  ;;  %v6165_v31 = vpop.f32.mrf.mxu1 }
 0x651   : > { %7335 = vst.msk [vmem:[%s11514_s25 + $0xd0] sm:$0xff] %vm7308_vm3, %v7206_v12  ;;  %v6444_v6 = vmax.f32 %v11800_v37, 0.0  ;;  %v9175_v18 = vpop.f32.mrf.mxu0 }
 0x652   : > { %v7204_v10 = vsel %vm7179_vm2, %v11329_v45, %v6763_v24  ;;  %v6774_v35 = vadd.f32 %v9175_v18, %v11503_v32  ;;  %v6168_v39 = vpop.f32.mrf.mxu1  ;;  %6359 = vmatmul.mubr.bf16.gmra.mxu1 %v11260_v30 }
 0x653   : > { %7333 = vst.msk [vmem:[%s11514_s25 + $0xc0] sm:$0xff] %vm7308_vm3, %v7204_v10  ;;  %v6765_v53 = vpop.f32.mrf.mxu0  ;;  %v6533_v8 = vpack.c.bf16 %v6444_v6, %v6443_v60  ;;  %v11824_v45 = vadd.f32 %v11547_v58, %v6168_v39 }
 0x654   : > { %v7207_v61 = vsel %vm7179_vm2, %v11344_v7, %v6774_v35  ;;  %v6766_v42 = vadd.f32 %v11503_v32, %v6765_v53  ;;  %v6170_v40 = vpop.f32.mrf.mxu1 }
 0x655   : > { %7336 = vst.msk [vmem:[%s11514_s25 + $0xd8] sm:$0xff] %vm7308_vm3, %v7207_v61  ;;  %9224 = vmatprep.mubr.bf16.mxu0 %v6533_v8  ;;  %v6445_v41 = vmax.f32 %v11824_v45, 0.0 }
 0x656   : > { %v7205_v30 = vsel %vm7179_vm2, %v11332_v50, %v6766_v42  ;;  %v6171_v62 = vpop.f32.mrf.mxu1 }
 0x657   : > { %7334 = vst.msk [vmem:[%s11514_s25 + $0xc8] sm:$0xff] %vm7308_vm3, %v7205_v30  ;;  %v11832_v3 = vadd.f32 %v11547_v58, %v6171_v62 }
 0x658   : > { %v6173_v7 = vpop.f32.mrf.mxu1 }
 0x659   : > { %v6446_v25 = vmax.f32 %v11832_v3, 0.0 }
 0x65a   : > { %v6176_v55 = vpop.f32.mrf.mxu1 }
 0x65b   : > { %v6534_v12 = vpack.c.bf16 %v6446_v25, %v6445_v41  ;;  %v11837_v31 = vadd.f32 %v11547_v58, %v6176_v55 }
 0x65c   : > { %v6178_v24 = vpop.f32.mrf.mxu1 }
 0x65d   : > { %v9178_v60 = vpop.f32.mrf.mxu0  ;;  %9225 = vmatmul.mubr.bf16.gmra.mxu0 %v6534_v12  ;;  %v6447_v8 = vmax.f32 %v11837_v31, 0.0 }
 0x65e   : > { %v6787_v50 = vadd.f32 %v9178_v60, %v11503_v32  ;;  %v6179_v6 = vpop.f32.mrf.mxu1 }
 0x65f   : > { %v11841_v18 = vadd.f32 %v11547_v58, %v6179_v6  ;;  %v6778_v10 = vpop.f32.mrf.mxu0 }
 0x660   : > { %v7210_v35 = vsel %vm7179_vm2, %v11365_v26, %v6787_v50  ;;  %v6779_v39 = vadd.f32 %v11503_v32, %v6778_v10  ;;  %v6181_v53 = vpop.f32.mrf.mxu1 }
 0x661   : > { %7339 = vst.msk [vmem:[%s11514_s25 + $0xf0] sm:$0xff] %vm7308_vm3, %v7210_v35  ;;  %v6448_v61 = vmax.f32 %v11841_v18, 0.0  ;;  %v9179_v42 = vpop.f32.mrf.mxu0 }
 0x662   : > { %v7208_v40 = vsel %vm7179_vm2, %v11353_v63, %v6779_v39  ;;  %v6790_v30 = vadd.f32 %v9179_v42, %v11503_v32  ;;  %v6184_v62 = vpop.f32.mrf.mxu1 }
 0x663   : > { %7337 = vst.msk [vmem:[%s11514_s25 + $0xe0] sm:$0xff] %vm7308_vm3, %v7208_v40  ;;  %v6781_v26 = vpop.f32.mrf.mxu0  ;;  %v6535_v7 = vpack.c.bf16 %v6448_v61, %v6447_v8  ;;  %v11864_v12 = vadd.f32 %v11547_v58, %v6184_v62 }
 0x664   : > { %v7211_v41 = vsel %vm7179_vm2, %v11368_v20, %v6790_v30  ;;  %v6782_v25 = vadd.f32 %v11503_v32, %v6781_v26  ;;  %v6186_v55 = vpop.f32.mrf.mxu1 }
 0x665   : > { %7340 = vst.msk [vmem:[%s11514_s25 + $0xf8] sm:$0xff] %vm7308_vm3, %v7211_v41  ;;  %9228 = vmatprep.mubr.bf16.mxu0 %v6535_v7  ;;  %v6449_v50 = vmax.f32 %v11864_v12, 0.0 }
 0x666   : > { %v7209_v63 = vsel %vm7179_vm2, %v11356_v44, %v6782_v25  ;;  %v6187_v24 = vpop.f32.mrf.mxu1 }
 0x667   : > { %7338 = vst.msk [vmem:[%s11514_s25 + $0xe8] sm:$0xff] %vm7308_vm3, %v7209_v63  ;;  %v11872_v60 = vadd.f32 %v11547_v58, %v6187_v24 }
 0x668   : > { %v6189_v20 = vpop.f32.mrf.mxu1 }
 0x669   : > { %v6450_v6 = vmax.f32 %v11872_v60, 0.0 }
 0x66a   : > { %v6192_v10 = vpop.f32.mrf.mxu1 }
 0x66b   : > { %v6536_v35 = vpack.c.bf16 %v6450_v6, %v6449_v50  ;;  %v11877_v53 = vadd.f32 %v11547_v58, %v6192_v10 }
 0x66c   : > { %v6194_v39 = vpop.f32.mrf.mxu1 }
 0x66d   : > { %v9182_v8 = vpop.f32.mrf.mxu0  ;;  %9229 = vmatmul.mubr.bf16.gmra.mxu0 %v6536_v35  ;;  %v6451_v7 = vmax.f32 %v11877_v53, 0.0 }
 0x66e   : > { %v6803_v44 = vadd.f32 %v9182_v8, %v11503_v32  ;;  %v6195_v61 = vpop.f32.mrf.mxu1 }
 0x66f   : > { %v11881_v42 = vadd.f32 %v11547_v58, %v6195_v61  ;;  %v6794_v40 = vpop.f32.mrf.mxu0 }
 0x670   : > { %v7214_v30 = vsel %vm7179_vm2, %v11389_v47, %v6803_v44  ;;  %v6795_v62 = vadd.f32 %v11503_v32, %v6794_v40  ;;  %v6197_v26 = vpop.f32.mrf.mxu1 }
 0x671   : > { %7343 = vst.msk [vmem:[%s11514_s25 + $0x110] sm:$0xff] %vm7308_vm3, %v7214_v30  ;;  %v6452_v41 = vmax.f32 %v11881_v42, 0.0  ;;  %v9183_v25 = vpop.f32.mrf.mxu0 }
 0x672   : > { %v7212_v55 = vsel %vm7179_vm2, %v11377_v54, %v6795_v62  ;;  %v6806_v63 = vadd.f32 %v9183_v25, %v11503_v32  ;;  %v6200_v24 = vpop.f32.mrf.mxu1 }
 0x673   : > { %7341 = vst.msk [vmem:[%s11514_s25 + $0x100] sm:$0xff] %vm7308_vm3, %v7212_v55  ;;  %v6797_v47 = vpop.f32.mrf.mxu0  ;;  %v6537_v20 = vpack.c.bf16 %v6452_v41, %v6451_v7  ;;  %v11904_v35 = vadd.f32 %v11547_v58, %v6200_v24 }
 0x674   : > { %v7215_v50 = vsel %vm7179_vm2, %v11392_v51, %v6806_v63  ;;  %v6798_v6 = vadd.f32 %v11503_v32, %v6797_v47  ;;  %v6202_v10 = vpop.f32.mrf.mxu1 }
 0x675   : > { %7344 = vst.msk [vmem:[%s11514_s25 + $0x118] sm:$0xff] %vm7308_vm3, %v7215_v50  ;;  %9232 = vmatprep.mubr.bf16.mxu0 %v6537_v20  ;;  %v6453_v44 = vmax.f32 %v11904_v35, 0.0 }
 0x676   : > { %v7213_v54 = vsel %vm7179_vm2, %v11380_v22, %v6798_v6  ;;  %v6203_v39 = vpop.f32.mrf.mxu1 }
 0x677   : > { %7342 = vst.msk [vmem:[%s11514_s25 + $0x108] sm:$0xff] %vm7308_vm3, %v7213_v54  ;;  %v11912_v8 = vadd.f32 %v11547_v58, %v6203_v39 }
 0x678   : > { %v6205_v51 = vpop.f32.mrf.mxu1 }
 0x679   : > { %v6454_v61 = vmax.f32 %v11912_v8, 0.0 }
 0x67a   : > { %v6208_v40 = vpop.f32.mrf.mxu1 }
 0x67b   : > { %v6538_v30 = vpack.c.bf16 %v6454_v61, %v6453_v44  ;;  %v11917_v26 = vadd.f32 %v11547_v58, %v6208_v40 }
 0x67c   : > { %v6210_v62 = vpop.f32.mrf.mxu1 }
 0x67d   : > { %v9186_v7 = vpop.f32.mrf.mxu0  ;;  %9233 = vmatmul.mubr.bf16.gmra.mxu0 %v6538_v30  ;;  %v6455_v20 = vmax.f32 %v11917_v26, 0.0 }
 0x67e   : > { %v6819_v22 = vadd.f32 %v9186_v7, %v11503_v32  ;;  %v6211_v41 = vpop.f32.mrf.mxu1 }
 0x67f   : > { %v11921_v25 = vadd.f32 %v11547_v58, %v6211_v41  ;;  %v6810_v55 = vpop.f32.mrf.mxu0 }
 0x680   : > { %v7218_v63 = vsel %vm7179_vm2, %v11413_v1, %v6819_v22  ;;  %v6811_v24 = vadd.f32 %v11503_v32, %v6810_v55  ;;  %v6213_v47 = vpop.f32.mrf.mxu1 }
 0x681   : > { %7347 = vst.msk [vmem:[%s11514_s25 + $0x130] sm:$0xff] %vm7308_vm3, %v7218_v63  ;;  %v6456_v50 = vmax.f32 %v11921_v25, 0.0  ;;  %v9187_v6 = vpop.f32.mrf.mxu0 }
 0x682   : > { %v7216_v10 = vsel %vm7179_vm2, %v11401_v4, %v6811_v24  ;;  %v6822_v54 = vadd.f32 %v9187_v6, %v11503_v32  ;;  %v6216_v39 = vpop.f32.mrf.mxu1 }
 0x683   : > { %7345 = vst.msk [vmem:[%s11514_s25 + $0x120] sm:$0xff] %vm7308_vm3, %v7216_v10  ;;  %v6813_v1 = vpop.f32.mrf.mxu0  ;;  %v6539_v51 = vpack.c.bf16 %v6456_v50, %v6455_v20  ;;  %v11944_v30 = vadd.f32 %v11547_v58, %v6216_v39 }
 0x684   : > { %v7219_v44 = vsel %vm7179_vm2, %v11416_v15, %v6822_v54  ;;  %v6814_v61 = vadd.f32 %v11503_v32, %v6813_v1  ;;  %v6218_v40 = vpop.f32.mrf.mxu1 }
 0x685   : > { %7348 = vst.msk [vmem:[%s11514_s25 + $0x138] sm:$0xff] %vm7308_vm3, %v7219_v44  ;;  %9236 = vmatprep.mubr.bf16.mxu0 %v6539_v51  ;;  %v6457_v22 = vmax.f32 %v11944_v30, 0.0 }
 0x686   : > { %v7217_v4 = vsel %vm7179_vm2, %v11404_v17, %v6814_v61  ;;  %v6219_v62 = vpop.f32.mrf.mxu1 }
 0x687   : > { %7346 = vst.msk [vmem:[%s11514_s25 + $0x128] sm:$0xff] %vm7308_vm3, %v7217_v4  ;;  %v11952_v7 = vadd.f32 %v11547_v58, %v6219_v62 }
 0x688   : > { %v6221_v15 = vpop.f32.mrf.mxu1 }
 0x689   : > { %v6458_v41 = vmax.f32 %v11952_v7, 0.0 }
 0x68a   : > { %v6224_v55 = vpop.f32.mrf.mxu1 }
 0x68b   : > { %v6540_v63 = vpack.c.bf16 %v6458_v41, %v6457_v22  ;;  %v11957_v47 = vadd.f32 %v11547_v58, %v6224_v55 }
 0x68c   : > { %v6226_v24 = vpop.f32.mrf.mxu1 }
 0x68d   : > { %v9190_v20 = vpop.f32.mrf.mxu0  ;;  %9237 = vmatmul.mubr.bf16.gmra.mxu0 %v6540_v63  ;;  %v6459_v51 = vmax.f32 %v11957_v47, 0.0 }
 0x68e   : > { %v6835_v17 = vadd.f32 %v9190_v20, %v11503_v32  ;;  %v6227_v50 = vpop.f32.mrf.mxu1 }
 0x68f   : > { %v11961_v6 = vadd.f32 %v11547_v58, %v6227_v50  ;;  %v6826_v10 = vpop.f32.mrf.mxu0 }
 0x690   : > { %v7222_v54 = vsel %vm7179_vm2, %v11437_v19, %v6835_v17  ;;  %v6827_v39 = vadd.f32 %v11503_v32, %v6826_v10  ;;  %v6229_v1 = vpop.f32.mrf.mxu1 }
 0x691   : > { %7351 = vst.msk [vmem:[%s11514_s25 + $0x150] sm:$0xff] %vm7308_vm3, %v7222_v54  ;;  %v6460_v44 = vmax.f32 %v11961_v6, 0.0  ;;  %v9191_v61 = vpop.f32.mrf.mxu0 }
 0x692   : > { %v7220_v40 = vsel %vm7179_vm2, %v11425_v21, %v6827_v39  ;;  %v6838_v4 = vadd.f32 %v9191_v61, %v11503_v32  ;;  %v6232_v62 = vpop.f32.mrf.mxu1  ;;  %v12732_v21 = vld [vmem:[#allocation29_spill] sm:$0xff] }
 0x693   : > { %7349 = vst.msk [vmem:[%s11514_s25 + $0x140] sm:$0xff] %vm7308_vm3, %v7220_v40  ;;  %v6829_v19 = vpop.f32.mrf.mxu0  ;;  %v6541_v15 = vpack.c.bf16 %v6460_v44, %v6459_v51  ;;  %v11984_v63 = vadd.f32 %v11547_v58, %v6232_v62 }
 0x694   : > { %v7223_v22 = vsel %vm7179_vm2, %v11440_v59, %v6838_v4  ;;  %v6830_v41 = vadd.f32 %v11503_v32, %v6829_v19  ;;  %v6234_v55 = vpop.f32.mrf.mxu1  ;;  %v12733_v19 = vld [vmem:[#allocation5_spill] sm:$0xff] }
 0x695   : > { %7352 = vst.msk [vmem:[%s11514_s25 + $0x158] sm:$0xff] %vm7308_vm3, %v7223_v22  ;;  %9240 = vmatprep.mubr.bf16.mxu0 %v6541_v15  ;;  %v6461_v50 = vmax.f32 %v11984_v63, 0.0 }
 0x696   : > { %v7221_v24 = vsel %vm7179_vm2, %v12732_v21, %v6830_v41  ;;  %v6235_v20 = vpop.f32.mrf.mxu1 }
 0x697   : > { %7350 = vst.msk [vmem:[%s11514_s25 + $0x148] sm:$0xff] %vm7308_vm3, %v7221_v24  ;;  %v11992_v17 = vadd.f32 %v11547_v58, %v6235_v20  ;;  %v12734_v20 = vld [vmem:[#allocation30_spill] sm:$0xff] }
 0x698   : > { %v6237_v59 = vpop.f32.mrf.mxu1 }
 0x699   : > { %v6462_v10 = vmax.f32 %v11992_v17, 0.0 }
 0x69a   : > { %v6240_v54 = vpop.f32.mrf.mxu1 }
 0x69b   : > { %v6542_v39 = vpack.c.bf16 %v6462_v10, %v6461_v50  ;;  %v11997_v51 = vadd.f32 %v11547_v58, %v6240_v54 }
 0x69c   : > { %v6242_v1 = vpop.f32.mrf.mxu1 }
 0x69d   : > { %v9194_v44 = vpop.f32.mrf.mxu0  ;;  %9241 = vmatmul.mubr.bf16.gmra.mxu0 %v6542_v39  ;;  %v6463_v55 = vmax.f32 %v11997_v51, 0.0  ;;  %v12735_v1 = vld [vmem:[#allocation32_spill] sm:$0xff] }
 0x69e   : > { %v6851_v61 = vadd.f32 %v9194_v44, %v11503_v32  ;;  %v6243_v40 = vpop.f32.mrf.mxu1 }
 0x69f   : > { %v12001_v4 = vadd.f32 %v11547_v58, %v6243_v40  ;;  %v6842_v62 = vpop.f32.mrf.mxu0 }
 0x6a0   : > { %v7226_v15 = vsel %vm7179_vm2, %v12733_v19, %v6851_v61  ;;  %v6843_v22 = vadd.f32 %v11503_v32, %v6842_v62  ;;  %v6245_v41 = vpop.f32.mrf.mxu1  ;;  %v12736_v19 = vld [vmem:[#allocation31_spill] sm:$0xff] }
 0x6a1   : > { %7355 = vst.msk [vmem:[%s11514_s25 + $0x170] sm:$0xff] %vm7308_vm3, %v7226_v15  ;;  %v6464_v21 = vmax.f32 %v12001_v4, 0.0  ;;  %v9195_v24 = vpop.f32.mrf.mxu0 }
 0x6a2   : > { %v7224_v59 = vsel %vm7179_vm2, %v12734_v20, %v6843_v22  ;;  %v6854_v50 = vadd.f32 %v9195_v24, %v11503_v32  ;;  %v6248_v10 = vpop.f32.mrf.mxu1 }
 0x6a3   : > { %7353 = vst.msk [vmem:[%s11514_s25 + $0x160] sm:$0xff] %vm7308_vm3, %v7224_v59  ;;  %v6845_v54 = vpop.f32.mrf.mxu0  ;;  %v6543_v39 = vpack.c.bf16 %v6464_v21, %v6463_v55  ;;  %v12024_v62 = vadd.f32 %v11547_v58, %v6248_v10 }
 0x6a4   : > { %v7227_v44 = vsel %vm7179_vm2, %v12735_v1, %v6854_v50  ;;  %v6846_v61 = vadd.f32 %v11503_v32, %v6845_v54  ;;  %v6250_v40 = vpop.f32.mrf.mxu1 }
 0x6a5   : > { %7356 = vst.msk [vmem:[%s11514_s25 + $0x178] sm:$0xff] %vm7308_vm3, %v7227_v44  ;;  %9244 = vmatprep.mubr.bf16.mxu0 %v6543_v39  ;;  %v6465_v21 = vmax.f32 %v12024_v62, 0.0  ;;  %v12738_v40 = vld [vmem:[#allocation7_spill] sm:$0xff] }
 0x6a6   : > { %v7225_v15 = vsel %vm7179_vm2, %v12736_v19, %v6846_v61  ;;  %v6251_v22 = vpop.f32.mrf.mxu1 }
 0x6a7   : > { %7354 = vst.msk [vmem:[%s11514_s25 + $0x168] sm:$0xff] %vm7308_vm3, %v7225_v15  ;;  %v12032_v41 = vadd.f32 %v11547_v58, %v6251_v22 }
 0x6a8   : > { %v6253_v55 = vpop.f32.mrf.mxu1 }
 0x6a9   : > { %v6466_v24 = vmax.f32 %v12032_v41, 0.0 }
 0x6aa   : > { %v6256_v20 = vpop.f32.mrf.mxu1 }
 0x6ab   : > { %v6544_v59 = vpack.c.bf16 %v6466_v24, %v6465_v21  ;;  %v12037_v10 = vadd.f32 %v11547_v58, %v6256_v20  ;;  %v12739_v20 = vld [vmem:[#allocation3_spill] sm:$0xff] }
 0x6ac   : > { %v6258_v50 = vpop.f32.mrf.mxu1 }
 0x6ad   : > { %v9198_v54 = vpop.f32.mrf.mxu0  ;;  %9245 = vmatmul.mubr.bf16.gmra.mxu0 %v6544_v59  ;;  %v6467_v55 = vmax.f32 %v12037_v10, 0.0  ;;  %v12057_v50 = vld [vmem:[%s12643_s2 + $0x5] ss:$0 sm:$0xff] }
 0x6ae   : > { %v6867_v39 = vadd.f32 %v9198_v54, %v11503_v32  ;;  %v6259_v1 = vpop.f32.mrf.mxu1 }
 0x6af   : > { %v12041_v44 = vadd.f32 %v11547_v58, %v6259_v1  ;;  %v6858_v61 = vpop.f32.mrf.mxu0 }
 0x6b0   : > { %v7230_v19 = vsel %vm7179_vm2, %v12738_v40, %v6867_v39  ;;  %v6859_v15 = vadd.f32 %v11503_v32, %v6858_v61  ;;  %v6261_v22 = vpop.f32.mrf.mxu1  ;;  %v12740_v61 = vld [vmem:[#allocation9_spill] sm:$0xff] }
 0x6b1   : > { %12737 = vst [vmem:[#allocation15_spill] sm:$0xff] %v12041_v44  ;;  %7359 = vst.msk [vmem:[%s11514_s25 + $0x190] sm:$0xff] %vm7308_vm3, %v7230_v19  ;;  %v6468_v21 = vmax.f32 %v12041_v44, 0.0  ;;  %v9199_v24 = vpop.f32.mrf.mxu0 }
 0x6b2   : > { %v7228_v59 = vsel %vm7179_vm2, %v12739_v20, %v6859_v15  ;;  %v6870_v32 = vadd.f32 %v12057_v50, %v9199_v24  ;;  %v6264_v54 = vpop.f32.mrf.mxu1  ;;  %v12741_v20 = vld [vmem:[#allocation4_spill] sm:$0xff] }
 0x6b3   : > { %7357 = vst.msk [vmem:[%s11514_s25 + $0x180] sm:$0xff] %vm7308_vm3, %v7228_v59  ;;  %v6861_v39 = vpop.f32.mrf.mxu0  ;;  %v6545_v1 = vpack.c.bf16 %v6468_v21, %v6467_v55  ;;  %v12069_v15 = vadd.f32 %v11547_v58, %v6264_v54 }
 0x6b4   : > { %v7231_v40 = vsel %vm7179_vm2, %v12740_v61, %v6870_v32  ;;  %v6862_v19 = vadd.f32 %v12057_v50, %v6861_v39  ;;  %v6266_v22 = vpop.f32.mrf.mxu1 }
 0x6b5   : > { %7360 = vst.msk [vmem:[%s11514_s25 + $0x198] sm:$0xff] %vm7308_vm3, %v7231_v40  ;;  %9248 = vmatprep.mubr.bf16.mxu0 %v6545_v1  ;;  %v6469_v32 = vmax.f32 %v12069_v15, 0.0 }
 0x6b6   : > { %v7229_v24 = vsel %vm7179_vm2, %v12741_v20, %v6862_v19  ;;  %v6267_v59 = vpop.f32.mrf.mxu1 }
 0x6b7   : > { %7358 = vst.msk [vmem:[%s11514_s25 + $0x188] sm:$0xff] %vm7308_vm3, %v7229_v24  ;;  %v12077_v55 = vadd.f32 %v11547_v58, %v6267_v59 }
 0x6b8   : > { %v6269_v21 = vpop.f32.mrf.mxu1 }
 0x6b9   : > { %v6470_v39 = vmax.f32 %v12077_v55, 0.0 }
 0x6ba   : > { %v6272_v61 = vpop.f32.mrf.mxu1 }
 0x6bb   : > { %v6546_v54 = vpack.c.bf16 %v6470_v39, %v6469_v32  ;;  %v12082_v1 = vadd.f32 %v11547_v58, %v6272_v61 }
 0x6bc   : > { %v6274_v40 = vpop.f32.mrf.mxu1 }
 0x6bd   : > { %12742 = vst [vmem:[#allocation10_spill] sm:$0xff] %v12082_v1  ;;  %v9202_v22 = vpop.f32.mrf.mxu0  ;;  %9249 = vmatmul.mubr.bf16.gmra.mxu0 %v6546_v54  ;;  %v6471_v61 = vmax.f32 %v12082_v1, 0.0 }
 0x6be   : > { %v6883_v19 = vadd.f32 %v12057_v50, %v9202_v22  ;;  %v6275_v20 = vpop.f32.mrf.mxu1  ;;  %v12744_v22 = vld [vmem:[#allocation6_spill] sm:$0xff] }
 0x6bf   : > { %v12086_v24 = vadd.f32 %v11547_v58, %v6275_v20  ;;  %v6874_v59 = vpop.f32.mrf.mxu0 }
 0x6c0   : > { %v7234_v21 = vsel %vm7179_vm2, %v11550_v33, %v6883_v19  ;;  %v6875_v32 = vadd.f32 %v12057_v50, %v6874_v59  ;;  %v6277_v39 = vpop.f32.mrf.mxu1  ;;  %v12745_v59 = vld [vmem:[#allocation13_spill] sm:$0xff] }
 0x6c1   : > { %12743 = vst [vmem:[#allocation16_spill] sm:$0xff] %v12086_v24  ;;  %7363 = vst.msk [vmem:[%s11514_s25 + $0x1b0] sm:$0xff] %vm7308_vm3, %v7234_v21  ;;  %v6472_v54 = vmax.f32 %v12086_v24, 0.0  ;;  %v9203_v40 = vpop.f32.mrf.mxu0 }
 0x6c2   : > { %v7232_v58 = vsel %vm7179_vm2, %v12744_v22, %v6875_v32  ;;  %v6886_v20 = vadd.f32 %v12057_v50, %v9203_v40  ;;  %v6280_v44 = vpop.f32.mrf.mxu1  ;;  %v12111_v32 = vld [vmem:[%s12645_s4] ss:$0 sm:$0xff]  ;;  %v12746_v22 = vld [vmem:[#allocation8_spill] sm:$0xff] }
 0x6c3   : > { %7361 = vst.msk [vmem:[%s11514_s25 + $0x1a0] sm:$0xff] %vm7308_vm3, %v7232_v58  ;;  %v6877_v33 = vpop.f32.mrf.mxu0  ;;  %v6547_v19 = vpack.c.bf16 %v6472_v54, %v6471_v61  ;;  %v12114_v40 = vadd.f32 %v12111_v32, %v6280_v44 }
 0x6c4   : > { %v7235_v39 = vsel %vm7179_vm2, %v12745_v59, %v6886_v20  ;;  %v6878_v21 = vadd.f32 %v12057_v50, %v6877_v33  ;;  %v6282_v24 = vpop.f32.mrf.mxu1 }
 0x6c5   : > { %7364 = vst.msk [vmem:[%s11514_s25 + $0x1b8] sm:$0xff] %vm7308_vm3, %v7235_v39  ;;  %9252 = vmatprep.mubr.bf16.mxu0 %v6547_v19  ;;  %v6473_v20 = vmax.f32 %v12114_v40, 0.0 }
 0x6c6   : > { %v7233_v61 = vsel %vm7179_vm2, %v12746_v22, %v6878_v21  ;;  %v6283_v54 = vpop.f32.mrf.mxu1 }
 0x6c7   : > { %7362 = vst.msk [vmem:[%s11514_s25 + $0x1a8] sm:$0xff] %vm7308_vm3, %v7233_v61  ;;  %v12122_v24 = vadd.f32 %v12111_v32, %v6283_v54 }
 0x6c8   : > { %v6285_v58 = vpop.f32.mrf.mxu1 }
 0x6c9   : > { %12747 = vst [vmem:[#allocation12_spill] sm:$0xff] %v12122_v24  ;;  %v6474_v33 = vmax.f32 %v12122_v24, 0.0 }
 0x6ca   : > { %v6288_v59 = vpop.f32.mrf.mxu1 }
 0x6cb   : > { %v6548_v44 = vpack.c.bf16 %v6474_v33, %v6473_v20  ;;  %v12127_v19 = vadd.f32 %v12111_v32, %v6288_v59 }
 0x6cc   : > { %v6290_v39 = vpop.f32.mrf.mxu1 }
 0x6cd   : > { %v9206_v1 = vpop.f32.mrf.mxu0  ;;  %9253 = vmatmul.mubr.bf16.gmra.mxu0 %v6548_v44  ;;  %v6475_v59 = vmax.f32 %v12127_v19, 0.0 }
 0x6ce   : > { %v6899_v21 = vadd.f32 %v12057_v50, %v9206_v1  ;;  %v6291_v22 = vpop.f32.mrf.mxu1 }
 0x6cf   : > { %v12131_v61 = vadd.f32 %v12111_v32, %v6291_v22  ;;  %v6890_v54 = vpop.f32.mrf.mxu0 }
 0x6d0   : > { %v7238_v58 = vsel %vm7179_vm2, %v11598_v52, %v6899_v21  ;;  %v6891_v20 = vadd.f32 %v12057_v50, %v6890_v54  ;;  %v6293_v33 = vpop.f32.mrf.mxu1 }
 0x6d1   : > { %12748 = vst [vmem:[#allocation11_spill] sm:$0xff] %v12131_v61  ;;  %7367 = vst.msk [vmem:[%s11514_s25 + $0x1d0] sm:$0xff] %vm7308_vm3, %v7238_v58  ;;  %v6476_v44 = vmax.f32 %v12131_v61, 0.0  ;;  %v9207_v1 = vpop.f32.mrf.mxu0 }
 0x6d2   : > { %v7236_v39 = vsel %vm7179_vm2, %v11567_v49, %v6891_v20  ;;  %v6902_v22 = vadd.f32 %v12057_v50, %v9207_v1  ;;  %v6296_v24 = vpop.f32.mrf.mxu1 }
 0x6d3   : > { %7365 = vst.msk [vmem:[%s11514_s25 + $0x1c0] sm:$0xff] %vm7308_vm3, %v7236_v39  ;;  %v6893_v52 = vpop.f32.mrf.mxu0  ;;  %v6549_v21 = vpack.c.bf16 %v6476_v44, %v6475_v59  ;;  %v12154_v61 = vadd.f32 %v12111_v32, %v6296_v24 }
 0x6d4   : > { %v7239_v54 = vsel %vm7179_vm2, %v11606_v2, %v6902_v22  ;;  %v6894_v58 = vadd.f32 %v12057_v50, %v6893_v52  ;;  %v6298_v33 = vpop.f32.mrf.mxu1 }
 0x6d5   : > { %7368 = vst.msk [vmem:[%s11514_s25 + $0x1d8] sm:$0xff] %vm7308_vm3, %v7239_v54  ;;  %9256 = vmatprep.mubr.bf16.mxu0 %v6549_v21  ;;  %v6477_v44 = vmax.f32 %v12154_v61, 0.0 }
 0x6d6   : > { %v7237_v49 = vsel %vm7179_vm2, %v11571_v56, %v6894_v58  ;;  %v6299_v20 = vpop.f32.mrf.mxu1 }
 0x6d7   : > { %7366 = vst.msk [vmem:[%s11514_s25 + $0x1c8] sm:$0xff] %vm7308_vm3, %v7237_v49  ;;  %v12162_v59 = vadd.f32 %v12111_v32, %v6299_v20 }
 0x6d8   : > { %v6301_v2 = vpop.f32.mrf.mxu1 }
 0x6d9   : > { %v6478_v1 = vmax.f32 %v12162_v59, 0.0 }
 0x6da   : > { %v6304_v39 = vpop.f32.mrf.mxu1 }
 0x6db   : > { %v6550_v24 = vpack.c.bf16 %v6478_v1, %v6477_v44  ;;  %v12167_v52 = vadd.f32 %v12111_v32, %v6304_v39 }
 0x6dc   : > { %v6306_v22 = vpop.f32.mrf.mxu1 }
 0x6dd   : > { %v9210_v21 = vpop.f32.mrf.mxu0  ;;  %9257 = vmatmul.mubr.bf16.gmra.mxu0 %v6550_v24  ;;  %v6479_v44 = vmax.f32 %v12167_v52, 0.0 }
 0x6de   : > { %v6915_v56 = vadd.f32 %v12057_v50, %v9210_v21  ;;  %v6307_v54 = vpop.f32.mrf.mxu1 }
 0x6df   : > { %v12171_v58 = vadd.f32 %v12111_v32, %v6307_v54  ;;  %v6906_v33 = vpop.f32.mrf.mxu0 }
 0x6e0   : > { %v7242_v49 = vsel %vm7179_vm2, %v11643_v48, %v6915_v56  ;;  %v6907_v20 = vadd.f32 %v12057_v50, %v6906_v33  ;;  %v6309_v2 = vpop.f32.mrf.mxu1 }
 0x6e1   : > { %7371 = vst.msk [vmem:[%s11514_s25 + $0x1f0] sm:$0xff] %vm7308_vm3, %v7242_v49  ;;  %v6480_v1 = vmax.f32 %v12171_v58, 0.0  ;;  %v9211_v39 = vpop.f32.mrf.mxu0 }
 0x6e2   : > { %v7240_v24 = vsel %vm7179_vm2, %v11611_v43, %v6907_v20  ;;  %v6918_v22 = vadd.f32 %v12057_v50, %v9211_v39  ;;  %v6312_v21 = vpop.f32.mrf.mxu1 }
 0x6e3   : > { %7369 = vst.msk [vmem:[%s11514_s25 + $0x1e0] sm:$0xff] %vm7308_vm3, %v7240_v24  ;;  %v6909_v48 = vpop.f32.mrf.mxu0  ;;  %v6551_v56 = vpack.c.bf16 %v6480_v1, %v6479_v44  ;;  %v12194_v2 = vadd.f32 %v12111_v32, %v6312_v21 }
 0x6e4   : > { %v7243_v54 = vsel %vm7179_vm2, %v11651_v9, %v6918_v22  ;;  %v6910_v33 = vadd.f32 %v12057_v50, %v6909_v48  ;;  %v6314_v49 = vpop.f32.mrf.mxu1 }
 0x6e5   : > { %7372 = vst.msk [vmem:[%s11514_s25 + $0x1f8] sm:$0xff] %vm7308_vm3, %v7243_v54  ;;  %9260 = vmatprep.mubr.bf16.mxu0 %v6551_v56  ;;  %v6481_v1 = vmax.f32 %v12194_v2, 0.0 }
 0x6e6   : > { %v7241_v43 = vsel %vm7179_vm2, %v11615_v38, %v6910_v33  ;;  %v6315_v20 = vpop.f32.mrf.mxu1 }
 0x6e7   : > { %7370 = vst.msk [vmem:[%s11514_s25 + $0x1e8] sm:$0xff] %vm7308_vm3, %v7241_v43  ;;  %v12202_v44 = vadd.f32 %v12111_v32, %v6315_v20 }
 0x6e8   : > { %v6317_v9 = vpop.f32.mrf.mxu1 }
 0x6e9   : > { %v6482_v39 = vmax.f32 %v12202_v44, 0.0 }
 0x6ea   : > { %v6320_v24 = vpop.f32.mrf.mxu1 }
 0x6eb   : > { %v6552_v22 = vpack.c.bf16 %v6482_v39, %v6481_v1  ;;  %v12207_v48 = vadd.f32 %v12111_v32, %v6320_v24 }
 0x6ec   : > { %v6322_v21 = vpop.f32.mrf.mxu1 }
 0x6ed   : > { %v9214_v56 = vpop.f32.mrf.mxu0  ;;  %9261 = vmatmul.mubr.bf16.gmra.mxu0 %v6552_v22  ;;  %v6483_v1 = vmax.f32 %v12207_v48, 0.0 }
 0x6ee   : > { %v6931_v38 = vadd.f32 %v12057_v50, %v9214_v56  ;;  %v6323_v54 = vpop.f32.mrf.mxu1 }
 0x6ef   : > { %v12211_v33 = vadd.f32 %v12111_v32, %v6323_v54  ;;  %v6922_v49 = vpop.f32.mrf.mxu0 }
 0x6f0   : > { %v7246_v43 = vsel %vm7179_vm2, %v11693_v36, %v6931_v38  ;;  %v6923_v20 = vadd.f32 %v12057_v50, %v6922_v49  ;;  %v6325_v9 = vpop.f32.mrf.mxu1 }
 0x6f1   : > { %7375 = vst.msk [vmem:[%s11514_s25 + $0x210] sm:$0xff] %vm7308_vm3, %v7246_v43  ;;  %v6484_v39 = vmax.f32 %v12211_v33, 0.0  ;;  %v9215_v24 = vpop.f32.mrf.mxu0 }
 0x6f2   : > { %v7244_v22 = vsel %vm7179_vm2, %v11656_v5, %v6923_v20  ;;  %v6934_v21 = vadd.f32 %v12057_v50, %v9215_v24  ;;  %v6328_v56 = vpop.f32.mrf.mxu1 }
 0x6f3   : > { %7373 = vst.msk [vmem:[%s11514_s25 + $0x200] sm:$0xff] %vm7308_vm3, %v7244_v22  ;;  %v6925_v36 = vpop.f32.mrf.mxu0  ;;  %v6553_v38 = vpack.c.bf16 %v6484_v39, %v6483_v1  ;;  %v12234_v9 = vadd.f32 %v12111_v32, %v6328_v56 }
 0x6f4   : > { %v7247_v54 = vsel %vm7179_vm2, %v11701_v28, %v6934_v21  ;;  %v6926_v49 = vadd.f32 %v12057_v50, %v6925_v36  ;;  %v6330_v43 = vpop.f32.mrf.mxu1 }
 0x6f5   : > { %7376 = vst.msk [vmem:[%s11514_s25 + $0x218] sm:$0xff] %vm7308_vm3, %v7247_v54  ;;  %9264 = vmatprep.mubr.bf16.mxu0 %v6553_v38  ;;  %v6485_v39 = vmax.f32 %v12234_v9, 0.0 }
 0x6f6   : > { %v7245_v5 = vsel %vm7179_vm2, %v11660_v0, %v6926_v49  ;;  %v6331_v20 = vpop.f32.mrf.mxu1 }
 0x6f7   : > { %7374 = vst.msk [vmem:[%s11514_s25 + $0x208] sm:$0xff] %vm7308_vm3, %v7245_v5  ;;  %v12242_v1 = vadd.f32 %v12111_v32, %v6331_v20 }
 0x6f8   : > { %v6333_v28 = vpop.f32.mrf.mxu1 }
 0x6f9   : > { %v6486_v24 = vmax.f32 %v12242_v1, 0.0 }
 0x6fa   : > { %v6336_v22 = vpop.f32.mrf.mxu1 }
 0x6fb   : > { %v6554_v21 = vpack.c.bf16 %v6486_v24, %v6485_v39  ;;  %v12247_v36 = vadd.f32 %v12111_v32, %v6336_v22 }
 0x6fc   : > { %v6338_v56 = vpop.f32.mrf.mxu1 }
 0x6fd   : > { %v9218_v38 = vpop.f32.mrf.mxu0  ;;  %9265 = vmatmul.mubr.bf16.gmra.mxu0 %v6554_v21  ;;  %v6487_v39 = vmax.f32 %v12247_v36, 0.0 }
 0x6fe   : > { %v6947_v0 = vadd.f32 %v12057_v50, %v9218_v38  ;;  %v6339_v54 = vpop.f32.mrf.mxu1 }
 0x6ff   : > { %v12251_v49 = vadd.f32 %v12111_v32, %v6339_v54  ;;  %v6938_v43 = vpop.f32.mrf.mxu0 }
 0x700   : > { %v7250_v5 = vsel %vm7179_vm2, %v11738_v13, %v6947_v0  ;;  %v6939_v20 = vadd.f32 %v12057_v50, %v6938_v43  ;;  %v6341_v28 = vpop.f32.mrf.mxu1 }
 0x701   : > { %7379 = vst.msk [vmem:[%s11514_s25 + $0x230] sm:$0xff] %vm7308_vm3, %v7250_v5  ;;  %v6488_v24 = vmax.f32 %v12251_v49, 0.0  ;;  %v9219_v22 = vpop.f32.mrf.mxu0 }
 0x702   : > { %v7248_v21 = vsel %vm7179_vm2, %v11706_v23, %v6939_v20  ;;  %v6950_v56 = vadd.f32 %v12057_v50, %v9219_v22  ;;  %v6344_v38 = vpop.f32.mrf.mxu1 }
 0x703   : > { %7377 = vst.msk [vmem:[%s11514_s25 + $0x220] sm:$0xff] %vm7308_vm3, %v7248_v21  ;;  %v6941_v13 = vpop.f32.mrf.mxu0  ;;  %v6555_v0 = vpack.c.bf16 %v6488_v24, %v6487_v39  ;;  %v12274_v28 = vadd.f32 %v12111_v32, %v6344_v38 }
 0x704   : > { %v7251_v54 = vsel %vm7179_vm2, %v11746_v14, %v6950_v56  ;;  %v6942_v43 = vadd.f32 %v12057_v50, %v6941_v13  ;;  %v6346_v5 = vpop.f32.mrf.mxu1 }
 0x705   : > { %7380 = vst.msk [vmem:[%s11514_s25 + $0x238] sm:$0xff] %vm7308_vm3, %v7251_v54  ;;  %9268 = vmatprep.mubr.bf16.mxu0 %v6555_v0  ;;  %v6489_v24 = vmax.f32 %v12274_v28, 0.0 }
 0x706   : > { %v7249_v23 = vsel %vm7179_vm2, %v11710_v46, %v6942_v43  ;;  %v6347_v20 = vpop.f32.mrf.mxu1 }
 0x707   : > { %7378 = vst.msk [vmem:[%s11514_s25 + $0x228] sm:$0xff] %vm7308_vm3, %v7249_v23  ;;  %v12282_v39 = vadd.f32 %v12111_v32, %v6347_v20 }
 0x708   : > { %v6349_v14 = vpop.f32.mrf.mxu1 }
 0x709   : > { %v6490_v22 = vmax.f32 %v12282_v39, 0.0 }
 0x70a   : > { %v6352_v21 = vpop.f32.mrf.mxu1 }
 0x70b   : > { %v6556_v56 = vpack.c.bf16 %v6490_v22, %v6489_v24  ;;  %v12287_v13 = vadd.f32 %v12111_v32, %v6352_v21 }
 0x70c   : > { %v6354_v38 = vpop.f32.mrf.mxu1 }
 0x70d   : > { %v9222_v0 = vpop.f32.mrf.mxu0  ;;  %9269 = vmatmul.mubr.bf16.gmra.mxu0 %v6556_v56  ;;  %v6491_v24 = vmax.f32 %v12287_v13, 0.0 }
 0x70e   : > { %v6963_v46 = vadd.f32 %v12057_v50, %v9222_v0  ;;  %v6355_v54 = vpop.f32.mrf.mxu1 }
 0x70f   : > { %v12291_v43 = vadd.f32 %v12111_v32, %v6355_v54  ;;  %v6954_v5 = vpop.f32.mrf.mxu0 }
 0x710   : > { %v7254_v23 = vsel %vm7179_vm2, %v11783_v57, %v6963_v46  ;;  %v6955_v20 = vadd.f32 %v12057_v50, %v6954_v5  ;;  %v6357_v14 = vpop.f32.mrf.mxu1 }
 0x711   : > { %7383 = vst.msk [vmem:[%s11514_s25 + $0x250] sm:$0xff] %vm7308_vm3, %v7254_v23  ;;  %v6492_v22 = vmax.f32 %v12291_v43, 0.0  ;;  %v9223_v21 = vpop.f32.mrf.mxu0 }
 0x712   : > { %v7252_v56 = vsel %vm7179_vm2, %v11751_v34, %v6955_v20  ;;  %v6966_v38 = vadd.f32 %v12057_v50, %v9223_v21  ;;  %v6360_v0 = vpop.f32.mrf.mxu1 }
 0x713   : > { %7381 = vst.msk [vmem:[%s11514_s25 + $0x240] sm:$0xff] %vm7308_vm3, %v7252_v56  ;;  %v6957_v57 = vpop.f32.mrf.mxu0  ;;  %v6557_v46 = vpack.c.bf16 %v6492_v22, %v6491_v24  ;;  %v12314_v14 = vadd.f32 %v12111_v32, %v6360_v0 }
 0x714   : > { %v7255_v54 = vsel %vm7179_vm2, %v11791_v29, %v6966_v38  ;;  %v6958_v5 = vadd.f32 %v12057_v50, %v6957_v57  ;;  %v6362_v23 = vpop.f32.mrf.mxu1 }
 0x715   : > { %7384 = vst.msk [vmem:[%s11514_s25 + $0x258] sm:$0xff] %vm7308_vm3, %v7255_v54  ;;  %9272 = vmatprep.mubr.bf16.mxu0 %v6557_v46  ;;  %v6493_v22 = vmax.f32 %v12314_v14, 0.0 }
 0x716   : > { %v7253_v34 = vsel %vm7179_vm2, %v11755_v16, %v6958_v5  ;;  %v6363_v20 = vpop.f32.mrf.mxu1 }
 0x717   : > { %7382 = vst.msk [vmem:[%s11514_s25 + $0x248] sm:$0xff] %vm7308_vm3, %v7253_v34  ;;  %v12322_v29 = vadd.f32 %v12111_v32, %v6363_v20 }
 0x718   : > { %v6365_v24 = vpop.f32.mrf.mxu1 }
 0x719   : > { %v6494_v21 = vmax.f32 %v12322_v29, 0.0 }
 0x71b   : > { %v6558_v56 = vpack.c.bf16 %v6494_v21, %v6493_v22 }
 0x71d   : > { %v9226_v38 = vpop.f32.mrf.mxu0  ;;  %9273 = vmatmul.mubr.bf16.gmra.mxu0 %v6558_v56 }
 0x71e   : > { %v6979_v0 = vadd.f32 %v12057_v50, %v9226_v38 }
 0x71f   : > { %v6970_v16 = vpop.f32.mrf.mxu0 }
 0x720   : > { %v7258_v57 = vsel %vm7179_vm2, %v11824_v45, %v6979_v0  ;;  %v6971_v32 = vadd.f32 %v12057_v50, %v6970_v16 }
 0x721   : > { %7387 = vst.msk [vmem:[%s11514_s25 + $0x270] sm:$0xff] %vm7308_vm3, %v7258_v57  ;;  %v9227_v46 = vpop.f32.mrf.mxu0 }
 0x722   : > { %v7256_v54 = vsel %vm7179_vm2, %v11796_v27, %v6971_v32  ;;  %v6982_v5 = vadd.f32 %v12057_v50, %v9227_v46 }
 0x723   : > { %7385 = vst.msk [vmem:[%s11514_s25 + $0x260] sm:$0xff] %vm7308_vm3, %v7256_v54  ;;  %v6973_v23 = vpop.f32.mrf.mxu0 }
 0x724   : > { %v7259_v45 = vsel %vm7179_vm2, %v11832_v3, %v6982_v5  ;;  %v6974_v34 = vadd.f32 %v12057_v50, %v6973_v23 }
 0x725   : > { %7388 = vst.msk [vmem:[%s11514_s25 + $0x278] sm:$0xff] %vm7308_vm3, %v7259_v45 }
 0x726   : > { %v7257_v20 = vsel %vm7179_vm2, %v11800_v37, %v6974_v34 }
 0x727   : > { %7386 = vst.msk [vmem:[%s11514_s25 + $0x268] sm:$0xff] %vm7308_vm3, %v7257_v20 }
 0x72d   : > { %v9230_v27 = vpop.f32.mrf.mxu0 }
 0x72e   : > { %v6995_v24 = vadd.f32 %v12057_v50, %v9230_v27 }
 0x72f   : > { %v6986_v22 = vpop.f32.mrf.mxu0 }
 0x730   : > { %v7262_v3 = vsel %vm7179_vm2, %v11864_v12, %v6995_v24  ;;  %v6987_v21 = vadd.f32 %v12057_v50, %v6986_v22 }
 0x731   : > { %7391 = vst.msk [vmem:[%s11514_s25 + $0x290] sm:$0xff] %vm7308_vm3, %v7262_v3  ;;  %v9231_v56 = vpop.f32.mrf.mxu0 }
 0x732   : > { %v7260_v37 = vsel %vm7179_vm2, %v11837_v31, %v6987_v21  ;;  %v6998_v38 = vadd.f32 %v12057_v50, %v9231_v56 }
 0x733   : > { %7389 = vst.msk [vmem:[%s11514_s25 + $0x280] sm:$0xff] %vm7308_vm3, %v7260_v37  ;;  %v6989_v0 = vpop.f32.mrf.mxu0 }
 0x734   : > { %v7263_v12 = vsel %vm7179_vm2, %v11872_v60, %v6998_v38  ;;  %v6990_v16 = vadd.f32 %v12057_v50, %v6989_v0 }
 0x735   : > { %7392 = vst.msk [vmem:[%s11514_s25 + $0x298] sm:$0xff] %vm7308_vm3, %v7263_v12 }
 0x736   : > { %v7261_v57 = vsel %vm7179_vm2, %v11841_v18, %v6990_v16 }
 0x737   : > { %7390 = vst.msk [vmem:[%s11514_s25 + $0x288] sm:$0xff] %vm7308_vm3, %v7261_v57 }
 0x73d   : > { %v9234_v31 = vpop.f32.mrf.mxu0 }
 0x73e   : > { %v7011_v32 = vadd.f32 %v12057_v50, %v9234_v31 }
 0x73f   : > { %v7002_v46 = vpop.f32.mrf.mxu0 }
 0x740   : > { %v7266_v60 = vsel %vm7179_vm2, %v11904_v35, %v7011_v32  ;;  %v7003_v54 = vadd.f32 %v12057_v50, %v7002_v46 }
 0x741   : > { %7395 = vst.msk [vmem:[%s11514_s25 + $0x2b0] sm:$0xff] %vm7308_vm3, %v7266_v60  ;;  %v9235_v5 = vpop.f32.mrf.mxu0 }
 0x742   : > { %v7264_v18 = vsel %vm7179_vm2, %v11877_v53, %v7003_v54  ;;  %v7014_v23 = vadd.f32 %v12057_v50, %v9235_v5 }
 0x743   : > { %7393 = vst.msk [vmem:[%s11514_s25 + $0x2a0] sm:$0xff] %vm7308_vm3, %v7264_v18  ;;  %v7005_v45 = vpop.f32.mrf.mxu0 }
 0x744   : > { %v7267_v35 = vsel %vm7179_vm2, %v11912_v8, %v7014_v23  ;;  %v7006_v34 = vadd.f32 %v12057_v50, %v7005_v45 }
 0x745   : > { %7396 = vst.msk [vmem:[%s11514_s25 + $0x2b8] sm:$0xff] %vm7308_vm3, %v7267_v35 }
 0x746   : > { %v7265_v20 = vsel %vm7179_vm2, %v11881_v42, %v7006_v34 }
 0x747   : > { %7394 = vst.msk [vmem:[%s11514_s25 + $0x2a8] sm:$0xff] %vm7308_vm3, %v7265_v20 }
 0x74d   : > { %v9238_v53 = vpop.f32.mrf.mxu0 }
 0x74e   : > { %v7027_v27 = vadd.f32 %v12057_v50, %v9238_v53 }
 0x74f   : > { %v7018_v24 = vpop.f32.mrf.mxu0 }
 0x750   : > { %v7270_v8 = vsel %vm7179_vm2, %v11944_v30, %v7027_v27  ;;  %v7019_v22 = vadd.f32 %v12057_v50, %v7018_v24 }
 0x751   : > { %7399 = vst.msk [vmem:[%s11514_s25 + $0x2d0] sm:$0xff] %vm7308_vm3, %v7270_v8  ;;  %v9239_v3 = vpop.f32.mrf.mxu0 }
 0x752   : > { %v7268_v42 = vsel %vm7179_vm2, %v11917_v26, %v7019_v22  ;;  %v7030_v21 = vadd.f32 %v12057_v50, %v9239_v3 }
 0x753   : > { %7397 = vst.msk [vmem:[%s11514_s25 + $0x2c0] sm:$0xff] %vm7308_vm3, %v7268_v42  ;;  %v7021_v56 = vpop.f32.mrf.mxu0 }
 0x754   : > { %v7271_v30 = vsel %vm7179_vm2, %v11952_v7, %v7030_v21  ;;  %v7022_v37 = vadd.f32 %v12057_v50, %v7021_v56  ;;  %v12749_v21 = vld [vmem:[#allocation15_spill] sm:$0xff] }
 0x755   : > { %7400 = vst.msk [vmem:[%s11514_s25 + $0x2d8] sm:$0xff] %vm7308_vm3, %v7271_v30 }
 0x756   : > { %v7269_v38 = vsel %vm7179_vm2, %v11921_v25, %v7022_v37 }
 0x757   : > { %7398 = vst.msk [vmem:[%s11514_s25 + $0x2c8] sm:$0xff] %vm7308_vm3, %v7269_v38 }
 0x75d   : > { %v9242_v26 = vpop.f32.mrf.mxu0 }
 0x75e   : > { %v7043_v0 = vadd.f32 %v12057_v50, %v9242_v26 }
 0x75f   : > { %v7034_v12 = vpop.f32.mrf.mxu0 }
 0x760   : > { %v7274_v7 = vsel %vm7179_vm2, %v11984_v63, %v7043_v0  ;;  %v7035_v16 = vadd.f32 %v12057_v50, %v7034_v12  ;;  %v12750_v0 = vld [vmem:[#allocation10_spill] sm:$0xff] }
 0x761   : > { %7403 = vst.msk [vmem:[%s11514_s25 + $0x2f0] sm:$0xff] %vm7308_vm3, %v7274_v7  ;;  %v9243_v57 = vpop.f32.mrf.mxu0 }
 0x762   : > { %v7272_v25 = vsel %vm7179_vm2, %v11957_v47, %v7035_v16  ;;  %v7046_v31 = vadd.f32 %v12057_v50, %v9243_v57  ;;  %v12751_v57 = vld [vmem:[#allocation12_spill] sm:$0xff] }
 0x763   : > { %7401 = vst.msk [vmem:[%s11514_s25 + $0x2e0] sm:$0xff] %vm7308_vm3, %v7272_v25  ;;  %v7037_v32 = vpop.f32.mrf.mxu0 }
 0x764   : > { %v7275_v63 = vsel %vm7179_vm2, %v11992_v17, %v7046_v31  ;;  %v7038_v46 = vadd.f32 %v12057_v50, %v7037_v32  ;;  %v12752_v31 = vld [vmem:[#allocation16_spill] sm:$0xff] }
 0x765   : > { %7404 = vst.msk [vmem:[%s11514_s25 + $0x2f8] sm:$0xff] %vm7308_vm3, %v7275_v63 }
 0x766   : > { %v7273_v60 = vsel %vm7179_vm2, %v11961_v6, %v7038_v46 }
 0x767   : > { %7402 = vst.msk [vmem:[%s11514_s25 + $0x2e8] sm:$0xff] %vm7308_vm3, %v7273_v60 }
 0x76d   : > { %v9246_v47 = vpop.f32.mrf.mxu0 }
 0x76e   : > { %v7059_v54 = vadd.f32 %v12057_v50, %v9246_v47 }
 0x76f   : > { %v7050_v5 = vpop.f32.mrf.mxu0 }
 0x770   : > { %v7278_v17 = vsel %vm7179_vm2, %v12024_v62, %v7059_v54  ;;  %v7051_v18 = vadd.f32 %v12057_v50, %v7050_v5 }
 0x771   : > { %7407 = vst.msk [vmem:[%s11514_s25 + $0x310] sm:$0xff] %vm7308_vm3, %v7278_v17  ;;  %v9247_v23 = vpop.f32.mrf.mxu0 }
 0x772   : > { %v7276_v6 = vsel %vm7179_vm2, %v11997_v51, %v7051_v18  ;;  %v7062_v45 = vadd.f32 %v12057_v50, %v9247_v23 }
 0x773   : > { %7405 = vst.msk [vmem:[%s11514_s25 + $0x300] sm:$0xff] %vm7308_vm3, %v7276_v6  ;;  %v7053_v35 = vpop.f32.mrf.mxu0 }
 0x774   : > { %v7279_v62 = vsel %vm7179_vm2, %v12032_v41, %v7062_v45  ;;  %v7054_v34 = vadd.f32 %v12057_v50, %v7053_v35  ;;  %v12753_v45 = vld [vmem:[#allocation11_spill] sm:$0xff] }
 0x775   : > { %7408 = vst.msk [vmem:[%s11514_s25 + $0x318] sm:$0xff] %vm7308_vm3, %v7279_v62 }
 0x776   : > { %v7277_v20 = vsel %vm7179_vm2, %v12001_v4, %v7054_v34 }
 0x777   : > { %7406 = vst.msk [vmem:[%s11514_s25 + $0x308] sm:$0xff] %vm7308_vm3, %v7277_v20 }
 0x77d   : > { %v9250_v51 = vpop.f32.mrf.mxu0 }
 0x77e   : > { %v7075_v53 = vadd.f32 %v12057_v50, %v9250_v51 }
 0x77f   : > { %v7066_v27 = vpop.f32.mrf.mxu0 }
 0x780   : > { %v7282_v41 = vsel %vm7179_vm2, %v12069_v15, %v7075_v53  ;;  %v7067_v24 = vadd.f32 %v12057_v50, %v7066_v27 }
 0x781   : > { %7411 = vst.msk [vmem:[%s11514_s25 + $0x330] sm:$0xff] %vm7308_vm3, %v7282_v41  ;;  %v9251_v8 = vpop.f32.mrf.mxu0 }
 0x782   : > { %v7280_v4 = vsel %vm7179_vm2, %v12037_v10, %v7067_v24  ;;  %v7078_v22 = vadd.f32 %v12057_v50, %v9251_v8 }
 0x783   : > { %7409 = vst.msk [vmem:[%s11514_s25 + $0x320] sm:$0xff] %vm7308_vm3, %v7280_v4  ;;  %v7069_v3 = vpop.f32.mrf.mxu0 }
 0x784   : > { %v7283_v15 = vsel %vm7179_vm2, %v12077_v55, %v7078_v22  ;;  %v7070_v42 = vadd.f32 %v12057_v50, %v7069_v3 }
 0x785   : > { %7412 = vst.msk [vmem:[%s11514_s25 + $0x338] sm:$0xff] %vm7308_vm3, %v7283_v15 }
 0x786   : > { %v7281_v56 = vsel %vm7179_vm2, %v12749_v21, %v7070_v42 }
 0x787   : > { %7410 = vst.msk [vmem:[%s11514_s25 + $0x328] sm:$0xff] %vm7308_vm3, %v7281_v56 }
 0x78d   : > { %v9254_v10 = vpop.f32.mrf.mxu0 }
 0x78e   : > { %v7091_v30 = vadd.f32 %v12057_v50, %v9254_v10 }
 0x78f   : > { %v7082_v37 = vpop.f32.mrf.mxu0 }
 0x790   : > { %v7286_v55 = vsel %vm7179_vm2, %v12114_v40, %v7091_v30  ;;  %v7083_v38 = vadd.f32 %v12057_v50, %v7082_v37 }
 0x791   : > { %7415 = vst.msk [vmem:[%s11514_s25 + $0x350] sm:$0xff] %vm7308_vm3, %v7286_v55  ;;  %v9255_v26 = vpop.f32.mrf.mxu0 }
 0x792   : > { %v7284_v12 = vsel %vm7179_vm2, %v12750_v0, %v7083_v38  ;;  %v7094_v7 = vadd.f32 %v12057_v50, %v9255_v26 }
 0x793   : > { %7413 = vst.msk [vmem:[%s11514_s25 + $0x340] sm:$0xff] %vm7308_vm3, %v7284_v12  ;;  %v7085_v16 = vpop.f32.mrf.mxu0 }
 0x794   : > { %v7287_v40 = vsel %vm7179_vm2, %v12751_v57, %v7094_v7  ;;  %v7086_v25 = vadd.f32 %v12057_v50, %v7085_v16 }
 0x795   : > { %7416 = vst.msk [vmem:[%s11514_s25 + $0x358] sm:$0xff] %vm7308_vm3, %v7287_v40 }
 0x796   : > { %v7285_v32 = vsel %vm7179_vm2, %v12752_v31, %v7086_v25 }
 0x797   : > { %7414 = vst.msk [vmem:[%s11514_s25 + $0x348] sm:$0xff] %vm7308_vm3, %v7285_v32 }
 0x79d   : > { %v9258_v63 = vpop.f32.mrf.mxu0 }
 0x79e   : > { %v7107_v46 = vadd.f32 %v12057_v50, %v9258_v63 }
 0x79f   : > { %v7098_v60 = vpop.f32.mrf.mxu0 }
 0x7a0   : > { %v7290_v47 = vsel %vm7179_vm2, %v12154_v61, %v7107_v46  ;;  %v7099_v54 = vadd.f32 %v12057_v50, %v7098_v60 }
 0x7a1   : > { %7419 = vst.msk [vmem:[%s11514_s25 + $0x370] sm:$0xff] %vm7308_vm3, %v7290_v47  ;;  %v9259_v5 = vpop.f32.mrf.mxu0 }
 0x7a2   : > { %v7288_v17 = vsel %vm7179_vm2, %v12127_v19, %v7099_v54  ;;  %v7110_v18 = vadd.f32 %v12057_v50, %v9259_v5 }
 0x7a3   : > { %7417 = vst.msk [vmem:[%s11514_s25 + $0x360] sm:$0xff] %vm7308_vm3, %v7288_v17  ;;  %v7101_v23 = vpop.f32.mrf.mxu0 }
 0x7a4   : > { %v7291_v61 = vsel %vm7179_vm2, %v12162_v59, %v7110_v18  ;;  %v7102_v6 = vadd.f32 %v12057_v50, %v7101_v23 }
 0x7a5   : > { %7420 = vst.msk [vmem:[%s11514_s25 + $0x378] sm:$0xff] %vm7308_vm3, %v7291_v61 }
 0x7a6   : > { %v7289_v35 = vsel %vm7179_vm2, %v12753_v45, %v7102_v6 }
 0x7a7   : > { %7418 = vst.msk [vmem:[%s11514_s25 + $0x368] sm:$0xff] %vm7308_vm3, %v7289_v35 }
 0x7ad   : > { %v9262_v19 = vpop.f32.mrf.mxu0 }
 0x7ae   : > { %v7123_v62 = vadd.f32 %v12057_v50, %v9262_v19 }
 0x7af   : > { %v7114_v34 = vpop.f32.mrf.mxu0 }
 0x7b0   : > { %v7294_v59 = vsel %vm7179_vm2, %v12194_v2, %v7123_v62  ;;  %v7115_v20 = vadd.f32 %v12057_v50, %v7114_v34 }
 0x7b1   : > { %7423 = vst.msk [vmem:[%s11514_s25 + $0x390] sm:$0xff] %vm7308_vm3, %v7294_v59  ;;  %v9263_v51 = vpop.f32.mrf.mxu0 }
 0x7b2   : > { %v7292_v53 = vsel %vm7179_vm2, %v12167_v52, %v7115_v20  ;;  %v7126_v27 = vadd.f32 %v12057_v50, %v9263_v51 }
 0x7b3   : > { %7421 = vst.msk [vmem:[%s11514_s25 + $0x380] sm:$0xff] %vm7308_vm3, %v7292_v53  ;;  %v7117_v41 = vpop.f32.mrf.mxu0 }
 0x7b4   : > { %v7295_v2 = vsel %vm7179_vm2, %v12202_v44, %v7126_v27  ;;  %v7118_v24 = vadd.f32 %v12057_v50, %v7117_v41 }
 0x7b5   : > { %7424 = vst.msk [vmem:[%s11514_s25 + $0x398] sm:$0xff] %vm7308_vm3, %v7295_v2 }
 0x7b6   : > { %v7293_v8 = vsel %vm7179_vm2, %v12171_v58, %v7118_v24 }
 0x7b7   : > { %7422 = vst.msk [vmem:[%s11514_s25 + $0x388] sm:$0xff] %vm7308_vm3, %v7293_v8 }
 0x7bd   : > { %v9266_v52 = vpop.f32.mrf.mxu0 }
 0x7be   : > { %v7139_v4 = vadd.f32 %v12057_v50, %v9266_v52 }
 0x7bf   : > { %v7130_v22 = vpop.f32.mrf.mxu0 }
 0x7c0   : > { %v7298_v44 = vsel %vm7179_vm2, %v12234_v9, %v7139_v4  ;;  %v7131_v3 = vadd.f32 %v12057_v50, %v7130_v22 }
 0x7c1   : > { %7427 = vst.msk [vmem:[%s11514_s25 + $0x3b0] sm:$0xff] %vm7308_vm3, %v7298_v44  ;;  %v9267_v15 = vpop.f32.mrf.mxu0 }
 0x7c2   : > { %v7296_v58 = vsel %vm7179_vm2, %v12207_v48, %v7131_v3  ;;  %v7142_v42 = vadd.f32 %v12057_v50, %v9267_v15 }
 0x7c3   : > { %7425 = vst.msk [vmem:[%s11514_s25 + $0x3a0] sm:$0xff] %vm7308_vm3, %v7296_v58  ;;  %v7133_v21 = vpop.f32.mrf.mxu0 }
 0x7c4   : > { %v7299_v9 = vsel %vm7179_vm2, %v12242_v1, %v7142_v42  ;;  %v7134_v56 = vadd.f32 %v12057_v50, %v7133_v21 }
 0x7c5   : > { %7428 = vst.msk [vmem:[%s11514_s25 + $0x3b8] sm:$0xff] %vm7308_vm3, %v7299_v9 }
 0x7c6   : > { %v7297_v10 = vsel %vm7179_vm2, %v12211_v33, %v7134_v56 }
 0x7c7   : > { %7426 = vst.msk [vmem:[%s11514_s25 + $0x3a8] sm:$0xff] %vm7308_vm3, %v7297_v10 }
 0x7cd   : > { %v9270_v48 = vpop.f32.mrf.mxu0 }
 0x7ce   : > { %v7155_v30 = vadd.f32 %v12057_v50, %v9270_v48 }
 0x7cf   : > { %v7146_v37 = vpop.f32.mrf.mxu0 }
 0x7d0   : > { %v7302_v1 = vsel %vm7179_vm2, %v12274_v28, %v7155_v30  ;;  %v7147_v55 = vadd.f32 %v12057_v50, %v7146_v37 }
 0x7d1   : > { %7431 = vst.msk [vmem:[%s11514_s25 + $0x3d0] sm:$0xff] %vm7308_vm3, %v7302_v1  ;;  %v9271_v38 = vpop.f32.mrf.mxu0 }
 0x7d2   : > { %v7300_v33 = vsel %vm7179_vm2, %v12247_v36, %v7147_v55  ;;  %v7158_v26 = vadd.f32 %v12057_v50, %v9271_v38 }
 0x7d3   : > { %7429 = vst.msk [vmem:[%s11514_s25 + $0x3c0] sm:$0xff] %vm7308_vm3, %v7300_v33  ;;  %v7149_v0 = vpop.f32.mrf.mxu0 }
 0x7d4   : > { %v7303_v28 = vsel %vm7179_vm2, %v12282_v39, %v7158_v26  ;;  %v7150_v12 = vadd.f32 %v12057_v50, %v7149_v0 }
 0x7d5   : > { %7432 = vst.msk [vmem:[%s11514_s25 + $0x3d8] sm:$0xff] %vm7308_vm3, %v7303_v28 }
 0x7d6   : > { %v7301_v7 = vsel %vm7179_vm2, %v12251_v49, %v7150_v12 }
 0x7d7   : > { %7430 = vst.msk [vmem:[%s11514_s25 + $0x3c8] sm:$0xff] %vm7308_vm3, %v7301_v7 }
 0x7dd   : > { %v9274_v36 = vpop.f32.mrf.mxu0 }
 0x7de   : > { %v7171_v16 = vadd.f32 %v12057_v50, %v9274_v36 }
 0x7df   : > { %v7162_v57 = vpop.f32.mrf.mxu0 }
 0x7e0   : > { %v7306_v39 = vsel %vm7179_vm2, %v12314_v14, %v7171_v16  ;;  %v7163_v40 = vadd.f32 %v12057_v50, %v7162_v57 }
 0x7e1   : > { %7435 = vst.msk [vmem:[%s11514_s25 + $0x3f0] sm:$0xff] %vm7308_vm3, %v7306_v39  ;;  %v9275_v25 = vpop.f32.mrf.mxu0 }
 0x7e2   : > { %v7304_v49 = vsel %vm7179_vm2, %v12287_v13, %v7163_v40  ;;  %v7174_v31 = vadd.f32 %v12057_v50, %v9275_v25 }
 0x7e3   : > { %7433 = vst.msk [vmem:[%s11514_s25 + $0x3e0] sm:$0xff] %vm7308_vm3, %v7304_v49  ;;  %v7165_v32 = vpop.f32.mrf.mxu0 }
 0x7e4   : > { %v7307_v63 = vsel %vm7179_vm2, %v12322_v29, %v7174_v31  ;;  %v7166_v14 = vadd.f32 %v12057_v50, %v7165_v32 }
 0x7e5   : > { %7436 = vst.msk [vmem:[%s11514_s25 + $0x3f8] sm:$0xff] %vm7308_vm3, %v7307_v63 }
 0x7e6   : > { %v7305_v46 = vsel %vm7179_vm2, %v12291_v43, %v7166_v14 }
 0x7e7   : > { %7434 = vst.msk [vmem:[%s11514_s25 + $0x3e8] sm:$0xff] %vm7308_vm3, %v7305_v46 }
 0x7e8 PF: > { %s15_s18 = sadd.s32 1, %s9492_s18  }
 0x7e9   : > { %p12_p4 = scmp.ge.s32.totalorder %s15_s18, 6  }
 0x7eb   :  { %14 = sbr.rel (!%p12_p4) target bundleno = 1 (0x1), region = 80 }

</bundles_post_ra>
